<compile_context>
chip_gen: v6e
topology: v6e:2x2x1
jax: 0.10.0
libtpu: 0.0.40
codegen_flags: <defaults>
</compile_context>

<pallas_src>
import functools

import jax
import jax.numpy as jnp
from jax.experimental import pallas as pl
from jax.experimental.pallas import tpu as pltpu


# ------------------------------ shared math ---------------------------------

def layer_norm(x, g, b, eps=1e-5):
    mu = jnp.mean(x, axis=-1, keepdims=True)
    var = jnp.mean(jnp.square(x - mu), axis=-1, keepdims=True)
    return (x - mu) * jax.lax.rsqrt(var + eps) * g + b


def gelu_tanh(x):
    # TODO(synk): PyTorch nn.GELU() defaults to the erf form; tanh approximation used here.
    return 0.5 * x * (1.0 + jnp.tanh(0.7978845608028654 * (x + 0.044715 * x * x * x)))


# --------------------------- fused Pallas kernel -----------------------------

def _fused_cross_attn_kernel(q_ref, k_ref, v_ref, skip_ref,
                             wqkv_ref, bqkv_ref, wp_ref, w1_ref, b1_ref, w2_ref, vecs_ref,
                             o_ref, *, n_groups, q_len, k_len, heads, dim_head, scale):
    """One batch element of the full CrossAttention.

    q_ref:    (n_groups*q_len, dim)  bf16      k_ref/v_ref: (n_groups*k_len, dim)  bf16
    skip_ref: (q_len, dim)           bf16      o_ref:       (q_len, dim)           f32
    wqkv_ref: (3, dim, md)  bqkv_ref: (3, md)  wp_ref: (md, dim)
    w1_ref:   (dim, 2*dim)  b1_ref:   (1, 2*dim)  w2_ref: (2*dim, dim)
    vecs_ref: (12, dim) = [ln_q_g, ln_q_b, ln_k_g, ln_k_b, ln_v_g, ln_v_b,
                           b_proj, g_pre, b_pre, b2, g_post, b_post]
    """
    f32 = jnp.float32
    md = heads * dim_head

    vecs = vecs_ref[...]                             # (12, dim) f32
    wqkv = wqkv_ref[...]                             # (3, dim, md)
    bqkv = bqkv_ref[...]                             # (3, md)
    wp = wp_ref[...]                                 # (md, dim)

    q = q_ref[...].astype(f32)                       # (n2*Q, dim)
    k = k_ref[...].astype(f32)                       # (n2*K, dim)
    v = v_ref[...].astype(f32)                       # (n2*K, dim)
    skip = skip_ref[...].astype(f32)                 # (Q, dim)
    dim = q.shape[-1]

    # LayerNorm + q/k/v projections: all groups as one 2-D slab, contraction = dim.
    qp = jnp.dot(layer_norm(q, vecs[0:1], vecs[1:2]), wqkv[0],
                 preferred_element_type=f32) + bqkv[0:1]          # (n2*Q, md)
    kp = jnp.dot(layer_norm(k, vecs[2:3], vecs[3:4]), wqkv[1],
                 preferred_element_type=f32) + bqkv[1:2]          # (n2*K, md)
    vp = jnp.dot(layer_norm(v, vecs[4:5], vecs[5:6]), wqkv[2],
                 preferred_element_type=f32) + bqkv[2:3]          # (n2*K, md)

    qp3 = qp.reshape(n_groups, q_len, md)
    kp3 = kp.reshape(n_groups, k_len, md)

    # accumulate proj(attention) directly into a lane-dense (Q, dim) buffer
    z = skip + vecs[6:7]                              # + b_proj

    for h in range(heads):
        lo = h * dim_head
        hi = lo + dim_head
        qh = qp3[:, :, lo:hi]                         # (n2, Q, dh)
        kh = kp3[:, :, lo:hi]                         # (n2, K, dh)

        # grouped logits in one batched matmul; softmax over (group, key) jointly
        s = scale * jnp.einsum('gqd,gkd->gqk', qh, kh,
                               preferred_element_type=f32)        # (n2, Q, K)
        m = jnp.max(jnp.max(s, axis=2, keepdims=True), axis=0, keepdims=True)   # (1, Q, 1)
        p = jnp.exp(s - m)
        l = jnp.sum(jnp.sum(p, axis=2, keepdims=True), axis=0, keepdims=True)   # (1, Q, 1)

        # fold this head's slice of the output projection into V -> lane-dense accumulator
        vproj = jnp.dot(vp[:, lo:hi], wp[lo:hi, :],
                        preferred_element_type=f32)               # (n2*K, dim)
        vproj = vproj.reshape(n_groups, k_len, dim)
        acc = jnp.einsum('gqk,gkc->gqc', p, vproj,
                         preferred_element_type=f32)              # (n2, Q, dim)
        acc = jnp.sum(acc, axis=0)                                # (Q, dim)
        z = z + acc * pl.reciprocal(l[0], approx=True)

    # output head: prenorm -> MLP(GELU) residual -> postnorm
    z = layer_norm(z, vecs[7:8], vecs[8:9])
    hmid = gelu_tanh(jnp.dot(z, w1_ref[...], preferred_element_type=f32) + b1_ref[...])
    z = z + jnp.dot(hmid, w2_ref[...], preferred_element_type=f32) + vecs[9:10]
    z = layer_norm(z, vecs[10:11], vecs[11:12])
    o_ref[...] = z.astype(o_ref.dtype)


def fused_cross_attention(p, cfg, q, k, v, skip):
    """q, k, v: (b, n2, tokens, dim) token-major; skip: (b, Q, dim). Returns (b, Q, dim) f32."""
    b, n2, q_len, dim = q.shape
    k_len = k.shape[2]
    heads, dim_head = cfg['heads'], cfg['dim_head']
    scale = dim_head ** (-0.5)

    # bf16 storage for the activations; f32 compute inside the kernel.
    qf = q.reshape(b, n2 * q_len, dim).astype(jnp.bfloat16)
    kf = k.reshape(b, n2 * k_len, dim).astype(jnp.bfloat16)
    vf = v.reshape(b, n2 * k_len, dim).astype(jnp.bfloat16)
    sf = skip.astype(jnp.bfloat16)

    # pack the small parameters into a handful of arrays (one DMA each, loaded once)
    wqkv = jnp.stack([p['w_q'], p['w_k'], p['w_v']])          # (3, dim, md)
    bqkv = jnp.stack([p['b_q'], p['b_k'], p['b_v']])          # (3, md)
    vecs = jnp.stack([p['ln_q_g'], p['ln_q_b'], p['ln_k_g'], p['ln_k_b'],
                      p['ln_v_g'], p['ln_v_b'], p['b_proj'], p['g_pre'], p['b_pre'],
                      p['b2'], p['g_post'], p['b_post']])     # (12, dim)
    b1 = p['b1'].reshape(1, -1)                               # (1, 2*dim)

    kern = functools.partial(_fused_cross_attn_kernel, n_groups=n2, q_len=q_len,
                             k_len=k_len, heads=heads, dim_head=dim_head, scale=scale)

    def wspec(a):
        nd = a.ndim
        return pl.BlockSpec(a.shape, lambda i, _nd=nd: (0,) * _nd)

    return pl.pallas_call(
        kern,
        out_shape=jax.ShapeDtypeStruct((b, q_len, dim), jnp.float32),
        grid=(b,),
        in_specs=[
            pl.BlockSpec((None, n2 * q_len, dim), lambda i: (i, 0, 0)),
            pl.BlockSpec((None, n2 * k_len, dim), lambda i: (i, 0, 0)),
            pl.BlockSpec((None, n2 * k_len, dim), lambda i: (i, 0, 0)),
            pl.BlockSpec((None, q_len, dim), lambda i: (i, 0, 0)),
            wspec(wqkv), wspec(bqkv), wspec(p['w_proj']),
            wspec(p['w1']), wspec(b1), wspec(p['w2']), wspec(vecs),
        ],
        out_specs=pl.BlockSpec((None, q_len, dim), lambda i: (i, 0, 0)),
        compiler_params=pltpu.CompilerParams(dimension_semantics=("parallel",)),
    )(qf, kf, vf, sf, wqkv, bqkv, p['w_proj'], p['w1'], b1, p['w2'], vecs)


# --------------------- pure-JAX reference (for self-check) -------------------

def cross_attention_ref(p, cfg, q, k, v, skip):
    """Token-major pure-JAX mirror of the PyTorch CrossAttention (tanh-GELU, exact softmax)."""
    b, n2, Q, dim = q.shape
    K = k.shape[2]
    heads, dh = cfg['heads'], cfg['dim_head']
    md = heads * dh
    scale = dh ** (-0.5)

    qp = layer_norm(q, p['ln_q_g'], p['ln_q_b']) @ p['w_q'] + p['b_q']
    kp = layer_norm(k, p['ln_k_g'], p['ln_k_b']) @ p['w_k'] + p['b_k']
    vp = layer_norm(v, p['ln_v_g'], p['ln_v_b']) @ p['w_v'] + p['b_v']

    qh = qp.reshape(b, n2, Q, heads, dh).transpose(0, 3, 1, 2, 4)     # (b, m, n2, Q, dh)
    kh = kp.reshape(b, n2, K, heads, dh).transpose(0, 3, 1, 2, 4)     # (b, m, n2, K, dh)
    vh = vp.reshape(b, n2, K, heads, dh).transpose(0, 3, 1, 2, 4).reshape(b, heads, n2 * K, dh)

    logits = scale * jnp.einsum('bmgqd,bmgkd->bmgqk', qh, kh)
    logits = logits.transpose(0, 1, 3, 2, 4).reshape(b, heads, Q, n2 * K)
    att = jax.nn.softmax(logits, axis=-1)
    a = jnp.einsum('bmqk,bmkd->bmqd', att, vh)                        # (b, m, Q, dh)
    a = a.transpose(0, 2, 1, 3).reshape(b, Q, md)

    z = a @ p['w_proj'] + p['b_proj'] + skip
    z = layer_norm(z, p['g_pre'], p['b_pre'])
    hmid = gelu_tanh(z @ p['w1'] + p['b1'])
    z = z + hmid @ p['w2'] + p['b2']
    z = layer_norm(z, p['g_post'], p['b_post'])
    return z


# ------------------------------ JAX glue (token-major) -----------------------

def generate_grid(height, width):
    xs = jnp.linspace(0.0, 1.0, width)
    ys = jnp.linspace(0.0, 1.0, height)
    gx, gy = jnp.meshgrid(xs, ys, indexing='xy')                 # each (H, W)
    indices = jnp.stack([gx, gy], axis=0)                        # (2, H, W)
    indices = jnp.concatenate(
        [indices, jnp.ones((1, height, width), indices.dtype)], axis=0)  # pad channel with 1
    return indices[None]                                         # (1, 3, H, W)


def get_view_matrix(h, w, h_meters, w_meters, offset):
    sh = h / h_meters
    sw = w / w_meters
    return jnp.array([[0.0, -sw, w / 2.0],
                      [-sh, 0.0, h * offset + h / 2.0],
                      [0.0, 0.0, 1.0]], jnp.float32)


def make_vel_grid(bev_h, bev_w, h_meters, w_meters, offset, n_decoder_blocks):
    h = bev_h // (2 ** n_decoder_blocks)
    w = bev_w // (2 ** n_decoder_blocks)
    grid = generate_grid(h, w)[0]                                # (3, h, w)
    grid = grid.at[0].multiply(bev_w)
    grid = grid.at[1].multiply(bev_h)
    V = get_view_matrix(bev_h, bev_w, h_meters, w_meters, offset)
    V_inv = jnp.linalg.inv(V)
    g = V_inv @ grid.reshape(3, h * w)
    return g.reshape(3, h, w)


def bn_relu_proj(x_tok, p, eps=1e-5):
    # eval-mode BatchNorm2d -> ReLU -> 1x1 conv (no bias), token-major (..., tokens, C)
    xn = (x_tok - p['bn_mean']) * jax.lax.rsqrt(p['bn_var'] + eps)
    xn = xn * p['bn_gamma'] + p['bn_beta']
    xn = jnp.maximum(xn, 0.0)
    return xn @ p['conv_w'].T


def velocity_cross_view_attention(params, cfg, y, vel_grid, feature, prev_feature,
                                  I_inv, E_inv, prev_I_inv, prev_E_inv):
    del prev_I_inv, prev_E_inv  # unused by the reference forward as well
    b, n, feat_dim, h, w = feature.shape
    dim = cfg['dim']
    H, W = y.shape[-2], y.shape[-1]
    hw, HW = h * w, H * W

    pixel = params['image_plane']                                # (1, 1, 3, h, w)

    # camera-center embedding: (bn, 1, dim)
    c = E_inv[..., -1]                                           # (b, n, 4)
    c_embed = c.reshape(b * n, 1, 4) @ params['cam_embed_w'].T

    # ray-direction embedding (token-major)
    pixel_flat = pixel.reshape(1, 1, 3, hw)
    cam = I_inv @ pixel_flat                                     # (b, n, 3, hw)
    cam = jnp.concatenate([cam, jnp.ones((b, n, 1, hw), cam.dtype)], axis=2)
    d = E_inv @ cam                                              # (b, n, 4, hw)
    d_tok = d.reshape(b * n, 4, hw).transpose(0, 2, 1)           # (bn, hw, 4)
    d_embed = d_tok @ params['img_embed_w'].T                    # (bn, hw, dim)
    img_embed = d_embed - c_embed
    img_embed = img_embed / (jnp.linalg.norm(img_embed, axis=-1, keepdims=True) + 1e-7)

    # velocity (BEV) positional embedding (token-major)
    vel_world = vel_grid[:2].reshape(2, HW).T                    # (HW, 2)
    v_embed = vel_world @ params['vel_embed_w'].T + params['vel_embed_b']   # (HW, dim)
    vel_embed = v_embed[None] - c_embed                          # (bn, HW, dim)
    vel_embed = vel_embed / (jnp.linalg.norm(vel_embed, axis=-1, keepdims=True) + 1e-7)
    query_pos = vel_embed.reshape(b, n, HW, dim)

    # temporal encoding + feature projections (token-major)
    feat_tok = feature.reshape(b * n, feat_dim, hw).transpose(0, 2, 1)
    prev_tok = prev_feature.reshape(b * n, feat_dim, hw).transpose(0, 2, 1)
    feature_flat = jnp.concatenate([prev_tok + params['time_encode_prev'],
                                    feat_tok + params['time_encode_curr']], axis=0)  # (2bn, hw, feat)

    img_embed2 = jnp.concatenate([img_embed, img_embed], axis=0)           # (2bn, hw, dim)
    key_flat = img_embed2 + bn_relu_proj(feature_flat, params['feature_proj'])
    val_flat = bn_relu_proj(feature_flat, params['feature_linear'])

    # assemble token-major q / k / v / skip for the fused kernel
    y_tok = y.reshape(b, dim, HW).transpose(0, 2, 1)             # (b, HW, dim)
    query = query_pos + y_tok[:, None]                           # (b, n, HW, dim)
    query = jnp.concatenate([query, query], axis=1)              # (b, 2n, HW, dim)
    key = key_flat.reshape(2, b, n, hw, dim).transpose(1, 0, 2, 3, 4).reshape(b, 2 * n, hw, dim)
    val = val_flat.reshape(2, b, n, hw, dim).transpose(1, 0, 2, 3, 4).reshape(b, 2 * n, hw, dim)
    skip_tok = y_tok if cfg['skip'] else jnp.zeros_like(y_tok)

    z = fused_cross_attention(params['cross'], cfg, query, key, val, skip_tok)   # (b, HW, dim)
    return z.transpose(0, 2, 1).reshape(b, dim, H, W)


# ------------------------- deterministic parameters --------------------------

def init_params(key, cfg):
    dim, feat_dim = cfg['dim'], cfg['feat_dim']
    heads, dim_head = cfg['heads'], cfg['dim_head']
    md = heads * dim_head
    ks = iter(jax.random.split(key, 32))

    def w(shape, fan_in):
        return jax.random.normal(next(ks), shape, jnp.float32) / jnp.sqrt(float(fan_in))

    image_plane = generate_grid(cfg['feat_height'], cfg['feat_width'])[None]   # (1,1,3,h,w)
    image_plane = image_plane.at[:, :, 0].multiply(cfg['image_width'])
    image_plane = image_plane.at[:, :, 1].multiply(cfg['image_height'])

    def bn_conv(cin, cout):
        return dict(bn_gamma=jnp.ones((cin,)), bn_beta=jnp.zeros((cin,)),
                    bn_mean=jnp.zeros((cin,)), bn_var=jnp.ones((cin,)),
                    conv_w=w((cout, cin), cin))

    cross = dict(
        ln_q_g=jnp.ones((dim,)), ln_q_b=jnp.zeros((dim,)),
        ln_k_g=jnp.ones((dim,)), ln_k_b=jnp.zeros((dim,)),
        ln_v_g=jnp.ones((dim,)), ln_v_b=jnp.zeros((dim,)),
        w_q=w((dim, md), dim), b_q=0.01 * jnp.ones((md,)),
        w_k=w((dim, md), dim), b_k=0.01 * jnp.ones((md,)),
        w_v=w((dim, md), dim), b_v=0.01 * jnp.ones((md,)),
        w_proj=w((md, dim), md), b_proj=jnp.zeros((dim,)),
        g_pre=jnp.ones((dim,)), b_pre=jnp.zeros((dim,)),
        w1=w((dim, 2 * dim), dim), b1=jnp.zeros((2 * dim,)),
        w2=w((2 * dim, dim), 2 * dim), b2=jnp.zeros((dim,)),
        g_post=jnp.ones((dim,)), b_post=jnp.zeros((dim,)),
    )

    return dict(
        image_plane=image_plane,
        time_encode_prev=jax.random.normal(next(ks), (1,)),
        time_encode_curr=jax.random.normal(next(ks), (1,)),
        feature_linear=bn_conv(feat_dim, dim),
        feature_proj=bn_conv(feat_dim, dim),
        vel_embed_w=w((dim, 2), 2), vel_embed_b=jnp.zeros((dim,)),
        img_embed_w=w((dim, 4), 4),
        cam_embed_w=w((dim, 4), 4),
        cross=cross,
    )


# ---------------------------------- main --------------------------------------

if __name__ == "__main__":
    cfg = dict(feat_height=8, feat_width=8, feat_dim=16, dim=32,
               image_height=64, image_width=64, qkv_bias=True,
               heads=2, dim_head=8, no_image_features=False, skip=True,
               bev_height=32, bev_width=32, h_meters=100.0, w_meters=100.0,
               offset=0.0, n_decoder_blocks=2)
    b, n = 2, 2
    H = cfg['bev_height'] // (2 ** cfg['n_decoder_blocks'])     # 8
    W = cfg['bev_width'] // (2 ** cfg['n_decoder_blocks'])      # 8

    key = jax.random.PRNGKey(0)
    k_par, k_in = jax.random.split(key)
    params = init_params(k_par, cfg)
    vel_grid = make_vel_grid(cfg['bev_height'], cfg['bev_width'],
                             cfg['h_meters'], cfg['w_meters'],
                             cfg['offset'], cfg['n_decoder_blocks'])

    ks = jax.random.split(k_in, 12)
    y = 0.1 * jax.random.normal(ks[0], (b, cfg['dim'], H, W), jnp.float32)
    feature = 0.1 * jax.random.normal(
        ks[1], (b, n, cfg['feat_dim'], cfg['feat_height'], cfg['feat_width']), jnp.float32)
    prev_feature = 0.1 * jax.random.normal(
        ks[2], (b, n, cfg['feat_dim'], cfg['feat_height'], cfg['feat_width']), jnp.float32)
    I_inv = jnp.eye(3)[None, None] + 0.05 * jax.random.normal(ks[3], (b, n, 3, 3), jnp.float32)
    E_inv = jnp.eye(4)[None, None] + 0.05 * jax.random.normal(ks[4], (b, n, 4, 4), jnp.float32)
    prev_I_inv = jnp.eye(3)[None, None] + 0.05 * jax.random.normal(ks[5], (b, n, 3, 3), jnp.float32)
    prev_E_inv = jnp.eye(4)[None, None] + 0.05 * jax.random.normal(ks[6], (b, n, 4, 4), jnp.float32)

    # ---- self-check: fused Pallas cross-attention vs pure-JAX reference --------------------
    n2 = 2 * n
    Q = H * W
    KT = cfg['feat_height'] * cfg['feat_width']
    qs = 0.5 * jax.random.normal(ks[7], (b, n2, Q, cfg['dim']), jnp.float32)
    kt = 0.5 * jax.random.normal(ks[8], (b, n2, KT, cfg['dim']), jnp.float32)
    vt = 0.5 * jax.random.normal(ks[9], (b, n2, KT, cfg['dim']), jnp.float32)
    st = 0.1 * jax.random.normal(ks[10], (b, Q, cfg['dim']), jnp.float32)

    out_pal = fused_cross_attention(params['cross'], cfg, qs, kt, vt, st)
    rd = lambda x: x.astype(jnp.bfloat16).astype(jnp.float32)   # kernel stores activations as bf16
    out_ref = cross_attention_ref(params['cross'], cfg, rd(qs), rd(kt), rd(vt), rd(st))
    err = float(jnp.max(jnp.abs(out_pal - out_ref)))
    assert err < 3e-2, f"fused cross-attention mismatch: max abs err {err}"

    # ---- full forward ----------------------------------------------------------------------
    out = velocity_cross_view_attention(params, cfg, y, vel_grid, feature, prev_feature,
                                        I_inv, E_inv, prev_I_inv, prev_E_inv)
    out = jax.block_until_ready(out)
    assert out.shape == (b, cfg['dim'], H, W)
    assert bool(jnp.all(jnp.isfinite(out)))
    print("KERNEL_OK")
</pallas_src>

<mosaic_0001>
module attributes {stable_mosaic.version = 11 : i64} {
  func.func @_fused_cross_attn_kernel(%arg0: i32, %arg1: memref<1x256x32xbf16, #tpu.memory_space<vmem>>, %arg2: memref<1x256x32xbf16, #tpu.memory_space<vmem>>, %arg3: memref<1x256x32xbf16, #tpu.memory_space<vmem>>, %arg4: memref<1x64x32xbf16, #tpu.memory_space<vmem>>, %arg5: memref<3x32x16xf32, #tpu.memory_space<vmem>>, %arg6: memref<3x16xf32, #tpu.memory_space<vmem>>, %arg7: memref<16x32xf32, #tpu.memory_space<vmem>>, %arg8: memref<32x64xf32, #tpu.memory_space<vmem>>, %arg9: memref<1x64xf32, #tpu.memory_space<vmem>>, %arg10: memref<64x32xf32, #tpu.memory_space<vmem>>, %arg11: memref<12x32xf32, #tpu.memory_space<vmem>>, %arg12: memref<1x64x32xf32, #tpu.memory_space<vmem>>) attributes {dimension_semantics = [#tpu.dimension_semantics<parallel>], iteration_bounds = array<i64: 2>, scalar_prefetch = 0 : i64, scratch_operands = 0 : i64, tpu.core_type = #tpu.core_type<tc>, window_params = [{transform_indices = @transform_0, window_bounds = array<i64: 1, 256, 32>}, {transform_indices = @transform_1, window_bounds = array<i64: 1, 256, 32>}, {transform_indices = @transform_2, window_bounds = array<i64: 1, 256, 32>}, {transform_indices = @transform_3, window_bounds = array<i64: 1, 64, 32>}, {pipeline_mode = #tpu.pipeline_mode<synchronous>, transform_indices = @transform_4, window_bounds = array<i64: 3, 32, 16>}, {pipeline_mode = #tpu.pipeline_mode<synchronous>, transform_indices = @transform_5, window_bounds = array<i64: 3, 16>}, {pipeline_mode = #tpu.pipeline_mode<synchronous>, transform_indices = @transform_6, window_bounds = array<i64: 16, 32>}, {pipeline_mode = #tpu.pipeline_mode<synchronous>, transform_indices = @transform_7, window_bounds = array<i64: 32, 64>}, {pipeline_mode = #tpu.pipeline_mode<synchronous>, transform_indices = @transform_8, window_bounds = array<i64: 1, 64>}, {pipeline_mode = #tpu.pipeline_mode<synchronous>, transform_indices = @transform_9, window_bounds = array<i64: 64, 32>}, {pipeline_mode = #tpu.pipeline_mode<synchronous>, transform_indices = @transform_10, window_bounds = array<i64: 12, 32>}, {transform_indices = @transform_11, window_bounds = array<i64: 1, 64, 32>}]} {
    %c0 = arith.constant 0 : index
    %c0_0 = arith.constant 0 : index
    %0 = vector.load %arg11[%c0, %c0_0] : memref<12x32xf32, #tpu.memory_space<vmem>>, vector<12x32xf32>
    %c0_1 = arith.constant 0 : index
    %c0_2 = arith.constant 0 : index
    %c0_3 = arith.constant 0 : index
    %1 = vector.load %arg5[%c0_1, %c0_2, %c0_3] : memref<3x32x16xf32, #tpu.memory_space<vmem>>, vector<3x32x16xf32>
    %c0_4 = arith.constant 0 : index
    %c0_5 = arith.constant 0 : index
    %2 = vector.load %arg6[%c0_4, %c0_5] : memref<3x16xf32, #tpu.memory_space<vmem>>, vector<3x16xf32>
    %c0_6 = arith.constant 0 : index
    %c0_7 = arith.constant 0 : index
    %3 = vector.load %arg7[%c0_6, %c0_7] : memref<16x32xf32, #tpu.memory_space<vmem>>, vector<16x32xf32>
    %c0_8 = arith.constant 0 : index
    %c0_9 = arith.constant 0 : index
    %c0_10 = arith.constant 0 : index
    %4 = vector.load %arg1[%c0_8, %c0_9, %c0_10] : memref<1x256x32xbf16, #tpu.memory_space<vmem>>, vector<1x256x32xbf16>
    %5 = vector.shape_cast %4 : vector<1x256x32xbf16> to vector<256x32xbf16>
    %6 = arith.extf %5 : vector<256x32xbf16> to vector<256x32xf32>
    %c0_11 = arith.constant 0 : index
    %c0_12 = arith.constant 0 : index
    %c0_13 = arith.constant 0 : index
    %7 = vector.load %arg2[%c0_11, %c0_12, %c0_13] : memref<1x256x32xbf16, #tpu.memory_space<vmem>>, vector<1x256x32xbf16>
    %8 = vector.shape_cast %7 : vector<1x256x32xbf16> to vector<256x32xbf16>
    %9 = arith.extf %8 : vector<256x32xbf16> to vector<256x32xf32>
    %c0_14 = arith.constant 0 : index
    %c0_15 = arith.constant 0 : index
    %c0_16 = arith.constant 0 : index
    %10 = vector.load %arg3[%c0_14, %c0_15, %c0_16] : memref<1x256x32xbf16, #tpu.memory_space<vmem>>, vector<1x256x32xbf16>
    %11 = vector.shape_cast %10 : vector<1x256x32xbf16> to vector<256x32xbf16>
    %12 = arith.extf %11 : vector<256x32xbf16> to vector<256x32xf32>
    %c0_17 = arith.constant 0 : index
    %c0_18 = arith.constant 0 : index
    %c0_19 = arith.constant 0 : index
    %13 = vector.load %arg4[%c0_17, %c0_18, %c0_19] : memref<1x64x32xbf16, #tpu.memory_space<vmem>>, vector<1x64x32xbf16>
    %14 = vector.shape_cast %13 : vector<1x64x32xbf16> to vector<64x32xbf16>
    %15 = arith.extf %14 : vector<64x32xbf16> to vector<64x32xf32>
    %16 = vector.extract_strided_slice %0 {offsets = [0, 0], sizes = [1, 32], strides = [1, 1]} : vector<12x32xf32> to vector<1x32xf32>
    %17 = vector.extract_strided_slice %0 {offsets = [1, 0], sizes = [1, 32], strides = [1, 1]} : vector<12x32xf32> to vector<1x32xf32>
    %cst = arith.constant dense<0.000000e+00> : vector<256xf32>
    %18 = vector.multi_reduction <add>, %6, %cst [1] : vector<256x32xf32> to vector<256xf32>
    %19 = vector.shape_cast %18 : vector<256xf32> to vector<256x1xf32>
    %cst_20 = arith.constant 3.200000e+01 : f32
    %20 = vector.broadcast %cst_20 : f32 to vector<256x1xf32>
    %21 = arith.divf %19, %20 : vector<256x1xf32>
    %22 = vector.broadcast %21 : vector<256x1xf32> to vector<256x32xf32>
    %23 = arith.subf %6, %22 : vector<256x32xf32>
    %24 = arith.mulf %23, %23 : vector<256x32xf32>
    %cst_21 = arith.constant dense<0.000000e+00> : vector<256xf32>
    %25 = vector.multi_reduction <add>, %24, %cst_21 [1] : vector<256x32xf32> to vector<256xf32>
    %26 = vector.shape_cast %25 : vector<256xf32> to vector<256x1xf32>
    %cst_22 = arith.constant 3.200000e+01 : f32
    %27 = vector.broadcast %cst_22 : f32 to vector<256x1xf32>
    %28 = arith.divf %26, %27 : vector<256x1xf32>
    %29 = vector.broadcast %21 : vector<256x1xf32> to vector<256x32xf32>
    %30 = arith.subf %6, %29 : vector<256x32xf32>
    %cst_23 = arith.constant 9.99999974E-6 : f32
    %31 = vector.broadcast %cst_23 : f32 to vector<256x1xf32>
    %32 = arith.addf %28, %31 : vector<256x1xf32>
    %33 = math.rsqrt %32 : vector<256x1xf32>
    %34 = vector.broadcast %33 : vector<256x1xf32> to vector<256x32xf32>
    %35 = arith.mulf %30, %34 : vector<256x32xf32>
    %36 = vector.broadcast %16 : vector<1x32xf32> to vector<256x32xf32>
    %37 = arith.mulf %35, %36 : vector<256x32xf32>
    %38 = vector.broadcast %17 : vector<1x32xf32> to vector<256x32xf32>
    %39 = arith.addf %37, %38 : vector<256x32xf32>
    %40 = vector.extract_strided_slice %1 {offsets = [0, 0, 0], sizes = [1, 32, 16], strides = [1, 1, 1]} : vector<3x32x16xf32> to vector<1x32x16xf32>
    %41 = vector.shape_cast %40 : vector<1x32x16xf32> to vector<32x16xf32>
    %cst_24 = arith.constant dense<0.000000e+00> : vector<256x16xf32>
    %42 = tpu.matmul %39, %41, %cst_24 {dimension_numbers = #tpu.dot_dimension_numbers<[1], [0], [0], [1], [0, 0, 1, 1], [], []>} : vector<256x32xf32>, vector<32x16xf32>, vector<256x16xf32> -> vector<256x16xf32>
    %43 = vector.extract_strided_slice %2 {offsets = [0, 0], sizes = [1, 16], strides = [1, 1]} : vector<3x16xf32> to vector<1x16xf32>
    %44 = vector.broadcast %43 : vector<1x16xf32> to vector<256x16xf32>
    %45 = arith.addf %42, %44 : vector<256x16xf32>
    %46 = vector.extract_strided_slice %0 {offsets = [2, 0], sizes = [1, 32], strides = [1, 1]} : vector<12x32xf32> to vector<1x32xf32>
    %47 = vector.extract_strided_slice %0 {offsets = [3, 0], sizes = [1, 32], strides = [1, 1]} : vector<12x32xf32> to vector<1x32xf32>
    %cst_25 = arith.constant dense<0.000000e+00> : vector<256xf32>
    %48 = vector.multi_reduction <add>, %9, %cst_25 [1] : vector<256x32xf32> to vector<256xf32>
    %49 = vector.shape_cast %48 : vector<256xf32> to vector<256x1xf32>
    %cst_26 = arith.constant 3.200000e+01 : f32
    %50 = vector.broadcast %cst_26 : f32 to vector<256x1xf32>
    %51 = arith.divf %49, %50 : vector<256x1xf32>
    %52 = vector.broadcast %51 : vector<256x1xf32> to vector<256x32xf32>
    %53 = arith.subf %9, %52 : vector<256x32xf32>
    %54 = arith.mulf %53, %53 : vector<256x32xf32>
    %cst_27 = arith.constant dense<0.000000e+00> : vector<256xf32>
    %55 = vector.multi_reduction <add>, %54, %cst_27 [1] : vector<256x32xf32> to vector<256xf32>
    %56 = vector.shape_cast %55 : vector<256xf32> to vector<256x1xf32>
    %cst_28 = arith.constant 3.200000e+01 : f32
    %57 = vector.broadcast %cst_28 : f32 to vector<256x1xf32>
    %58 = arith.divf %56, %57 : vector<256x1xf32>
    %59 = vector.broadcast %51 : vector<256x1xf32> to vector<256x32xf32>
    %60 = arith.subf %9, %59 : vector<256x32xf32>
    %cst_29 = arith.constant 9.99999974E-6 : f32
    %61 = vector.broadcast %cst_29 : f32 to vector<256x1xf32>
    %62 = arith.addf %58, %61 : vector<256x1xf32>
    %63 = math.rsqrt %62 : vector<256x1xf32>
    %64 = vector.broadcast %63 : vector<256x1xf32> to vector<256x32xf32>
    %65 = arith.mulf %60, %64 : vector<256x32xf32>
    %66 = vector.broadcast %46 : vector<1x32xf32> to vector<256x32xf32>
    %67 = arith.mulf %65, %66 : vector<256x32xf32>
    %68 = vector.broadcast %47 : vector<1x32xf32> to vector<256x32xf32>
    %69 = arith.addf %67, %68 : vector<256x32xf32>
    %70 = vector.extract_strided_slice %1 {offsets = [1, 0, 0], sizes = [1, 32, 16], strides = [1, 1, 1]} : vector<3x32x16xf32> to vector<1x32x16xf32>
    %71 = vector.shape_cast %70 : vector<1x32x16xf32> to vector<32x16xf32>
    %cst_30 = arith.constant dense<0.000000e+00> : vector<256x16xf32>
    %72 = tpu.matmul %69, %71, %cst_30 {dimension_numbers = #tpu.dot_dimension_numbers<[1], [0], [0], [1], [0, 0, 1, 1], [], []>} : vector<256x32xf32>, vector<32x16xf32>, vector<256x16xf32> -> vector<256x16xf32>
    %73 = vector.extract_strided_slice %2 {offsets = [1, 0], sizes = [1, 16], strides = [1, 1]} : vector<3x16xf32> to vector<1x16xf32>
    %74 = vector.broadcast %73 : vector<1x16xf32> to vector<256x16xf32>
    %75 = arith.addf %72, %74 : vector<256x16xf32>
    %76 = vector.extract_strided_slice %0 {offsets = [4, 0], sizes = [1, 32], strides = [1, 1]} : vector<12x32xf32> to vector<1x32xf32>
    %77 = vector.extract_strided_slice %0 {offsets = [5, 0], sizes = [1, 32], strides = [1, 1]} : vector<12x32xf32> to vector<1x32xf32>
    %cst_31 = arith.constant dense<0.000000e+00> : vector<256xf32>
    %78 = vector.multi_reduction <add>, %12, %cst_31 [1] : vector<256x32xf32> to vector<256xf32>
    %79 = vector.shape_cast %78 : vector<256xf32> to vector<256x1xf32>
    %cst_32 = arith.constant 3.200000e+01 : f32
    %80 = vector.broadcast %cst_32 : f32 to vector<256x1xf32>
    %81 = arith.divf %79, %80 : vector<256x1xf32>
    %82 = vector.broadcast %81 : vector<256x1xf32> to vector<256x32xf32>
    %83 = arith.subf %12, %82 : vector<256x32xf32>
    %84 = arith.mulf %83, %83 : vector<256x32xf32>
    %cst_33 = arith.constant dense<0.000000e+00> : vector<256xf32>
    %85 = vector.multi_reduction <add>, %84, %cst_33 [1] : vector<256x32xf32> to vector<256xf32>
    %86 = vector.shape_cast %85 : vector<256xf32> to vector<256x1xf32>
    %cst_34 = arith.constant 3.200000e+01 : f32
    %87 = vector.broadcast %cst_34 : f32 to vector<256x1xf32>
    %88 = arith.divf %86, %87 : vector<256x1xf32>
    %89 = vector.broadcast %81 : vector<256x1xf32> to vector<256x32xf32>
    %90 = arith.subf %12, %89 : vector<256x32xf32>
    %cst_35 = arith.constant 9.99999974E-6 : f32
    %91 = vector.broadcast %cst_35 : f32 to vector<256x1xf32>
    %92 = arith.addf %88, %91 : vector<256x1xf32>
    %93 = math.rsqrt %92 : vector<256x1xf32>
    %94 = vector.broadcast %93 : vector<256x1xf32> to vector<256x32xf32>
    %95 = arith.mulf %90, %94 : vector<256x32xf32>
    %96 = vector.broadcast %76 : vector<1x32xf32> to vector<256x32xf32>
    %97 = arith.mulf %95, %96 : vector<256x32xf32>
    %98 = vector.broadcast %77 : vector<1x32xf32> to vector<256x32xf32>
    %99 = arith.addf %97, %98 : vector<256x32xf32>
    %100 = vector.extract_strided_slice %1 {offsets = [2, 0, 0], sizes = [1, 32, 16], strides = [1, 1, 1]} : vector<3x32x16xf32> to vector<1x32x16xf32>
    %101 = vector.shape_cast %100 : vector<1x32x16xf32> to vector<32x16xf32>
    %cst_36 = arith.constant dense<0.000000e+00> : vector<256x16xf32>
    %102 = tpu.matmul %99, %101, %cst_36 {dimension_numbers = #tpu.dot_dimension_numbers<[1], [0], [0], [1], [0, 0, 1, 1], [], []>} : vector<256x32xf32>, vector<32x16xf32>, vector<256x16xf32> -> vector<256x16xf32>
    %103 = vector.extract_strided_slice %2 {offsets = [2, 0], sizes = [1, 16], strides = [1, 1]} : vector<3x16xf32> to vector<1x16xf32>
    %104 = vector.broadcast %103 : vector<1x16xf32> to vector<256x16xf32>
    %105 = arith.addf %102, %104 : vector<256x16xf32>
    %106 = vector.shape_cast %45 : vector<256x16xf32> to vector<4x64x16xf32>
    %107 = vector.shape_cast %75 : vector<256x16xf32> to vector<4x64x16xf32>
    %108 = vector.extract_strided_slice %0 {offsets = [6, 0], sizes = [1, 32], strides = [1, 1]} : vector<12x32xf32> to vector<1x32xf32>
    %109 = vector.broadcast %108 : vector<1x32xf32> to vector<64x32xf32>
    %110 = arith.addf %15, %109 : vector<64x32xf32>
    %111 = vector.extract_strided_slice %106 {offsets = [0, 0, 0], sizes = [4, 64, 8], strides = [1, 1, 1]} : vector<4x64x16xf32> to vector<4x64x8xf32>
    %112 = vector.extract_strided_slice %107 {offsets = [0, 0, 0], sizes = [4, 64, 8], strides = [1, 1, 1]} : vector<4x64x16xf32> to vector<4x64x8xf32>
    "tpu.trace_start"() <{level = 10 : i32, message = "gqd,gkd->gqk"}> : () -> ()
    %cst_37 = arith.constant dense<0.000000e+00> : vector<4x64x64xf32>
    %113 = tpu.matmul %111, %112, %cst_37 {dimension_numbers = #tpu.dot_dimension_numbers<[2], [2], [1], [1], [0, 0, 0, 1, 1, 1], [0], [0]>} : vector<4x64x8xf32>, vector<4x64x8xf32>, vector<4x64x64xf32> -> vector<4x64x64xf32>
    "tpu.trace_stop"() : () -> ()
    %cst_38 = arith.constant 0.353553385 : f32
    %114 = vector.broadcast %cst_38 : f32 to vector<4x64x64xf32>
    %115 = arith.mulf %114, %113 : vector<4x64x64xf32>
    %cst_39 = arith.constant dense<0xFF800000> : vector<4x64xf32>
    %116 = vector.multi_reduction <maximumf>, %115, %cst_39 [2] : vector<4x64x64xf32> to vector<4x64xf32>
    %117 = vector.shape_cast %116 : vector<4x64xf32> to vector<4x64x1xf32>
    %cst_40 = arith.constant dense<0xFF800000> : vector<64x1xf32>
    %118 = vector.multi_reduction <maximumf>, %117, %cst_40 [0] : vector<4x64x1xf32> to vector<64x1xf32>
    %119 = vector.shape_cast %118 : vector<64x1xf32> to vector<1x64x1xf32>
    %120 = vector.broadcast %119 : vector<1x64x1xf32> to vector<4x64x64xf32>
    %121 = arith.subf %115, %120 : vector<4x64x64xf32>
    %122 = math.exp %121 : vector<4x64x64xf32>
    %cst_41 = arith.constant dense<0.000000e+00> : vector<4x64xf32>
    %123 = vector.multi_reduction <add>, %122, %cst_41 [2] : vector<4x64x64xf32> to vector<4x64xf32>
    %124 = vector.shape_cast %123 : vector<4x64xf32> to vector<4x64x1xf32>
    %cst_42 = arith.constant dense<0.000000e+00> : vector<64x1xf32>
    %125 = vector.multi_reduction <add>, %124, %cst_42 [0] : vector<4x64x1xf32> to vector<64x1xf32>
    %126 = vector.shape_cast %125 : vector<64x1xf32> to vector<1x64x1xf32>
    %127 = vector.extract_strided_slice %105 {offsets = [0, 0], sizes = [256, 8], strides = [1, 1]} : vector<256x16xf32> to vector<256x8xf32>
    %128 = vector.extract_strided_slice %3 {offsets = [0, 0], sizes = [8, 32], strides = [1, 1]} : vector<16x32xf32> to vector<8x32xf32>
    %cst_43 = arith.constant dense<0.000000e+00> : vector<256x32xf32>
    %129 = tpu.matmul %127, %128, %cst_43 {dimension_numbers = #tpu.dot_dimension_numbers<[1], [0], [0], [1], [0, 0, 1, 1], [], []>} : vector<256x8xf32>, vector<8x32xf32>, vector<256x32xf32> -> vector<256x32xf32>
    %130 = vector.shape_cast %129 : vector<256x32xf32> to vector<4x64x32xf32>
    "tpu.trace_start"() <{level = 10 : i32, message = "gqk,gkc->gqc"}> : () -> ()
    %cst_44 = arith.constant dense<0.000000e+00> : vector<4x64x32xf32>
    %131 = tpu.matmul %122, %130, %cst_44 {dimension_numbers = #tpu.dot_dimension_numbers<[2], [1], [1], [2], [0, 0, 0, 1, 1, 2], [0], [0]>} : vector<4x64x64xf32>, vector<4x64x32xf32>, vector<4x64x32xf32> -> vector<4x64x32xf32>
    "tpu.trace_stop"() : () -> ()
    %cst_45 = arith.constant dense<0.000000e+00> : vector<64x32xf32>
    %132 = vector.multi_reduction <add>, %131, %cst_45 [0] : vector<4x64x32xf32> to vector<64x32xf32>
    %133 = vector.shape_cast %126 : vector<1x64x1xf32> to vector<64x1xf32>
    %134 = tpu.reciprocal %133 {approx = true} : vector<64x1xf32> -> vector<64x1xf32>
    %135 = vector.broadcast %134 : vector<64x1xf32> to vector<64x32xf32>
    %136 = arith.mulf %132, %135 : vector<64x32xf32>
    %137 = arith.addf %110, %136 : vector<64x32xf32>
    %138 = vector.extract_strided_slice %106 {offsets = [0, 0, 8], sizes = [4, 64, 8], strides = [1, 1, 1]} : vector<4x64x16xf32> to vector<4x64x8xf32>
    %139 = vector.extract_strided_slice %107 {offsets = [0, 0, 8], sizes = [4, 64, 8], strides = [1, 1, 1]} : vector<4x64x16xf32> to vector<4x64x8xf32>
    "tpu.trace_start"() <{level = 10 : i32, message = "gqd,gkd->gqk"}> : () -> ()
    %cst_46 = arith.constant dense<0.000000e+00> : vector<4x64x64xf32>
    %140 = tpu.matmul %138, %139, %cst_46 {dimension_numbers = #tpu.dot_dimension_numbers<[2], [2], [1], [1], [0, 0, 0, 1, 1, 1], [0], [0]>} : vector<4x64x8xf32>, vector<4x64x8xf32>, vector<4x64x64xf32> -> vector<4x64x64xf32>
    "tpu.trace_stop"() : () -> ()
    %cst_47 = arith.constant 0.353553385 : f32
    %141 = vector.broadcast %cst_47 : f32 to vector<4x64x64xf32>
    %142 = arith.mulf %141, %140 : vector<4x64x64xf32>
    %cst_48 = arith.constant dense<0xFF800000> : vector<4x64xf32>
    %143 = vector.multi_reduction <maximumf>, %142, %cst_48 [2] : vector<4x64x64xf32> to vector<4x64xf32>
    %144 = vector.shape_cast %143 : vector<4x64xf32> to vector<4x64x1xf32>
    %cst_49 = arith.constant dense<0xFF800000> : vector<64x1xf32>
    %145 = vector.multi_reduction <maximumf>, %144, %cst_49 [0] : vector<4x64x1xf32> to vector<64x1xf32>
    %146 = vector.shape_cast %145 : vector<64x1xf32> to vector<1x64x1xf32>
    %147 = vector.broadcast %146 : vector<1x64x1xf32> to vector<4x64x64xf32>
    %148 = arith.subf %142, %147 : vector<4x64x64xf32>
    %149 = math.exp %148 : vector<4x64x64xf32>
    %cst_50 = arith.constant dense<0.000000e+00> : vector<4x64xf32>
    %150 = vector.multi_reduction <add>, %149, %cst_50 [2] : vector<4x64x64xf32> to vector<4x64xf32>
    %151 = vector.shape_cast %150 : vector<4x64xf32> to vector<4x64x1xf32>
    %cst_51 = arith.constant dense<0.000000e+00> : vector<64x1xf32>
    %152 = vector.multi_reduction <add>, %151, %cst_51 [0] : vector<4x64x1xf32> to vector<64x1xf32>
    %153 = vector.shape_cast %152 : vector<64x1xf32> to vector<1x64x1xf32>
    %154 = vector.extract_strided_slice %105 {offsets = [0, 8], sizes = [256, 8], strides = [1, 1]} : vector<256x16xf32> to vector<256x8xf32>
    %155 = vector.extract_strided_slice %3 {offsets = [8, 0], sizes = [8, 32], strides = [1, 1]} : vector<16x32xf32> to vector<8x32xf32>
    %cst_52 = arith.constant dense<0.000000e+00> : vector<256x32xf32>
    %156 = tpu.matmul %154, %155, %cst_52 {dimension_numbers = #tpu.dot_dimension_numbers<[1], [0], [0], [1], [0, 0, 1, 1], [], []>} : vector<256x8xf32>, vector<8x32xf32>, vector<256x32xf32> -> vector<256x32xf32>
    %157 = vector.shape_cast %156 : vector<256x32xf32> to vector<4x64x32xf32>
    "tpu.trace_start"() <{level = 10 : i32, message = "gqk,gkc->gqc"}> : () -> ()
    %cst_53 = arith.constant dense<0.000000e+00> : vector<4x64x32xf32>
    %158 = tpu.matmul %149, %157, %cst_53 {dimension_numbers = #tpu.dot_dimension_numbers<[2], [1], [1], [2], [0, 0, 0, 1, 1, 2], [0], [0]>} : vector<4x64x64xf32>, vector<4x64x32xf32>, vector<4x64x32xf32> -> vector<4x64x32xf32>
    "tpu.trace_stop"() : () -> ()
    %cst_54 = arith.constant dense<0.000000e+00> : vector<64x32xf32>
    %159 = vector.multi_reduction <add>, %158, %cst_54 [0] : vector<4x64x32xf32> to vector<64x32xf32>
    %160 = vector.shape_cast %153 : vector<1x64x1xf32> to vector<64x1xf32>
    %161 = tpu.reciprocal %160 {approx = true} : vector<64x1xf32> -> vector<64x1xf32>
    %162 = vector.broadcast %161 : vector<64x1xf32> to vector<64x32xf32>
    %163 = arith.mulf %159, %162 : vector<64x32xf32>
    %164 = arith.addf %137, %163 : vector<64x32xf32>
    %165 = vector.extract_strided_slice %0 {offsets = [7, 0], sizes = [1, 32], strides = [1, 1]} : vector<12x32xf32> to vector<1x32xf32>
    %166 = vector.extract_strided_slice %0 {offsets = [8, 0], sizes = [1, 32], strides = [1, 1]} : vector<12x32xf32> to vector<1x32xf32>
    %cst_55 = arith.constant dense<0.000000e+00> : vector<64xf32>
    %167 = vector.multi_reduction <add>, %164, %cst_55 [1] : vector<64x32xf32> to vector<64xf32>
    %168 = vector.shape_cast %167 : vector<64xf32> to vector<64x1xf32>
    %cst_56 = arith.constant 3.200000e+01 : f32
    %169 = vector.broadcast %cst_56 : f32 to vector<64x1xf32>
    %170 = arith.divf %168, %169 : vector<64x1xf32>
    %171 = vector.broadcast %170 : vector<64x1xf32> to vector<64x32xf32>
    %172 = arith.subf %164, %171 : vector<64x32xf32>
    %173 = arith.mulf %172, %172 : vector<64x32xf32>
    %cst_57 = arith.constant dense<0.000000e+00> : vector<64xf32>
    %174 = vector.multi_reduction <add>, %173, %cst_57 [1] : vector<64x32xf32> to vector<64xf32>
    %175 = vector.shape_cast %174 : vector<64xf32> to vector<64x1xf32>
    %cst_58 = arith.constant 3.200000e+01 : f32
    %176 = vector.broadcast %cst_58 : f32 to vector<64x1xf32>
    %177 = arith.divf %175, %176 : vector<64x1xf32>
    %178 = vector.broadcast %170 : vector<64x1xf32> to vector<64x32xf32>
    %179 = arith.subf %164, %178 : vector<64x32xf32>
    %cst_59 = arith.constant 9.99999974E-6 : f32
    %180 = vector.broadcast %cst_59 : f32 to vector<64x1xf32>
    %181 = arith.addf %177, %180 : vector<64x1xf32>
    %182 = math.rsqrt %181 : vector<64x1xf32>
    %183 = vector.broadcast %182 : vector<64x1xf32> to vector<64x32xf32>
    %184 = arith.mulf %179, %183 : vector<64x32xf32>
    %185 = vector.broadcast %165 : vector<1x32xf32> to vector<64x32xf32>
    %186 = arith.mulf %184, %185 : vector<64x32xf32>
    %187 = vector.broadcast %166 : vector<1x32xf32> to vector<64x32xf32>
    %188 = arith.addf %186, %187 : vector<64x32xf32>
    %c0_60 = arith.constant 0 : index
    %c0_61 = arith.constant 0 : index
    %189 = vector.load %arg8[%c0_60, %c0_61] : memref<32x64xf32, #tpu.memory_space<vmem>>, vector<32x64xf32>
    %cst_62 = arith.constant dense<0.000000e+00> : vector<64x64xf32>
    %190 = tpu.matmul %188, %189, %cst_62 {dimension_numbers = #tpu.dot_dimension_numbers<[1], [0], [0], [1], [0, 0, 1, 1], [], []>} : vector<64x32xf32>, vector<32x64xf32>, vector<64x64xf32> -> vector<64x64xf32>
    %c0_63 = arith.constant 0 : index
    %c0_64 = arith.constant 0 : index
    %191 = vector.load %arg9[%c0_63, %c0_64] : memref<1x64xf32, #tpu.memory_space<vmem>>, vector<1x64xf32>
    %192 = vector.broadcast %191 : vector<1x64xf32> to vector<64x64xf32>
    %193 = arith.addf %190, %192 : vector<64x64xf32>
    %cst_65 = arith.constant 5.000000e-01 : f32
    %194 = vector.broadcast %cst_65 : f32 to vector<64x64xf32>
    %195 = arith.mulf %194, %193 : vector<64x64xf32>
    %cst_66 = arith.constant 4.471500e-02 : f32
    %196 = vector.broadcast %cst_66 : f32 to vector<64x64xf32>
    %197 = arith.mulf %196, %193 : vector<64x64xf32>
    %198 = arith.mulf %197, %193 : vector<64x64xf32>
    %199 = arith.mulf %198, %193 : vector<64x64xf32>
    %200 = arith.addf %193, %199 : vector<64x64xf32>
    %cst_67 = arith.constant 0.797884583 : f32
    %201 = vector.broadcast %cst_67 : f32 to vector<64x64xf32>
    %202 = arith.mulf %201, %200 : vector<64x64xf32>
    %203 = math.tanh %202 : vector<64x64xf32>
    %cst_68 = arith.constant 1.000000e+00 : f32
    %204 = vector.broadcast %cst_68 : f32 to vector<64x64xf32>
    %205 = arith.addf %204, %203 : vector<64x64xf32>
    %206 = arith.mulf %195, %205 : vector<64x64xf32>
    %c0_69 = arith.constant 0 : index
    %c0_70 = arith.constant 0 : index
    %207 = vector.load %arg10[%c0_69, %c0_70] : memref<64x32xf32, #tpu.memory_space<vmem>>, vector<64x32xf32>
    %cst_71 = arith.constant dense<0.000000e+00> : vector<64x32xf32>
    %208 = tpu.matmul %206, %207, %cst_71 {dimension_numbers = #tpu.dot_dimension_numbers<[1], [0], [0], [1], [0, 0, 1, 1], [], []>} : vector<64x64xf32>, vector<64x32xf32>, vector<64x32xf32> -> vector<64x32xf32>
    %209 = arith.addf %188, %208 : vector<64x32xf32>
    %210 = vector.extract_strided_slice %0 {offsets = [9, 0], sizes = [1, 32], strides = [1, 1]} : vector<12x32xf32> to vector<1x32xf32>
    %211 = vector.broadcast %210 : vector<1x32xf32> to vector<64x32xf32>
    %212 = arith.addf %209, %211 : vector<64x32xf32>
    %213 = vector.extract_strided_slice %0 {offsets = [10, 0], sizes = [1, 32], strides = [1, 1]} : vector<12x32xf32> to vector<1x32xf32>
    %214 = vector.extract_strided_slice %0 {offsets = [11, 0], sizes = [1, 32], strides = [1, 1]} : vector<12x32xf32> to vector<1x32xf32>
    %cst_72 = arith.constant dense<0.000000e+00> : vector<64xf32>
    %215 = vector.multi_reduction <add>, %212, %cst_72 [1] : vector<64x32xf32> to vector<64xf32>
    %216 = vector.shape_cast %215 : vector<64xf32> to vector<64x1xf32>
    %cst_73 = arith.constant 3.200000e+01 : f32
    %217 = vector.broadcast %cst_73 : f32 to vector<64x1xf32>
    %218 = arith.divf %216, %217 : vector<64x1xf32>
    %219 = vector.broadcast %218 : vector<64x1xf32> to vector<64x32xf32>
    %220 = arith.subf %212, %219 : vector<64x32xf32>
    %221 = arith.mulf %220, %220 : vector<64x32xf32>
    %cst_74 = arith.constant dense<0.000000e+00> : vector<64xf32>
    %222 = vector.multi_reduction <add>, %221, %cst_74 [1] : vector<64x32xf32> to vector<64xf32>
    %223 = vector.shape_cast %222 : vector<64xf32> to vector<64x1xf32>
    %cst_75 = arith.constant 3.200000e+01 : f32
    %224 = vector.broadcast %cst_75 : f32 to vector<64x1xf32>
    %225 = arith.divf %223, %224 : vector<64x1xf32>
    %226 = vector.broadcast %218 : vector<64x1xf32> to vector<64x32xf32>
    %227 = arith.subf %212, %226 : vector<64x32xf32>
    %cst_76 = arith.constant 9.99999974E-6 : f32
    %228 = vector.broadcast %cst_76 : f32 to vector<64x1xf32>
    %229 = arith.addf %225, %228 : vector<64x1xf32>
    %230 = math.rsqrt %229 : vector<64x1xf32>
    %231 = vector.broadcast %230 : vector<64x1xf32> to vector<64x32xf32>
    %232 = arith.mulf %227, %231 : vector<64x32xf32>
    %233 = vector.broadcast %213 : vector<1x32xf32> to vector<64x32xf32>
    %234 = arith.mulf %232, %233 : vector<64x32xf32>
    %235 = vector.broadcast %214 : vector<1x32xf32> to vector<64x32xf32>
    %236 = arith.addf %234, %235 : vector<64x32xf32>
    %c0_77 = arith.constant 0 : index
    %c0_78 = arith.constant 0 : index
    %c0_79 = arith.constant 0 : index
    %237 = vector.load %arg12[%c0_77, %c0_78, %c0_79] : memref<1x64x32xf32, #tpu.memory_space<vmem>>, vector<1x64x32xf32>
    %238 = vector.shape_cast %237 : vector<1x64x32xf32> to vector<64x32xf32>
    %239 = vector.shape_cast %236 : vector<64x32xf32> to vector<1x64x32xf32>
    tpu.vector_store %arg12[%c0_77, %c0_78, %c0_79], %239 {strides = array<i32>} : memref<1x64x32xf32, #tpu.memory_space<vmem>>, vector<1x64x32xf32>,
    return
  }
  func.func @transform_0(%arg0: i32) -> (i32, i32, i32) {
    %c0_i32 = arith.constant 0 : i32
    %c0_i32_0 = arith.constant 0 : i32
    %c0_i32_1 = arith.constant 0 : i32
    return %arg0, %c0_i32, %c0_i32_0 : i32, i32, i32
  }
  func.func @transform_1(%arg0: i32) -> (i32, i32, i32) {
    %c0_i32 = arith.constant 0 : i32
    %c0_i32_0 = arith.constant 0 : i32
    %c0_i32_1 = arith.constant 0 : i32
    return %arg0, %c0_i32, %c0_i32_0 : i32, i32, i32
  }
  func.func @transform_2(%arg0: i32) -> (i32, i32, i32) {
    %c0_i32 = arith.constant 0 : i32
    %c0_i32_0 = arith.constant 0 : i32
    %c0_i32_1 = arith.constant 0 : i32
    return %arg0, %c0_i32, %c0_i32_0 : i32, i32, i32
  }
  func.func @transform_3(%arg0: i32) -> (i32, i32, i32) {
    %c0_i32 = arith.constant 0 : i32
    %c0_i32_0 = arith.constant 0 : i32
    %c0_i32_1 = arith.constant 0 : i32
    return %arg0, %c0_i32, %c0_i32_0 : i32, i32, i32
  }
  func.func @transform_4(%arg0: i32) -> (i32, i32, i32) {
    %c0_i32 = arith.constant 0 : i32
    %c0_i32_0 = arith.constant 0 : i32
    %c0_i32_1 = arith.constant 0 : i32
    %c0_i32_2 = arith.constant 0 : i32
    return %c0_i32, %c0_i32_0, %c0_i32_1 : i32, i32, i32
  }
  func.func @transform_5(%arg0: i32) -> (i32, i32) {
    %c0_i32 = arith.constant 0 : i32
    %c0_i32_0 = arith.constant 0 : i32
    %c0_i32_1 = arith.constant 0 : i32
    return %c0_i32, %c0_i32_0 : i32, i32
  }
  func.func @transform_6(%arg0: i32) -> (i32, i32) {
    %c0_i32 = arith.constant 0 : i32
    %c0_i32_0 = arith.constant 0 : i32
    %c0_i32_1 = arith.constant 0 : i32
    return %c0_i32, %c0_i32_0 : i32, i32
  }
  func.func @transform_7(%arg0: i32) -> (i32, i32) {
    %c0_i32 = arith.constant 0 : i32
    %c0_i32_0 = arith.constant 0 : i32
    %c0_i32_1 = arith.constant 0 : i32
    return %c0_i32, %c0_i32_0 : i32, i32
  }
  func.func @transform_8(%arg0: i32) -> (i32, i32) {
    %c0_i32 = arith.constant 0 : i32
    %c0_i32_0 = arith.constant 0 : i32
    %c0_i32_1 = arith.constant 0 : i32
    return %c0_i32, %c0_i32_0 : i32, i32
  }
  func.func @transform_9(%arg0: i32) -> (i32, i32) {
    %c0_i32 = arith.constant 0 : i32
    %c0_i32_0 = arith.constant 0 : i32
    %c0_i32_1 = arith.constant 0 : i32
    return %c0_i32, %c0_i32_0 : i32, i32
  }
  func.func @transform_10(%arg0: i32) -> (i32, i32) {
    %c0_i32 = arith.constant 0 : i32
    %c0_i32_0 = arith.constant 0 : i32
    %c0_i32_1 = arith.constant 0 : i32
    return %c0_i32, %c0_i32_0 : i32, i32
  }
  func.func @transform_11(%arg0: i32) -> (i32, i32, i32) {
    %c0_i32 = arith.constant 0 : i32
    %c0_i32_0 = arith.constant 0 : i32
    %c0_i32_1 = arith.constant 0 : i32
    return %arg0, %c0_i32, %c0_i32_0 : i32, i32, i32
  }
}

</mosaic_0001>

<bundles_post_ra>
// kernel: tpu_custom_call.1
= control target key start
LH: loop header
LB: loop body
LE: loop exit
PB: predicated region body
PF: predicated region fallthrough
CT: control target
= control target key end

     0   :  { %s10099_s17 = smov 0   ;;  %s14332_s0 = inlined_call_operand.vmem [shape: bf16[2,256,32], index: 0, kind: input, shape index: {}]   ;;  %s14333_s1 = inlined_call_operand.vmem [shape: bf16[2,256,32], index: 1, kind: input, shape index: {}]   ;;  %s14334_s2 = inlined_call_operand.vmem [shape: bf16[2,256,32], index: 2, kind: input, shape index: {}]   ;;  %s14335_s3 = inlined_call_operand.vmem [shape: bf16[2,64,32], index: 3, kind: input, shape index: {}]   ;;  %s14336_s4 = inlined_call_operand.vmem [shape: f32[3,32,16], index: 4, kind: input, shape index: {}]   ;;  %s14337_s5 = inlined_call_operand.vmem [shape: f32[3,16], index: 5, kind: input, shape index: {}]   ;;  %s14338_s6 = inlined_call_operand.vmem [shape: f32[16,32], index: 6, kind: input, shape index: {}]   ;;  %s14339_s7 = inlined_call_operand.vmem [shape: f32[32,64], index: 7, kind: input, shape index: {}]   ;;  %s14340_s8 = inlined_call_operand.vmem [shape: f32[1,64], index: 8, kind: input, shape index: {}]   ;;  %s14341_s9 = inlined_call_operand.vmem [shape: f32[64,32], index: 9, kind: input, shape index: {}]   ;;  %s14342_s10 = inlined_call_operand.vmem [shape: f32[12,32], index: 10, kind: input, shape index: {}]   ;;  %s14343_s11 = inlined_call_operand.vmem [shape: f32[2,64,32], index: 11, kind: output, shape index: {}]  }
   0x1 LB: > { %s7741_s18 = sadd.s32 4294967295, %s10036_s17   ;;  %p7745_p0 = scmp.ge.s32.totalorder %s10036_s17, 1  ;;  %s10036_s17 = sphi %s10099_s17, %s21_s17  }
   0x2   : > { %p367_p1 = scmp.lt.s32.totalorder %s10036_s17, 3 }
   0x4   : > { %p368_p2 = pnand %p7745_p0, %p367_p1 }
   0x6   : > { %371 = sbr.rel (%p368_p2) target bundleno = 2860 (0xb2c), region = 64 }
   0xb   : > { %p422_p3 = scmp.lt.s32.totalorder %s7741_s18, 1  ;;  %vm672_vm0 = vcmask 261120   ;;  %s10038_s23 = smov 120   ;;  %vm3125_vm1 = vcmask 64512   ;;  %vm3770_vm2 = vcmask 523264  }
   0xd   : > { %s14918_s18 = smov (!%p422_p3, %s7741_s18), 1 }
   0xe   : > { %s10110_s19 = sshll.u32 %s14918_s18, 7  ;;  %s8130_s13 = sshll.u32 %s14918_s18, 5 }
   0xf   : > { %s10116_s22 = scalar_lea.vmem %s14332_s0, %s10110_s19  ;;  %s10122_s25 = scalar_lea.vmem %s14333_s1, %s10110_s19 }
  0x10   : > { %v10125_v0 = vld [vmem:[%s10116_s22 + $0x78] sm:$0xff]   ;;  %v10128_v1 = vld [vmem:[%s10116_s22 + $0x70] sm:$0xff]   ;;  %v10135_v6 = vld [vmem:[%s10122_s25] sm:$0xff]   ;;  %s441_s16 = scalar_lea.vmem %s14335_s3, %s8130_s13  ;;  %s8131_s13 = sshll.u32 %s14918_s18, 6 }
  0x11   : > { %v8194_v2 = vunpack.c.l.bf16 %v10125_v0  ;;  %v8190_v3 = vunpack.c.l.bf16 %v10128_v1  ;;  %v8195_v4 = vunpack.c.h.bf16 %v10125_v0  ;;  %v8191_v5 = vunpack.c.h.bf16 %v10128_v1  ;;  %v10152_v13 = vld [vmem:[%s10122_s25 + $0x8] sm:$0xff]   ;;  %v10163_v18 = vld [vmem:[%s10122_s25 + $0x10] sm:$0xff]   ;;  %v10174_v23 = vld [vmem:[%s10122_s25 + $0x18] sm:$0xff]  }
  0x12   : > { %v8199_v11 = vunpack.c.h.bf16 %v10135_v6  ;;  %v8198_v12 = vunpack.c.l.bf16 %v10135_v6  ;;  %v8203_v16 = vunpack.c.h.bf16 %v10152_v13  ;;  %v8202_v17 = vunpack.c.l.bf16 %v10152_v13  ;;  %v10185_v28 = vld [vmem:[%s10122_s25 + $0x20] sm:$0xff]   ;;  %v10196_v33 = vld [vmem:[%s10122_s25 + $0x28] sm:$0xff]   ;;  %v10207_v38 = vld [vmem:[%s10122_s25 + $0x30] sm:$0xff]  }
  0x13   : > { %v763_v7 = vsel %vm672_vm0, %v8194_v2, 0.0  ;;  %v757_v8 = vsel %vm672_vm0, %v8190_v3, 0.0  ;;  %v766_v9 = vsel %vm672_vm0, %v8195_v4, 0.0  ;;  %v760_v10 = vsel %vm672_vm0, %v8191_v5, 0.0  ;;  %v10218_v43 = vld [vmem:[%s10116_s22] sm:$0xff]   ;;  %v10229_v48 = vld [vmem:[%s10122_s25 + $0x38] sm:$0xff]  }
  0x14   : > { %764 = vadd.xlane.f32.xlu1 %v763_v7  ;;  %758 = vadd.xlane.f32.xlu0 %v757_v8  ;;  %v1490_v14 = vsel %vm672_vm0, %v8199_v11, 0.0  ;;  %v1487_v15 = vsel %vm672_vm0, %v8198_v12, 0.0  ;;  %v1496_v19 = vsel %vm672_vm0, %v8203_v16, 0.0  ;;  %v1493_v20 = vsel %vm672_vm0, %v8202_v17, 0.0  ;;  %v10240_v53 = vld [vmem:[%s10122_s25 + $0x40] sm:$0xff]   ;;  %v10251_v58 = vld [vmem:[%s10122_s25 + $0x48] sm:$0xff]  }
  0x15   : > { %v8207_v21 = vunpack.c.h.bf16 %v10163_v18  ;;  %v8206_v22 = vunpack.c.l.bf16 %v10163_v18  ;;  %v8211_v26 = vunpack.c.h.bf16 %v10174_v23  ;;  %v8210_v27 = vunpack.c.l.bf16 %v10174_v23  ;;  %v10262_v63 = vld [vmem:[%s10122_s25 + $0x50] sm:$0xff]  }
  0x16   : > { %v8215_v31 = vunpack.c.h.bf16 %v10185_v28  ;;  %v8214_v32 = vunpack.c.l.bf16 %v10185_v28  ;;  %v14386_v36 = vunpack.c.h.bf16 %v10196_v33  ;;  %v8218_v37 = vunpack.c.l.bf16 %v10196_v33 }
  0x17   : > { %v1502_v24 = vsel %vm672_vm0, %v8207_v21, 0.0  ;;  %v1499_v25 = vsel %vm672_vm0, %v8206_v22, 0.0  ;;  %v1508_v29 = vsel %vm672_vm0, %v8211_v26, 0.0  ;;  %v1505_v30 = vsel %vm672_vm0, %v8210_v27, 0.0 }
  0x18   : > { %767 = vadd.xlane.f32.xlu1 %v766_v9  ;;  %761 = vadd.xlane.f32.xlu0 %v760_v10  ;;  %v1514_v34 = vsel %vm672_vm0, %v8215_v31, 0.0  ;;  %v1511_v35 = vsel %vm672_vm0, %v8214_v32, 0.0  ;;  %v1520_v39 = vsel %vm672_vm0, %v14386_v36, 0.0  ;;  %v1517_v40 = vsel %vm672_vm0, %v8218_v37, 0.0 }
  0x19   : > { %v14383_v41 = vunpack.c.h.bf16 %v10207_v38  ;;  %v8222_v42 = vunpack.c.l.bf16 %v10207_v38  ;;  %v14381_v46 = vunpack.c.h.bf16 %v10218_v43  ;;  %v8134_v47 = vunpack.c.l.bf16 %v10218_v43 }
  0x1a   : > { %v14370_v51 = vunpack.c.h.bf16 %v10229_v48  ;;  %v8226_v52 = vunpack.c.l.bf16 %v10229_v48  ;;  %v14364_v56 = vunpack.c.h.bf16 %v10240_v53  ;;  %v14389_v57 = vunpack.c.l.bf16 %v10240_v53 }
  0x1b   : > { %v1526_v44 = vsel %vm672_vm0, %v14383_v41, 0.0  ;;  %v1523_v45 = vsel %vm672_vm0, %v8222_v42, 0.0  ;;  %v676_v49 = vsel %vm672_vm0, %v14381_v46, 0.0  ;;  %v673_v50 = vsel %vm672_vm0, %v8134_v47, 0.0 }
  0x1c   : > { %1491 = vadd.xlane.f32.xlu1 %v1490_v14  ;;  %1488 = vadd.xlane.f32.xlu0 %v1487_v15  ;;  %v1532_v54 = vsel %vm672_vm0, %v14370_v51, 0.0  ;;  %v1529_v55 = vsel %vm672_vm0, %v8226_v52, 0.0  ;;  %v1538_v59 = vsel %vm672_vm0, %v14364_v56, 0.0  ;;  %v1535_v60 = vsel %vm672_vm0, %v14389_v57, 0.0  ;;  %v10273_v14 = vld [vmem:[%s10116_s22 + $0x8] sm:$0xff]   ;;  %v10276_v15 = vld [vmem:[%s10122_s25 + $0x58] sm:$0xff]  }
  0x1d   : > { %v14359_v61 = vunpack.c.h.bf16 %v10251_v58  ;;  %v14385_v62 = vunpack.c.l.bf16 %v10251_v58  ;;  %v14356_v9 = vunpack.c.h.bf16 %v10262_v63  ;;  %v14382_v10 = vunpack.c.l.bf16 %v10262_v63  ;;  %v10411_v56 = vld [vmem:[%s10116_s22 + $0x60] sm:$0xff]  }
  0x1f   : > { %v1544_v7 = vsel %vm672_vm0, %v14359_v61, 0.0  ;;  %v1541_v8 = vsel %vm672_vm0, %v14385_v62, 0.0 }
  0x20   : > { %1497 = vadd.xlane.f32.xlu1 %v1496_v19  ;;  %1494 = vadd.xlane.f32.xlu0 %v1493_v20  ;;  %v1550_v19 = vsel %vm672_vm0, %v14356_v9, 0.0  ;;  %v1547_v20 = vsel %vm672_vm0, %v14382_v10, 0.0 }
  0x24   : > { %1503 = vadd.xlane.f32.xlu1 %v1502_v24  ;;  %1500 = vadd.xlane.f32.xlu0 %v1499_v25  ;;  %v14349_v24 = vunpack.c.l.bf16 %v10273_v14  ;;  %v14379_v25 = vunpack.c.l.bf16 %v10276_v15 }
  0x28   : > { %1509 = vadd.xlane.f32.xlu1 %v1508_v29  ;;  %1506 = vadd.xlane.f32.xlu0 %v1505_v30  ;;  %v679_v29 = vsel %vm672_vm0, %v14349_v24, 0.0  ;;  %v1553_v30 = vsel %vm672_vm0, %v14379_v25, 0.0 }
  0x2c   : > { %1515 = vadd.xlane.f32.xlu1 %v1514_v34  ;;  %1512 = vadd.xlane.f32.xlu0 %v1511_v35  ;;  %v14347_v34 = vunpack.c.h.bf16 %v10273_v14  ;;  %v14366_v35 = vunpack.c.h.bf16 %v10276_v15 }
  0x30   : > { %1521 = vadd.xlane.f32.xlu1 %v1520_v39  ;;  %1518 = vadd.xlane.f32.xlu0 %v1517_v40  ;;  %v10295_v39 = vld [vmem:[%s10116_s22 + $0x10] sm:$0xff]   ;;  %v10298_v40 = vld [vmem:[%s10122_s25 + $0x60] sm:$0xff]  }
  0x34   : > { %1527 = vadd.xlane.f32.xlu1 %v1526_v44  ;;  %1524 = vadd.xlane.f32.xlu0 %v1523_v45  ;;  %v682_v44 = vsel %vm672_vm0, %v14347_v34, 0.0  ;;  %v1556_v45 = vsel %vm672_vm0, %v14366_v35, 0.0  ;;  %v14372_v35 = vunpack.c.h.bf16 %v10411_v56 }
  0x38   : > { %677 = vadd.xlane.f32.xlu1 %v676_v49  ;;  %674 = vadd.xlane.f32.xlu0 %v673_v50  ;;  %v14345_v49 = vunpack.c.l.bf16 %v10295_v39  ;;  %v14362_v50 = vunpack.c.l.bf16 %v10298_v40 }
  0x3c   : > { %1533 = vadd.xlane.f32.xlu1 %v1532_v54  ;;  %1530 = vadd.xlane.f32.xlu0 %v1529_v55  ;;  %v685_v54 = vsel %vm672_vm0, %v14345_v49, 0.0  ;;  %v1559_v55 = vsel %vm672_vm0, %v14362_v50, 0.0  ;;  %v10342_v49 = vld [vmem:[%s10122_s25 + $0x70] sm:$0xff]  }
  0x3d   : > { %v14352_v34 = vunpack.c.l.bf16 %v10342_v49 }
  0x40   : > { %1539 = vadd.xlane.f32.xlu1 %v1538_v59  ;;  %1536 = vadd.xlane.f32.xlu0 %v1535_v60  ;;  %v14344_v59 = vunpack.c.h.bf16 %v10295_v39  ;;  %v14357_v60 = vunpack.c.h.bf16 %v10298_v40 }
  0x44   : > { %1545 = vadd.xlane.f32.xlu1 %v1544_v7  ;;  %1542 = vadd.xlane.f32.xlu0 %v1541_v8  ;;  %v10317_v7 = vld [vmem:[%s10116_s22 + $0x18] sm:$0xff]   ;;  %v10320_v8 = vld [vmem:[%s10122_s25 + $0x68] sm:$0xff]  }
  0x48   : > { %1551 = vadd.xlane.f32.xlu1 %v1550_v19  ;;  %1548 = vadd.xlane.f32.xlu0 %v1547_v20  ;;  %v688_v19 = vsel %vm672_vm0, %v14344_v59, 0.0  ;;  %v1562_v20 = vsel %vm672_vm0, %v14357_v60, 0.0  ;;  %v10339_v59 = vld [vmem:[%s10116_s22 + $0x20] sm:$0xff]  }
  0x49   : > { %v14355_v24 = vunpack.c.h.bf16 %v10339_v59 }
  0x4c   : > { %680 = vadd.xlane.f32.xlu1 %v679_v29  ;;  %1554 = vadd.xlane.f32.xlu0 %v1553_v30  ;;  %v14346_v29 = vunpack.c.l.bf16 %v10317_v7  ;;  %v14353_v30 = vunpack.c.l.bf16 %v10320_v8 }
  0x50   : > { %683 = vadd.xlane.f32.xlu1 %v682_v44  ;;  %1557 = vadd.xlane.f32.xlu0 %v1556_v45  ;;  %v691_v44 = vsel %vm672_vm0, %v14346_v29, 0.0  ;;  %v1565_v45 = vsel %vm672_vm0, %v14353_v30, 0.0  ;;  %v14351_v29 = vunpack.c.l.bf16 %v10339_v59 }
  0x54   : > { %686 = vadd.xlane.f32.xlu1 %v685_v54  ;;  %1560 = vadd.xlane.f32.xlu0 %v1559_v55  ;;  %v14348_v54 = vunpack.c.h.bf16 %v10320_v8  ;;  %v14350_v55 = vunpack.c.h.bf16 %v10317_v7 }
  0x58   : > { %689 = vadd.xlane.f32.xlu1 %v688_v19  ;;  %1563 = vadd.xlane.f32.xlu0 %v1562_v20  ;;  %v1568_v19 = vsel %vm672_vm0, %v14348_v54, 0.0  ;;  %v694_v20 = vsel %vm672_vm0, %v14350_v55, 0.0  ;;  %v14354_v54 = vunpack.c.h.bf16 %v10342_v49  ;;  %v10361_v55 = vld [vmem:[%s10122_s25 + $0x78] sm:$0xff]  }
  0x5c   : > { %692 = vadd.xlane.f32.xlu1 %v691_v44  ;;  %1566 = vadd.xlane.f32.xlu0 %v1565_v45  ;;  %v697_v44 = vsel %vm672_vm0, %v14351_v29, 0.0  ;;  %v1571_v45 = vsel %vm672_vm0, %v14352_v34, 0.0  ;;  %v700_v29 = vsel %vm672_vm0, %v14355_v24, 0.0  ;;  %v14358_v34 = vunpack.c.l.bf16 %v10361_v55 }
  0x60   : > { %1569 = vadd.xlane.f32.xlu1 %v1568_v19  ;;  %695 = vadd.xlane.f32.xlu0 %v694_v20  ;;  %v10364_v19 = vld [vmem:[%s10116_s22 + $0x28] sm:$0xff]   ;;  %v1574_v20 = vsel %vm672_vm0, %v14354_v54, 0.0  ;;  %v14361_v54 = vunpack.c.h.bf16 %v10361_v55 }
  0x61   : > { %v14360_v30 = vunpack.c.l.bf16 %v10364_v19  ;;  %v14365_v60 = vunpack.c.h.bf16 %v10364_v19 }
  0x63   : > { %v703_v24 = vsel %vm672_vm0, %v14360_v30, 0.0  ;;  %v10397_v30 = vld [vmem:[%s10116_s22 + $0x30] sm:$0xff]  }
  0x64   : > { %698 = vadd.xlane.f32.xlu1 %v697_v44  ;;  %1572 = vadd.xlane.f32.xlu0 %v1571_v45  ;;  %v10375_v44 = vld [vmem:[%s10116_s22 + $0x48] sm:$0xff]   ;;  %v1577_v45 = vsel %vm672_vm0, %v14358_v34, 0.0 }
  0x65   : > { %v14363_v9 = vunpack.c.h.bf16 %v10375_v44 }
  0x67   : > { %v730_v34 = vsel %vm672_vm0, %v14363_v9, 0.0 }
  0x68   : > { %1575 = vadd.xlane.f32.xlu1 %v1574_v20  ;;  %701 = vadd.xlane.f32.xlu0 %v700_v29  ;;  %v10386_v20 = vld [vmem:[%s10116_s22 + $0x50] sm:$0xff]   ;;  %v1580_v29 = vsel %vm672_vm0, %v14361_v54, 0.0  ;;  %v14368_v54 = vunpack.c.l.bf16 %v10397_v30 }
  0x69   : > { %v14367_v61 = vunpack.c.h.bf16 %v10386_v20 }
  0x6b   : > { %v736_v50 = vsel %vm672_vm0, %v14367_v61, 0.0  ;;  %v10422_v61 = vld [vmem:[%s10116_s22 + $0x38] sm:$0xff]  }
  0x6c   : > { %1578 = vadd.xlane.f32.xlu0 %v1577_v45  ;;  %704 = vadd.xlane.f32.xlu1 %v703_v24  ;;  %v10400_v24 = vld [vmem:[%s10116_s22 + $0x58] sm:$0xff]   ;;  %v706_v45 = vsel %vm672_vm0, %v14365_v60, 0.0  ;;  %v14373_v51 = vunpack.c.h.bf16 %v10422_v61 }
  0x6d   : > { %v14369_v9 = vunpack.c.h.bf16 %v10400_v24 }
  0x6f   : > { %v742_v60 = vsel %vm672_vm0, %v14369_v9, 0.0 }
  0x70   : > { %1581 = vadd.xlane.f32.xlu0 %v1580_v29  ;;  %731 = vadd.xlane.f32.xlu1 %v730_v34  ;;  %v709_v34 = vsel %vm672_vm0, %v14368_v54, 0.0  ;;  %v14371_v29 = vunpack.c.h.bf16 %v10397_v30  ;;  %v748_v54 = vsel %vm672_vm0, %v14372_v35, 0.0 }
  0x74   : > { %707 = vadd.xlane.f32.xlu0 %v706_v45  ;;  %737 = vadd.xlane.f32.xlu1 %v736_v50  ;;  %v712_v50 = vsel %vm672_vm0, %v14371_v29, 0.0  ;;  %v14376_v45 = vunpack.c.l.bf16 %v10422_v61 }
  0x76   : > { %v715_v9 = vsel %vm672_vm0, %v14376_v45, 0.0  ;;  %v10463_v45 = vld [vmem:[%s10116_s22 + $0x68] sm:$0xff]  }
  0x78   : > { %710 = vadd.xlane.f32.xlu0 %v709_v34  ;;  %743 = vadd.xlane.f32.xlu1 %v742_v60  ;;  %v10436_v34 = vld [vmem:[%s10116_s22 + $0x40] sm:$0xff]   ;;  %v718_v60 = vsel %vm672_vm0, %v14373_v51, 0.0  ;;  %s10866_s22 = scalar_lea.vmem %s14334_s2, %s10110_s19 }
  0x79   : > { %v14374_v29 = vunpack.c.l.bf16 %v10436_v34 }
  0x7c   : > { %713 = vadd.xlane.f32.xlu0 %v712_v50  ;;  %749 = vadd.xlane.f32.xlu1 %v748_v54  ;;  %v721_v54 = vsel %vm672_vm0, %v14374_v29, 0.0  ;;  %v14375_v50 = vunpack.c.h.bf16 %v10436_v34 }
  0x7e   : > { %v724_v35 = vsel %vm672_vm0, %v14375_v50, 0.0 }
  0x80   : > { %716 = vadd.xlane.f32.xlu0 %v715_v9  ;;  %v14377_v9 = vunpack.c.l.bf16 %v10375_v44 }
  0x82   : > { %v727_v51 = vsel %vm672_vm0, %v14377_v9, 0.0  ;;  %v14387_v9 = vunpack.c.l.bf16 %v10463_v45 }
  0x84   : > { %719 = vadd.xlane.f32.xlu0 %v718_v60  ;;  %v14378_v60 = vunpack.c.l.bf16 %v10386_v20 }
  0x86   : > { %v733_v29 = vsel %vm672_vm0, %v14378_v60, 0.0 }
  0x88   : > { %722 = vadd.xlane.f32.xlu0 %v721_v54  ;;  %v14380_v54 = vunpack.c.l.bf16 %v10400_v24 }
  0x8a   : > { %v739_v50 = vsel %vm672_vm0, %v14380_v54, 0.0  ;;  %v14388_v54 = vunpack.c.h.bf16 %v10463_v45 }
  0x8c   : > { %725 = vadd.xlane.f32.xlu0 %v724_v35  ;;  %v14384_v35 = vunpack.c.l.bf16 %v10411_v56 }
  0x90   : > { %728 = vadd.xlane.f32.xlu0 %v727_v51  ;;  %v745_v51 = vsel %vm672_vm0, %v14384_v35, 0.0 }
  0x94   : > { %734 = vadd.xlane.f32.xlu0 %v733_v29  ;;  %v751_v29 = vsel %vm672_vm0, %v14387_v9, 0.0 }
  0x98   : > { %740 = vadd.xlane.f32.xlu0 %v739_v50 }
  0x9c   : > { %746 = vadd.xlane.f32.xlu0 %v745_v51  ;;  %v754_v51 = vsel %vm672_vm0, %v14388_v54, 0.0 }
  0x9d   : > { %v765_v60 = vpop.xlane.xlu1 %764  ;;  %v759_v25 = vpop.xlane.xlu0 %758 }
  0x9e   : > { %v798_v46 = vmul.f32 0.03125, %v759_v25  ;;  %v800_v10 = vmul.f32 0.03125, %v765_v60 }
  0xa0   : > { %v10475_v50 = vsub.f32 %v8190_v3, %v798_v46  ;;  %752 = vadd.xlane.f32.xlu0 %v751_v29  ;;  %v10482_v9 = vsub.f32 %v8194_v2, %v800_v10 }
  0xa1   : > { %v768_v41 = vpop.xlane.xlu1 %767  ;;  %v762_v35 = vpop.xlane.xlu0 %761 }
  0xa2   : > { %v801_v62 = vmul.f32 0.03125, %v768_v41  ;;  %v799_v36 = vmul.f32 0.03125, %v762_v35  ;;  %v862_v25 = vmul.f32 %v10475_v50, %v10475_v50  ;;  %v864_v0 = vmul.f32 %v10482_v9, %v10482_v9 }
  0xa4   : > { %v10488_v3 = vsub.f32 %v8195_v4, %v801_v62  ;;  %v10492_v46 = vsub.f32 %v8191_v5, %v799_v36  ;;  %755 = vadd.xlane.f32.xlu0 %v754_v51  ;;  %v950_v54 = vsel %vm672_vm0, %v862_v25, 0.0 }
  0xa5   : > { %v1492_v60 = vpop.xlane.xlu1 %1491  ;;  %v1489_v29 = vpop.xlane.xlu0 %1488 }
  0xa6   : > { %v1584_v41 = vmul.f32 0.03125, %v1492_v60  ;;  %v1583_v35 = vmul.f32 0.03125, %v1489_v29  ;;  %v863_v2 = vmul.f32 %v10492_v46, %v10492_v46  ;;  %v865_v10 = vmul.f32 %v10488_v3, %v10488_v3 }
  0xa7   : > { %v956_v29 = vsel %vm672_vm0, %v864_v0, 0.0 }
  0xa8   : > { %v10503_v1 = vsub.f32 %v8198_v12, %v1583_v35  ;;  %951 = vadd.xlane.f32.xlu0 %v950_v54  ;;  %v953_v4 = vsel %vm672_vm0, %v863_v2, 0.0  ;;  %v10508_v62 = vsub.f32 %v8199_v11, %v1584_v41  ;;  %v959_v25 = vsel %vm672_vm0, %v865_v10, 0.0 }
  0xa9   : > { %v1498_v5 = vpop.xlane.xlu1 %1497  ;;  %v1495_v36 = vpop.xlane.xlu0 %1494  ;;  %954 = vadd.xlane.f32.xlu1 %v953_v4 }
  0xaa   : > { %v1585_v51 = vmul.f32 0.03125, %v1495_v36  ;;  %v1647_v60 = vmul.f32 %v10503_v1, %v10503_v1  ;;  %v1586_v35 = vmul.f32 0.03125, %v1498_v5  ;;  %v1648_v11 = vmul.f32 %v10508_v62, %v10508_v62 }
  0xac   : > { %957 = vadd.xlane.f32.xlu0 %v956_v29  ;;  %v10516_v2 = vsub.f32 %v8202_v17, %v1585_v51  ;;  %v1679_v6 = vsel %vm672_vm0, %v1647_v60, 0.0  ;;  %v10523_v0 = vsub.f32 %v8203_v16, %v1586_v35  ;;  %v1682_v4 = vsel %vm672_vm0, %v1648_v11, 0.0 }
  0xad   : > { %v1504_v12 = vpop.xlane.xlu1 %1503  ;;  %v1501_v54 = vpop.xlane.xlu0 %1500  ;;  %960 = vadd.xlane.f32.xlu1 %v959_v25 }
  0xae   : > { %v1649_v5 = vmul.f32 %v10516_v2, %v10516_v2  ;;  %v1587_v36 = vmul.f32 0.03125, %v1501_v54  ;;  %v1588_v25 = vmul.f32 0.03125, %v1504_v12  ;;  %v1650_v29 = vmul.f32 %v10523_v0, %v10523_v0 }
  0xb0   : > { %v1685_v60 = vsel %vm672_vm0, %v1649_v5, 0.0  ;;  %v10533_v13 = vsub.f32 %v8206_v22, %v1587_v36  ;;  %v1688_v11 = vsel %vm672_vm0, %v1650_v29, 0.0 }
  0xb1   : > { %v1510_v41 = vpop.xlane.xlu1 %1509  ;;  %v1507_v10 = vpop.xlane.xlu0 %1506  ;;  %1680 = vadd.xlane.f32.xlu1 %v1679_v6  ;;  %v10537_v6 = vsub.f32 %v8207_v21, %v1588_v25 }
  0xb2   : > { %v1589_v12 = vmul.f32 0.03125, %v1507_v10  ;;  %v1651_v5 = vmul.f32 %v10533_v13, %v10533_v13 }
  0xb3   : > { %v1652_v21 = vmul.f32 %v10537_v6, %v10537_v6 }
  0xb4   : > { %v10554_v10 = vsub.f32 %v8210_v27, %v1589_v12  ;;  %v1691_v25 = vsel %vm672_vm0, %v1651_v5, 0.0 }
  0xb5   : > { %v1516_v17 = vpop.xlane.xlu1 %1515  ;;  %v1513_v51 = vpop.xlane.xlu0 %1512  ;;  %1683 = vadd.xlane.f32.xlu1 %v1682_v4  ;;  %v1694_v27 = vsel %vm672_vm0, %v1652_v21, 0.0 }
  0xb6   : > { %v1591_v12 = vmul.f32 0.03125, %v1513_v51 }
  0xb9   : > { %v1522_v16 = vpop.xlane.xlu1 %1521  ;;  %v1519_v35 = vpop.xlane.xlu0 %1518  ;;  %1686 = vadd.xlane.f32.xlu1 %v1685_v60  ;;  %v1590_v60 = vmul.f32 0.03125, %v1510_v41 }
  0xba   : > { %v1593_v54 = vmul.f32 0.03125, %v1519_v35 }
  0xbc   : > { %v10542_v4 = vsub.f32 %v8218_v37, %v1593_v54  ;;  %v10566_v54 = vsub.f32 %v8211_v26, %v1590_v60  ;;  %v1653_v26 = vmul.f32 %v10554_v10, %v10554_v10 }
  0xbd   : > { %v10546_v22 = vpop.xlane.xlu1 %1527  ;;  %v1525_v36 = vpop.xlane.xlu0 %1524  ;;  %1689 = vadd.xlane.f32.xlu1 %v1688_v11 }
  0xbe   : > { %v1595_v57 = vmul.f32 0.03125, %v1525_v36  ;;  %v1657_v18 = vmul.f32 %v10542_v4, %v10542_v4  ;;  %v451_v36 = vld [vmem:[%s14336_s4 + $0x10] sm:$0xff] }
  0xc0   : > { %v10558_v37 = vsub.f32 %v8222_v42, %v1595_v57  ;;  %v1709_v29 = vsel %vm672_vm0, %v1657_v18, 0.0  ;;  %v452_v57 = vld [vmem:[%s14336_s4 + $0x18] sm:$0xff]  ;;  %v1592_v18 = vmul.f32 0.03125, %v1516_v17 }
  0xc1   : > { %1692 = vadd.xlane.f32.xlu1 %v1691_v25  ;;  %v10562_v41 = vpop.xlane.xlu1 %677  ;;  %1710 = vadd.xlane.f32.xlu0 %v1709_v29  ;;  %v675_v35 = vpop.xlane.xlu0 %674  ;;  %v1654_v25 = vmul.f32 %v10566_v54, %v10566_v54  ;;  %v450_v29 = vld [vmem:[%s14336_s4 + $0x8] sm:$0xff] }
  0xc2   : > { %v770_v11 = vmul.f32 0.03125, %v675_v35  ;;  %v1659_v42 = vmul.f32 %v10558_v37, %v10558_v37  ;;  %9610 = vmatprep.subr.mxu1 %v452_v57  ;;  %8846 = vmatprep.subr.mxu0 %v452_v57  ;;  %v10595_v35 = vsub.f32 %v8214_v32, %v1591_v12  ;;  %v10608_v12 = vsub.f32 %v8215_v31, %v1592_v18 }
  0xc3   : > { %9614 = vmatpush3.msra.mxu1 %v452_v57  ;;  %8847 = vmatpush3.msra.mxu0 %v452_v57  ;;  %v1594_v57 = vmul.f32 0.03125, %v1522_v16  ;;  %v14542_v16 = vunpack.c.l.bf16 %v10240_v53  ;;  %v14544_v31 = vunpack.c.h.bf16 %v10196_v33  ;;  %v14545_v33 = vunpack.c.l.bf16 %v10251_v58 }
  0xc4   : > { %v10576_v5 = vsub.f32 %v8134_v47, %v770_v11  ;;  %v1715_v23 = vsel %vm672_vm0, %v1659_v42, 0.0  ;;  %9611 = vmatprep.subr.mxu1 %v451_v36  ;;  %8848 = vmatprep.subr.mxu0 %v451_v36  ;;  %v1697_v11 = vsel %vm672_vm0, %v1653_v26, 0.0  ;;  %v449_v42 = vld [vmem:[%s14336_s4] sm:$0xff]  ;;  %v1700_v26 = vsel %vm672_vm0, %v1654_v25, 0.0 }
  0xc5   : > { %1695 = vadd.xlane.f32.xlu1 %v1694_v27  ;;  %v10584_v60 = vpop.xlane.xlu1 %1533  ;;  %1716 = vadd.xlane.f32.xlu0 %v1715_v23  ;;  %v1531_v51 = vpop.xlane.xlu0 %1530  ;;  %v1655_v28 = vmul.f32 %v10595_v35, %v10595_v35  ;;  %v10622_v18 = vsub.f32 %v14544_v31, %v1594_v57 }
  0xc6   : > { %v1597_v21 = vmul.f32 0.03125, %v1531_v51  ;;  %v834_v47 = vmul.f32 %v10576_v5, %v10576_v5  ;;  %9615 = vmatpush3.msra.mxu1 %v451_v36  ;;  %8849 = vmatpush3.msra.mxu0 %v451_v36 }
  0xc7   : > { %9612 = vmatprep.subr.mxu1 %v450_v29  ;;  %8850 = vmatprep.subr.mxu0 %v450_v29  ;;  %v1658_v31 = vmul.f32 %v10622_v18, %v10622_v18 }
  0xc8   : > { %v10599_v17 = vsub.f32 %v8226_v52, %v1597_v21  ;;  %v866_v27 = vsel %vm672_vm0, %v834_v47, 0.0  ;;  %9616 = vmatpush3.msra.mxu1 %v450_v29  ;;  %8851 = vmatpush3.msra.mxu0 %v450_v29  ;;  %v1596_v47 = vmul.f32 0.03125, %v10546_v22  ;;  %v1703_v22 = vsel %vm672_vm0, %v1655_v28, 0.0 }
  0xc9   : > { %1698 = vadd.xlane.f32.xlu1 %v1697_v11  ;;  %v1540_v23 = vpop.xlane.xlu1 %1539  ;;  %867 = vadd.xlane.f32.xlu0 %v866_v27  ;;  %v1537_v32 = vpop.xlane.xlu0 %1536 }
  0xca   : > { %v1599_v52 = vmul.f32 0.03125, %v1537_v32  ;;  %v1661_v36 = vmul.f32 %v10599_v17, %v10599_v17  ;;  %9613 = vmatprep.subr.mxu1 %v449_v42  ;;  %8852 = vmatprep.subr.mxu0 %v449_v42  ;;  %v1656_v32 = vmul.f32 %v10608_v12, %v10608_v12 }
  0xcb   : > { %9617 = vmatpush3.msra.mxu1 %v449_v42  ;;  %8853 = vmatpush3.msra.mxu0 %v449_v42  ;;  %v10632_v42 = vld [vmem:[%s14336_s4 + $0x38] sm:$0xff] }
  0xcc   : > { %v10615_v51 = vsub.f32 %v14542_v16, %v1599_v52  ;;  %v1721_v21 = vsel %vm672_vm0, %v1661_v36, 0.0  ;;  %8902 = vmatprep.subr.mxu1 %v10632_v42  ;;  %v1706_v28 = vsel %vm672_vm0, %v1656_v32, 0.0  ;;  %v14550_v32 = vunpack.c.h.bf16 %v10218_v43 }
  0xcd   : > { %1701 = vadd.xlane.f32.xlu1 %v1700_v26  ;;  %v1546_v25 = vpop.xlane.xlu1 %1545  ;;  %1722 = vadd.xlane.f32.xlu0 %v1721_v21  ;;  %v1543_v29 = vpop.xlane.xlu0 %1542  ;;  %v14547_v26 = vunpack.c.h.bf16 %v10207_v38 }
  0xce   : > { %14543 = vst [vmem:[#allocation2_spill] sm:$0xff] %v10615_v51  ;;  %v1601_v11 = vmul.f32 0.03125, %v1543_v29  ;;  %v1663_v27 = vmul.f32 %v10615_v51, %v10615_v51  ;;  %v771_v29 = vmul.f32 0.03125, %v10562_v41 }
  0xcf   : > { %v10643_v36 = vsub.f32 %v14547_v26, %v1596_v47  ;;  %v1712_v26 = vsel %vm672_vm0, %v1658_v31, 0.0  ;;  %v1600_v31 = vmul.f32 0.03125, %v1540_v23 }
  0xd0   : > { %v10636_v57 = vsub.f32 %v14545_v33, %v1601_v11  ;;  %v1727_v52 = vsel %vm672_vm0, %v1663_v27, 0.0  ;;  %v14549_v33 = vunpack.c.l.bf16 %v10262_v63 }
  0xd1   : > { %14548 = vst [vmem:[#allocation4_spill] sm:$0xff] %v10643_v36  ;;  %1704 = vadd.xlane.f32.xlu1 %v1703_v22  ;;  %v1552_v16 = vpop.xlane.xlu1 %1551  ;;  %1728 = vadd.xlane.f32.xlu0 %v1727_v52  ;;  %v1549_v21 = vpop.xlane.xlu0 %1548  ;;  %v1660_v41 = vmul.f32 %v10643_v36, %v10643_v36 }
  0xd2   : > { %14546 = vst [vmem:[#allocation3_spill] sm:$0xff] %v10636_v57  ;;  %v1603_v11 = vmul.f32 0.03125, %v1549_v21  ;;  %v1665_v27 = vmul.f32 %v10636_v57, %v10636_v57  ;;  %v10661_v21 = vsub.f32 %v14550_v32, %v771_v29  ;;  %v1598_v57 = vmul.f32 0.03125, %v10584_v60 }
  0xd3   : > { %v1718_v43 = vsel %vm672_vm0, %v1660_v41, 0.0  ;;  %v14553_v29 = vunpack.c.h.bf16 %v10229_v48  ;;  %v1602_v48 = vmul.f32 0.03125, %v1546_v25  ;;  %v14558_v25 = vunpack.c.h.bf16 %v10251_v58 }
  0xd4   : > { %v10653_v38 = vsub.f32 %v14549_v33, %v1603_v11  ;;  %v1733_v47 = vsel %vm672_vm0, %v1665_v27, 0.0 }
  0xd5   : > { %1707 = vadd.xlane.f32.xlu1 %v1706_v28  ;;  %v681_v22 = vpop.xlane.xlu1 %680  ;;  %1734 = vadd.xlane.f32.xlu0 %v1733_v47  ;;  %v1555_v52 = vpop.xlane.xlu0 %1554  ;;  %v14551_v28 = vunpack.c.l.bf16 %v10276_v15  ;;  %v10674_v60 = vsub.f32 %v14553_v29, %v1598_v57 }
  0xd6   : > { %v1605_v51 = vmul.f32 0.03125, %v1555_v52  ;;  %v1667_v11 = vmul.f32 %v10653_v38, %v10653_v38 }
  0xd8   : > { %v10668_v27 = vsub.f32 %v14551_v28, %v1605_v51  ;;  %v1739_v33 = vsel %vm672_vm0, %v1667_v11, 0.0  ;;  %v835_v51 = vmul.f32 %v10661_v21, %v10661_v21  ;;  %v14554_v11 = vunpack.c.h.bf16 %v10276_v15 }
  0xd9   : > { %1713 = vadd.xlane.f32.xlu1 %v1712_v26  ;;  %v684_v47 = vpop.xlane.xlu1 %683  ;;  %1740 = vadd.xlane.f32.xlu0 %v1739_v33  ;;  %v1558_v36 = vpop.xlane.xlu0 %1557  ;;  %v14555_v28 = vunpack.c.h.bf16 %v10240_v53  ;;  %v1662_v15 = vmul.f32 %v10674_v60, %v10674_v60 }
  0xda   : > { %14552 = vst [vmem:[#allocation5_spill] sm:$0xff] %v10668_v27  ;;  %v1606_v52 = vmul.f32 0.03125, %v1558_v36  ;;  %v1669_v32 = vmul.f32 %v10668_v27, %v10668_v27  ;;  %v869_v29 = vsel %vm672_vm0, %v835_v51, 0.0 }
  0xdb   : > { %v10687_v41 = vsub.f32 %v14555_v28, %v1600_v31  ;;  %v10701_v31 = vsub.f32 %v14558_v25, %v1602_v48 }
  0xdc   : > { %v10682_v23 = vsub.f32 %v14554_v11, %v1606_v52  ;;  %v1745_v26 = vsel %vm672_vm0, %v1669_v32, 0.0  ;;  %v14556_v52 = vunpack.c.l.bf16 %v10298_v40 }
  0xdd   : > { %1719 = vadd.xlane.f32.xlu1 %v1718_v43  ;;  %v687_v57 = vpop.xlane.xlu1 %686  ;;  %1746 = vadd.xlane.f32.xlu0 %v1745_v26  ;;  %v1561_v36 = vpop.xlane.xlu0 %1560  ;;  %v1664_v11 = vmul.f32 %v10687_v41, %v10687_v41  ;;  %v1604_v26 = vmul.f32 0.03125, %v1552_v16  ;;  %v1666_v16 = vmul.f32 %v10701_v31, %v10701_v31 }
  0xde   : > { %v1607_v33 = vmul.f32 0.03125, %v1561_v36  ;;  %v1670_v27 = vmul.f32 %v10682_v23, %v10682_v23  ;;  %v1724_v36 = vsel %vm672_vm0, %v1662_v15, 0.0  ;;  %v14561_v15 = vunpack.c.h.bf16 %v10262_v63 }
  0xdf   : > { %v1736_v63 = vsel %vm672_vm0, %v1666_v16, 0.0 }
  0xe0   : > { %v10696_v32 = vsub.f32 %v14556_v52, %v1607_v33  ;;  %v1748_v53 = vsel %vm672_vm0, %v1670_v27, 0.0  ;;  %v14559_v27 = vunpack.c.h.bf16 %v10298_v40  ;;  %v10718_v25 = vsub.f32 %v14561_v15, %v1604_v26 }
  0xe1   : > { %870 = vadd.xlane.f32.xlu1 %v869_v29  ;;  %v690_v43 = vpop.xlane.xlu1 %689  ;;  %1749 = vadd.xlane.f32.xlu0 %v1748_v53  ;;  %v1564_v51 = vpop.xlane.xlu0 %1563  ;;  %v1730_v53 = vsel %vm672_vm0, %v1664_v11, 0.0  ;;  %v14564_v26 = vunpack.c.l.bf16 %v10273_v14 }
  0xe2   : > { %14557 = vst [vmem:[#allocation6_spill] sm:$0xff] %v10696_v32  ;;  %v1608_v28 = vmul.f32 0.03125, %v1564_v51  ;;  %v1671_v33 = vmul.f32 %v10696_v32, %v10696_v32  ;;  %v772_v51 = vmul.f32 0.03125, %v681_v22 }
  0xe4   : > { %v10710_v52 = vsub.f32 %v14559_v27, %v1608_v28  ;;  %v1751_v58 = vsel %vm672_vm0, %v1671_v33, 0.0  ;;  %v14562_v28 = vunpack.c.l.bf16 %v10320_v8  ;;  %v773_v27 = vmul.f32 0.03125, %v684_v47 }
  0xe5   : > { %1725 = vadd.xlane.f32.xlu1 %v1724_v36  ;;  %v693_v48 = vpop.xlane.xlu1 %692  ;;  %1752 = vadd.xlane.f32.xlu0 %v1751_v58  ;;  %v1567_v29 = vpop.xlane.xlu0 %1566  ;;  %v10730_v22 = vsub.f32 %v14564_v26, %v772_v51 }
  0xe6   : > { %14560 = vst [vmem:[#allocation7_spill] sm:$0xff] %v10710_v52  ;;  %v1609_v32 = vmul.f32 0.03125, %v1567_v29  ;;  %v1672_v40 = vmul.f32 %v10710_v52, %v10710_v52 }
  0xe8   : > { %v10724_v36 = vsub.f32 %v14562_v28, %v1609_v32  ;;  %v1754_v33 = vsel %vm672_vm0, %v1672_v40, 0.0  ;;  %v1668_v32 = vmul.f32 %v10718_v25, %v10718_v25  ;;  %v14565_v40 = vunpack.c.h.bf16 %v10320_v8 }
  0xe9   : > { %1731 = vadd.xlane.f32.xlu1 %v1730_v53  ;;  %v1570_v11 = vpop.xlane.xlu1 %1569  ;;  %1755 = vadd.xlane.f32.xlu0 %v1754_v33  ;;  %v696_v58 = vpop.xlane.xlu0 %695  ;;  %v14566_v28 = vunpack.c.h.bf16 %v10273_v14  ;;  %v774_v33 = vmul.f32 0.03125, %v687_v57  ;;  %v836_v8 = vmul.f32 %v10730_v22, %v10730_v22  ;;  %v14569_v57 = vunpack.c.l.bf16 %v10295_v39 }
  0xea   : > { %14563 = vst [vmem:[#allocation8_spill] sm:$0xff] %v10724_v36  ;;  %v1610_v29 = vmul.f32 0.03125, %v1570_v11  ;;  %v1673_v15 = vmul.f32 %v10724_v36, %v10724_v36  ;;  %v1742_v36 = vsel %vm672_vm0, %v1668_v32, 0.0 }
  0xeb   : > { %v10743_v16 = vsub.f32 %v14566_v28, %v773_v27  ;;  %v10757_v27 = vsub.f32 %v14569_v57, %v774_v33  ;;  %v14571_v57 = vunpack.c.h.bf16 %v10295_v39  ;;  %v14573_v39 = vunpack.c.l.bf16 %v10317_v7 }
  0xec   : > { %v10738_v47 = vsub.f32 %v14565_v40, %v1610_v29  ;;  %v1757_v53 = vsel %vm672_vm0, %v1673_v15, 0.0  ;;  %v14567_v29 = vunpack.c.l.bf16 %v10342_v49 }
  0xed   : > { %1737 = vadd.xlane.f32.xlu1 %v1736_v63  ;;  %v699_v51 = vpop.xlane.xlu1 %698  ;;  %1758 = vadd.xlane.f32.xlu0 %v1757_v53  ;;  %v1573_v11 = vpop.xlane.xlu0 %1572  ;;  %v837_v40 = vmul.f32 %v10743_v16, %v10743_v16  ;;  %v775_v53 = vmul.f32 0.03125, %v690_v43  ;;  %v838_v43 = vmul.f32 %v10757_v27, %v10757_v27 }
  0xee   : > { %v1611_v26 = vmul.f32 0.03125, %v1573_v11  ;;  %v1674_v52 = vmul.f32 %v10738_v47, %v10738_v47  ;;  %v872_v11 = vsel %vm672_vm0, %v836_v8, 0.0 }
  0xef   : > { %v10774_v8 = vsub.f32 %v14571_v57, %v775_v53  ;;  %v14575_v57 = vunpack.c.h.bf16 %v10361_v55 }
  0xf0   : > { %v10752_v15 = vsub.f32 %v14567_v29, %v1611_v26  ;;  %v1760_v14 = vsel %vm672_vm0, %v1674_v52, 0.0  ;;  %v14570_v52 = vunpack.c.h.bf16 %v10342_v49 }
  0xf1   : > { %1743 = vadd.xlane.f32.xlu1 %v1742_v36  ;;  %v1576_v63 = vpop.xlane.xlu1 %1575  ;;  %1761 = vadd.xlane.f32.xlu0 %v1760_v14  ;;  %v702_v32 = vpop.xlane.xlu0 %701  ;;  %v875_v14 = vsel %vm672_vm0, %v837_v40, 0.0 }
  0xf2   : > { %14568 = vst [vmem:[#allocation9_spill] sm:$0xff] %v10752_v15  ;;  %v1612_v28 = vmul.f32 0.03125, %v1576_v63  ;;  %v1675_v26 = vmul.f32 %v10752_v15, %v10752_v15  ;;  %v776_v63 = vmul.f32 0.03125, %v693_v48 }
  0xf4   : > { %v10766_v29 = vsub.f32 %v14570_v52, %v1612_v28  ;;  %v1763_v33 = vsel %vm672_vm0, %v1675_v26, 0.0  ;;  %v14572_v28 = vunpack.c.l.bf16 %v10361_v55  ;;  %v878_v52 = vsel %vm672_vm0, %v838_v43, 0.0 }
  0xf5   : > { %873 = vadd.xlane.f32.xlu1 %v872_v11  ;;  %1764 = vadd.xlane.f32.xlu0 %v1763_v33  ;;  %v1579_v36 = vpop.xlane.xlu0 %1578  ;;  %v10786_v53 = vsub.f32 %v14573_v39, %v776_v63 }
  0xf6   : > { %v1613_v15 = vmul.f32 0.03125, %v1579_v36  ;;  %v1676_v49 = vmul.f32 %v10766_v29, %v10766_v29  ;;  %v839_v36 = vmul.f32 %v10774_v8, %v10774_v8 }
  0xf7   : > { %14574 = vst [vmem:[#allocation10_spill] sm:$0xff] %v10786_v53 }
  0xf8   : > { %v10780_v26 = vsub.f32 %v14572_v28, %v1613_v15  ;;  %v1766_v11 = vsel %vm672_vm0, %v1676_v49, 0.0  ;;  %v777_v15 = vmul.f32 0.03125, %v696_v58  ;;  %v778_v28 = vmul.f32 0.03125, %v699_v51 }
  0xf9   : > { %876 = vadd.xlane.f32.xlu1 %v875_v14  ;;  %1767 = vadd.xlane.f32.xlu0 %v1766_v11  ;;  %v1582_v40 = vpop.xlane.xlu0 %1581  ;;  %v881_v63 = vsel %vm672_vm0, %v839_v36, 0.0  ;;  %v14577_v58 = vunpack.c.h.bf16 %v10317_v7 }
  0xfa   : > { %v1614_v48 = vmul.f32 0.03125, %v1582_v40  ;;  %v1677_v33 = vmul.f32 %v10780_v26, %v10780_v26  ;;  %v840_v40 = vmul.f32 %v10786_v53, %v10786_v53  ;;  %v14579_v53 = vunpack.c.l.bf16 %v10397_v30 }
  0xfb   : > { %v10804_v39 = vsub.f32 %v14577_v58, %v777_v15 }
  0xfc   : > { %v10794_v49 = vsub.f32 %v14575_v57, %v1614_v48  ;;  %v1769_v14 = vsel %vm672_vm0, %v1677_v33, 0.0  ;;  %v14578_v48 = vunpack.c.l.bf16 %v10339_v59  ;;  %v884_v36 = vsel %vm672_vm0, %v840_v40, 0.0  ;;  %v705_v57 = vpop.xlane.xlu1 %704 }
  0xfd   : > { %879 = vadd.xlane.f32.xlu1 %v878_v52  ;;  %1770 = vadd.xlane.f32.xlu0 %v1769_v14  ;;  %v708_v43 = vpop.xlane.xlu0 %707  ;;  %v779_v14 = vmul.f32 0.03125, %v702_v32  ;;  %v841_v7 = vmul.f32 %v10804_v39, %v10804_v39  ;;  %v14581_v40 = vunpack.c.h.bf16 %v10339_v59 }
  0xfe   : > { %14576 = vst [vmem:[#allocation11_spill] sm:$0xff] %v10794_v49  ;;  %v1678_v11 = vmul.f32 %v10794_v49, %v10794_v49  ;;  %v10809_v51 = vsub.f32 %v14578_v48, %v778_v28  ;;  %v14582_v48 = vunpack.c.l.bf16 %v10364_v19 }
  0xff   : > { %v10824_v58 = vsub.f32 %v14581_v40, %v779_v14  ;;  %v887_v32 = vsel %vm672_vm0, %v841_v7, 0.0 }
 0x100   : > { %v1772_v55 = vsel %vm672_vm0, %v1678_v11, 0.0  ;;  %v780_v11 = vmul.f32 0.03125, %v705_v57  ;;  %v842_v28 = vmul.f32 %v10809_v51, %v10809_v51  ;;  %v781_v57 = vmul.f32 0.03125, %v708_v43 }
 0x101   : > { %882 = vadd.xlane.f32.xlu1 %v881_v63  ;;  %1773 = vadd.xlane.f32.xlu0 %v1772_v55  ;;  %v711_v52 = vpop.xlane.xlu0 %710  ;;  %v843_v14 = vmul.f32 %v10824_v58, %v10824_v58 }
 0x102   : > { %v782_v33 = vmul.f32 0.03125, %v711_v52 }
 0x104   : > { %v10814_v49 = vsub.f32 %v14579_v53, %v782_v33  ;;  %v10830_v33 = vsub.f32 %v14582_v48, %v780_v11  ;;  %v14585_v11 = vunpack.c.h.bf16 %v10364_v19  ;;  %v14586_v48 = vunpack.c.h.bf16 %v10397_v30 }
 0x105   : > { %885 = vadd.xlane.f32.xlu1 %v884_v36  ;;  %v714_v15 = vpop.xlane.xlu0 %713  ;;  %v890_v36 = vsel %vm672_vm0, %v842_v28, 0.0  ;;  %v893_v28 = vsel %vm672_vm0, %v843_v14, 0.0  ;;  %v14588_v19 = vunpack.c.l.bf16 %v10436_v34  ;;  %v14590_v30 = vunpack.c.h.bf16 %v10422_v61 }
 0x106   : > { %14580 = vst [vmem:[#allocation12_spill] sm:$0xff] %v10814_v49  ;;  %v846_v63 = vmul.f32 %v10814_v49, %v10814_v49  ;;  %v14583_v49 = vunpack.c.l.bf16 %v10422_v61  ;;  %v844_v40 = vmul.f32 %v10830_v33, %v10830_v33  ;;  %v783_v43 = vmul.f32 0.03125, %v714_v15  ;;  %v10881_v61 = vld [vmem:[%s10866_s22] sm:$0xff]  }
 0x108   : > { %v902_v53 = vsel %vm672_vm0, %v846_v63, 0.0 }
 0x109   : > { %888 = vadd.xlane.f32.xlu1 %v887_v32  ;;  %903 = vadd.xlane.f32.xlu0 %v902_v53  ;;  %v717_v55 = vpop.xlane.xlu0 %716  ;;  %v10845_v32 = vsub.f32 %v14585_v11, %v781_v57 }
 0x10a   : > { %v784_v52 = vmul.f32 0.03125, %v717_v55 }
 0x10b   : > { %v845_v15 = vmul.f32 %v10845_v32, %v10845_v32 }
 0x10c   : > { %v10835_v59 = vsub.f32 %v14583_v49, %v784_v52  ;;  %v896_v52 = vsel %vm672_vm0, %v844_v40, 0.0 }
 0x10d   : > { %891 = vadd.xlane.f32.xlu1 %v890_v36  ;;  %v720_v7 = vpop.xlane.xlu0 %719  ;;  %v10852_v36 = vsub.f32 %v14586_v48, %v783_v43  ;;  %v899_v40 = vsel %vm672_vm0, %v845_v15, 0.0 }
 0x10e   : > { %14584 = vst [vmem:[#allocation13_spill] sm:$0xff] %v10835_v59  ;;  %v848_v63 = vmul.f32 %v10835_v59, %v10835_v59  ;;  %v785_v59 = vmul.f32 0.03125, %v720_v7 }
 0x10f   : > { %14587 = vst [vmem:[#allocation14_spill] sm:$0xff] %v10852_v36 }
 0x110   : > { %v908_v49 = vsel %vm672_vm0, %v848_v63, 0.0  ;;  %v10870_v7 = vsub.f32 %v14590_v30, %v785_v59  ;;  %v14594_v59 = vunpack.c.l.bf16 %v10375_v44 }
 0x111   : > { %894 = vadd.xlane.f32.xlu1 %v893_v28  ;;  %909 = vadd.xlane.f32.xlu0 %v908_v49  ;;  %v723_v53 = vpop.xlane.xlu0 %722  ;;  %v732_v28 = vpop.xlane.xlu1 %731  ;;  %v847_v49 = vmul.f32 %v10852_v36, %v10852_v36 }
 0x112   : > { %v786_v55 = vmul.f32 0.03125, %v723_v53  ;;  %14591 = vst [vmem:[#allocation16_spill] sm:$0xff] %v10870_v7 }
 0x113   : > { %v905_v15 = vsel %vm672_vm0, %v847_v49, 0.0  ;;  %v14598_v49 = vunpack.c.l.bf16 %v10386_v20 }
 0x114   : > { %v10856_v57 = vsub.f32 %v14588_v19, %v786_v55  ;;  %v14592_v55 = vunpack.c.h.bf16 %v10436_v34  ;;  %v789_v19 = vmul.f32 0.03125, %v732_v28 }
 0x115   : > { %897 = vadd.xlane.f32.xlu1 %v896_v52  ;;  %v726_v14 = vpop.xlane.xlu0 %725 }
 0x116   : > { %14589 = vst [vmem:[#allocation15_spill] sm:$0xff] %v10856_v57  ;;  %v787_v63 = vmul.f32 0.03125, %v726_v14  ;;  %v850_v11 = vmul.f32 %v10856_v57, %v10856_v57  ;;  %v14611_v57 = vunpack.c.l.bf16 %v10463_v45 }
 0x118   : > { %v914_v43 = vsel %vm672_vm0, %v850_v11, 0.0  ;;  %v10878_v52 = vsub.f32 %v14592_v55, %v787_v63  ;;  %v849_v11 = vmul.f32 %v10870_v7, %v10870_v7  ;;  %v14596_v63 = vunpack.c.h.bf16 %v10375_v44 }
 0x119   : > { %900 = vadd.xlane.f32.xlu1 %v899_v40  ;;  %915 = vadd.xlane.f32.xlu0 %v914_v43  ;;  %v729_v53 = vpop.xlane.xlu0 %728  ;;  %v14403_v40 = vunpack.c.l.bf16 %v10881_v61 }
 0x11a   : > { %14593 = vst [vmem:[#allocation17_spill] sm:$0xff] %v10878_v52  ;;  %v788_v48 = vmul.f32 0.03125, %v729_v53  ;;  %v10893_v28 = vsub.f32 %v14596_v63, %v789_v19  ;;  %v851_v53 = vmul.f32 %v10878_v52, %v10878_v52 }
 0x11b   : > { %v2300_v19 = vsel %vm672_vm0, %v14403_v40, 0.0 }
 0x11c   : > { %v10885_v14 = vsub.f32 %v14594_v59, %v788_v48  ;;  %14597 = vst [vmem:[#allocation19_spill] sm:$0xff] %v10893_v28  ;;  %v911_v48 = vsel %vm672_vm0, %v849_v11, 0.0  ;;  %v917_v63 = vsel %vm672_vm0, %v851_v53, 0.0  ;;  %v853_v52 = vmul.f32 %v10893_v28, %v10893_v28  ;;  %v10914_v11 = vld [vmem:[%s10866_s22 + $0x8] sm:$0xff]  }
 0x11d   : > { %906 = vadd.xlane.f32.xlu1 %v905_v15  ;;  %v735_v30 = vpop.xlane.xlu0 %734  ;;  %v738_v15 = vpop.xlane.xlu1 %737  ;;  %14600 = vst [vmem:[#allocation21_spill] sm:$0xff] %v10914_v11 }
 0x11e   : > { %14595 = vst [vmem:[#allocation18_spill] sm:$0xff] %v10885_v14  ;;  %v790_v34 = vmul.f32 0.03125, %v735_v30  ;;  %v852_v43 = vmul.f32 %v10885_v14, %v10885_v14  ;;  %v923_v53 = vsel %vm672_vm0, %v853_v52, 0.0  ;;  %v14603_v14 = vunpack.c.h.bf16 %v10386_v20 }
 0x120   : > { %v10901_v55 = vsub.f32 %v14598_v49, %v790_v34  ;;  %v920_v59 = vsel %vm672_vm0, %v852_v43, 0.0  ;;  %v791_v43 = vmul.f32 0.03125, %v738_v15 }
 0x121   : > { %912 = vadd.xlane.f32.xlu1 %v911_v48  ;;  %921 = vadd.xlane.f32.xlu0 %v920_v59  ;;  %v741_v44 = vpop.xlane.xlu0 %740  ;;  %v14407_v48 = vunpack.c.h.bf16 %v10881_v61  ;;  %v14601_v59 = vunpack.c.l.bf16 %v10400_v24  ;;  %v744_v28 = vpop.xlane.xlu1 %743 }
 0x122   : > { %14599 = vst [vmem:[#allocation20_spill] sm:$0xff] %v10901_v55  ;;  %v792_v30 = vmul.f32 0.03125, %v741_v44  ;;  %v854_v34 = vmul.f32 %v10901_v55, %v10901_v55  ;;  %v14408_v55 = vunpack.c.l.bf16 %v10914_v11  ;;  %v10926_v15 = vsub.f32 %v14603_v14, %v791_v43 }
 0x123   : > { %v793_v20 = vmul.f32 0.03125, %v744_v28  ;;  %v14608_v28 = vunpack.c.h.bf16 %v10400_v24 }
 0x124   : > { %v10919_v44 = vsub.f32 %v14601_v59, %v792_v30  ;;  %v926_v40 = vsel %vm672_vm0, %v854_v34, 0.0  ;;  %14604 = vst [vmem:[#allocation23_spill] sm:$0xff] %v10926_v15  ;;  %v2303_v30 = vsel %vm672_vm0, %v14407_v48, 0.0  ;;  %v2306_v52 = vsel %vm672_vm0, %v14408_v55, 0.0  ;;  %v10937_v59 = vld [vmem:[%s10866_s22 + $0x10] sm:$0xff]  }
 0x125   : > { %918 = vadd.xlane.f32.xlu1 %v917_v63  ;;  %2301 = vadd.xlane.f32.xlu0 %v2300_v19  ;;  %v747_v49 = vpop.xlane.xlu0 %746  ;;  %14605 = vst [vmem:[#allocation24_spill] sm:$0xff] %v10937_v59  ;;  %v750_v14 = vpop.xlane.xlu1 %749  ;;  %v10950_v7 = vsub.f32 %v14608_v28, %v793_v20  ;;  %v10962_v20 = vld [vmem:[%s10866_s22 + $0x18] sm:$0xff]  }
 0x126   : > { %14602 = vst [vmem:[#allocation22_spill] sm:$0xff] %v10919_v44  ;;  %v794_v63 = vmul.f32 0.03125, %v747_v49  ;;  %v856_v34 = vmul.f32 %v10919_v44, %v10919_v44  ;;  %v14415_v49 = vunpack.c.h.bf16 %v10914_v11  ;;  %v14416_v44 = vunpack.c.l.bf16 %v10937_v59  ;;  %14610 = vst [vmem:[#allocation27_spill] sm:$0xff] %v10962_v20 }
 0x127   : > { %14609 = vst [vmem:[#allocation26_spill] sm:$0xff] %v10950_v7  ;;  %v857_v28 = vmul.f32 %v10950_v7, %v10950_v7 }
 0x128   : > { %v932_v55 = vsel %vm672_vm0, %v856_v34, 0.0  ;;  %v2312_v34 = vsel %vm672_vm0, %v14416_v44, 0.0  ;;  %v1090_v44 = vlaneseq }
 0x129   : > { %924 = vadd.xlane.f32.xlu1 %v923_v53  ;;  %927 = vadd.xlane.f32.xlu0 %v926_v40  ;;  %v753_v19 = vpop.xlane.xlu0 %752  ;;  %v855_v40 = vmul.f32 %v10926_v15, %v10926_v15  ;;  %v14606_v53 = vunpack.c.l.bf16 %v10411_v56 }
 0x12a   : > { %v796_v36 = vmul.f32 0.03125, %v753_v19 }
 0x12b   : > { %v10944_v48 = vsub.f32 %v14606_v53, %v794_v63  ;;  %v929_v15 = vsel %vm672_vm0, %v855_v40, 0.0 }
 0x12d   : > { %2304 = vadd.xlane.f32.xlu1 %v2303_v30  ;;  %2307 = vadd.xlane.f32.xlu0 %v2306_v52  ;;  %v756_v43 = vpop.xlane.xlu0 %755  ;;  %14607 = vst [vmem:[#allocation25_spill] sm:$0xff] %v10944_v48  ;;  %v2309_v52 = vsel %vm672_vm0, %v14415_v49, 0.0  ;;  %v858_v24 = vmul.f32 %v10944_v48, %v10944_v48  ;;  %v10970_v48 = vsub.f32 %v14611_v57, %v796_v36  ;;  %v935_v49 = vsel %vm672_vm0, %v857_v28, 0.0 }
 0x12e   : > { %v14615_v36 = vunpack.c.h.bf16 %v10937_v59 }
 0x12f   : > { %14612 = vst [vmem:[#allocation28_spill] sm:$0xff] %v10970_v48 }
 0x130   : > { %v2315_v57 = vsel %vm672_vm0, %v14615_v36, 0.0  ;;  %v11006_v36 = vld [vmem:[%s14342_s10] sm:$0xff] }
 0x131   : > { %930 = vadd.xlane.f32.xlu1 %v929_v15  ;;  %933 = vadd.xlane.f32.xlu0 %v932_v55  ;;  %v952_v30 = vpop.xlane.xlu0 %951  ;;  %v795_v15 = vmul.f32 0.03125, %v750_v14 }
 0x132   : > { %v990_v63 = vmul.f32 0.03125, %v952_v30  ;;  %v955_v53 = vpop.xlane.xlu1 %954 }
 0x133   : > { %v991_v40 = vmul.f32 0.03125, %v955_v53 }
 0x134   : > { %v1022_v55 = vadd.f32 1e-05, %v990_v63  ;;  %v938_v63 = vsel %vm672_vm0, %v858_v24, 0.0  ;;  %v797_v24 = vmul.f32 0.03125, %v756_v43  ;;  %v14420_v43 = vunpack.c.h.bf16 %v10962_v20 }
 0x135   : > { %v1023_v11 = vadd.f32 1e-05, %v991_v40  ;;  %2310 = vadd.xlane.f32.xlu1 %v2309_v52  ;;  %2313 = vadd.xlane.f32.xlu0 %v2312_v34  ;;  %v958_v19 = vpop.xlane.xlu0 %957  ;;  %v14613_v52 = vunpack.c.h.bf16 %v10411_v56 }
 0x136   : > { %9627 = vrsqrt.f32 %v1022_v55  ;;  %v992_v53 = vmul.f32 0.03125, %v958_v19  ;;  %v961_v14 = vpop.xlane.xlu1 %960  ;;  %v14616_v55 = vunpack.c.l.bf16 %v10962_v20  ;;  %v10984_v19 = vshrl.u32 %v1090_v44, 7 }
 0x137   : > { %9629 = vrsqrt.f32 %v1023_v11  ;;  %v993_v7 = vmul.f32 0.03125, %v961_v14  ;;  %v10975_v34 = vsub.f32 %v14613_v52, %v795_v15  ;;  %v860_v15 = vmul.f32 %v10970_v48, %v10970_v48 }
 0x138   : > { %v1024_v40 = vadd.f32 1e-05, %v992_v53  ;;  %v2318_v11 = vsel %vm672_vm0, %v14616_v55, 0.0  ;;  %14617 = vst [vmem:[#allocation30_spill] sm:$0xff] %v10984_v19  ;;  %v14618_v14 = vunpack.c.h.bf16 %v10463_v45  ;;  %v11009_v55 = vld [vmem:[%s10866_s22 + $0x28] sm:$0xff]   ;;  %v11045_v20 = vsub.s32 2, %v10984_v19 }
 0x139   : > { %14614 = vst [vmem:[#allocation29_spill] sm:$0xff] %v10975_v34  ;;  %v1025_v30 = vadd.f32 1e-05, %v993_v7  ;;  %936 = vadd.xlane.f32.xlu1 %v935_v49  ;;  %939 = vadd.xlane.f32.xlu0 %v938_v63  ;;  %v10989_v49 = vld [vmem:[%s10866_s22 + $0x20] sm:$0xff]   ;;  %v859_v28 = vmul.f32 %v10975_v34, %v10975_v34  ;;  %v14622_v34 = vunpack.c.l.bf16 %v11009_v55 }
 0x13a   : > { %9631 = vrsqrt.f32 %v1024_v40  ;;  %v1681_v56 = vpop.xlane.xlu1 %1680  ;;  %v10996_v44 = vsub.f32 %v14618_v14, %v797_v24  ;;  %v14422_v52 = vunpack.c.l.bf16 %v10989_v49  ;;  %v11001_v40 = vsub.s32 0, %v10984_v19  ;;  %14623 = vst [vmem:[#allocation34_spill] sm:$0xff] %v11045_v20 }
 0x13b   : > { %9633 = vrsqrt.f32 %v1025_v30  ;;  %v1775_v7 = vmul.f32 0.03125, %v1681_v56  ;;  %v944_v30 = vsel %vm672_vm0, %v860_v15, 0.0  ;;  %v941_v45 = vsel %vm672_vm0, %v859_v28, 0.0  ;;  %v11019_v15 = vld [vmem:[%s10866_s22 + $0x30] sm:$0xff]  }
 0x13c   : > { %14619 = vst [vmem:[#allocation31_spill] sm:$0xff] %v10996_v44  ;;  %14620 = vst [vmem:[#allocation32_spill] sm:$0xff] %v11001_v40  ;;  %v2321_v56 = vsel %vm672_vm0, %v14420_v43, 0.0  ;;  %v861_v28 = vmul.f32 %v10996_v44, %v10996_v44  ;;  %v14624_v59 = vunpack.c.h.bf16 %v10989_v49 }
 0x13d   : > { %v1807_v53 = vadd.f32 1e-05, %v1775_v7  ;;  %2316 = vadd.xlane.f32.xlu1 %v2315_v57  ;;  %2319 = vadd.xlane.f32.xlu0 %v2318_v11  ;;  %v11013_v11 = vsub.s32 1, %v10984_v19 }
 0x13e   : > { %v1684_v63 = vpop.xlane.xlu1 %1683 }
 0x13f   : > { %9635 = vrsqrt.f32 %v1807_v53  ;;  %v1776_v57 = vmul.f32 0.03125, %v1684_v63  ;;  %14621 = vst [vmem:[#allocation33_spill] sm:$0xff] %v11013_v11  ;;  %v2324_v53 = vsel %vm672_vm0, %v14422_v52, 0.0  ;;  %v11029_v63 = vrot.slane %v11006_v36, %v11001_v40 }
 0x140   : > { %v11034_v48 = vrot.slane %v11006_v36, %v11013_v11  ;;  %v14433_v52 = vunpack.c.l.bf16 %v11019_v15 }
 0x141   : > { %v1808_v24 = vadd.f32 1e-05, %v1776_v57  ;;  %942 = vadd.xlane.f32.xlu1 %v941_v45  ;;  %945 = vadd.xlane.f32.xlu0 %v944_v30 }
 0x142   : > { %v1687_v7 = vpop.xlane.xlu1 %1686 }
 0x143   : > { %v9628_v30 = vpop.eup %9627  ;;  %9637 = vrsqrt.f32 %v1808_v24  ;;  %v1777_v57 = vmul.f32 0.03125, %v1687_v7  ;;  %v2330_v24 = vsel %vm672_vm0, %v14622_v34, 0.0  ;;  %v947_v7 = vsel %vm672_vm0, %v861_v28, 0.0 }
 0x144   : > { %v9630_v45 = vpop.eup %9629  ;;  %v1086_v43 = vmul.f32 %v9628_v30, %v10475_v50  ;;  %v2336_v34 = vsel %vm672_vm0, %v14433_v52, 0.0  ;;  %v2327_v52 = vsel %vm672_vm0, %v14624_v59, 0.0  ;;  %v455_v59 = vld [vmem:[%s14336_s4 + $0x30] sm:$0xff] }
 0x145   : > { %v1809_v14 = vadd.f32 1e-05, %v1777_v57  ;;  %2322 = vadd.xlane.f32.xlu1 %v2321_v56  ;;  %2325 = vadd.xlane.f32.xlu0 %v2324_v53  ;;  %v1087_v44 = vmul.f32 %v9630_v45, %v10492_v46  ;;  %v11049_v46 = vld [vmem:[%s10866_s22 + $0x38] sm:$0xff]  }
 0x146   : > { %v1690_v40 = vpop.xlane.xlu1 %1689  ;;  %v1122_v50 = vmul.f32 %v11029_v63, %v1086_v43 }
 0x147   : > { %v9632_v11 = vpop.eup %9631  ;;  %9639 = vrsqrt.f32 %v1809_v14  ;;  %v1778_v56 = vmul.f32 0.03125, %v1690_v40  ;;  %v1123_v53 = vmul.f32 %v11029_v63, %v1087_v44  ;;  %v14434_v44 = vsub.s32 3, %v10984_v19 }
 0x148   : > { %v9634_v57 = vpop.eup %9633  ;;  %v1158_v45 = vadd.f32 %v11034_v48, %v1122_v50  ;;  %v1088_v43 = vmul.f32 %v9632_v11, %v10482_v9  ;;  %v14435_v11 = vunpack.c.l.bf16 %v11049_v46 }
 0x149   : > { %v1810_v28 = vadd.f32 1e-05, %v1778_v56  ;;  %2331 = vadd.xlane.f32.xlu0 %v2330_v24  ;;  %948 = vadd.xlane.f32.xlu1 %v947_v7  ;;  %v1159_v30 = vadd.f32 %v11034_v48, %v1123_v53  ;;  %v1089_v40 = vmul.f32 %v9634_v57, %v10488_v3  ;;  %v11068_v7 = vrot.slane %v11006_v36, %v11045_v20  ;;  %v11076_v53 = vld [vmem:[%s10866_s22 + $0x40] sm:$0xff]  }
 0x14a   : > { %v1693_v14 = vpop.xlane.xlu1 %1692  ;;  %8896 = vmatprep.mubr.msk.f32.mxu1 %vm672_vm0, %v1158_v45  ;;  %v1711_v50 = vpop.xlane.xlu0 %1710  ;;  %v1124_v9 = vmul.f32 %v11029_v63, %v1088_v43 }
 0x14b   : > { %9641 = vrsqrt.f32 %v1810_v28  ;;  %v1779_v3 = vmul.f32 0.03125, %v1693_v14  ;;  %8897 = vmatmul.mubr.msk.f32.vlgmr.msra.gmra.mxu1 %vm672_vm0, %v1159_v30  ;;  %v1125_v56 = vmul.f32 %v11029_v63, %v1089_v40  ;;  %v11085_v40 = vrot.slane %v11006_v36, %v14434_v44 }
 0x14c   : > { %v9636_v57 = vpop.eup %9635  ;;  %v1160_v45 = vadd.f32 %v11034_v48, %v1124_v9  ;;  %8903 = vmatpush3.msra.mxu1 %v10632_v42  ;;  %v2342_v42 = vsel %vm672_vm0, %v14435_v11, 0.0  ;;  %v14441_v9 = vunpack.c.h.bf16 %v11019_v15  ;;  %v1785_v20 = vmul.f32 0.03125, %v1711_v50 }
 0x14d   : > { %v1811_v43 = vadd.f32 1e-05, %v1779_v3  ;;  %2337 = vadd.xlane.f32.xlu0 %v2336_v34  ;;  %2328 = vadd.xlane.f32.xlu1 %v2327_v52  ;;  %v1161_v28 = vadd.f32 %v11034_v48, %v1125_v56  ;;  %v1871_v30 = vmul.f32 %v9636_v57, %v10503_v1  ;;  %v14625_v52 = vunpack.c.h.bf16 %v11009_v55  ;;  %v454_v3 = vld [vmem:[%s14336_s4 + $0x28] sm:$0xff] }
 0x14e   : > { %v1696_v14 = vpop.xlane.xlu1 %1695  ;;  %8899 = vmatprep.mubr.msk.f32.mxu1 %vm672_vm0, %v1160_v45  ;;  %v1717_v24 = vpop.xlane.xlu0 %1716  ;;  %8904 = vmatprep.subr.mxu1 %v455_v59  ;;  %v14436_v1 = vunpack.c.l.bf16 %v11076_v53  ;;  %v11102_v57 = vld [vmem:[%s10866_s22 + $0x48] sm:$0xff]   ;;  %v14629_v50 = vunpack.c.h.bf16 %v11049_v46 }
 0x14f   : > { %v2333_v34 = vsel %vm672_vm0, %v14625_v52, 0.0  ;;  %9643 = vrsqrt.f32 %v1811_v43  ;;  %v1780_v36 = vmul.f32 0.03125, %v1696_v14  ;;  %8900 = vmatmul.mubr.msk.f32.gmra.mxu1 %vm672_vm0, %v1161_v28  ;;  %v1907_v56 = vmul.f32 %v11068_v7, %v1871_v30  ;;  %v453_v28 = vld [vmem:[%s14336_s4 + $0x20] sm:$0xff] }
 0x150   : > { %v9638_v45 = vpop.eup %9637  ;;  %8905 = vmatpush3.msra.mxu1 %v455_v59  ;;  %v2348_v30 = vsel %vm672_vm0, %v14436_v1, 0.0  ;;  %v11125_v59 = vld [vmem:[%s10866_s22 + $0x58] sm:$0xff]  }
 0x151   : > { %v1872_v52 = vmul.f32 %v9638_v45, %v10508_v62  ;;  %v1812_v44 = vadd.f32 1e-05, %v1780_v36  ;;  %2343 = vadd.xlane.f32.xlu0 %v2342_v42  ;;  %2334 = vadd.xlane.f32.xlu1 %v2333_v34  ;;  %v1943_v43 = vadd.f32 %v11085_v40, %v1907_v56  ;;  %v2339_v62 = vsel %vm672_vm0, %v14441_v9, 0.0  ;;  %v11120_v45 = vld [vmem:[%s10866_s22 + $0x50] sm:$0xff]   ;;  %14627 = vst [vmem:[#allocation36_spill] sm:$0xff] %v11125_v59 }
 0x152   : > { %v1699_v14 = vpop.xlane.xlu1 %1698  ;;  %v868_v11 = vpop.xlane.xlu0 %867  ;;  %8906 = vmatprep.subr.mxu1 %v454_v3  ;;  %14626 = vst [vmem:[#allocation35_spill] sm:$0xff] %v11120_v45 }
 0x153   : > { %v1908_v34 = vmul.f32 %v11068_v7, %v1872_v52  ;;  %9645 = vrsqrt.f32 %v1812_v44  ;;  %v1781_v36 = vmul.f32 0.03125, %v1699_v14  ;;  %v962_v56 = vmul.f32 0.03125, %v868_v11  ;;  %8910 = vmatprep.mubr.msk.f32.mxu1 %vm672_vm0, %v1943_v43  ;;  %8907 = vmatpush3.msra.mxu1 %v454_v3 }
 0x154   : > { %v9640_v1 = vpop.eup %9639  ;;  %8908 = vmatprep.subr.mxu1 %v453_v28  ;;  %v14628_v3 = vunpack.c.l.bf16 %v11102_v57  ;;  %v2345_v14 = vsel %vm672_vm0, %v14629_v50, 0.0 }
 0x155   : > { %v1813_v19 = vadd.f32 1e-05, %v1781_v36  ;;  %v994_v9 = vadd.f32 1e-05, %v962_v56  ;;  %2349 = vadd.xlane.f32.xlu0 %v2348_v30  ;;  %2340 = vadd.xlane.f32.xlu1 %v2339_v62  ;;  %v1944_v42 = vadd.f32 %v11085_v40, %v1908_v34  ;;  %v1873_v52 = vmul.f32 %v9640_v1, %v10516_v2 }
 0x156   : > { %v1702_v44 = vpop.xlane.xlu1 %1701  ;;  %8909 = vmatpush3.msra.mxu1 %v453_v28  ;;  %v1723_v11 = vpop.xlane.xlu0 %1722  ;;  %v2354_v43 = vsel %vm672_vm0, %v14628_v3, 0.0  ;;  %v14442_v30 = vunpack.c.l.bf16 %v11120_v45  ;;  %v1817_v28 = vadd.f32 1e-05, %v1785_v20  ;;  %v14443_v36 = vunpack.c.l.bf16 %v11125_v59 }
 0x157   : > { %9647 = vrsqrt.f32 %v1813_v19  ;;  %v1782_v34 = vmul.f32 0.03125, %v1702_v44  ;;  %8911 = vmatmul.mubr.msk.f32.vlgmr.msra.gmra.mxu1 %vm672_vm0, %v1944_v42  ;;  %v1909_v2 = vmul.f32 %v11068_v7, %v1873_v52  ;;  %v1787_v56 = vmul.f32 0.03125, %v1717_v24 }
 0x158   : > { %v9642_v1 = vpop.eup %9641  ;;  %9649 = vrsqrt.f32 %v994_v9  ;;  %v2360_v42 = vsel %vm672_vm0, %v14442_v30, 0.0  ;;  %v14630_v20 = vunpack.c.h.bf16 %v11076_v53  ;;  %v14444_v24 = vunpack.c.h.bf16 %v11102_v57 }
 0x159   : > { %v1814_v3 = vadd.f32 1e-05, %v1782_v34  ;;  %2355 = vadd.xlane.f32.xlu0 %v2354_v43  ;;  %2346 = vadd.xlane.f32.xlu1 %v2345_v14  ;;  %v1945_v50 = vadd.f32 %v11085_v40, %v1909_v2  ;;  %v1874_v62 = vmul.f32 %v9642_v1, %v10523_v0  ;;  %v11150_v0 = vld [vmem:[%s10866_s22 + $0x60] sm:$0xff]   ;;  %v2366_v34 = vsel %vm672_vm0, %v14443_v36, 0.0 }
 0x15a   : > { %v1705_v19 = vpop.xlane.xlu1 %1704  ;;  %v1729_v44 = vpop.xlane.xlu0 %1728  ;;  %v2351_v9 = vsel %vm672_vm0, %v14630_v20, 0.0  ;;  %v1819_v2 = vadd.f32 1e-05, %v1787_v56  ;;  %v14445_v36 = vunpack.c.l.bf16 %v11150_v0  ;;  %v11172_v56 = vld [vmem:[%s10866_s22 + $0x70] sm:$0xff]  }
 0x15b   : > { %9651 = vrsqrt.f32 %v1814_v3  ;;  %v1783_v52 = vmul.f32 0.03125, %v1705_v19  ;;  %8913 = vmatprep.mubr.msk.f32.mxu1 %vm672_vm0, %v1945_v50  ;;  %v1910_v43 = vmul.f32 %v11068_v7, %v1874_v62  ;;  %v11158_v19 = vld [vmem:[%s10866_s22 + $0x68] sm:$0xff]   ;;  %v1789_v50 = vmul.f32 0.03125, %v1723_v11 }
 0x15c   : > { %v9644_v14 = vpop.eup %9643  ;;  %9653 = vrsqrt.f32 %v1817_v28  ;;  %v2357_v28 = vsel %vm672_vm0, %v14444_v24, 0.0  ;;  %v14631_v11 = vunpack.c.h.bf16 %v11120_v45 }
 0x15d   : > { %v1815_v1 = vadd.f32 1e-05, %v1783_v52  ;;  %2361 = vadd.xlane.f32.xlu0 %v2360_v42  ;;  %2352 = vadd.xlane.f32.xlu1 %v2351_v9  ;;  %v1946_v20 = vadd.f32 %v11085_v40, %v1910_v43  ;;  %v1875_v3 = vmul.f32 %v9644_v14, %v10533_v13 }
 0x15e   : > { %v1708_v62 = vpop.xlane.xlu1 %1707  ;;  %v1735_v30 = vpop.xlane.xlu0 %1734 }
 0x15f   : > { %9655 = vrsqrt.f32 %v1815_v1  ;;  %v1784_v42 = vmul.f32 0.03125, %v1708_v62  ;;  %8914 = vmatmul.mubr.msk.f32.gmra.mxu1 %vm672_vm0, %v1946_v20  ;;  %v1911_v13 = vmul.f32 %v11068_v7, %v1875_v3  ;;  %v1821_v1 = vadd.f32 1e-05, %v1789_v50 }
 0x160   : > { %v9646_v9 = vpop.eup %9645  ;;  %9657 = vrsqrt.f32 %v1819_v2  ;;  %v2372_v3 = vsel %vm672_vm0, %v14445_v36, 0.0  ;;  %v2363_v2 = vsel %vm672_vm0, %v14631_v11, 0.0  ;;  %v14632_v50 = vunpack.c.l.bf16 %v11158_v19 }
 0x161   : > { %v1816_v43 = vadd.f32 1e-05, %v1784_v42  ;;  %2367 = vadd.xlane.f32.xlu0 %v2366_v34  ;;  %2358 = vadd.xlane.f32.xlu1 %v2357_v28  ;;  %v1947_v14 = vadd.f32 %v11085_v40, %v1911_v13  ;;  %v1876_v24 = vmul.f32 %v9646_v9, %v10537_v6  ;;  %v14633_v11 = vunpack.c.h.bf16 %v11125_v59 }
 0x162   : > { %v1714_v62 = vpop.xlane.xlu1 %1713  ;;  %v1741_v20 = vpop.xlane.xlu0 %1740  ;;  %v2378_v42 = vsel %vm672_vm0, %v14632_v50, 0.0 }
 0x163   : > { %9659 = vrsqrt.f32 %v1816_v43  ;;  %v1786_v34 = vmul.f32 0.03125, %v1714_v62  ;;  %8916 = vmatprep.mubr.msk.f32.mxu1 %vm672_vm0, %v1947_v14  ;;  %v1912_v6 = vmul.f32 %v11068_v7, %v1876_v24  ;;  %v2369_v43 = vsel %vm672_vm0, %v14633_v11, 0.0  ;;  %v11192_v24 = vld [vmem:[%s10866_s22 + $0x78] sm:$0xff]  }
 0x164   : > { %v9648_v28 = vpop.eup %9647  ;;  %9661 = vrsqrt.f32 %v1821_v1  ;;  %v1791_v62 = vmul.f32 0.03125, %v1729_v44 }
 0x165   : > { %v9650_v9 = vpop.eup %9649  ;;  %v1818_v36 = vadd.f32 1e-05, %v1786_v34  ;;  %2373 = vadd.xlane.f32.xlu0 %v2372_v3  ;;  %2364 = vadd.xlane.f32.xlu1 %v2363_v2  ;;  %v1948_v52 = vadd.f32 %v11085_v40, %v1912_v6  ;;  %v1877_v14 = vmul.f32 %v9648_v28, %v10554_v10  ;;  %v14634_v10 = vunpack.c.l.bf16 %v11172_v56 }
 0x166   : > { %v1720_v45 = vpop.xlane.xlu1 %1719  ;;  %v1747_v50 = vpop.xlane.xlu0 %1746  ;;  %v1058_v13 = vmul.f32 %v9650_v9, %v10576_v5  ;;  %v1793_v9 = vmul.f32 0.03125, %v1735_v30 }
 0x167   : > { %9663 = vrsqrt.f32 %v1818_v36  ;;  %v1788_v3 = vmul.f32 0.03125, %v1720_v45  ;;  %8917 = vmatmul.mubr.msk.f32.gmra.mxu1 %vm672_vm0, %v1948_v52  ;;  %v1913_v2 = vmul.f32 %v11068_v7, %v1877_v14  ;;  %v2384_v1 = vsel %vm672_vm0, %v14634_v10, 0.0 }
 0x168   : > { %v9652_v6 = vpop.eup %9651  ;;  %v1094_v11 = vmul.f32 %v11029_v63, %v1058_v13  ;;  %v8315_v36 = vunpack.c.h.bf16 %v11158_v19  ;;  %v1823_v52 = vadd.f32 1e-05, %v1791_v62  ;;  %v14635_v10 = vunpack.c.h.bf16 %v11150_v0 }
 0x169   : > { %v9654_v28 = vpop.eup %9653  ;;  %v1820_v59 = vadd.f32 1e-05, %v1788_v3  ;;  %2379 = vadd.xlane.f32.xlu0 %v2378_v42  ;;  %2370 = vadd.xlane.f32.xlu1 %v2369_v43  ;;  %v1949_v5 = vadd.f32 %v11085_v40, %v1913_v2  ;;  %v1878_v45 = vmul.f32 %v9652_v6, %v10566_v54  ;;  %v14636_v54 = vunpack.c.l.bf16 %v11192_v24 }
 0x16a   : > { %v871_v14 = vpop.xlane.xlu1 %870  ;;  %v1750_v13 = vpop.xlane.xlu0 %1749  ;;  %v1130_v34 = vadd.f32 %v11034_v48, %v1094_v11  ;;  %v2375_v44 = vsel %vm672_vm0, %v14635_v10, 0.0  ;;  %v1881_v62 = vmul.f32 %v9654_v28, %v10542_v4 }
 0x16b   : > { %9665 = vrsqrt.f32 %v1820_v59  ;;  %v963_v3 = vmul.f32 0.03125, %v871_v14  ;;  %8919 = vmatprep.mubr.msk.f32.mxu1 %vm672_vm0, %v1949_v5  ;;  %v1914_v42 = vmul.f32 %v11068_v7, %v1878_v45  ;;  %v2390_v30 = vsel %vm672_vm0, %v14636_v54, 0.0 }
 0x16c   : > { %v9656_v43 = vpop.eup %9655  ;;  %8854 = vmatprep.mubr.msk.f32.mxu0 %vm672_vm0, %v1130_v34  ;;  %v2381_v59 = vsel %vm672_vm0, %v8315_v36, 0.0  ;;  %9667 = vrsqrt.f32 %v1823_v52  ;;  %v1825_v34 = vadd.f32 1e-05, %v1793_v9  ;;  %v1795_v45 = vmul.f32 0.03125, %v1741_v20 }
 0x16d   : > { %v995_v2 = vadd.f32 1e-05, %v963_v3  ;;  %2385 = vadd.xlane.f32.xlu0 %v2384_v1  ;;  %2376 = vadd.xlane.f32.xlu1 %v2375_v44  ;;  %v1950_v6 = vadd.f32 %v11085_v40, %v1914_v42  ;;  %v1879_v11 = vmul.f32 %v9656_v43, %v10595_v35  ;;  %v9658_v5 = vpop.eup %9657  ;;  %v8319_v54 = vunpack.c.h.bf16 %v11172_v56 }
 0x16e   : > { %v1726_v14 = vpop.xlane.xlu1 %1725  ;;  %v1753_v10 = vpop.xlane.xlu0 %1752  ;;  %v1917_v28 = vmul.f32 %v11068_v7, %v1881_v62  ;;  %v8323_v3 = vunpack.c.h.bf16 %v11192_v24  ;;  %v1883_v9 = vmul.f32 %v9658_v5, %v10558_v37  ;;  %v1827_v42 = vadd.f32 1e-05, %v1795_v45 }
 0x16f   : > { %9669 = vrsqrt.f32 %v995_v2  ;;  %v1790_v4 = vmul.f32 0.03125, %v1726_v14  ;;  %8920 = vmatmul.mubr.msk.f32.gmra.mxu1 %vm672_vm0, %v1950_v6  ;;  %v1915_v1 = vmul.f32 %v11068_v7, %v1879_v11  ;;  %v1797_v43 = vmul.f32 0.03125, %v1747_v50 }
 0x170   : > { %v9660_v44 = vpop.eup %9659  ;;  %9671 = vrsqrt.f32 %v1825_v34  ;;  %v2387_v62 = vsel %vm672_vm0, %v8319_v54, 0.0  ;;  %v1953_v37 = vadd.f32 %v11085_v40, %v1917_v28  ;;  %v2393_v50 = vsel %vm672_vm0, %v8323_v3, 0.0 }
 0x171   : > { %v1822_v35 = vadd.f32 1e-05, %v1790_v4  ;;  %2391 = vadd.xlane.f32.xlu0 %v2390_v30  ;;  %2382 = vadd.xlane.f32.xlu1 %v2381_v59  ;;  %v1951_v20 = vadd.f32 %v11085_v40, %v1915_v1  ;;  %v1880_v52 = vmul.f32 %v9660_v44, %v10608_v12  ;;  %v9662_v11 = vpop.eup %9661  ;;  %v1798_v12 = vmul.f32 0.03125, %v1750_v13 }
 0x172   : > { %v1732_v2 = vpop.xlane.xlu1 %1731  ;;  %v1756_v6 = vpop.xlane.xlu0 %1755  ;;  %v1919_v4 = vmul.f32 %v11068_v7, %v1883_v9  ;;  %v1829_v1 = vadd.f32 1e-05, %v1797_v43  ;;  %v1799_v44 = vmul.f32 0.03125, %v1753_v10  ;;  %v1885_v13 = vmul.f32 %v9662_v11, %v10599_v17 }
 0x173   : > { %9673 = vrsqrt.f32 %v1822_v35  ;;  %v1792_v14 = vmul.f32 0.03125, %v1732_v2  ;;  %8922 = vmatprep.mubr.msk.f32.mxu1 %vm672_vm0, %v1951_v20  ;;  %v1916_v30 = vmul.f32 %v11068_v7, %v1880_v52 }
 0x174   : > { %v9664_v59 = vpop.eup %9663  ;;  %9675 = vrsqrt.f32 %v1827_v42  ;;  %v1955_v10 = vadd.f32 %v11085_v40, %v1919_v4  ;;  %v14637_v42 = vld [vmem:[#allocation4_spill] sm:$0xff]  ;;  %v1831_v17 = vadd.f32 1e-05, %v1799_v44 }
 0x175   : > { %v1824_v5 = vadd.f32 1e-05, %v1792_v14  ;;  %2388 = vadd.xlane.f32.xlu1 %v2387_v62  ;;  %v1952_v34 = vadd.f32 %v11085_v40, %v1916_v30  ;;  %v1882_v45 = vmul.f32 %v9664_v59, %v10622_v18  ;;  %v1830_v62 = vadd.f32 1e-05, %v1798_v12 }
 0x176   : > { %v1738_v35 = vpop.xlane.xlu1 %1737  ;;  %v1759_v20 = vpop.xlane.xlu0 %1758  ;;  %v1800_v14 = vmul.f32 0.03125, %v1756_v6 }
 0x177   : > { %9677 = vrsqrt.f32 %v1824_v5  ;;  %v1794_v28 = vmul.f32 0.03125, %v1738_v35  ;;  %8923 = vmatmul.mubr.msk.f32.gmra.mxu1 %vm672_vm0, %v1952_v34  ;;  %v1918_v52 = vmul.f32 %v11068_v7, %v1882_v45  ;;  %v1801_v11 = vmul.f32 0.03125, %v1759_v20 }
 0x178   : > { %v9666_v2 = vpop.eup %9665  ;;  %8925 = vmatprep.mubr.msk.f32.mxu1 %vm672_vm0, %v1953_v37  ;;  %9679 = vrsqrt.f32 %v1829_v1  ;;  %v1921_v5 = vmul.f32 %v11068_v7, %v1885_v13 }
 0x179   : > { %v1826_v18 = vadd.f32 1e-05, %v1794_v28  ;;  %2394 = vadd.xlane.f32.xlu1 %v2393_v50  ;;  %v1954_v9 = vadd.f32 %v11085_v40, %v1918_v52  ;;  %v1884_v43 = vmul.f32 %v9666_v2, %v14637_v42  ;;  %v9668_v34 = vpop.eup %9667  ;;  %v1832_v50 = vadd.f32 1e-05, %v1800_v14  ;;  %v14638_v52 = vld [vmem:[#allocation2_spill] sm:$0xff] }
 0x17a   : > { %v1744_v30 = vpop.xlane.xlu1 %1743  ;;  %v1762_v59 = vpop.xlane.xlu0 %1761  ;;  %v1833_v35 = vadd.f32 1e-05, %v1801_v11  ;;  %v1957_v28 = vadd.f32 %v11085_v40, %v1921_v5  ;;  %v1887_v2 = vmul.f32 %v9668_v34, %v14638_v52  ;;  %v14639_v34 = vld [vmem:[#allocation3_spill] sm:$0xff] }
 0x17b   : > { %9681 = vrsqrt.f32 %v1826_v18  ;;  %v1796_v6 = vmul.f32 0.03125, %v1744_v30  ;;  %8926 = vmatmul.mubr.msk.f32.gmra.mxu1 %vm672_vm0, %v1954_v9  ;;  %v1920_v12 = vmul.f32 %v11068_v7, %v1884_v43  ;;  %v1802_v45 = vmul.f32 0.03125, %v1762_v59 }
 0x17c   : > { %v9670_v37 = vpop.eup %9669  ;;  %9683 = vrsqrt.f32 %v1830_v62  ;;  %8928 = vmatprep.mubr.msk.f32.mxu1 %vm672_vm0, %v1955_v10  ;;  %v1923_v5 = vmul.f32 %v11068_v7, %v1887_v2 }
 0x17d   : > { %v1828_v4 = vadd.f32 1e-05, %v1796_v6  ;;  %v1956_v1 = vadd.f32 %v11085_v40, %v1920_v12  ;;  %v1059_v44 = vmul.f32 %v9670_v37, %v10661_v21  ;;  %9685 = vrsqrt.f32 %v1831_v17  ;;  %v9672_v18 = vpop.eup %9671 }
 0x17e   : > { %v874_v20 = vpop.xlane.xlu1 %873  ;;  %v1765_v13 = vpop.xlane.xlu0 %1764  ;;  %v1834_v42 = vadd.f32 1e-05, %v1802_v45  ;;  %v1889_v6 = vmul.f32 %v9672_v18, %v14639_v34 }
 0x17f   : > { %9687 = vrsqrt.f32 %v1828_v4  ;;  %v964_v62 = vmul.f32 0.03125, %v874_v20  ;;  %v1803_v14 = vmul.f32 0.03125, %v1765_v13  ;;  %8929 = vmatmul.mubr.msk.f32.gmra.mxu1 %vm672_vm0, %v1956_v1  ;;  %v1095_v9 = vmul.f32 %v11029_v63, %v1059_v44 }
 0x180   : > { %v9674_v10 = vpop.eup %9673  ;;  %9689 = vrsqrt.f32 %v1832_v50  ;;  %8931 = vmatprep.mubr.msk.f32.mxu1 %vm672_vm0, %v1957_v28  ;;  %v1959_v28 = vadd.f32 %v11085_v40, %v1923_v5  ;;  %v1925_v52 = vmul.f32 %v11068_v7, %v1889_v6  ;;  %v14640_v5 = vld [vmem:[#allocation5_spill] sm:$0xff] }
 0x181   : > { %v996_v21 = vadd.f32 1e-05, %v964_v62  ;;  %v1131_v43 = vadd.f32 %v11034_v48, %v1095_v9  ;;  %v1886_v17 = vmul.f32 %v9674_v10, %v10674_v60  ;;  %9691 = vrsqrt.f32 %v1833_v35  ;;  %v9676_v12 = vpop.eup %9675 }
 0x182   : > { %v1835_v11 = vadd.f32 1e-05, %v1803_v14  ;;  %v877_v30 = vpop.xlane.xlu1 %876  ;;  %v1768_v59 = vpop.xlane.xlu0 %1767  ;;  %v1891_v2 = vmul.f32 %v9676_v12, %v10653_v38 }
 0x183   : > { %9693 = vrsqrt.f32 %v996_v21  ;;  %v965_v37 = vmul.f32 0.03125, %v877_v30  ;;  %v1804_v50 = vmul.f32 0.03125, %v1768_v59  ;;  %8855 = vmatmul.mubr.msk.f32.vlgmr.msra.gmra.mxu0 %vm672_vm0, %v1131_v43  ;;  %v1922_v45 = vmul.f32 %v11068_v7, %v1886_v17 }
 0x184   : > { %v9678_v4 = vpop.eup %9677  ;;  %9695 = vrsqrt.f32 %v1834_v42  ;;  %v1961_v30 = vadd.f32 %v11085_v40, %v1925_v52  ;;  %v1927_v59 = vmul.f32 %v11068_v7, %v1891_v2  ;;  %v14641_v52 = vld [vmem:[#allocation6_spill] sm:$0xff] }
 0x185   : > { %v997_v1 = vadd.f32 1e-05, %v965_v37  ;;  %v1836_v60 = vadd.f32 1e-05, %v1804_v50  ;;  %v1958_v44 = vadd.f32 %v11085_v40, %v1922_v45  ;;  %v1888_v35 = vmul.f32 %v9678_v4, %v10687_v41  ;;  %v9680_v18 = vpop.eup %9679 }
 0x186   : > { %9697 = vrsqrt.f32 %v1835_v11  ;;  %v880_v20 = vpop.xlane.xlu1 %879  ;;  %v1771_v13 = vpop.xlane.xlu0 %1770  ;;  %v1893_v34 = vmul.f32 %v9680_v18, %v14640_v5 }
 0x187   : > { %9699 = vrsqrt.f32 %v997_v1  ;;  %v966_v62 = vmul.f32 0.03125, %v880_v20  ;;  %v1805_v14 = vmul.f32 0.03125, %v1771_v13  ;;  %8932 = vmatmul.mubr.msk.f32.gmra.mxu1 %vm672_vm0, %v1958_v44  ;;  %v1924_v9 = vmul.f32 %v11068_v7, %v1888_v35 }
 0x188   : > { %v9682_v10 = vpop.eup %9681  ;;  %9701 = vrsqrt.f32 %v1836_v60  ;;  %8934 = vmatprep.mubr.msk.f32.mxu1 %vm672_vm0, %v1959_v28  ;;  %v1963_v13 = vadd.f32 %v11085_v40, %v1927_v59  ;;  %v1929_v28 = vmul.f32 %v11068_v7, %v1893_v34 }
 0x189   : > { %v9684_v41 = vpop.eup %9683  ;;  %v998_v42 = vadd.f32 1e-05, %v966_v62  ;;  %v1837_v21 = vadd.f32 1e-05, %v1805_v14  ;;  %v1960_v43 = vadd.f32 %v11085_v40, %v1924_v9  ;;  %v1890_v17 = vmul.f32 %v9682_v10, %v10701_v31  ;;  %v14642_v9 = vld [vmem:[#allocation7_spill] sm:$0xff] }
 0x18a   : > { %v883_v38 = vpop.xlane.xlu1 %882  ;;  %v1774_v11 = vpop.xlane.xlu0 %1773  ;;  %v1894_v31 = vmul.f32 %v9684_v41, %v10682_v23 }
 0x18b   : > { %v9686_v6 = vpop.eup %9685  ;;  %9703 = vrsqrt.f32 %v998_v42  ;;  %v967_v12 = vmul.f32 0.03125, %v883_v38  ;;  %v1806_v37 = vmul.f32 0.03125, %v1774_v11  ;;  %8935 = vmatmul.mubr.msk.f32.gmra.mxu1 %vm672_vm0, %v1960_v43  ;;  %v1926_v50 = vmul.f32 %v11068_v7, %v1890_v17 }
 0x18c   : > { %v9688_v45 = vpop.eup %9687  ;;  %9705 = vrsqrt.f32 %v1837_v21  ;;  %8937 = vmatprep.mubr.msk.f32.mxu1 %vm672_vm0, %v1961_v30  ;;  %v1895_v2 = vmul.f32 %v9686_v6, %v14641_v52  ;;  %v1930_v43 = vmul.f32 %v11068_v7, %v1894_v31  ;;  %v1965_v38 = vadd.f32 %v11085_v40, %v1929_v28  ;;  %v14643_v30 = vld [vmem:[#allocation8_spill] sm:$0xff] }
 0x18d   : > { %v9690_v4 = vpop.eup %9689  ;;  %v999_v1 = vadd.f32 1e-05, %v967_v12  ;;  %v1838_v60 = vadd.f32 1e-05, %v1806_v37  ;;  %v1962_v44 = vadd.f32 %v11085_v40, %v1926_v50  ;;  %v1892_v35 = vmul.f32 %v9688_v45, %v10718_v25 }
 0x18e   : > { %v886_v20 = vpop.xlane.xlu1 %885  ;;  %v9692_v18 = vpop.eup %9691  ;;  %v1896_v25 = vmul.f32 %v9690_v4, %v14642_v9  ;;  %v1931_v11 = vmul.f32 %v11068_v7, %v1895_v2 }
 0x18f   : > { %9707 = vrsqrt.f32 %v999_v1  ;;  %v968_v62 = vmul.f32 0.03125, %v886_v20  ;;  %8938 = vmatmul.mubr.msk.f32.gmra.mxu1 %vm672_vm0, %v1962_v44  ;;  %v1928_v23 = vmul.f32 %v11068_v7, %v1892_v35  ;;  %v1897_v59 = vmul.f32 %v9692_v18, %v14643_v30 }
 0x190   : > { %v9694_v14 = vpop.eup %9693  ;;  %9709 = vrsqrt.f32 %v1838_v60  ;;  %8940 = vmatprep.mubr.msk.f32.mxu1 %vm672_vm0, %v1963_v13  ;;  %v1966_v1 = vadd.f32 %v11085_v40, %v1930_v43  ;;  %v1967_v35 = vadd.f32 %v11085_v40, %v1931_v11  ;;  %v14644_v13 = vld [vmem:[#allocation9_spill] sm:$0xff] }
 0x191   : > { %v9696_v10 = vpop.eup %9695  ;;  %v1000_v41 = vadd.f32 1e-05, %v968_v62  ;;  %v1964_v42 = vadd.f32 %v11085_v40, %v1928_v23  ;;  %v1060_v21 = vmul.f32 %v9694_v14, %v10730_v22  ;;  %v1932_v22 = vmul.f32 %v11068_v7, %v1896_v25 }
 0x192   : > { %v889_v17 = vpop.xlane.xlu1 %888  ;;  %v1898_v37 = vmul.f32 %v9696_v10, %v10738_v47  ;;  %v904_v31 = vpop.xlane.xlu0 %903  ;;  %v1933_v20 = vmul.f32 %v11068_v7, %v1897_v59 }
 0x193   : > { %v9698_v5 = vpop.eup %9697  ;;  %9711 = vrsqrt.f32 %v1000_v41  ;;  %v969_v34 = vmul.f32 0.03125, %v889_v17  ;;  %8941 = vmatmul.mubr.msk.f32.gmra.mxu1 %vm672_vm0, %v1964_v42  ;;  %v1096_v6 = vmul.f32 %v11029_v63, %v1060_v21  ;;  %v974_v18 = vmul.f32 0.03125, %v904_v31 }
 0x194   : > { %v9700_v12 = vpop.eup %9699  ;;  %8943 = vmatprep.mubr.msk.f32.mxu1 %vm672_vm0, %v1965_v38  ;;  %v1899_v28 = vmul.f32 %v9698_v5, %v14644_v13  ;;  %v1934_v62 = vmul.f32 %v11068_v7, %v1898_v37  ;;  %v1969_v42 = vadd.f32 %v11085_v40, %v1933_v20  ;;  %v14646_v13 = vld [vmem:[#allocation10_spill] sm:$0xff] }
 0x195   : > { %v9702_v50 = vpop.eup %9701  ;;  %v1001_v45 = vadd.f32 1e-05, %v969_v34  ;;  %v1132_v4 = vadd.f32 %v11034_v48, %v1096_v6  ;;  %v1061_v60 = vmul.f32 %v9700_v12, %v10743_v16  ;;  %v1968_v16 = vadd.f32 %v11085_v40, %v1932_v22 }
 0x196   : > { %v892_v44 = vpop.xlane.xlu1 %891  ;;  %v1900_v10 = vmul.f32 %v9702_v50, %v10766_v29  ;;  %v1935_v21 = vmul.f32 %v11068_v7, %v1899_v28  ;;  %v1970_v29 = vadd.f32 %v11085_v40, %v1934_v62 }
 0x197   : > { %9713 = vrsqrt.f32 %v1001_v45  ;;  %v970_v52 = vmul.f32 0.03125, %v892_v44  ;;  %8857 = vmatprep.mubr.msk.f32.mxu0 %vm672_vm0, %v1132_v4  ;;  %8944 = vmatmul.mubr.msk.f32.gmra.mxu1 %vm672_vm0, %v1966_v1  ;;  %v1097_v47 = vmul.f32 %v11029_v63, %v1061_v60  ;;  %v14645_v45 = vld [vmem:[#allocation11_spill] sm:$0xff] }
 0x198   : > { %v9704_v2 = vpop.eup %9703  ;;  %8946 = vmatprep.mubr.msk.f32.mxu1 %vm672_vm0, %v1967_v35  ;;  %v1936_v6 = vmul.f32 %v11068_v7, %v1900_v10  ;;  %v1971_v37 = vadd.f32 %v11085_v40, %v1935_v21 }
 0x199   : > { %v9706_v23 = vpop.eup %9705  ;;  %v1002_v14 = vadd.f32 1e-05, %v970_v52  ;;  %v1133_v9 = vadd.f32 %v11034_v48, %v1097_v47  ;;  %v1062_v25 = vmul.f32 %v9704_v2, %v10757_v27  ;;  %v1006_v27 = vadd.f32 1e-05, %v974_v18 }
 0x19a   : > { %v895_v41 = vpop.xlane.xlu1 %894  ;;  %v1901_v43 = vmul.f32 %v9706_v23, %v10780_v26  ;;  %v910_v38 = vpop.xlane.xlu0 %909  ;;  %v1972_v20 = vadd.f32 %v11085_v40, %v1936_v6 }
 0x19b   : > { %9715 = vrsqrt.f32 %v1002_v14  ;;  %v971_v17 = vmul.f32 0.03125, %v895_v41  ;;  %8858 = vmatmul.mubr.msk.f32.gmra.mxu0 %vm672_vm0, %v1133_v9  ;;  %8947 = vmatmul.mubr.msk.f32.gmra.mxu1 %vm672_vm0, %v1968_v16  ;;  %v1098_v11 = vmul.f32 %v11029_v63, %v1062_v25  ;;  %v976_v12 = vmul.f32 0.03125, %v910_v38 }
 0x19c   : > { %v9708_v30 = vpop.eup %9707  ;;  %8949 = vmatprep.mubr.msk.f32.mxu1 %vm672_vm0, %v1969_v42  ;;  %v1937_v50 = vmul.f32 %v11068_v7, %v1901_v43 }
 0x19d   : > { %v9710_v59 = vpop.eup %9709  ;;  %v1003_v5 = vadd.f32 1e-05, %v971_v17  ;;  %v1134_v34 = vadd.f32 %v11034_v48, %v1098_v11  ;;  %v1063_v26 = vmul.f32 %v9708_v30, %v10774_v8  ;;  %v1008_v52 = vadd.f32 1e-05, %v976_v12 }
 0x19e   : > { %v898_v22 = vpop.xlane.xlu1 %897  ;;  %v1902_v31 = vmul.f32 %v9710_v59, %v14645_v45  ;;  %v1973_v18 = vadd.f32 %v11085_v40, %v1937_v50 }
 0x19f   : > { %9717 = vrsqrt.f32 %v1003_v5  ;;  %v972_v4 = vmul.f32 0.03125, %v898_v22  ;;  %8860 = vmatprep.mubr.msk.f32.mxu0 %vm672_vm0, %v1134_v34  ;;  %8950 = vmatmul.mubr.msk.f32.gmra.mxu1 %vm672_vm0, %v1970_v29  ;;  %v1099_v1 = vmul.f32 %v11029_v63, %v1063_v26 }
 0x1a0   : > { %v9712_v60 = vpop.eup %9711  ;;  %8952 = vmatprep.mubr.msk.f32.mxu1 %vm672_vm0, %v1971_v37  ;;  %v1938_v8 = vmul.f32 %v11068_v7, %v1902_v31  ;;  %9719 = vrsqrt.f32 %v1006_v27 }
 0x1a1   : > { %v1004_v44 = vadd.f32 1e-05, %v972_v4  ;;  %v1135_v35 = vadd.f32 %v11034_v48, %v1099_v1  ;;  %v1064_v28 = vmul.f32 %v9712_v60, %v14646_v13  ;;  %v14647_v60 = vunpack.c.l.bf16 %v10881_v61  ;;  %v14648_v13 = vld [vmem:[#allocation12_spill] sm:$0xff] }
 0x1a2   : > { %v901_v47 = vpop.xlane.xlu1 %900  ;;  %v916_v2 = vpop.xlane.xlu0 %915  ;;  %v1974_v14 = vadd.f32 %v11085_v40, %v1938_v8 }
 0x1a3   : > { %9721 = vrsqrt.f32 %v1004_v44  ;;  %v973_v16 = vmul.f32 0.03125, %v901_v47  ;;  %v978_v62 = vmul.f32 0.03125, %v916_v2  ;;  %8861 = vmatmul.mubr.msk.f32.gmra.mxu0 %vm672_vm0, %v1135_v35  ;;  %8953 = vmatmul.mubr.msk.f32.gmra.mxu1 %vm672_vm0, %v1972_v20  ;;  %v1100_v7 = vmul.f32 %v11029_v63, %v1064_v28 }
 0x1a4   : > { %v9714_v23 = vpop.eup %9713  ;;  %8955 = vmatprep.mubr.msk.f32.mxu1 %vm672_vm0, %v1973_v18  ;;  %9723 = vrsqrt.f32 %v1008_v52 }
 0x1a5   : > { %v1005_v9 = vadd.f32 1e-05, %v973_v16  ;;  %v1010_v25 = vadd.f32 1e-05, %v978_v62  ;;  %v1136_v10 = vadd.f32 %v11034_v48, %v1100_v7  ;;  %v1065_v41 = vmul.f32 %v9714_v23, %v10804_v39 }
 0x1a6   : > { %v907_v42 = vpop.xlane.xlu1 %906 }
 0x1a7   : > { %9725 = vrsqrt.f32 %v1005_v9  ;;  %v975_v21 = vmul.f32 0.03125, %v907_v42  ;;  %8863 = vmatprep.mubr.msk.f32.mxu0 %vm672_vm0, %v1136_v10  ;;  %8956 = vmatmul.mubr.msk.f32.gmra.mxu1 %vm672_vm0, %v1974_v14  ;;  %v1101_v43 = vmul.f32 %v11029_v63, %v1065_v41 }
 0x1a8   : > { %v9716_v17 = vpop.eup %9715  ;;  %9727 = vrsqrt.f32 %v1010_v25 }
 0x1a9   : > { %v1007_v38 = vadd.f32 1e-05, %v975_v21  ;;  %v1137_v40 = vadd.f32 %v11034_v48, %v1101_v43  ;;  %v1066_v11 = vmul.f32 %v9716_v17, %v10809_v51  ;;  %v14649_v21 = vld [vmem:[#allocation13_spill] sm:$0xff] }
 0x1aa   : > { %v913_v30 = vpop.xlane.xlu1 %912  ;;  %v922_v27 = vpop.xlane.xlu0 %921 }
 0x1ab   : > { %9729 = vrsqrt.f32 %v1007_v38  ;;  %v977_v39 = vmul.f32 0.03125, %v913_v30  ;;  %v980_v29 = vmul.f32 0.03125, %v922_v27  ;;  %8864 = vmatmul.mubr.msk.f32.gmra.mxu0 %vm672_vm0, %v1137_v40  ;;  %v1102_v59 = vmul.f32 %v11029_v63, %v1066_v11  ;;  %v14650_v30 = vld [vmem:[#allocation15_spill] sm:$0xff]  ;;  %v460_v27 = vld [vmem:[%s14336_s4 + $0x58] sm:$0xff] }
 0x1ac   : > { %v9718_v5 = vpop.eup %9717  ;;  %8958 = vmatprep.subr.mxu0 %v460_v27 }
 0x1ad   : > { %v1009_v34 = vadd.f32 1e-05, %v977_v39  ;;  %v1012_v26 = vadd.f32 1e-05, %v980_v29  ;;  %v1138_v6 = vadd.f32 %v11034_v48, %v1102_v59  ;;  %v1067_v12 = vmul.f32 %v9718_v5, %v10824_v58  ;;  %v9720_v50 = vpop.eup %9719  ;;  %v14652_v59 = vld [vmem:[#allocation21_spill] sm:$0xff]  ;;  %8959 = vmatpush3.msra.mxu0 %v460_v27 }
 0x1ae   : > { %v919_v22 = vpop.xlane.xlu1 %918  ;;  %v2302_v37 = vpop.xlane.xlu0 %2301  ;;  %v1070_v28 = vmul.f32 %v9720_v50, %v14648_v13  ;;  %v14651_v39 = vunpack.c.h.bf16 %v10881_v61  ;;  %v14653_v5 = vunpack.c.l.bf16 %v14652_v59 }
 0x1af   : > { %9731 = vrsqrt.f32 %v1009_v34  ;;  %v979_v51 = vmul.f32 0.03125, %v919_v22  ;;  %v2396_v45 = vmul.f32 0.03125, %v2302_v37  ;;  %8866 = vmatprep.mubr.msk.f32.mxu0 %vm672_vm0, %v1138_v6  ;;  %v1103_v31 = vmul.f32 %v11029_v63, %v1067_v12  ;;  %v14654_v6 = vld [vmem:[#allocation14_spill] sm:$0xff] }
 0x1b0   : > { %v9722_v4 = vpop.eup %9721  ;;  %9733 = vrsqrt.f32 %v1012_v26  ;;  %v1106_v42 = vmul.f32 %v11029_v63, %v1070_v28 }
 0x1b1   : > { %v1011_v1 = vadd.f32 1e-05, %v979_v51  ;;  %v11361_v8 = vsub.f32 %v14647_v60, %v2396_v45  ;;  %v1139_v44 = vadd.f32 %v11034_v48, %v1103_v31  ;;  %v1068_v58 = vmul.f32 %v9722_v4, %v10830_v33  ;;  %v9724_v52 = vpop.eup %9723 }
 0x1b2   : > { %v925_v35 = vpop.xlane.xlu1 %924  ;;  %v928_v20 = vpop.xlane.xlu0 %927  ;;  %v1072_v43 = vmul.f32 %v9724_v52, %v14649_v21  ;;  %v1142_v50 = vadd.f32 %v11034_v48, %v1106_v42  ;;  %v14658_v42 = vld [vmem:[#allocation24_spill] sm:$0xff] }
 0x1b3   : > { %9735 = vrsqrt.f32 %v1011_v1  ;;  %v981_v47 = vmul.f32 0.03125, %v925_v35  ;;  %v982_v2 = vmul.f32 0.03125, %v928_v20  ;;  %8867 = vmatmul.mubr.msk.f32.gmra.mxu0 %vm672_vm0, %v1139_v44  ;;  %v2460_v18 = vmul.f32 %v11361_v8, %v11361_v8 }
 0x1b4   : > { %v9726_v16 = vpop.eup %9725  ;;  %v1104_v62 = vmul.f32 %v11029_v63, %v1068_v58  ;;  %v1108_v51 = vmul.f32 %v11029_v63, %v1072_v43  ;;  %v14659_v21 = vunpack.c.l.bf16 %v14658_v42 }
 0x1b5   : > { %v9728_v7 = vpop.eup %9727  ;;  %v1013_v23 = vadd.f32 1e-05, %v981_v47  ;;  %v1014_v14 = vadd.f32 1e-05, %v982_v2  ;;  %v2492_v33 = vsel %vm672_vm0, %v2460_v18, 0.0  ;;  %v1069_v9 = vmul.f32 %v9726_v16, %v10845_v32  ;;  %v14655_v18 = vld [vmem:[#allocation16_spill] sm:$0xff] }
 0x1b6   : > { %v2305_v25 = vpop.xlane.xlu1 %2304  ;;  %2493 = vadd.xlane.f32.xlu0 %v2492_v33  ;;  %v2308_v10 = vpop.xlane.xlu0 %2307  ;;  %v1140_v41 = vadd.f32 %v11034_v48, %v1104_v62  ;;  %v1074_v32 = vmul.f32 %v9728_v7, %v14650_v30  ;;  %v14656_v62 = vld [vmem:[#allocation18_spill] sm:$0xff]  ;;  %v1144_v33 = vadd.f32 %v11034_v48, %v1108_v51 }
 0x1b7   : > { %9737 = vrsqrt.f32 %v1013_v23  ;;  %v2397_v17 = vmul.f32 0.03125, %v2305_v25  ;;  %v2398_v38 = vmul.f32 0.03125, %v2308_v10  ;;  %v1105_v40 = vmul.f32 %v11029_v63, %v1069_v9 }
 0x1b8   : > { %v9730_v11 = vpop.eup %9729  ;;  %9739 = vrsqrt.f32 %v1014_v14  ;;  %8869 = vmatprep.mubr.msk.f32.mxu0 %vm672_vm0, %v1140_v41  ;;  %v1110_v44 = vmul.f32 %v11029_v63, %v1074_v32  ;;  %v14657_v10 = vunpack.c.h.bf16 %v14652_v59 }
 0x1b9   : > { %v11383_v29 = vsub.f32 %v14651_v39, %v2397_v17  ;;  %v11387_v34 = vsub.f32 %v14653_v5, %v2398_v38  ;;  %v1141_v26 = vadd.f32 %v11034_v48, %v1105_v40  ;;  %v1071_v12 = vmul.f32 %v9730_v11, %v14654_v6  ;;  %v14660_v17 = vld [vmem:[#allocation17_spill] sm:$0xff] }
 0x1ba   : > { %v931_v22 = vpop.xlane.xlu1 %930  ;;  %v934_v37 = vpop.xlane.xlu0 %933  ;;  %v1146_v32 = vadd.f32 %v11034_v48, %v1110_v44  ;;  %v14662_v44 = vld [vmem:[#allocation20_spill] sm:$0xff] }
 0x1bb   : > { %v983_v45 = vmul.f32 0.03125, %v931_v22  ;;  %v984_v61 = vmul.f32 0.03125, %v934_v37  ;;  %8870 = vmatmul.mubr.msk.f32.gmra.mxu0 %vm672_vm0, %v1141_v26  ;;  %v2461_v31 = vmul.f32 %v11383_v29, %v11383_v29  ;;  %v2462_v4 = vmul.f32 %v11387_v34, %v11387_v34 }
 0x1bc   : > { %v9732_v1 = vpop.eup %9731  ;;  %8872 = vmatprep.mubr.msk.f32.mxu0 %vm672_vm0, %v1142_v50  ;;  %v1107_v60 = vmul.f32 %v11029_v63, %v1071_v12 }
 0x1bd   : > { %v9734_v58 = vpop.eup %9733  ;;  %v1015_v35 = vadd.f32 1e-05, %v983_v45  ;;  %v1016_v20 = vadd.f32 1e-05, %v984_v61  ;;  %v2495_v13 = vsel %vm672_vm0, %v2461_v31, 0.0  ;;  %v2498_v28 = vsel %vm672_vm0, %v2462_v4, 0.0 }
 0x1be   : > { %v2311_v52 = vpop.xlane.xlu1 %2310  ;;  %2496 = vadd.xlane.f32.xlu1 %v2495_v13  ;;  %2499 = vadd.xlane.f32.xlu0 %v2498_v28  ;;  %v2314_v47 = vpop.xlane.xlu0 %2313  ;;  %v1143_v2 = vadd.f32 %v11034_v48, %v1107_v60  ;;  %v1073_v16 = vmul.f32 %v9732_v1, %v14655_v18  ;;  %v1076_v7 = vmul.f32 %v9734_v58, %v14656_v62  ;;  %v14661_v1 = vld [vmem:[#allocation19_spill] sm:$0xff] }
 0x1bf   : > { %9741 = vrsqrt.f32 %v1015_v35  ;;  %v2399_v23 = vmul.f32 0.03125, %v2311_v52  ;;  %v2400_v14 = vmul.f32 0.03125, %v2314_v47  ;;  %v459_v35 = vld [vmem:[%s14336_s4 + $0x50] sm:$0xff] }
 0x1c0   : > { %v9736_v9 = vpop.eup %9735  ;;  %9743 = vrsqrt.f32 %v1016_v20  ;;  %8873 = vmatmul.mubr.msk.f32.gmra.mxu0 %vm672_vm0, %v1143_v2  ;;  %v1109_v25 = vmul.f32 %v11029_v63, %v1073_v16  ;;  %v1112_v27 = vmul.f32 %v11029_v63, %v1076_v7  ;;  %8960 = vmatprep.subr.mxu0 %v459_v35  ;;  %v14663_v2 = vunpack.c.h.bf16 %v14658_v42  ;;  %v14664_v16 = vld [vmem:[#allocation27_spill] sm:$0xff] }
 0x1c1   : > { %v11411_v41 = vsub.f32 %v14657_v10, %v2399_v23  ;;  %v11415_v43 = vsub.f32 %v14659_v21, %v2400_v14  ;;  %8875 = vmatprep.mubr.msk.f32.mxu0 %vm672_vm0, %v1144_v33  ;;  %v1075_v38 = vmul.f32 %v9736_v9, %v14660_v17  ;;  %v14665_v62 = vunpack.c.l.bf16 %v14664_v16  ;;  %8961 = vmatpush3.msra.mxu0 %v459_v35 }
 0x1c2   : > { %v937_v40 = vpop.xlane.xlu1 %936  ;;  %v940_v11 = vpop.xlane.xlu0 %939  ;;  %v1145_v30 = vadd.f32 %v11034_v48, %v1109_v25  ;;  %v1148_v28 = vadd.f32 %v11034_v48, %v1112_v27 }
 0x1c3   : > { %v985_v39 = vmul.f32 0.03125, %v937_v40  ;;  %v986_v59 = vmul.f32 0.03125, %v940_v11  ;;  %v2463_v5 = vmul.f32 %v11411_v41, %v11411_v41  ;;  %v2464_v26 = vmul.f32 %v11415_v43, %v11415_v43 }
 0x1c4   : > { %v9738_v6 = vpop.eup %9737  ;;  %8876 = vmatmul.mubr.msk.f32.gmra.mxu0 %vm672_vm0, %v1145_v30  ;;  %v1111_v12 = vmul.f32 %v11029_v63, %v1075_v38 }
 0x1c5   : > { %v9740_v22 = vpop.eup %9739  ;;  %v1017_v37 = vadd.f32 1e-05, %v985_v39  ;;  %v1018_v50 = vadd.f32 1e-05, %v986_v59  ;;  %8878 = vmatprep.mubr.msk.f32.mxu0 %vm672_vm0, %v1146_v32  ;;  %v2501_v51 = vsel %vm672_vm0, %v2463_v5, 0.0  ;;  %v2504_v45 = vsel %vm672_vm0, %v2464_v26, 0.0 }
 0x1c6   : > { %v2317_v61 = vpop.xlane.xlu1 %2316  ;;  %2502 = vadd.xlane.f32.xlu1 %v2501_v51  ;;  %2505 = vadd.xlane.f32.xlu0 %v2504_v45  ;;  %v2320_v31 = vpop.xlane.xlu0 %2319  ;;  %v1147_v4 = vadd.f32 %v11034_v48, %v1111_v12  ;;  %v1077_v60 = vmul.f32 %v9738_v6, %v14661_v1  ;;  %v1078_v58 = vmul.f32 %v9740_v22, %v14662_v44  ;;  %v14666_v59 = vld [vmem:[#allocation23_spill] sm:$0xff]  ;;  %v14667_v26 = vld [vmem:[#allocation22_spill] sm:$0xff]  ;;  %v14668_v51 = vunpack.c.h.bf16 %v14664_v16 }
 0x1c7   : > { %9745 = vrsqrt.f32 %v1017_v37  ;;  %v2401_v20 = vmul.f32 0.03125, %v2317_v61  ;;  %v2402_v13 = vmul.f32 0.03125, %v2320_v31  ;;  %v14669_v61 = vunpack.c.l.bf16 %v10989_v49 }
 0x1c8   : > { %9747 = vrsqrt.f32 %v1018_v50  ;;  %8879 = vmatmul.mubr.msk.f32.gmra.mxu0 %vm672_vm0, %v1147_v4  ;;  %v1113_v52 = vmul.f32 %v11029_v63, %v1077_v60  ;;  %v1114_v47 = vmul.f32 %v11029_v63, %v1078_v58 }
 0x1c9   : > { %v11443_v18 = vsub.f32 %v14663_v2, %v2401_v20  ;;  %v11447_v7 = vsub.f32 %v14665_v62, %v2402_v13  ;;  %8881 = vmatprep.mubr.msk.f32.mxu0 %vm672_vm0, %v1148_v28  ;;  %v14670_v2 = vunpack.c.l.bf16 %v11009_v55 }
 0x1ca   : > { %v943_v23 = vpop.xlane.xlu1 %942  ;;  %v946_v14 = vpop.xlane.xlu0 %945  ;;  %v1149_v33 = vadd.f32 %v11034_v48, %v1113_v52  ;;  %v1150_v9 = vadd.f32 %v11034_v48, %v1114_v47 }
 0x1cb   : > { %v987_v25 = vmul.f32 0.03125, %v943_v23  ;;  %v988_v10 = vmul.f32 0.03125, %v946_v14  ;;  %v2465_v42 = vmul.f32 %v11443_v18, %v11443_v18  ;;  %v2466_v21 = vmul.f32 %v11447_v7, %v11447_v7 }
 0x1cc   : > { %v9742_v17 = vpop.eup %9741  ;;  %8882 = vmatmul.mubr.msk.f32.gmra.mxu0 %vm672_vm0, %v1149_v33 }
 0x1cd   : > { %v9744_v38 = vpop.eup %9743  ;;  %v1019_v40 = vadd.f32 1e-05, %v987_v25  ;;  %v1020_v11 = vadd.f32 1e-05, %v988_v10  ;;  %8884 = vmatprep.mubr.msk.f32.mxu0 %vm672_vm0, %v1150_v9  ;;  %v2507_v30 = vsel %vm672_vm0, %v2465_v42, 0.0  ;;  %v2510_v32 = vsel %vm672_vm0, %v2466_v21, 0.0 }
 0x1ce   : > { %v2323_v27 = vpop.xlane.xlu1 %2322  ;;  %2508 = vadd.xlane.f32.xlu1 %v2507_v30  ;;  %2511 = vadd.xlane.f32.xlu0 %v2510_v32  ;;  %v2326_v39 = vpop.xlane.xlu0 %2325  ;;  %v1079_v5 = vmul.f32 %v9742_v17, %v14666_v59  ;;  %v1080_v6 = vmul.f32 %v9744_v38, %v14667_v26  ;;  %v14671_v9 = vld [vmem:[#allocation26_spill] sm:$0xff]  ;;  %v14672_v10 = vld [vmem:[#allocation25_spill] sm:$0xff]  ;;  %v458_v21 = vld [vmem:[%s14336_s4 + $0x48] sm:$0xff]  ;;  %v14674_v59 = vunpack.c.l.bf16 %v11019_v15 }
 0x1cf   : > { %9749 = vrsqrt.f32 %v1019_v40  ;;  %v2403_v12 = vmul.f32 0.03125, %v2323_v27  ;;  %v2404_v22 = vmul.f32 0.03125, %v2326_v39  ;;  %8962 = vmatprep.subr.mxu0 %v458_v21  ;;  %v457_v32 = vld [vmem:[%s14336_s4 + $0x40] sm:$0xff]  ;;  %v14673_v27 = vunpack.c.h.bf16 %v10989_v49 }
 0x1d0   : > { %9751 = vrsqrt.f32 %v1020_v11  ;;  %v1115_v37 = vmul.f32 %v11029_v63, %v1079_v5  ;;  %v1116_v50 = vmul.f32 %v11029_v63, %v1080_v6  ;;  %8963 = vmatpush3.msra.mxu0 %v458_v21 }
 0x1d1   : > { %v11466_v45 = vsub.f32 %v14668_v51, %v2403_v12  ;;  %v11470_v31 = vsub.f32 %v14669_v61, %v2404_v22  ;;  %8964 = vmatprep.subr.mxu0 %v457_v32 }
 0x1d2   : > { %v949_v4 = vpop.xlane.xlu1 %948  ;;  %v2332_v1 = vpop.xlane.xlu0 %2331  ;;  %v1151_v60 = vadd.f32 %v11034_v48, %v1115_v37  ;;  %v1152_v44 = vadd.f32 %v11034_v48, %v1116_v50  ;;  %8965 = vmatpush3.msra.mxu0 %v457_v32 }
 0x1d3   : > { %v989_v58 = vmul.f32 0.03125, %v949_v4  ;;  %v2406_v35 = vmul.f32 0.03125, %v2332_v1  ;;  %v2467_v20 = vmul.f32 %v11466_v45, %v11466_v45  ;;  %v2468_v13 = vmul.f32 %v11470_v31, %v11470_v31 }
 0x1d4   : > { %v9746_v28 = vpop.eup %9745  ;;  %8885 = vmatmul.mubr.msk.f32.gmra.mxu0 %vm672_vm0, %v1151_v60  ;;  %v14675_v60 = vunpack.c.h.bf16 %v11009_v55 }
 0x1d5   : > { %v9748_v52 = vpop.eup %9747  ;;  %v1021_v47 = vadd.f32 1e-05, %v989_v58  ;;  %v11481_v16 = vsub.f32 %v14670_v2, %v2406_v35  ;;  %8887 = vmatprep.mubr.msk.f32.mxu0 %vm672_vm0, %v1152_v44  ;;  %v2513_v62 = vsel %vm672_vm0, %v2467_v20, 0.0  ;;  %v2516_v23 = vsel %vm672_vm0, %v2468_v13, 0.0 }
 0x1d6   : > { %2514 = vadd.xlane.f32.xlu1 %v2513_v62  ;;  %v2329_v14 = vpop.xlane.xlu1 %2328  ;;  %2517 = vadd.xlane.f32.xlu0 %v2516_v23  ;;  %v2338_v33 = vpop.xlane.xlu0 %2337  ;;  %v1081_v25 = vmul.f32 %v9746_v28, %v14671_v9  ;;  %v1082_v42 = vmul.f32 %v9748_v52, %v14672_v10  ;;  %v14676_v58 = vunpack.c.l.bf16 %v11049_v46  ;;  %v14678_v62 = vld [vmem:[#allocation28_spill] sm:$0xff] }
 0x1d7   : > { %9753 = vrsqrt.f32 %v1021_v47  ;;  %v2405_v17 = vmul.f32 0.03125, %v2329_v14  ;;  %v2408_v38 = vmul.f32 0.03125, %v2338_v33  ;;  %v2470_v40 = vmul.f32 %v11481_v16, %v11481_v16  ;;  %v14677_v47 = vld [vmem:[#allocation29_spill] sm:$0xff] }
 0x1d8   : > { %v1117_v11 = vmul.f32 %v11029_v63, %v1081_v25  ;;  %v1118_v30 = vmul.f32 %v11029_v63, %v1082_v42  ;;  %v14679_v42 = vunpack.c.h.bf16 %v11019_v15 }
 0x1d9   : > { %v11500_v39 = vsub.f32 %v14673_v27, %v2405_v17  ;;  %v11504_v5 = vsub.f32 %v14674_v59, %v2408_v38  ;;  %v2522_v26 = vsel %vm672_vm0, %v2470_v40, 0.0  ;;  %v14680_v17 = vunpack.c.l.bf16 %v11076_v53 }
 0x1da   : > { %v2335_v6 = vpop.xlane.xlu1 %2334  ;;  %2523 = vadd.xlane.f32.xlu0 %v2522_v26  ;;  %v2344_v12 = vpop.xlane.xlu0 %2343  ;;  %v1153_v22 = vadd.f32 %v11034_v48, %v1117_v11  ;;  %v1154_v37 = vadd.f32 %v11034_v48, %v1118_v30 }
 0x1db   : > { %v2407_v50 = vmul.f32 0.03125, %v2335_v6  ;;  %v2410_v51 = vmul.f32 0.03125, %v2344_v12  ;;  %v2469_v49 = vmul.f32 %v11500_v39, %v11500_v39  ;;  %v2472_v61 = vmul.f32 %v11504_v5, %v11504_v5 }
 0x1dc   : > { %v9750_v4 = vpop.eup %9749  ;;  %8888 = vmatmul.mubr.msk.f32.gmra.mxu0 %vm672_vm0, %v1153_v22 }
 0x1dd   : > { %v9752_v1 = vpop.eup %9751  ;;  %v11516_v44 = vsub.f32 %v14675_v60, %v2407_v50  ;;  %v11520_v35 = vsub.f32 %v14676_v58, %v2410_v51  ;;  %8890 = vmatprep.mubr.msk.f32.mxu0 %vm672_vm0, %v1154_v37  ;;  %v2519_v20 = vsel %vm672_vm0, %v2469_v49, 0.0  ;;  %v2528_v13 = vsel %vm672_vm0, %v2472_v61, 0.0  ;;  %v14683_v58 = vld [vmem:[#allocation31_spill] sm:$0xff] }
 0x1de   : > { %2520 = vadd.xlane.f32.xlu1 %v2519_v20  ;;  %v2341_v28 = vpop.xlane.xlu1 %2340  ;;  %2529 = vadd.xlane.f32.xlu0 %v2528_v13  ;;  %v2350_v52 = vpop.xlane.xlu0 %2349  ;;  %v1083_v2 = vmul.f32 %v9750_v4, %v14677_v47  ;;  %v1084_v55 = vmul.f32 %v9752_v1, %v14678_v62  ;;  %v14681_v37 = vunpack.c.h.bf16 %v11049_v46  ;;  %v14682_v51 = vunpack.c.l.bf16 %v11102_v57 }
 0x1df   : > { %v2409_v23 = vmul.f32 0.03125, %v2341_v28  ;;  %v2412_v14 = vmul.f32 0.03125, %v2350_v52  ;;  %v2471_v33 = vmul.f32 %v11516_v44, %v11516_v44  ;;  %v2474_v9 = vmul.f32 %v11520_v35, %v11520_v35 }
 0x1e0   : > { %v1119_v25 = vmul.f32 %v11029_v63, %v1083_v2  ;;  %v1120_v10 = vmul.f32 %v11029_v63, %v1084_v55  ;;  %v14684_v2 = vunpack.c.h.bf16 %v11076_v53  ;;  %v14685_v55 = vld [vmem:[#allocation35_spill] sm:$0xff] }
 0x1e1   : > { %v11535_v21 = vsub.f32 %v14679_v42, %v2409_v23  ;;  %v11539_v38 = vsub.f32 %v14680_v17, %v2412_v14  ;;  %v2525_v40 = vsel %vm672_vm0, %v2471_v33, 0.0  ;;  %v2534_v11 = vsel %vm672_vm0, %v2474_v9, 0.0 }
 0x1e2   : > { %2526 = vadd.xlane.f32.xlu1 %v2525_v40  ;;  %v2347_v30 = vpop.xlane.xlu1 %2346  ;;  %2535 = vadd.xlane.f32.xlu0 %v2534_v11  ;;  %v2356_v32 = vpop.xlane.xlu0 %2355  ;;  %v1155_v27 = vadd.f32 %v11034_v48, %v1119_v25  ;;  %v1156_v59 = vadd.f32 %v11034_v48, %v1120_v10  ;;  %v14686_v23 = vunpack.c.l.bf16 %v14685_v55  ;;  %v14687_v11 = vunpack.c.h.bf16 %v11102_v57 }
 0x1e3   : > { %v2411_v26 = vmul.f32 0.03125, %v2347_v30  ;;  %v2414_v15 = vmul.f32 0.03125, %v2356_v32  ;;  %v2473_v6 = vmul.f32 %v11535_v21, %v11535_v21  ;;  %v2476_v12 = vmul.f32 %v11539_v38, %v11539_v38  ;;  %v14688_v32 = vld [vmem:[#allocation36_spill] sm:$0xff] }
 0x1e4   : > { %v9754_v22 = vpop.eup %9753  ;;  %8891 = vmatmul.mubr.msk.f32.gmra.mxu0 %vm672_vm0, %v1155_v27  ;;  %v14689_v27 = vunpack.c.l.bf16 %v14688_v32 }
 0x1e5   : > { %v11552_v50 = vsub.f32 %v14681_v37, %v2411_v26  ;;  %v11556_v49 = vsub.f32 %v14682_v51, %v2414_v15  ;;  %8893 = vmatprep.mubr.msk.f32.mxu0 %vm672_vm0, %v1156_v59  ;;  %v2531_v61 = vsel %vm672_vm0, %v2473_v6, 0.0  ;;  %v2540_v4 = vsel %vm672_vm0, %v2476_v12, 0.0 }
 0x1e6   : > { %2532 = vadd.xlane.f32.xlu1 %v2531_v61  ;;  %v2353_v1 = vpop.xlane.xlu1 %2352  ;;  %2541 = vadd.xlane.f32.xlu0 %v2540_v4  ;;  %v2362_v60 = vpop.xlane.xlu0 %2361  ;;  %v1085_v20 = vmul.f32 %v9754_v22, %v14683_v58  ;;  %v14690_v51 = vunpack.c.h.bf16 %v14685_v55  ;;  %v14691_v4 = vunpack.c.l.bf16 %v11150_v0 }
 0x1e7   : > { %v2413_v13 = vmul.f32 0.03125, %v2353_v1  ;;  %v2416_v46 = vmul.f32 0.03125, %v2362_v60  ;;  %v2475_v28 = vmul.f32 %v11552_v50, %v11552_v50  ;;  %v2478_v52 = vmul.f32 %v11556_v49, %v11556_v49 }
 0x1e8   : > { %v1121_v47 = vmul.f32 %v11029_v63, %v1085_v20 }
 0x1e9   : > { %v11569_v62 = vsub.f32 %v14684_v2, %v2413_v13  ;;  %v11573_v14 = vsub.f32 %v14686_v23, %v2416_v46  ;;  %v2537_v33 = vsel %vm672_vm0, %v2475_v28, 0.0  ;;  %v2546_v9 = vsel %vm672_vm0, %v2478_v52, 0.0 }
 0x1ea   : > { %2538 = vadd.xlane.f32.xlu1 %v2537_v33  ;;  %v2359_v25 = vpop.xlane.xlu1 %2358  ;;  %2547 = vadd.xlane.f32.xlu0 %v2546_v9  ;;  %v2368_v10 = vpop.xlane.xlu0 %2367  ;;  %v1157_v42 = vadd.f32 %v11034_v48, %v1121_v47  ;;  %v14692_v2 = vunpack.c.h.bf16 %v14688_v32  ;;  %v14693_v23 = vunpack.c.l.bf16 %v11158_v19 }
 0x1eb   : > { %v2415_v17 = vmul.f32 0.03125, %v2359_v25  ;;  %v2418_v63 = vmul.f32 0.03125, %v2368_v10  ;;  %v2477_v53 = vmul.f32 %v11569_v62, %v11569_v62  ;;  %v2480_v40 = vmul.f32 %v11573_v14, %v11573_v14 }
 0x1ec   : > { %8894 = vmatmul.mubr.msk.f32.gmra.mxu0 %vm672_vm0, %v1157_v42 }
 0x1ed   : > { %v11585_v30 = vsub.f32 %v14687_v11, %v2415_v17  ;;  %v11589_v59 = vsub.f32 %v14689_v27, %v2418_v63  ;;  %v2543_v48 = vsel %vm672_vm0, %v2477_v53, 0.0  ;;  %v2552_v26 = vsel %vm672_vm0, %v2480_v40, 0.0 }
 0x1ee   : > { %2544 = vadd.xlane.f32.xlu1 %v2543_v48  ;;  %v2365_v15 = vpop.xlane.xlu1 %2364  ;;  %2553 = vadd.xlane.f32.xlu0 %v2552_v26  ;;  %v2374_v6 = vpop.xlane.xlu0 %2373  ;;  %v14694_v11 = vunpack.c.h.bf16 %v11150_v0  ;;  %v14695_v27 = vunpack.c.l.bf16 %v11172_v56 }
 0x1ef   : > { %v2417_v12 = vmul.f32 0.03125, %v2365_v15  ;;  %v2420_v22 = vmul.f32 0.03125, %v2374_v6  ;;  %v2479_v37 = vmul.f32 %v11585_v30, %v11585_v30  ;;  %v2482_v57 = vmul.f32 %v11589_v59, %v11589_v59 }
 0x1f1   : > { %v11599_v61 = vsub.f32 %v14690_v51, %v2417_v12  ;;  %v11603_v1 = vsub.f32 %v14691_v4, %v2420_v22  ;;  %v2549_v60 = vsel %vm672_vm0, %v2479_v37, 0.0  ;;  %v2558_v58 = vsel %vm672_vm0, %v2482_v57, 0.0 }
 0x1f2   : > { %2550 = vadd.xlane.f32.xlu1 %v2549_v60  ;;  %v2371_v20 = vpop.xlane.xlu1 %2370  ;;  %2559 = vadd.xlane.f32.xlu0 %v2558_v58  ;;  %v2380_v13 = vpop.xlane.xlu0 %2379  ;;  %v14696_v4 = vunpack.c.l.bf16 %v11192_v24 }
 0x1f3   : > { %v2419_v46 = vmul.f32 0.03125, %v2371_v20  ;;  %v2422_v28 = vmul.f32 0.03125, %v2380_v13  ;;  %v2481_v52 = vmul.f32 %v11599_v61, %v11599_v61  ;;  %v2484_v47 = vmul.f32 %v11603_v1, %v11603_v1 }
 0x1f5   : > { %v11613_v55 = vsub.f32 %v14692_v2, %v2419_v46  ;;  %v11617_v33 = vsub.f32 %v14693_v23, %v2422_v28  ;;  %v2555_v9 = vsel %vm672_vm0, %v2481_v52, 0.0  ;;  %v2564_v25 = vsel %vm672_vm0, %v2484_v47, 0.0 }
 0x1f6   : > { %2556 = vadd.xlane.f32.xlu1 %v2555_v9  ;;  %v2377_v10 = vpop.xlane.xlu1 %2376  ;;  %2565 = vadd.xlane.f32.xlu0 %v2564_v25  ;;  %v2386_v42 = vpop.xlane.xlu0 %2385 }
 0x1f7   : > { %v2421_v17 = vmul.f32 0.03125, %v2377_v10  ;;  %v2424_v63 = vmul.f32 0.03125, %v2386_v42  ;;  %v2483_v53 = vmul.f32 %v11613_v55, %v11613_v55  ;;  %v2486_v40 = vmul.f32 %v11617_v33, %v11617_v33 }
 0x1f9   : > { %v11627_v32 = vsub.f32 %v14694_v11, %v2421_v17  ;;  %v11631_v48 = vsub.f32 %v14695_v27, %v2424_v63  ;;  %v2561_v26 = vsel %vm672_vm0, %v2483_v53, 0.0  ;;  %v2570_v15 = vsel %vm672_vm0, %v2486_v40, 0.0  ;;  %v461_v11 = vld [vmem:[%s14337_s5] sm:$0x7] }
 0x1fa   : > { %2562 = vadd.xlane.f32.xlu1 %v2561_v26  ;;  %v2383_v6 = vpop.xlane.xlu1 %2382  ;;  %2571 = vadd.xlane.f32.xlu0 %v2570_v15  ;;  %v2392_v12 = vpop.xlane.xlu0 %2391  ;;  %v14698_v26 = vld [vmem:[#allocation33_spill] sm:$0xff] }
 0x1fb   : > { %v2423_v22 = vmul.f32 0.03125, %v2383_v6  ;;  %v2426_v37 = vmul.f32 0.03125, %v2392_v12  ;;  %v2485_v57 = vmul.f32 %v11627_v32, %v11627_v32  ;;  %v2488_v0 = vmul.f32 %v11631_v48, %v11631_v48 }
 0x1fc   : > { %v11681_v15 = vrot.slane %v461_v11, %v14698_v26 }
 0x1fd   : > { %v11641_v51 = vsub.f32 %v8315_v36, %v2423_v22  ;;  %v11645_v60 = vsub.f32 %v14696_v4, %v2426_v37  ;;  %v2567_v58 = vsel %vm672_vm0, %v2485_v57, 0.0  ;;  %v2576_v20 = vsel %vm672_vm0, %v2488_v0, 0.0 }
 0x1fe   : > { %2568 = vadd.xlane.f32.xlu1 %v2567_v58  ;;  %v2389_v13 = vpop.xlane.xlu1 %2388  ;;  %2577 = vadd.xlane.f32.xlu0 %v2576_v20 }
 0x1ff   : > { %v2425_v46 = vmul.f32 0.03125, %v2389_v13  ;;  %v2487_v28 = vmul.f32 %v11641_v51, %v11641_v51  ;;  %v2490_v19 = vmul.f32 %v11645_v60, %v11645_v60 }
 0x201   : > { %v11655_v36 = vsub.f32 %v8319_v54, %v2425_v46  ;;  %v2573_v52 = vsel %vm672_vm0, %v2487_v28, 0.0  ;;  %v2582_v47 = vsel %vm672_vm0, %v2490_v19, 0.0 }
 0x202   : > { %2574 = vadd.xlane.f32.xlu1 %v2573_v52  ;;  %v2395_v2 = vpop.xlane.xlu1 %2394  ;;  %2583 = vadd.xlane.f32.xlu0 %v2582_v47 }
 0x203   : > { %v2427_v23 = vmul.f32 0.03125, %v2395_v2  ;;  %v2489_v9 = vmul.f32 %v11655_v36, %v11655_v36 }
 0x205   : > { %v11663_v25 = vsub.f32 %v8323_v3, %v2427_v23  ;;  %v2579_v10 = vsel %vm672_vm0, %v2489_v9, 0.0 }
 0x206   : > { %2580 = vadd.xlane.f32.xlu1 %v2579_v10 }
 0x207   : > { %v2491_v56 = vmul.f32 %v11663_v25, %v11663_v25 }
 0x209   : > { %v2585_v54 = vsel %vm672_vm0, %v2491_v56, 0.0 }
 0x20a   : > { %2586 = vadd.xlane.f32.xlu1 %v2585_v54  ;;  %v14702_v54 = vld [vmem:[#allocation32_spill] sm:$0xff] }
 0x20b   : > { %v11669_v42 = vpop.f32.mrf.mxu1 }
 0x20d   : > { %v11671_v17 = vpop.f32.mrf.mxu1 }
 0x20f   : > { %v11673_v63 = vpop.f32.mrf.mxu1 }
 0x210   : > { %14697 = vst [vmem:[#allocation4_spill] sm:$0xff] %v11673_v63 }
 0x211   : > { %v11675_v53 = vpop.f32.mrf.mxu1 }
 0x217   : > { %v8912_v24 = vpop.f32.mrf.mxu1 }
 0x219   : > { %v2141_v3 = vpop.f32.mrf.mxu1 }
 0x21f   : > { %v8915_v40 = vpop.f32.mrf.mxu1 }
 0x220   : > { %v11709_v19 = vadd.f32 %v8915_v40, %v11681_v15  ;;  %v11726_v40 = vrot.slane %v461_v11, %v14702_v54 }
 0x221   : > { %v2151_v27 = vpop.f32.mrf.mxu1 }
 0x222   : > { %14700 = vst [vmem:[#allocation3_spill] sm:$0xff] %v11709_v19  ;;  %v11719_v9 = vadd.f32 %v2151_v27, %v11681_v15  ;;  %v11733_v27 = vadd.f32 %v8912_v24, %v11681_v15 }
 0x224   : > { %14701 = vst [vmem:[#allocation5_spill] sm:$0xff] %v11719_v9  ;;  %14703 = vst [vmem:[#allocation6_spill] sm:$0xff] %v11733_v27 }
 0x227   : > { %v8918_v6 = vpop.f32.mrf.mxu1 }
 0x228   : > { %v2167_v12 = vadd.f32 %v8918_v6, %v11681_v15 }
 0x229   : > { %v2161_v22 = vpop.f32.mrf.mxu1 }
 0x22a   : > { %5050 = vrot.lane.b32.xlu0 %v2167_v12, %s10038_s23  ;;  %v11699_v13 = vadd.f32 %v2161_v22, %v11681_v15 }
 0x22c   : > { %14699 = vst [vmem:[#allocation2_spill] sm:$0xff] %v11699_v13 }
 0x22f   : > { %v8921_v37 = vpop.f32.mrf.mxu1 }
 0x230   : > { %v2177_v57 = vadd.f32 %v8921_v37, %v11681_v15 }
 0x231   : > { %v2171_v0 = vpop.f32.mrf.mxu1 }
 0x232   : > { %v2172_v4 = vadd.f32 %v2171_v0, %v11681_v15  ;;  %9014 = vmatprep.subr.msk.mxu1 %vm3125_vm1, %v2177_v57  ;;  %5054 = vrot.lane.b32.xlu0 %v2177_v57, %s10038_s23 }
 0x233   : > { %9015 = vmatpush3.xpose.msk.msra.mxu1 %vm3125_vm1, %v2177_v57 }
 0x234   : > { %5052 = vrot.lane.b32.xlu1 %v2172_v4, %s10038_s23  ;;  %9016 = vmatprep.subr.msk.mxu1 %vm3125_vm1, %v2172_v4 }
 0x237   : > { %v11692_v58 = vpop.f32.mrf.mxu1  ;;  %9017 = vmatpush3.xpose.msk.msra.mxu1 %vm3125_vm1, %v2172_v4 }
 0x238   : > { %9018 = vmatprep.subr.msk.mxu1 %vm3125_vm1, %v2167_v12 }
 0x239   : > { %v11696_v20 = vpop.f32.mrf.mxu1 }
 0x23b   : > { %v11701_v46 = vpop.f32.mrf.mxu1  ;;  %9019 = vmatpush3.xpose.msk.msra.mxu1 %vm3125_vm1, %v2167_v12 }
 0x23c   : > { %9020 = vmatprep.subr.msk.mxu1 %vm3125_vm1, %v11699_v13 }
 0x23d   : > { %v11706_v28 = vpop.f32.mrf.mxu1 }
 0x23f   : > { %v8930_v52 = vpop.f32.mrf.mxu1  ;;  %9021 = vmatpush3.xpose.msk.msra.mxu1 %vm3125_vm1, %v11699_v13  ;;  %v2494_v47 = vpop.xlane.xlu0 %2493 }
 0x240   : > { %v11714_v2 = vadd.f32 %v8930_v52, %v11681_v15  ;;  %v2588_v23 = vmul.f32 0.03125, %v2494_v47  ;;  %9022 = vmatprep.subr.msk.mxu1 %vm3125_vm1, %v11709_v19  ;;  %v11746_v47 = vadd.f32 %v2141_v3, %v11681_v15 }
 0x241   : > { %v11730_v6 = vpop.f32.mrf.mxu1 }
 0x242   : > { %v2620_v10 = vadd.f32 1e-05, %v2588_v23  ;;  %5219 = vrot.lane.b32.xlu1 %v11714_v2, %s10038_s23  ;;  %14705 = vst [vmem:[#allocation8_spill] sm:$0xff] %v11746_v47 }
 0x243   : > { %v8856_v56 = vpop.f32.mrf.mxu0  ;;  %9023 = vmatpush3.xpose.msk.msra.mxu1 %vm3125_vm1, %v11709_v19 }
 0x244   : > { %9755 = vrsqrt.f32 %v2620_v10  ;;  %9024 = vmatprep.subr.msk.mxu1 %vm3125_vm1, %v11719_v9 }
 0x245   : > { %v1328_v12 = vpop.f32.mrf.mxu0 }
 0x246   : > { %v11736_v22 = vadd.f32 %v1328_v12, %v11726_v40 }
 0x247   : > { %v2497_v37 = vpop.xlane.xlu1 %2496  ;;  %v8933_v57 = vpop.f32.mrf.mxu1  ;;  %9025 = vmatpush3.xpose.msk.msra.mxu1 %vm3125_vm1, %v11719_v9 }
 0x248   : > { %14704 = vst [vmem:[#allocation7_spill] sm:$0xff] %v11736_v22  ;;  %v2589_v11 = vmul.f32 0.03125, %v2497_v37  ;;  %v2217_v0 = vadd.f32 %v8933_v57, %v11681_v15  ;;  %v2500_v4 = vpop.xlane.xlu0 %2499  ;;  %9026 = vmatprep.subr.msk.mxu1 %vm3125_vm1, %v11733_v27  ;;  %9030 = vmatprep.mubr.msk.f32.mxu1 %vm3125_vm1, %v11736_v22  ;;  %v14706_v37 = vld [vmem:[#allocation30_spill] sm:$0xff] }
 0x249   : > { %v2590_v24 = vmul.f32 0.03125, %v2500_v4  ;;  %v2211_v52 = vpop.f32.mrf.mxu1  ;;  %v2718_v57 = vsub.s32 4, %v14706_v37 }
 0x24a   : > { %v2621_v23 = vadd.f32 1e-05, %v2589_v11  ;;  %5223 = vrot.lane.b32.xlu1 %v2217_v0, %s10038_s23  ;;  %v2212_v26 = vadd.f32 %v2211_v52, %v11681_v15  ;;  %v2754_v11 = vsub.s32 5, %v14706_v37  ;;  %v10027_v52 = vld [vmem:[%s14342_s10] sm:$0xff] }
 0x24b   : > { %v2622_v10 = vadd.f32 1e-05, %v2590_v24  ;;  %v11749_v12 = vpop.f32.mrf.mxu1  ;;  %9027 = vmatpush3.xpose.msk.msra.mxu1 %vm3125_vm1, %v11733_v27 }
 0x24c   : > { %9757 = vrsqrt.f32 %v2621_v23  ;;  %9028 = vmatprep.subr.msk.mxu1 %vm3125_vm1, %v11746_v47  ;;  %v11766_v23 = vadd.f32 %v8856_v56, %v11726_v40 }
 0x24d   : > { %9759 = vrsqrt.f32 %v2622_v10  ;;  %v11757_v3 = vpop.f32.mrf.mxu1  ;;  %v11771_v10 = vrot.slane %v10027_v52, %v2718_v57 }
 0x24e   : > { %5221 = vrot.lane.b32.xlu1 %v2212_v26, %s10038_s23  ;;  %14707 = vst [vmem:[#allocation9_spill] sm:$0xff] %v11766_v23 }
 0x24f   : > { %v2503_v4 = vpop.xlane.xlu1 %2502  ;;  %v11761_v24 = vpop.f32.mrf.mxu1  ;;  %9029 = vmatpush3.xpose.msk.msra.mxu1 %vm3125_vm1, %v11746_v47  ;;  %v11779_v47 = vrot.slane %v10027_v52, %v2754_v11  ;;  %v11798_v52 = vadd.f32 %v11730_v6, %v11681_v15 }
 0x250   : > { %v2591_v54 = vmul.f32 0.03125, %v2503_v4  ;;  %v2506_v22 = vpop.xlane.xlu0 %2505  ;;  %9042 = vmatprep.subr.msk.mxu1 %vm3125_vm1, %v2217_v0 }
 0x251   : > { %v9756_v37 = vpop.eup %9755  ;;  %v2592_v27 = vmul.f32 0.03125, %v2506_v22  ;;  %v11774_v9 = vpop.f32.mrf.mxu1 }
 0x252   : > { %v2623_v19 = vadd.f32 1e-05, %v2591_v54  ;;  %9031 = vmatmul.mubr.msk.f32.vlgmr.msra.gmra.mxu1 %vm3125_vm1, %v11766_v23  ;;  %v2684_v56 = vmul.f32 %v9756_v37, %v11361_v8 }
 0x253   : > { %v2624_v13 = vadd.f32 1e-05, %v2592_v27  ;;  %v11781_v63 = vpop.f32.mrf.mxu1  ;;  %9043 = vmatpush3.xpose.msk.msra.mxu1 %vm3125_vm1, %v2217_v0 }
 0x254   : > { %9761 = vrsqrt.f32 %v2623_v19  ;;  %9044 = vmatprep.subr.msk.mxu1 %vm3125_vm1, %v2212_v26  ;;  %v2720_v22 = vmul.f32 %v11771_v10, %v2684_v56 }
 0x255   : > { %9763 = vrsqrt.f32 %v2624_v13  ;;  %v11786_v57 = vpop.f32.mrf.mxu1 }
 0x256   : > { %v2756_v54 = vadd.f32 %v11779_v47, %v2720_v22 }
 0x257   : > { %v2509_v4 = vpop.xlane.xlu1 %2508  ;;  %v8945_v23 = vpop.f32.mrf.mxu1  ;;  %9045 = vmatpush3.xpose.msk.msra.mxu1 %vm3125_vm1, %v2212_v26 }
 0x258   : > { %v2593_v8 = vmul.f32 0.03125, %v2509_v4  ;;  %v11791_v27 = vadd.f32 %v8945_v23, %v11681_v15  ;;  %v2512_v37 = vpop.xlane.xlu0 %2511  ;;  %8966 = vmatprep.mubr.msk.f32.mxu0 %vm672_vm0, %v2756_v54  ;;  %9046 = vmatprep.subr.msk.mxu1 %vm3125_vm1, %v11714_v2 }
 0x259   : > { %v9758_v19 = vpop.eup %9757  ;;  %v2594_v13 = vmul.f32 0.03125, %v2512_v37  ;;  %v2251_v0 = vpop.f32.mrf.mxu1 }
 0x25a   : > { %14708 = vst [vmem:[#allocation11_spill] sm:$0xff] %v11791_v27  ;;  %v9760_v11 = vpop.eup %9759  ;;  %v2685_v26 = vmul.f32 %v9758_v19, %v11383_v29  ;;  %v2625_v56 = vadd.f32 1e-05, %v2593_v8  ;;  %9070 = vmatprep.subr.msk.mxu0 %vm3125_vm1, %v11791_v27 }
 0x25b   : > { %v2626_v23 = vadd.f32 1e-05, %v2594_v13  ;;  %v8859_v22 = vpop.f32.mrf.mxu0  ;;  %v11803_v54 = vpop.f32.mrf.mxu1  ;;  %9047 = vmatpush3.xpose.msk.msra.mxu1 %vm3125_vm1, %v11714_v2  ;;  %v2686_v4 = vmul.f32 %v9760_v11, %v11387_v34  ;;  %v11820_v34 = vadd.f32 %v11701_v46, %v11681_v15 }
 0x25c   : > { %v2721_v37 = vmul.f32 %v11771_v10, %v2685_v26  ;;  %9765 = vrsqrt.f32 %v2625_v56  ;;  %9048 = vmatprep.subr.msk.mxu1 %vm3125_vm1, %v11798_v52  ;;  %v11828_v56 = vadd.f32 %v8859_v22, %v11726_v40 }
 0x25d   : > { %9767 = vrsqrt.f32 %v2626_v23  ;;  %v1338_v29 = vpop.f32.mrf.mxu0  ;;  %v11811_v6 = vpop.f32.mrf.mxu1  ;;  %v2722_v8 = vmul.f32 %v11771_v10, %v2686_v4 }
 0x25e   : > { %v11815_v19 = vadd.f32 %v1338_v29, %v11726_v40  ;;  %v2757_v13 = vadd.f32 %v11779_v47, %v2721_v37  ;;  %14710 = vst [vmem:[#allocation12_spill] sm:$0xff] %v11828_v56  ;;  %v11834_v37 = vadd.f32 %v2251_v0, %v11681_v15 }
 0x25f   : > { %v2515_v2 = vpop.xlane.xlu1 %2514  ;;  %v11822_v11 = vpop.f32.mrf.mxu1  ;;  %9049 = vmatpush3.xpose.msk.msra.mxu1 %vm3125_vm1, %v11798_v52  ;;  %v2758_v26 = vadd.f32 %v11779_v47, %v2722_v8 }
 0x260   : > { %14709 = vst [vmem:[#allocation10_spill] sm:$0xff] %v11815_v19  ;;  %v2595_v23 = vmul.f32 0.03125, %v2515_v2  ;;  %v2518_v4 = vpop.xlane.xlu0 %2517  ;;  %8967 = vmatmul.mubr.msk.f32.vlgmr.msra.gmra.mxu0 %vm672_vm0, %v2757_v13  ;;  %9033 = vmatprep.mubr.msk.f32.mxu1 %vm3125_vm1, %v11815_v19  ;;  %14711 = vst [vmem:[#allocation13_spill] sm:$0xff] %v11834_v37  ;;  %v11844_v13 = vadd.f32 %v11706_v28, %v11681_v15  ;;  %v11857_v28 = vadd.f32 %v11781_v63, %v11681_v15 }
 0x261   : > { %v9762_v46 = vpop.eup %9761  ;;  %v2596_v29 = vmul.f32 0.03125, %v2518_v4  ;;  %9050 = vmatprep.subr.msk.mxu1 %vm3125_vm1, %v11820_v34  ;;  %9071 = vmatpush3.xpose.msk.msra.mxu0 %vm3125_vm1, %v11791_v27  ;;  %v11840_v22 = vpop.f32.mrf.mxu1 }
 0x262   : > { %v9764_v8 = vpop.eup %9763  ;;  %v2627_v2 = vadd.f32 1e-05, %v2595_v23  ;;  %8969 = vmatprep.mubr.msk.f32.mxu0 %vm672_vm0, %v2758_v26  ;;  %9034 = vmatmul.mubr.msk.f32.gmra.mxu1 %vm3125_vm1, %v11828_v56  ;;  %v2687_v0 = vmul.f32 %v9762_v46, %v11411_v41 }
 0x263   : > { %v2628_v4 = vadd.f32 1e-05, %v2596_v29  ;;  %9072 = vmatprep.subr.msk.mxu0 %vm3125_vm1, %v11834_v37  ;;  %v8862_v19 = vpop.f32.mrf.mxu0  ;;  %9051 = vmatpush3.xpose.msk.msra.mxu1 %vm3125_vm1, %v11820_v34  ;;  %v2688_v27 = vmul.f32 %v9764_v8, %v11415_v43  ;;  %v11859_v26 = vpop.f32.mrf.mxu1 }
 0x264   : > { %9769 = vrsqrt.f32 %v2627_v2  ;;  %v2524_v23 = vpop.xlane.xlu0 %2523  ;;  %9052 = vmatprep.subr.msk.mxu1 %vm3125_vm1, %v11844_v13  ;;  %v2723_v41 = vmul.f32 %v11771_v10, %v2687_v0  ;;  %v11875_v2 = vadd.f32 %v11692_v58, %v11681_v15 }
 0x265   : > { %9771 = vrsqrt.f32 %v2628_v4  ;;  %v2598_v46 = vmul.f32 0.03125, %v2524_v23  ;;  %9073 = vmatpush3.xpose.msk.msra.mxu0 %vm3125_vm1, %v11834_v37  ;;  %v1348_v29 = vpop.f32.mrf.mxu0  ;;  %v2724_v43 = vmul.f32 %v11771_v10, %v2688_v27  ;;  %v11881_v27 = vadd.f32 %v8862_v19, %v11726_v40 }
 0x266   : > { %v11868_v63 = vadd.f32 %v1348_v29, %v11726_v40  ;;  %9074 = vmatprep.subr.msk.mxu0 %vm3125_vm1, %v11857_v28  ;;  %v2759_v8 = vadd.f32 %v11779_v47, %v2723_v41  ;;  %v11883_v29 = vpop.f32.mrf.mxu1  ;;  %v11890_v41 = vadd.f32 %v11786_v57, %v11681_v15 }
 0x267   : > { %v2630_v0 = vadd.f32 1e-05, %v2598_v46  ;;  %v2521_v4 = vpop.xlane.xlu1 %2520  ;;  %9053 = vmatpush3.xpose.msk.msra.mxu1 %vm3125_vm1, %v11844_v13  ;;  %v2760_v23 = vadd.f32 %v11779_v47, %v2724_v43  ;;  %14713 = vst [vmem:[#allocation21_spill] sm:$0xff] %v11881_v27  ;;  %v11898_v43 = vadd.f32 %v11696_v20, %v11681_v15 }
 0x268   : > { %14712 = vst [vmem:[#allocation15_spill] sm:$0xff] %v11868_v63  ;;  %v2597_v56 = vmul.f32 0.03125, %v2521_v4  ;;  %v2530_v37 = vpop.xlane.xlu0 %2529  ;;  %8970 = vmatmul.mubr.msk.f32.gmra.mxu0 %vm672_vm0, %v2759_v8  ;;  %9036 = vmatprep.mubr.msk.f32.mxu1 %vm3125_vm1, %v11868_v63 }
 0x269   : > { %v9766_v58 = vpop.eup %9765  ;;  %9773 = vrsqrt.f32 %v2630_v0  ;;  %v2600_v46 = vmul.f32 0.03125, %v2530_v37  ;;  %9054 = vmatprep.subr.msk.mxu1 %vm3125_vm1, %v11875_v2  ;;  %9075 = vmatpush3.xpose.msk.msra.mxu0 %vm3125_vm1, %v11857_v28 }
 0x26a   : > { %v9768_v19 = vpop.eup %9767  ;;  %v2629_v8 = vadd.f32 1e-05, %v2597_v56  ;;  %8972 = vmatprep.mubr.msk.f32.mxu0 %vm672_vm0, %v2760_v23  ;;  %9037 = vmatmul.mubr.msk.f32.gmra.mxu1 %vm3125_vm1, %v11881_v27  ;;  %v2689_v57 = vmul.f32 %v9766_v58, %v11443_v18  ;;  %v11911_v56 = vadd.f32 %v11761_v24, %v11681_v15  ;;  %v8957_v23 = vpop.f32.mrf.mxu1 }
 0x26b   : > { %v2632_v37 = vadd.f32 1e-05, %v2600_v46  ;;  %9076 = vmatprep.subr.msk.mxu0 %vm3125_vm1, %v11890_v41  ;;  %v2527_v0 = vpop.xlane.xlu1 %2526  ;;  %v8865_v4 = vpop.f32.mrf.mxu0  ;;  %9055 = vmatpush3.xpose.msk.msra.mxu1 %vm3125_vm1, %v11875_v2  ;;  %v2690_v20 = vmul.f32 %v9768_v19, %v11447_v7 }
 0x26c   : > { %14714 = vst [vmem:[#allocation14_spill] sm:$0xff] %v11911_v56  ;;  %9775 = vrsqrt.f32 %v2629_v8  ;;  %v2599_v63 = vmul.f32 0.03125, %v2527_v0  ;;  %v2536_v27 = vpop.xlane.xlu0 %2535  ;;  %9056 = vmatprep.subr.msk.mxu1 %vm3125_vm1, %v11898_v43  ;;  %v2725_v18 = vmul.f32 %v11771_v10, %v2689_v57  ;;  %v11926_v0 = vadd.f32 %v8957_v23, %v11681_v15 }
 0x26d   : > { %9777 = vrsqrt.f32 %v2632_v37  ;;  %v2602_v58 = vmul.f32 0.03125, %v2536_v27  ;;  %9077 = vmatpush3.xpose.msk.msra.mxu0 %vm3125_vm1, %v11890_v41  ;;  %v1358_v46 = vpop.f32.mrf.mxu0  ;;  %v2726_v7 = vmul.f32 %v11771_v10, %v2690_v20 }
 0x26e   : > { %v2631_v19 = vadd.f32 1e-05, %v2599_v63  ;;  %v11920_v24 = vadd.f32 %v1358_v46, %v11726_v40  ;;  %9078 = vmatprep.subr.msk.mxu0 %vm3125_vm1, %v11911_v56  ;;  %v2761_v8 = vadd.f32 %v11779_v47, %v2725_v18  ;;  %v11932_v63 = vadd.f32 %v8865_v4, %v11726_v40 }
 0x26f   : > { %v2634_v57 = vadd.f32 1e-05, %v2602_v58  ;;  %v2533_v27 = vpop.xlane.xlu1 %2532  ;;  %9057 = vmatpush3.xpose.msk.msra.mxu1 %vm3125_vm1, %v11898_v43  ;;  %v2762_v37 = vadd.f32 %v11779_v47, %v2726_v7  ;;  %v11939_v18 = vadd.f32 %v11774_v9, %v11681_v15 }
 0x270   : > { %14715 = vst [vmem:[#allocation16_spill] sm:$0xff] %v11920_v24  ;;  %9779 = vrsqrt.f32 %v2631_v19  ;;  %14716 = vst [vmem:[#allocation18_spill] sm:$0xff] %v11932_v63  ;;  %v2601_v20 = vmul.f32 0.03125, %v2533_v27  ;;  %v2542_v46 = vpop.xlane.xlu0 %2541  ;;  %8973 = vmatmul.mubr.msk.f32.gmra.mxu0 %vm672_vm0, %v2761_v8  ;;  %9039 = vmatprep.mubr.msk.f32.mxu1 %vm3125_vm1, %v11920_v24 }
 0x271   : > { %v9770_v23 = vpop.eup %9769  ;;  %9781 = vrsqrt.f32 %v2634_v57  ;;  %v2604_v58 = vmul.f32 0.03125, %v2542_v46  ;;  %9079 = vmatpush3.xpose.msk.msra.mxu0 %vm3125_vm1, %v11911_v56  ;;  %9098 = vmatprep.subr.msk.mxu1 %vm3125_vm1, %v11926_v0  ;;  %v11954_v46 = vadd.f32 %v11749_v12, %v11681_v15 }
 0x272   : > { %v9772_v4 = vpop.eup %9771  ;;  %v2633_v7 = vadd.f32 1e-05, %v2601_v20  ;;  %8975 = vmatprep.mubr.msk.f32.mxu0 %vm672_vm0, %v2762_v37  ;;  %9040 = vmatmul.mubr.msk.f32.gmra.mxu1 %vm3125_vm1, %v11932_v63  ;;  %v2691_v19 = vmul.f32 %v9770_v23, %v11466_v45 }
 0x273   : > { %v2636_v8 = vadd.f32 1e-05, %v2604_v58  ;;  %9080 = vmatprep.subr.msk.mxu0 %vm3125_vm1, %v11939_v18  ;;  %v2539_v9 = vpop.xlane.xlu1 %2538  ;;  %v8868_v57 = vpop.f32.mrf.mxu0  ;;  %v2692_v27 = vmul.f32 %v9772_v4, %v11470_v31  ;;  %14717 = vst [vmem:[#allocation24_spill] sm:$0xff] %v11954_v46 }
 0x274   : > { %9783 = vrsqrt.f32 %v2633_v7  ;;  %v2603_v20 = vmul.f32 0.03125, %v2539_v9  ;;  %v2548_v37 = vpop.xlane.xlu0 %2547  ;;  %v2727_v24 = vmul.f32 %v11771_v10, %v2691_v19  ;;  %v2291_v4 = vpop.f32.mrf.mxu1 }
 0x275   : > { %9785 = vrsqrt.f32 %v2636_v8  ;;  %v2606_v63 = vmul.f32 0.03125, %v2548_v37  ;;  %9081 = vmatpush3.xpose.msk.msra.mxu0 %vm3125_vm1, %v11939_v18  ;;  %v1368_v45 = vpop.f32.mrf.mxu0  ;;  %v2728_v23 = vmul.f32 %v11771_v10, %v2692_v27  ;;  %v11970_v27 = vadd.f32 %v11757_v3, %v11681_v15 }
 0x276   : > { %v9774_v58 = vpop.eup %9773  ;;  %v2635_v56 = vadd.f32 1e-05, %v2603_v20  ;;  %v11961_v31 = vadd.f32 %v1368_v45, %v11726_v40  ;;  %9082 = vmatprep.subr.msk.mxu0 %vm3125_vm1, %v11954_v46  ;;  %v2763_v12 = vadd.f32 %v11779_v47, %v2727_v24  ;;  %v11973_v20 = vadd.f32 %v8868_v57, %v11726_v40 }
 0x277   : > { %v2638_v7 = vadd.f32 1e-05, %v2606_v63  ;;  %v2545_v19 = vpop.xlane.xlu1 %2544  ;;  %v2764_v8 = vadd.f32 %v11779_v47, %v2728_v23  ;;  %v2694_v9 = vmul.f32 %v9774_v58, %v11481_v16  ;;  %14718 = vst [vmem:[#allocation17_spill] sm:$0xff] %v11970_v27  ;;  %v11982_v3 = vadd.f32 %v2291_v4, %v11681_v15 }
 0x278   : > { %9787 = vrsqrt.f32 %v2635_v56  ;;  %v2605_v37 = vmul.f32 0.03125, %v2545_v19  ;;  %v2554_v45 = vpop.xlane.xlu0 %2553  ;;  %8976 = vmatmul.mubr.msk.f32.gmra.mxu0 %vm672_vm0, %v2763_v12  ;;  %9058 = vmatprep.mubr.msk.f32.mxu1 %vm3125_vm1, %v11961_v31  ;;  %v11996_v19 = vld [vmem:[%s14338_s6] sm:$0xff] }
 0x279   : > { %v9776_v24 = vpop.eup %9775  ;;  %9789 = vrsqrt.f32 %v2638_v7  ;;  %v2608_v63 = vmul.f32 0.03125, %v2554_v45  ;;  %9083 = vmatpush3.xpose.msk.msra.mxu0 %vm3125_vm1, %v11954_v46  ;;  %8978 = vmatprep.mubr.msk.f32.mxu0 %vm672_vm0, %v2764_v8  ;;  %v2730_v7 = vmul.f32 %v11771_v10, %v2694_v9 }
 0x27a   : > { %v9778_v16 = vpop.eup %9777  ;;  %v2637_v56 = vadd.f32 1e-05, %v2605_v37  ;;  %9059 = vmatmul.mubr.msk.f32.vlgmr.msra.gmra.mxu1 %vm3125_vm1, %v11973_v20  ;;  %9084 = vmatprep.subr.msk.mxu0 %vm3125_vm1, %v11970_v27  ;;  %v2693_v57 = vmul.f32 %v9776_v24, %v11500_v39  ;;  %v12003_v24 = vadd.f32 %v11859_v26, %v11681_v15 }
 0x27b   : > { %v2640_v23 = vadd.f32 1e-05, %v2608_v63  ;;  %9099 = vmatpush3.xpose.msk.msra.mxu1 %vm3125_vm1, %v11926_v0  ;;  %v2551_v58 = vpop.xlane.xlu1 %2550  ;;  %v8871_v12 = vpop.f32.mrf.mxu0  ;;  %v2696_v4 = vmul.f32 %v9778_v16, %v11504_v5 }
 0x27c   : > { %9791 = vrsqrt.f32 %v2637_v56  ;;  %9100 = vmatprep.subr.msk.mxu1 %vm3125_vm1, %v11982_v3  ;;  %v2607_v39 = vmul.f32 0.03125, %v2551_v58  ;;  %v2560_v8 = vpop.xlane.xlu0 %2559  ;;  %v2729_v37 = vmul.f32 %v11771_v10, %v2693_v57 }
 0x27d   : > { %v9780_v45 = vpop.eup %9779  ;;  %9793 = vrsqrt.f32 %v2640_v23  ;;  %v2610_v5 = vmul.f32 0.03125, %v2560_v8  ;;  %9085 = vmatpush3.xpose.msk.msra.mxu0 %vm3125_vm1, %v11970_v27  ;;  %v1378_v9 = vpop.f32.mrf.mxu0  ;;  %v2766_v23 = vadd.f32 %v11779_v47, %v2730_v7  ;;  %v2732_v8 = vmul.f32 %v11771_v10, %v2696_v4 }
 0x27e   : > { %v9782_v63 = vpop.eup %9781  ;;  %v2639_v16 = vadd.f32 1e-05, %v2607_v39  ;;  %v12008_v56 = vadd.f32 %v1378_v9, %v11726_v40  ;;  %v2765_v58 = vadd.f32 %v11779_v47, %v2729_v37  ;;  %v2695_v57 = vmul.f32 %v9780_v45, %v11516_v44  ;;  %9126 = vmatprep.subr.mxu0 %v11996_v19 }
 0x27f   : > { %v2642_v46 = vadd.f32 1e-05, %v2610_v5  ;;  %9101 = vmatpush3.xpose.msk.msra.mxu1 %vm3125_vm1, %v11982_v3  ;;  %v2557_v26 = vpop.xlane.xlu1 %2556  ;;  %v2698_v39 = vmul.f32 %v9782_v63, %v11520_v35  ;;  %v12019_v9 = vadd.f32 %v8871_v12, %v11726_v40  ;;  %v12027_v7 = vadd.f32 %v11883_v29, %v11681_v15 }
 0x280   : > { %9795 = vrsqrt.f32 %v2639_v16  ;;  %9102 = vmatprep.subr.msk.mxu1 %vm3125_vm1, %v12003_v24  ;;  %v2609_v44 = vmul.f32 0.03125, %v2557_v26  ;;  %v8874_v37 = vpop.f32.mrf.mxu0  ;;  %v2566_v45 = vpop.xlane.xlu0 %2565  ;;  %8979 = vmatmul.mubr.msk.f32.gmra.mxu0 %vm672_vm0, %v2765_v58  ;;  %v2731_v5 = vmul.f32 %v11771_v10, %v2695_v57 }
 0x281   : > { %v9784_v27 = vpop.eup %9783  ;;  %9797 = vrsqrt.f32 %v2642_v46  ;;  %v2612_v35 = vmul.f32 0.03125, %v2566_v45  ;;  %9061 = vmatprep.mubr.msk.f32.mxu1 %vm3125_vm1, %v12008_v56  ;;  %8981 = vmatprep.mubr.msk.f32.mxu0 %vm672_vm0, %v2766_v23  ;;  %v2734_v29 = vmul.f32 %v11771_v10, %v2698_v39  ;;  %v2768_v23 = vadd.f32 %v11779_v47, %v2732_v8 }
 0x282   : > { %v9786_v12 = vpop.eup %9785  ;;  %v2641_v4 = vadd.f32 1e-05, %v2609_v44  ;;  %v1388_v63 = vpop.f32.mrf.mxu0  ;;  %9062 = vmatmul.mubr.msk.f32.gmra.mxu1 %vm3125_vm1, %v12019_v9  ;;  %v2767_v16 = vadd.f32 %v11779_v47, %v2731_v5  ;;  %v2697_v58 = vmul.f32 %v9784_v27, %v11535_v21  ;;  %v12045_v45 = vadd.f32 %v8874_v37, %v11726_v40 }
 0x283   : > { %v2644_v57 = vadd.f32 1e-05, %v2612_v35  ;;  %v12038_v46 = vadd.f32 %v1388_v63, %v11726_v40  ;;  %9103 = vmatpush3.xpose.msk.msra.mxu1 %vm3125_vm1, %v12003_v24  ;;  %v2563_v26 = vpop.xlane.xlu1 %2562  ;;  %v2700_v44 = vmul.f32 %v9786_v12, %v11539_v38  ;;  %v12053_v8 = vadd.f32 %v11822_v11, %v11681_v15 }
 0x284   : > { %9799 = vrsqrt.f32 %v2641_v4  ;;  %9104 = vmatprep.subr.msk.mxu1 %vm3125_vm1, %v12027_v7  ;;  %v2611_v21 = vmul.f32 0.03125, %v2563_v26  ;;  %v8877_v27 = vpop.f32.mrf.mxu0  ;;  %v2572_v39 = vpop.xlane.xlu0 %2571  ;;  %8982 = vmatmul.mubr.msk.f32.gmra.mxu0 %vm672_vm0, %v2767_v16  ;;  %v2733_v5 = vmul.f32 %v11771_v10, %v2697_v58  ;;  %v2770_v16 = vadd.f32 %v11779_v47, %v2734_v29 }
 0x285   : > { %v9788_v35 = vpop.eup %9787  ;;  %9801 = vrsqrt.f32 %v2644_v57  ;;  %v2614_v38 = vmul.f32 0.03125, %v2572_v39  ;;  %9064 = vmatprep.mubr.msk.f32.mxu1 %vm3125_vm1, %v12038_v46  ;;  %8984 = vmatprep.mubr.msk.f32.mxu0 %vm672_vm0, %v2768_v23  ;;  %v2736_v23 = vmul.f32 %v11771_v10, %v2700_v44  ;;  %v12071_v39 = vadd.f32 %v8877_v27, %v11726_v40 }
 0x286   : > { %v9790_v37 = vpop.eup %9789  ;;  %v2643_v12 = vadd.f32 1e-05, %v2611_v21  ;;  %v1398_v4 = vpop.f32.mrf.mxu0  ;;  %9065 = vmatmul.mubr.msk.f32.gmra.mxu1 %vm3125_vm1, %v12045_v45  ;;  %v2769_v63 = vadd.f32 %v11779_v47, %v2733_v5  ;;  %v2699_v11 = vmul.f32 %v9788_v35, %v11552_v50  ;;  %v12082_v44 = vadd.f32 %v11840_v22, %v11681_v15 }
 0x287   : > { %v2646_v58 = vadd.f32 1e-05, %v2614_v38  ;;  %v12064_v57 = vadd.f32 %v1398_v4, %v11726_v40  ;;  %9105 = vmatpush3.xpose.msk.msra.mxu1 %vm3125_vm1, %v12027_v7  ;;  %v2569_v26 = vpop.xlane.xlu1 %2568  ;;  %v2702_v21 = vmul.f32 %v9790_v37, %v11556_v49 }
 0x288   : > { %9803 = vrsqrt.f32 %v2643_v12  ;;  %9106 = vmatprep.subr.msk.mxu1 %vm3125_vm1, %v12053_v8  ;;  %v2613_v50 = vmul.f32 0.03125, %v2569_v26  ;;  %v2578_v29 = vpop.xlane.xlu0 %2577  ;;  %8985 = vmatmul.mubr.msk.f32.gmra.mxu0 %vm672_vm0, %v2769_v63  ;;  %v2735_v5 = vmul.f32 %v11771_v10, %v2699_v11  ;;  %v12084_v37 = vpop.f32.mrf.mxu0  ;;  %v2772_v11 = vadd.f32 %v11779_v47, %v2736_v23 }
 0x289   : > { %v9792_v35 = vpop.eup %9791  ;;  %9805 = vrsqrt.f32 %v2646_v58  ;;  %v2616_v38 = vmul.f32 0.03125, %v2578_v29  ;;  %9067 = vmatprep.mubr.msk.f32.mxu1 %vm3125_vm1, %v12064_v57  ;;  %8987 = vmatprep.mubr.msk.f32.mxu0 %vm672_vm0, %v2770_v16  ;;  %v2738_v22 = vmul.f32 %v11771_v10, %v2702_v21  ;;  %v12102_v21 = vadd.f32 %v11803_v54, %v11681_v15 }
 0x28a   : > { %v9794_v49 = vpop.eup %9793  ;;  %v2645_v27 = vadd.f32 1e-05, %v2613_v50  ;;  %9068 = vmatmul.mubr.msk.f32.gmra.mxu1 %vm3125_vm1, %v12071_v39  ;;  %v2771_v12 = vadd.f32 %v11779_v47, %v2735_v5  ;;  %v2701_v4 = vmul.f32 %v9792_v35, %v11569_v62 }
 0x28b   : > { %v2648_v63 = vadd.f32 1e-05, %v2616_v38  ;;  %9107 = vmatpush3.xpose.msk.msra.mxu1 %vm3125_vm1, %v12053_v8  ;;  %v2575_v16 = vpop.xlane.xlu1 %2574  ;;  %v2704_v58 = vmul.f32 %v9794_v49, %v11573_v14  ;;  %v12104_v14 = vpop.f32.mrf.mxu0 }
 0x28c   : > { %9807 = vrsqrt.f32 %v2645_v27  ;;  %9108 = vmatprep.subr.msk.mxu1 %vm3125_vm1, %v12082_v44  ;;  %v2615_v26 = vmul.f32 0.03125, %v2575_v16  ;;  %v2584_v50 = vpop.xlane.xlu0 %2583  ;;  %8988 = vmatmul.mubr.msk.f32.gmra.mxu0 %vm672_vm0, %v2771_v12  ;;  %v2737_v62 = vmul.f32 %v11771_v10, %v2701_v4  ;;  %v2774_v4 = vadd.f32 %v11779_v47, %v2738_v22 }
 0x28d   : > { %v9796_v29 = vpop.eup %9795  ;;  %9809 = vrsqrt.f32 %v2648_v63  ;;  %v2618_v5 = vmul.f32 0.03125, %v2584_v50  ;;  %8990 = vmatprep.mubr.msk.f32.mxu0 %vm672_vm0, %v2772_v11  ;;  %v2740_v63 = vmul.f32 %v11771_v10, %v2704_v58  ;;  %v12120_v22 = vadd.f32 %v11811_v6, %v11681_v15  ;;  %v12122_v58 = vpop.f32.mrf.mxu0 }
 0x28e   : > { %v9798_v23 = vpop.eup %9797  ;;  %v2647_v35 = vadd.f32 1e-05, %v2615_v26  ;;  %v2773_v38 = vadd.f32 %v11779_v47, %v2737_v62  ;;  %v2703_v49 = vmul.f32 %v9796_v29, %v11585_v30 }
 0x28f   : > { %v2650_v27 = vadd.f32 1e-05, %v2618_v5  ;;  %9109 = vmatpush3.xpose.msk.msra.mxu1 %vm3125_vm1, %v12082_v44  ;;  %v2581_v12 = vpop.xlane.xlu1 %2580  ;;  %v2706_v16 = vmul.f32 %v9798_v23, %v11589_v59  ;;  %v2776_v5 = vadd.f32 %v11779_v47, %v2740_v63 }
 0x290   : > { %9811 = vrsqrt.f32 %v2647_v35  ;;  %9110 = vmatprep.subr.msk.mxu1 %vm3125_vm1, %v12102_v21  ;;  %v2617_v54 = vmul.f32 0.03125, %v2581_v12  ;;  %8991 = vmatmul.mubr.msk.f32.gmra.mxu0 %vm672_vm0, %v2773_v38  ;;  %v2739_v30 = vmul.f32 %v11771_v10, %v2703_v49  ;;  %v12136_v49 = vpop.f32.mrf.mxu0 }
 0x291   : > { %v9800_v11 = vpop.eup %9799  ;;  %9813 = vrsqrt.f32 %v2650_v27  ;;  %8993 = vmatprep.mubr.msk.f32.mxu0 %vm672_vm0, %v2774_v4  ;;  %v2742_v23 = vmul.f32 %v11771_v10, %v2706_v16 }
 0x292   : > { %v9802_v26 = vpop.eup %9801  ;;  %v2649_v59 = vadd.f32 1e-05, %v2617_v54  ;;  %v2775_v50 = vadd.f32 %v11779_v47, %v2739_v30  ;;  %v2705_v62 = vmul.f32 %v9800_v11, %v11599_v61 }
 0x293   : > { %9111 = vmatpush3.xpose.msk.msra.mxu1 %vm3125_vm1, %v12102_v21  ;;  %v2587_v29 = vpop.xlane.xlu1 %2586  ;;  %v2708_v35 = vmul.f32 %v9802_v26, %v11603_v1  ;;  %v2778_v4 = vadd.f32 %v11779_v47, %v2742_v23 }
 0x294   : > { %9815 = vrsqrt.f32 %v2649_v59  ;;  %9112 = vmatprep.subr.msk.mxu1 %vm3125_vm1, %v12120_v22  ;;  %v2619_v15 = vmul.f32 0.03125, %v2587_v29  ;;  %8994 = vmatmul.mubr.msk.f32.gmra.mxu0 %vm672_vm0, %v2775_v50  ;;  %v2741_v6 = vmul.f32 %v11771_v10, %v2705_v62  ;;  %v12145_v54 = vpop.f32.mrf.mxu0 }
 0x295   : > { %v9804_v61 = vpop.eup %9803  ;;  %8996 = vmatprep.mubr.msk.f32.mxu0 %vm672_vm0, %v2776_v5  ;;  %v2744_v63 = vmul.f32 %v11771_v10, %v2708_v35 }
 0x296   : > { %v9806_v38 = vpop.eup %9805  ;;  %v2651_v27 = vadd.f32 1e-05, %v2619_v15  ;;  %v2777_v12 = vadd.f32 %v11779_v47, %v2741_v6  ;;  %v2707_v1 = vmul.f32 %v9804_v61, %v11613_v55  ;;  %v1428_v29 = vpop.f32.mrf.mxu0 }
 0x297   : > { %9113 = vmatpush3.xpose.msk.msra.mxu1 %vm3125_vm1, %v12120_v22  ;;  %v2710_v16 = vmul.f32 %v9806_v38, %v11617_v33  ;;  %v2780_v50 = vadd.f32 %v11779_v47, %v2744_v63 }
 0x298   : > { %9817 = vrsqrt.f32 %v2651_v27  ;;  %8997 = vmatmul.mubr.msk.f32.gmra.mxu0 %vm672_vm0, %v2777_v12  ;;  %v2743_v30 = vmul.f32 %v11771_v10, %v2707_v1 }
 0x299   : > { %v9808_v11 = vpop.eup %9807  ;;  %8999 = vmatprep.mubr.msk.f32.mxu0 %vm672_vm0, %v2778_v4  ;;  %v2746_v62 = vmul.f32 %v11771_v10, %v2710_v16 }
 0x29a   : > { %v9810_v55 = vpop.eup %9809  ;;  %v2779_v26 = vadd.f32 %v11779_v47, %v2743_v30  ;;  %v2709_v59 = vmul.f32 %v9808_v11, %v11627_v32 }
 0x29b   : > { %v2712_v33 = vmul.f32 %v9810_v55, %v11631_v48  ;;  %v2782_v61 = vadd.f32 %v11779_v47, %v2746_v62 }
 0x29c   : > { %9000 = vmatmul.mubr.msk.f32.gmra.mxu0 %vm672_vm0, %v2779_v26  ;;  %v2745_v5 = vmul.f32 %v11771_v10, %v2709_v59  ;;  %v12158_v15 = vpop.f32.mrf.mxu0 }
 0x29d   : > { %v9812_v23 = vpop.eup %9811  ;;  %9002 = vmatprep.mubr.msk.f32.mxu0 %vm672_vm0, %v2780_v50  ;;  %v2748_v38 = vmul.f32 %v11771_v10, %v2712_v33 }
 0x29e   : > { %v9814_v35 = vpop.eup %9813  ;;  %v2781_v6 = vadd.f32 %v11779_v47, %v2745_v5  ;;  %v2711_v32 = vmul.f32 %v9812_v23, %v11641_v51  ;;  %v1438_v1 = vpop.f32.mrf.mxu0  ;;  %v12194_v5 = vadd.f32 %v12104_v14, %v11726_v40 }
 0x29f   : > { %v2714_v48 = vmul.f32 %v9814_v35, %v11645_v60  ;;  %v2784_v51 = vadd.f32 %v11779_v47, %v2748_v38  ;;  %v12203_v35 = vpop.permute.xlu0 %5050  ;;  %v12233_v38 = vadd.f32 %v1428_v29, %v11726_v40  ;;  %v14719_v29 = vld [vmem:[#allocation4_spill] sm:$0xff] }
 0x2a0   : > { %9003 = vmatmul.mubr.msk.f32.gmra.mxu0 %vm672_vm0, %v2781_v6  ;;  %v2747_v27 = vmul.f32 %v11771_v10, %v2711_v32 }
 0x2a1   : > { %v9816_v12 = vpop.eup %9815  ;;  %9005 = vmatprep.mubr.msk.f32.mxu0 %vm672_vm0, %v2782_v61  ;;  %v2750_v16 = vmul.f32 %v11771_v10, %v2714_v48  ;;  %v12226_v61 = vadd.f32 %v12122_v58, %v11726_v40  ;;  %v12252_v58 = vadd.f32 %v12145_v54, %v11726_v40  ;;  %v12271_v54 = vadd.f32 %v12158_v15, %v11726_v40  ;;  %v10028_v15 = vld [vmem:[%s14337_s5] sm:$0x7] }
 0x2a2   : > { %v2783_v4 = vadd.f32 %v11779_v47, %v2747_v27  ;;  %v2713_v63 = vmul.f32 %v9816_v12, %v11655_v36 }
 0x2a3   : > { %v2786_v36 = vadd.f32 %v11779_v47, %v2750_v16 }
 0x2a4   : > { %v8892_v30 = vpop.f32.mrf.mxu0  ;;  %9006 = vmatmul.mubr.msk.f32.gmra.mxu0 %vm672_vm0, %v2783_v4  ;;  %v2749_v60 = vmul.f32 %v11771_v10, %v2713_v63  ;;  %v14720_v63 = vld [vmem:[#allocation34_spill] sm:$0xff] }
 0x2a5   : > { %v9818_v11 = vpop.eup %9817  ;;  %9008 = vmatprep.mubr.msk.f32.mxu0 %vm672_vm0, %v2784_v51  ;;  %v12182_v62 = vadd.f32 %v8892_v30, %v11726_v40  ;;  %v12289_v51 = vrot.slane %v10028_v15, %v14720_v63 }
 0x2a6   : > { %v1448_v55 = vpop.f32.mrf.mxu0  ;;  %v2785_v26 = vadd.f32 %v11779_v47, %v2749_v60  ;;  %v2715_v59 = vmul.f32 %v9818_v11, %v11663_v25 }
 0x2a7   : > { %v12178_v50 = vadd.f32 %v1448_v55, %v11726_v40 }
 0x2a8   : > { %9009 = vmatmul.mubr.msk.f32.gmra.mxu0 %vm672_vm0, %v2785_v26  ;;  %v2751_v33 = vmul.f32 %v11771_v10, %v2715_v59  ;;  %v12201_v10 = vadd.f32 %v12084_v37, %v11726_v40  ;;  %v12219_v37 = vadd.f32 %v11671_v17, %v11726_v40  ;;  %v12240_v17 = vadd.f32 %v11669_v42, %v11726_v40 }
 0x2a9   : > { %9114 = vmatprep.mubr.msk.f32.mxu1 %vm3125_vm1, %v12178_v50  ;;  %9011 = vmatprep.mubr.msk.f32.mxu0 %vm672_vm0, %v2786_v36  ;;  %v12257_v42 = vadd.f32 %v1438_v1, %v11726_v40 }
 0x2aa   : > { %9115 = vmatmul.mubr.msk.f32.vlgmr.msra.gmra.mxu1 %vm3125_vm1, %v12182_v62  ;;  %v2787_v25 = vadd.f32 %v11779_v47, %v2751_v33  ;;  %v12210_v47 = vadd.f32 %v12136_v49, %v11726_v40  ;;  %v5055_v49 = vpop.permute.xlu0 %5054 }
 0x2ac   : > { %v8895_v23 = vpop.f32.mrf.mxu0  ;;  %9012 = vmatmul.mubr.msk.f32.gmra.mxu0 %vm672_vm0, %v2787_v25  ;;  %v5053_v25 = vpop.permute.xlu1 %5052 }
 0x2ad   : > { %9086 = vmatprep.mubr.msk.f32.mxu0 %vm3125_vm1, %v12194_v5  ;;  %v12213_v14 = vadd.f32 %v8895_v23, %v11726_v40 }
 0x2ae   : > { %v1458_v6 = vpop.f32.mrf.mxu0 }
 0x2af   : > { %v12206_v32 = vadd.f32 %v1458_v6, %v11726_v40 }
 0x2b0   : > { %9087 = vmatmul.mubr.msk.f32.vlgmr.msra.gmra.mxu0 %vm3125_vm1, %v12201_v10 }
 0x2b1   : > { %9117 = vmatprep.mubr.msk.f32.mxu1 %vm3125_vm1, %v12206_v32  ;;  %9127 = vmatpush3.msra.mxu0 %v11996_v19  ;;  %v12246_v19 = vadd.f32 %v11675_v53, %v11726_v40  ;;  %v12263_v53 = vadd.f32 %v14719_v29, %v11726_v40 }
 0x2b2   : > { %9089 = vmatprep.mubr.msk.f32.mxu0 %vm3125_vm1, %v12210_v47  ;;  %9118 = vmatmul.mubr.msk.f32.gmra.mxu1 %vm3125_vm1, %v12213_v14 }
 0x2b3   : > { %9288 = vmatprep.subr.msk.mxu0 %vm3125_vm1, %v5055_v49  ;;  %9120 = vmatprep.mubr.msk.f32.mxu1 %vm3125_vm1, %v12219_v37 }
 0x2b4   : > { %9090 = vmatmul.mubr.msk.f32.gmra.mxu0 %vm3125_vm1, %v12226_v61 }
 0x2b5   : > { %9092 = vmatprep.mubr.msk.f32.mxu0 %vm3125_vm1, %v12233_v38 }
 0x2b6   : > { %9121 = vmatmul.mubr.msk.f32.gmra.mxu1 %vm3125_vm1, %v12240_v17 }
 0x2b7   : > { %9123 = vmatprep.mubr.msk.f32.mxu1 %vm3125_vm1, %v12246_v19 }
 0x2b8   : > { %9093 = vmatmul.mubr.msk.f32.gmra.mxu0 %vm3125_vm1, %v12252_v58 }
 0x2b9   : > { %9095 = vmatprep.mubr.msk.f32.mxu0 %vm3125_vm1, %v12257_v42 }
 0x2ba   : > { %9124 = vmatmul.mubr.msk.f32.gmra.mxu1 %vm3125_vm1, %v12263_v53 }
 0x2bc   : > { %9096 = vmatmul.mubr.msk.f32.gmra.mxu0 %vm3125_vm1, %v12271_v54 }
 0x312   : > { %v9032_v48 = vpop.f32.mrf.mxu1 }
 0x313   : > { %v12277_v27 = vmul.f32 0.35355338, %v9032_v48 }
 0x314   : > { %v3240_v12 = vpop.f32.mrf.mxu1 }
 0x315   : > { %v12279_v1 = vmul.f32 0.35355338, %v3240_v12  ;;  %v3774_v4 = vsel %vm3770_vm2, %v12277_v27, -inf }
 0x316   : > { %3775 = vmax.xlane.f32.xlu0 %v3774_v4 }
 0x317   : > { %v3771_v40 = vsel %vm3770_vm2, %v12279_v1, -inf }
 0x31a   : > { %3772 = vmax.xlane.f32.xlu0 %v3771_v40 }
 0x320   : > { %v8968_v16 = vpop.f32.mrf.mxu0 }
 0x321   : > { %v12297_v26 = vadd.f32 %v8968_v16, %v12289_v51 }
 0x322   : > { %v9035_v30 = vpop.f32.mrf.mxu1  ;;  %v2954_v60 = vpop.f32.mrf.mxu0 }
 0x323   : > { %v12291_v11 = vmul.f32 0.35355338, %v9035_v30  ;;  %v12294_v55 = vadd.f32 %v2954_v60, %v12289_v51 }
 0x324   : > { %v3250_v59 = vpop.f32.mrf.mxu1 }
 0x325   : > { %v12299_v36 = vmul.f32 0.35355338, %v3250_v59  ;;  %v3780_v33 = vsel %vm3770_vm2, %v12291_v11, -inf  ;;  %9128 = vmatprep.mubr.msk.f32.mxu0 %vm3125_vm1, %v12294_v55 }
 0x326   : > { %3781 = vmax.xlane.f32.xlu1 %v3780_v33  ;;  %9129 = vmatmul.mubr.msk.f32.vlgmr.msra.gmra.mxu0 %vm3125_vm1, %v12297_v26 }
 0x327   : > { %9289 = vmatpush3.xpose.msk.msra.mxu0 %vm3125_vm1, %v5055_v49  ;;  %v3777_v23 = vsel %vm3770_vm2, %v12299_v36, -inf }
 0x328   : > { %3778 = vmax.xlane.f32.xlu0 %v3777_v23  ;;  %9290 = vmatprep.subr.msk.mxu0 %vm3125_vm1, %v5053_v25  ;;  %v8971_v6 = vpop.f32.mrf.mxu0 }
 0x329   : > { %v12318_v40 = vadd.f32 %v8971_v6, %v12289_v51 }
 0x32a   : > { %v9038_v29 = vpop.f32.mrf.mxu1  ;;  %v2964_v48 = vpop.f32.mrf.mxu0 }
 0x32b   : > { %v12311_v12 = vmul.f32 0.35355338, %v9038_v29  ;;  %v12314_v4 = vadd.f32 %v2964_v48, %v12289_v51  ;;  %9291 = vmatpush3.xpose.msk.msra.mxu0 %vm3125_vm1, %v5053_v25  ;;  %14723 = vst [vmem:[#allocation27_spill] sm:$0xff] %v12318_v40 }
 0x32c   : > { %v3260_v49 = vpop.f32.mrf.mxu1  ;;  %9292 = vmatprep.subr.msk.mxu0 %vm3125_vm1, %v12203_v35 }
 0x32d   : > { %14721 = vst [vmem:[#allocation19_spill] sm:$0xff] %v12311_v12  ;;  %14722 = vst [vmem:[#allocation20_spill] sm:$0xff] %v12314_v4  ;;  %v12322_v15 = vmul.f32 0.35355338, %v3260_v49  ;;  %v3786_v16 = vsel %vm3770_vm2, %v12311_v12, -inf  ;;  %9131 = vmatprep.mubr.msk.f32.mxu0 %vm3125_vm1, %v12314_v4 }
 0x32e   : > { %3787 = vmax.xlane.f32.xlu1 %v3786_v16  ;;  %9132 = vmatmul.mubr.msk.f32.gmra.mxu0 %vm3125_vm1, %v12318_v40 }
 0x32f   : > { %14724 = vst [vmem:[#allocation23_spill] sm:$0xff] %v12322_v15  ;;  %9293 = vmatpush3.xpose.msk.msra.mxu0 %vm3125_vm1, %v12203_v35  ;;  %v3783_v30 = vsel %vm3770_vm2, %v12322_v15, -inf }
 0x330   : > { %3784 = vmax.xlane.f32.xlu0 %v3783_v30  ;;  %v8974_v60 = vpop.f32.mrf.mxu0 }
 0x331   : > { %v12340_v6 = vadd.f32 %v8974_v60, %v12289_v51 }
 0x332   : > { %v9041_v59 = vpop.f32.mrf.mxu1  ;;  %v2974_v33 = vpop.f32.mrf.mxu0 }
 0x333   : > { %v12334_v25 = vmul.f32 0.35355338, %v9041_v59  ;;  %v12337_v23 = vadd.f32 %v2974_v33, %v12289_v51  ;;  %14727 = vst [vmem:[#allocation25_spill] sm:$0xff] %v12340_v6 }
 0x334   : > { %v3270_v29 = vpop.f32.mrf.mxu1 }
 0x335   : > { %14725 = vst [vmem:[#allocation22_spill] sm:$0xff] %v12334_v25  ;;  %14726 = vst [vmem:[#allocation26_spill] sm:$0xff] %v12337_v23  ;;  %v12342_v48 = vmul.f32 0.35355338, %v3270_v29  ;;  %v3792_v35 = vsel %vm3770_vm2, %v12334_v25, -inf  ;;  %9134 = vmatprep.mubr.msk.f32.mxu0 %vm3125_vm1, %v12337_v23 }
 0x336   : > { %3793 = vmax.xlane.f32.xlu1 %v3792_v35  ;;  %9135 = vmatmul.mubr.msk.f32.gmra.mxu0 %vm3125_vm1, %v12340_v6 }
 0x337   : > { %14728 = vst [vmem:[#allocation29_spill] sm:$0xff] %v12342_v48  ;;  %v3789_v49 = vsel %vm3770_vm2, %v12342_v48, -inf }
 0x338   : > { %3790 = vmax.xlane.f32.xlu0 %v3789_v49  ;;  %v8977_v16 = vpop.f32.mrf.mxu0 }
 0x339   : > { %v12358_v29 = vadd.f32 %v8977_v16, %v12289_v51 }
 0x33a   : > { %v9060_v30 = vpop.f32.mrf.mxu1  ;;  %v2984_v60 = vpop.f32.mrf.mxu0 }
 0x33b   : > { %v12352_v59 = vmul.f32 0.35355338, %v9060_v30  ;;  %v12355_v33 = vadd.f32 %v2984_v60, %v12289_v51  ;;  %14731 = vst [vmem:[#allocation35_spill] sm:$0xff] %v12358_v29 }
 0x33d   : > { %14729 = vst [vmem:[#allocation28_spill] sm:$0xff] %v12352_v59  ;;  %14730 = vst [vmem:[#allocation31_spill] sm:$0xff] %v12355_v33  ;;  %v3798_v35 = vsel %vm3770_vm2, %v12352_v59, -inf  ;;  %9137 = vmatprep.mubr.msk.f32.mxu0 %vm3125_vm1, %v12355_v33 }
 0x33e   : > { %3799 = vmax.xlane.f32.xlu1 %v3798_v35  ;;  %9138 = vmatmul.mubr.msk.f32.gmra.mxu0 %vm3125_vm1, %v12358_v29 }
 0x340   : > { %v8980_v49 = vpop.f32.mrf.mxu0 }
 0x341   : > { %v12370_v60 = vadd.f32 %v8980_v49, %v12289_v51 }
 0x342   : > { %v2994_v63 = vpop.f32.mrf.mxu0 }
 0x343   : > { %v12367_v30 = vadd.f32 %v2994_v63, %v12289_v51  ;;  %14733 = vst [vmem:[#allocation4_spill] sm:$0xff] %v12370_v60 }
 0x344   : > { %v8983_v16 = vpop.f32.mrf.mxu0 }
 0x345   : > { %14732 = vst [vmem:[#allocation36_spill] sm:$0xff] %v12367_v30  ;;  %9140 = vmatprep.mubr.msk.f32.mxu0 %vm3125_vm1, %v12367_v30  ;;  %v12380_v25 = vadd.f32 %v8983_v16, %v12289_v51 }
 0x346   : > { %v3004_v59 = vpop.f32.mrf.mxu0  ;;  %9141 = vmatmul.mubr.msk.f32.gmra.mxu0 %vm3125_vm1, %v12370_v60 }
 0x347   : > { %v12377_v35 = vadd.f32 %v3004_v59, %v12289_v51  ;;  %14735 = vst [vmem:[#allocation38_spill] sm:$0xff] %v12380_v25 }
 0x348   : > { %v8986_v33 = vpop.f32.mrf.mxu0 }
 0x349   : > { %14734 = vst [vmem:[#allocation37_spill] sm:$0xff] %v12377_v35  ;;  %9143 = vmatprep.mubr.msk.f32.mxu0 %vm3125_vm1, %v12377_v35  ;;  %v12390_v30 = vadd.f32 %v8986_v33, %v12289_v51 }
 0x34a   : > { %v3014_v63 = vpop.f32.mrf.mxu0  ;;  %9144 = vmatmul.mubr.msk.f32.gmra.mxu0 %vm3125_vm1, %v12380_v25 }
 0x34b   : > { %v12387_v49 = vadd.f32 %v3014_v63, %v12289_v51  ;;  %14737 = vst [vmem:[#allocation40_spill] sm:$0xff] %v12390_v30 }
 0x34c   : > { %v8989_v60 = vpop.f32.mrf.mxu0 }
 0x34d   : > { %14736 = vst [vmem:[#allocation39_spill] sm:$0xff] %v12387_v49  ;;  %9146 = vmatprep.mubr.msk.f32.mxu0 %vm3125_vm1, %v12387_v49  ;;  %v12400_v35 = vadd.f32 %v8989_v60, %v12289_v51 }
 0x34e   : > { %v3024_v59 = vpop.f32.mrf.mxu0  ;;  %9147 = vmatmul.mubr.msk.f32.gmra.mxu0 %vm3125_vm1, %v12390_v30 }
 0x34f   : > { %v12397_v16 = vadd.f32 %v3024_v59, %v12289_v51  ;;  %14739 = vst [vmem:[#allocation42_spill] sm:$0xff] %v12400_v35 }
 0x350   : > { %v8992_v25 = vpop.f32.mrf.mxu0 }
 0x351   : > { %14738 = vst [vmem:[#allocation41_spill] sm:$0xff] %v12397_v16  ;;  %9149 = vmatprep.mubr.msk.f32.mxu0 %vm3125_vm1, %v12397_v16  ;;  %v12410_v49 = vadd.f32 %v8992_v25, %v12289_v51 }
 0x352   : > { %v3034_v33 = vpop.f32.mrf.mxu0  ;;  %9150 = vmatmul.mubr.msk.f32.gmra.mxu0 %vm3125_vm1, %v12400_v35 }
 0x353   : > { %v12407_v63 = vadd.f32 %v3034_v33, %v12289_v51  ;;  %14741 = vst [vmem:[#allocation44_spill] sm:$0xff] %v12410_v49 }
 0x354   : > { %v8995_v30 = vpop.f32.mrf.mxu0 }
 0x355   : > { %14740 = vst [vmem:[#allocation43_spill] sm:$0xff] %v12407_v63  ;;  %9152 = vmatprep.mubr.msk.f32.mxu0 %vm3125_vm1, %v12407_v63  ;;  %v12420_v16 = vadd.f32 %v8995_v30, %v12289_v51 }
 0x356   : > { %v3044_v60 = vpop.f32.mrf.mxu0  ;;  %9153 = vmatmul.mubr.msk.f32.gmra.mxu0 %vm3125_vm1, %v12410_v49 }
 0x357   : > { %v12417_v59 = vadd.f32 %v3044_v60, %v12289_v51  ;;  %14743 = vst [vmem:[#allocation46_spill] sm:$0xff] %v12420_v16 }
 0x358   : > { %v8998_v35 = vpop.f32.mrf.mxu0 }
 0x359   : > { %14742 = vst [vmem:[#allocation45_spill] sm:$0xff] %v12417_v59  ;;  %9155 = vmatprep.mubr.msk.f32.mxu0 %vm3125_vm1, %v12417_v59  ;;  %v12430_v63 = vadd.f32 %v8998_v35, %v12289_v51 }
 0x35a   : > { %v3054_v25 = vpop.f32.mrf.mxu0  ;;  %9156 = vmatmul.mubr.msk.f32.gmra.mxu0 %vm3125_vm1, %v12420_v16 }
 0x35b   : > { %v12427_v33 = vadd.f32 %v3054_v25, %v12289_v51  ;;  %14745 = vst [vmem:[#allocation48_spill] sm:$0xff] %v12430_v63 }
 0x35c   : > { %v9001_v49 = vpop.f32.mrf.mxu0 }
 0x35d   : > { %14744 = vst [vmem:[#allocation47_spill] sm:$0xff] %v12427_v33  ;;  %9158 = vmatprep.mubr.msk.f32.mxu0 %vm3125_vm1, %v12427_v33  ;;  %v12440_v59 = vadd.f32 %v9001_v49, %v12289_v51  ;;  %v3393_v33 = vpop.f32.mrf.mxu1 }
 0x35e   : > { %v3064_v30 = vpop.f32.mrf.mxu0  ;;  %9159 = vmatmul.mubr.msk.f32.gmra.mxu0 %vm3125_vm1, %v12430_v63 }
 0x35f   : > { %v12437_v60 = vadd.f32 %v3064_v30, %v12289_v51  ;;  %14747 = vst [vmem:[#allocation50_spill] sm:$0xff] %v12440_v59  ;;  %v9063_v49 = vpop.f32.mrf.mxu1 }
 0x360   : > { %v9004_v16 = vpop.f32.mrf.mxu0 }
 0x361   : > { %14746 = vst [vmem:[#allocation49_spill] sm:$0xff] %v12437_v60  ;;  %9161 = vmatprep.mubr.msk.f32.mxu0 %vm3125_vm1, %v12437_v60  ;;  %v12450_v63 = vadd.f32 %v9004_v16, %v12289_v51  ;;  %v3403_v16 = vpop.f32.mrf.mxu1 }
 0x362   : > { %v3074_v35 = vpop.f32.mrf.mxu0  ;;  %9162 = vmatmul.mubr.msk.f32.gmra.mxu0 %vm3125_vm1, %v12440_v59 }
 0x363   : > { %v12447_v25 = vadd.f32 %v3074_v35, %v12289_v51  ;;  %14749 = vst [vmem:[#allocation52_spill] sm:$0xff] %v12450_v63 }
 0x364   : > { %v9007_v30 = vpop.f32.mrf.mxu0 }
 0x365   : > { %14748 = vst [vmem:[#allocation51_spill] sm:$0xff] %v12447_v25  ;;  %9164 = vmatprep.mubr.msk.f32.mxu0 %vm3125_vm1, %v12447_v25  ;;  %v12460_v59 = vadd.f32 %v9007_v30, %v12289_v51  ;;  %v9066_v30 = vpop.f32.mrf.mxu1 }
 0x366   : > { %v3084_v48 = vpop.f32.mrf.mxu0  ;;  %9165 = vmatmul.mubr.msk.f32.gmra.mxu0 %vm3125_vm1, %v12450_v63 }
 0x367   : > { %v12457_v60 = vadd.f32 %v3084_v48, %v12289_v51  ;;  %14751 = vst [vmem:[#allocation54_spill] sm:$0xff] %v12460_v59 }
 0x368   : > { %v9010_v35 = vpop.f32.mrf.mxu0 }
 0x369   : > { %14750 = vst [vmem:[#allocation53_spill] sm:$0xff] %v12457_v60  ;;  %9167 = vmatprep.mubr.msk.f32.mxu0 %vm3125_vm1, %v12457_v60  ;;  %v12470_v63 = vadd.f32 %v9010_v35, %v12289_v51  ;;  %v3413_v35 = vpop.f32.mrf.mxu1 }
 0x36a   : > { %v3094_v29 = vpop.f32.mrf.mxu0  ;;  %9168 = vmatmul.mubr.msk.f32.gmra.mxu0 %vm3125_vm1, %v12460_v59  ;;  %v12522_v40 = vmul.f32 0.35355338, %v3413_v35 }
 0x36b   : > { %v12467_v25 = vadd.f32 %v3094_v29, %v12289_v51  ;;  %14753 = vst [vmem:[#allocation56_spill] sm:$0xff] %v12470_v63 }
 0x36c   : > { %v9013_v48 = vpop.f32.mrf.mxu0 }
 0x36d   : > { %14752 = vst [vmem:[#allocation55_spill] sm:$0xff] %v12467_v25  ;;  %9170 = vmatprep.mubr.msk.f32.mxu0 %vm3125_vm1, %v12467_v25  ;;  %v12480_v59 = vadd.f32 %v9013_v48, %v12289_v51  ;;  %v12488_v25 = vmul.f32 0.35355338, %v3393_v33  ;;  %v12494_v48 = vmul.f32 0.35355338, %v9063_v49 }
 0x36e   : > { %v3104_v23 = vpop.f32.mrf.mxu0  ;;  %9171 = vmatmul.mubr.msk.f32.gmra.mxu0 %vm3125_vm1, %v12470_v63 }
 0x36f   : > { %v12477_v60 = vadd.f32 %v3104_v23, %v12289_v51  ;;  %14755 = vst [vmem:[#allocation58_spill] sm:$0xff] %v12480_v59  ;;  %14757 = vst [vmem:[#allocation60_spill] sm:$0xff] %v12488_v25  ;;  %v3795_v33 = vsel %vm3770_vm2, %v12488_v25, -inf }
 0x370   : > { %v9088_v29 = vpop.f32.mrf.mxu0  ;;  %14759 = vst [vmem:[#allocation62_spill] sm:$0xff] %v12494_v48 }
 0x371   : > { %14754 = vst [vmem:[#allocation57_spill] sm:$0xff] %v12477_v60  ;;  %v12482_v12 = vmul.f32 0.35355338, %v9088_v29  ;;  %9173 = vmatprep.mubr.msk.f32.mxu0 %vm3125_vm1, %v12477_v60  ;;  %v9069_v60 = vpop.f32.mrf.mxu1 }
 0x372   : > { %v3546_v6 = vpop.f32.mrf.mxu0  ;;  %9174 = vmatmul.mubr.msk.f32.gmra.mxu0 %vm3125_vm1, %v12480_v59 }
 0x373   : > { %14756 = vst [vmem:[#allocation59_spill] sm:$0xff] %v12482_v12  ;;  %v12490_v63 = vmul.f32 0.35355338, %v3546_v6  ;;  %v3822_v23 = vsel %vm3770_vm2, %v12482_v12, -inf  ;;  %v3423_v59 = vpop.f32.mrf.mxu1  ;;  %v12506_v12 = vmul.f32 0.35355338, %v3403_v16 }
 0x374   : > { %3823 = vmax.xlane.f32.xlu1 %v3822_v23  ;;  %v9091_v51 = vpop.f32.mrf.mxu0  ;;  %v3804_v23 = vsel %vm3770_vm2, %v12494_v48, -inf }
 0x375   : > { %14758 = vst [vmem:[#allocation61_spill] sm:$0xff] %v12490_v63  ;;  %v3819_v29 = vsel %vm3770_vm2, %v12490_v63, -inf  ;;  %v12498_v15 = vmul.f32 0.35355338, %v9091_v51  ;;  %14762 = vst [vmem:[#allocation65_spill] sm:$0xff] %v12506_v12  ;;  %v9116_v63 = vpop.f32.mrf.mxu1  ;;  %v3801_v48 = vsel %vm3770_vm2, %v12506_v12, -inf }
 0x376   : > { %3820 = vmax.xlane.f32.xlu0 %v3819_v29  ;;  %v3556_v4 = vpop.f32.mrf.mxu0  ;;  %v12510_v51 = vmul.f32 0.35355338, %v9066_v30 }
 0x377   : > { %14760 = vst [vmem:[#allocation63_spill] sm:$0xff] %v12498_v15  ;;  %v12502_v6 = vmul.f32 0.35355338, %v3556_v4  ;;  %v3828_v29 = vsel %vm3770_vm2, %v12498_v15, -inf }
 0x378   : > { %3796 = vmax.xlane.f32.xlu1 %v3795_v33  ;;  %v9094_v49 = vpop.f32.mrf.mxu0  ;;  %14763 = vst [vmem:[#allocation66_spill] sm:$0xff] %v12510_v51  ;;  %v3810_v15 = vsel %vm3770_vm2, %v12510_v51, -inf  ;;  %v3807_v51 = vsel %vm3770_vm2, %v12522_v40, -inf }
 0x379   : > { %14761 = vst [vmem:[#allocation64_spill] sm:$0xff] %v12502_v6  ;;  %v3825_v33 = vsel %vm3770_vm2, %v12502_v6, -inf  ;;  %v12514_v25 = vmul.f32 0.35355338, %v9094_v49  ;;  %v12526_v49 = vmul.f32 0.35355338, %v9069_v60 }
 0x37a   : > { %3805 = vmax.xlane.f32.xlu0 %v3804_v23  ;;  %v3566_v4 = vpop.f32.mrf.mxu0  ;;  %v3699_v23 = vpop.f32.mrf.mxu1  ;;  %v12538_v60 = vmul.f32 0.35355338, %v3423_v59 }
 0x37b   : > { %14764 = vst [vmem:[#allocation67_spill] sm:$0xff] %v12514_v25  ;;  %v12518_v16 = vmul.f32 0.35355338, %v3566_v4  ;;  %v3816_v35 = vsel %vm3770_vm2, %v12526_v49, -inf }
 0x37c   : > { %3829 = vmax.xlane.f32.xlu1 %v3828_v29  ;;  %v9119_v29 = vpop.f32.mrf.mxu1  ;;  %v9097_v30 = vpop.f32.mrf.mxu0 }
 0x37d   : > { %14765 = vst [vmem:[#allocation68_spill] sm:$0xff] %v12518_v16  ;;  %v3831_v6 = vsel %vm3770_vm2, %v12518_v16, -inf  ;;  %v12530_v12 = vmul.f32 0.35355338, %v9097_v30 }
 0x37e   : > { %3826 = vmax.xlane.f32.xlu0 %v3825_v33  ;;  %v3834_v33 = vsel %vm3770_vm2, %v12514_v25, -inf  ;;  %v3576_v4 = vpop.f32.mrf.mxu0 }
 0x37f   : > { %14766 = vst [vmem:[#allocation69_spill] sm:$0xff] %v12530_v12  ;;  %v3840_v25 = vsel %vm3770_vm2, %v12530_v12, -inf }
 0x380   : > { %3802 = vmax.xlane.f32.xlu1 %v3801_v48  ;;  %v3709_v48 = vpop.f32.mrf.mxu1 }
 0x382   : > { %3811 = vmax.xlane.f32.xlu0 %v3810_v15  ;;  %v12534_v15 = vmul.f32 0.35355338, %v3576_v4  ;;  %v3813_v4 = vsel %vm3770_vm2, %v12538_v60, -inf }
 0x384   : > { %3835 = vmax.xlane.f32.xlu1 %v3834_v33  ;;  %14767 = vst [vmem:[#allocation70_spill] sm:$0xff] %v12534_v15  ;;  %v9122_v33 = vpop.f32.mrf.mxu1  ;;  %v3837_v30 = vsel %vm3770_vm2, %v12534_v15, -inf }
 0x386   : > { %3832 = vmax.xlane.f32.xlu0 %v3831_v6  ;;  %v12542_v6 = vmul.f32 0.35355338, %v3699_v23  ;;  %v3719_v16 = vpop.f32.mrf.mxu1 }
 0x388   : > { %3808 = vmax.xlane.f32.xlu1 %v3807_v51  ;;  %v12546_v51 = vmul.f32 0.35355338, %v9116_v63  ;;  %v3843_v59 = vsel %vm3770_vm2, %v12542_v6, -inf  ;;  %v9125_v12 = vpop.f32.mrf.mxu1 }
 0x38a   : > { %3817 = vmax.xlane.f32.xlu0 %v3816_v35  ;;  %v12550_v35 = vmul.f32 0.35355338, %v3709_v48  ;;  %v3846_v23 = vsel %vm3770_vm2, %v12546_v51, -inf  ;;  %v3729_v15 = vpop.f32.mrf.mxu1  ;;  %v12562_v48 = vmul.f32 0.35355338, %v9122_v33 }
 0x38c   : > { %3841 = vmax.xlane.f32.xlu1 %v3840_v25  ;;  %v12554_v25 = vmul.f32 0.35355338, %v9119_v29  ;;  %v3849_v63 = vsel %vm3770_vm2, %v12550_v35, -inf }
 0x38e   : > { %3838 = vmax.xlane.f32.xlu0 %v3837_v30  ;;  %v12558_v30 = vmul.f32 0.35355338, %v3719_v16  ;;  %v3858_v16 = vsel %vm3770_vm2, %v12562_v48, -inf }
 0x390   : > { %3814 = vmax.xlane.f32.xlu1 %v3813_v4  ;;  %v3852_v4 = vsel %vm3770_vm2, %v12554_v25, -inf  ;;  %v3855_v29 = vsel %vm3770_vm2, %v12558_v30, -inf }
 0x392   : > { %3844 = vmax.xlane.f32.xlu0 %v3843_v59  ;;  %v12566_v59 = vmul.f32 0.35355338, %v3729_v15  ;;  %v14768_v15 = vld [vmem:[#allocation2_spill] sm:$0xff] }
 0x394   : > { %3847 = vmax.xlane.f32.xlu1 %v3846_v23  ;;  %v12570_v23 = vmul.f32 0.35355338, %v9125_v12  ;;  %v3861_v33 = vsel %vm3770_vm2, %v12566_v59, -inf  ;;  %v14769_v12 = vld [vmem:[#allocation3_spill] sm:$0xff] }
 0x396   : > { %3850 = vmax.xlane.f32.xlu0 %v3849_v63  ;;  %v3864_v63 = vsel %vm3770_vm2, %v12570_v23, -inf }
 0x398   : > { %3853 = vmax.xlane.f32.xlu1 %v3852_v4  ;;  %v14770_v4 = vld [vmem:[#allocation5_spill] sm:$0xff] }
 0x39a   : > { %3856 = vmax.xlane.f32.xlu0 %v3855_v29  ;;  %v14773_v29 = vld [vmem:[#allocation11_spill] sm:$0xff] }
 0x39c   : > { %3859 = vmax.xlane.f32.xlu1 %v3858_v16  ;;  %v14780_v16 = vld [vmem:[#allocation21_spill] sm:$0xff] }
 0x39e   : > { %3862 = vmax.xlane.f32.xlu0 %v3861_v33 }
 0x3a0   : > { %3865 = vmax.xlane.f32.xlu1 %v3864_v63 }
 0x3b1   : > { %5217 = vrot.lane.b32.xlu1 %v11798_v52, %s10038_s23  ;;  %v14771_v52 = vld [vmem:[#allocation6_spill] sm:$0xff] }
 0x3b4   : > { %5048 = vrot.lane.b32.xlu0 %v14768_v15, %s10038_s23 }
 0x3b5   : > { %5215 = vrot.lane.b32.xlu1 %v11820_v34, %s10038_s23  ;;  %v14772_v34 = vld [vmem:[#allocation8_spill] sm:$0xff] }
 0x3b8   : > { %5046 = vrot.lane.b32.xlu0 %v14769_v12, %s10038_s23 }
 0x3b9   : > { %5213 = vrot.lane.b32.xlu1 %v11844_v13, %s10038_s23  ;;  %v14774_v13 = vld [vmem:[#allocation7_spill] sm:$0xff] }
 0x3bc   : > { %5044 = vrot.lane.b32.xlu0 %v14770_v4, %s10038_s23 }
 0x3bd   : > { %5211 = vrot.lane.b32.xlu1 %v11875_v2, %s10038_s23  ;;  %v14775_v2 = vld [vmem:[#allocation9_spill] sm:$0xff] }
 0x3c0   : > { %5042 = vrot.lane.b32.xlu0 %v14771_v52, %s10038_s23 }
 0x3c1   : > { %5209 = vrot.lane.b32.xlu1 %v11898_v43, %s10038_s23  ;;  %v14776_v43 = vld [vmem:[#allocation13_spill] sm:$0xff] }
 0x3c4   : > { %5040 = vrot.lane.b32.xlu0 %v14772_v34, %s10038_s23 }
 0x3c5   : > { %5392 = vrot.lane.b32.xlu1 %v14773_v29, %s10038_s23 }
 0x3c8   : > { %5024 = vrot.lane.b32.xlu0 %v14774_v13, %s10038_s23 }
 0x3c9   : > { %5193 = vrot.lane.b32.xlu1 %v11961_v31, %s10038_s23  ;;  %v14777_v31 = vld [vmem:[#allocation14_spill] sm:$0xff] }
 0x3cc   : > { %5026 = vrot.lane.b32.xlu0 %v14775_v2, %s10038_s23 }
 0x3cd   : > { %5195 = vrot.lane.b32.xlu1 %v11973_v20, %s10038_s23  ;;  %v14778_v20 = vld [vmem:[#allocation12_spill] sm:$0xff] }
 0x3d0   : > { %5561 = vrot.lane.b32.xlu0 %v11926_v0, %s10038_s23  ;;  %v12624_v0 = vpop.permute.xlu1 %5219 }
 0x3d1   : > { %5559 = vrot.lane.b32.xlu1 %v11982_v3, %s10038_s23 }
 0x3d4   : > { %5390 = vrot.lane.b32.xlu0 %v14776_v43, %s10038_s23  ;;  %v12630_v3 = vpop.permute.xlu1 %5223  ;;  %v14784_v43 = vld [vmem:[#allocation16_spill] sm:$0xff] }
 0x3d5   : > { %5557 = vrot.lane.b32.xlu1 %v12003_v24, %s10038_s23  ;;  %v12640_v24 = vpop.xlane.xlu0 %3775 }
 0x3d8   : > { %5388 = vrot.lane.b32.xlu0 %v11857_v28, %s10038_s23  ;;  %v14779_v28 = vld [vmem:[#allocation10_spill] sm:$0xff] }
 0x3d9   : > { %5555 = vrot.lane.b32.xlu1 %v12027_v7, %s10038_s23 }
 0x3dc   : > { %5386 = vrot.lane.b32.xlu0 %v11890_v41, %s10038_s23  ;;  %v12638_v41 = vpop.permute.xlu1 %5221 }
 0x3dd   : > { %5553 = vrot.lane.b32.xlu1 %v12053_v8, %s10038_s23 }
 0x3e0   : > { %5384 = vrot.lane.b32.xlu0 %v14777_v31, %s10038_s23  ;;  %v12646_v8 = vpop.xlane.xlu1 %3781 }
 0x3e1   : > { %5030 = vrot.lane.b32.xlu1 %v14778_v20, %s10038_s23 }
 0x3e4   : > { %5028 = vrot.lane.b32.xlu0 %v14779_v28, %s10038_s23  ;;  %v12654_v63 = vpop.xlane.xlu1 %3787  ;;  %v14785_v28 = vld [vmem:[#allocation17_spill] sm:$0xff] }
 0x3e5   : > { %5197 = vrot.lane.b32.xlu1 %v12008_v56, %s10038_s23  ;;  %v12650_v56 = vpop.xlane.xlu0 %3772 }
 0x3e6   : > { %v9130_v7 = vpop.f32.mrf.mxu0 }
 0x3e8   : > { %5382 = vrot.lane.b32.xlu0 %v11939_v18, %s10038_s23  ;;  %v4269_v33 = vpop.f32.mrf.mxu0  ;;  %v14781_v18 = vld [vmem:[#allocation15_spill] sm:$0xff]  ;;  %v12662_v12 = vpop.xlane.xlu1 %3793 }
 0x3e9   : > { %5551 = vrot.lane.b32.xlu1 %v12082_v44, %s10038_s23  ;;  %v12658_v15 = vpop.xlane.xlu0 %3778 }
 0x3ec   : > { %5199 = vrot.lane.b32.xlu0 %v12019_v9, %s10038_s23  ;;  %v14782_v9 = vld [vmem:[#allocation24_spill] sm:$0xff]  ;;  %v12670_v29 = vpop.xlane.xlu1 %3799 }
 0x3ed   : > { %5034 = vrot.lane.b32.xlu1 %v14780_v16, %s10038_s23  ;;  %v12666_v52 = vpop.xlane.xlu0 %3784 }
 0x3ee   : > { %v9133_v44 = vpop.f32.mrf.mxu0 }
 0x3f0   : > { %5032 = vrot.lane.b32.xlu0 %v14781_v18, %s10038_s23  ;;  %v4279_v4 = vpop.f32.mrf.mxu0 }
 0x3f1   : > { %5201 = vrot.lane.b32.xlu1 %v12038_v46, %s10038_s23  ;;  %v14783_v46 = vld [vmem:[#allocation18_spill] sm:$0xff]  ;;  %v12674_v13 = vpop.xlane.xlu0 %3790 }
 0x3f4   : > { %5380 = vrot.lane.b32.xlu0 %v14782_v9, %s10038_s23 }
 0x3f5   : > { %5549 = vrot.lane.b32.xlu1 %v12102_v21, %s10038_s23 }
 0x3f6   : > { %v9136_v34 = vpop.f32.mrf.mxu0 }
 0x3f8   : > { %5203 = vrot.lane.b32.xlu0 %v12045_v45, %s10038_s23  ;;  %v4289_v2 = vpop.f32.mrf.mxu0 }
 0x3f9   : > { %5038 = vrot.lane.b32.xlu1 %v14783_v46, %s10038_s23 }
 0x3fc   : > { %5036 = vrot.lane.b32.xlu0 %v14784_v43, %s10038_s23 }
 0x3fd   : > { %v12678_v31 = vpop.xlane.xlu1 %3823  ;;  %5205 = vrot.lane.b32.xlu1 %v12064_v57, %s10038_s23 }
 0x3fe   : > { %v9139_v21 = vpop.f32.mrf.mxu0 }
 0x3ff   : > { %9176 = vmatprep.subr.mxu1 %v9139_v21  ;;  %v3821_v20 = vpop.xlane.xlu0 %3820 }
 0x400   : > { %v4299_v45 = vpop.f32.mrf.mxu0  ;;  %9177 = vmatpush3.msra.mxu1 %v9139_v21  ;;  %5378 = vrot.lane.b32.xlu0 %v14785_v28, %s10038_s23 }
 0x401   : > { %v3797_v16 = vpop.xlane.xlu1 %3796  ;;  %5547 = vrot.lane.b32.xlu1 %v12120_v22, %s10038_s23  ;;  %9178 = vmatprep.subr.mxu1 %v4299_v45 }
 0x402   : > { %9179 = vmatpush3.msra.mxu1 %v4299_v45 }
 0x403   : > { %9180 = vmatprep.subr.mxu1 %v9136_v34  ;;  %v12686_v18 = vpop.xlane.xlu0 %3805 }
 0x404   : > { %9181 = vmatpush3.msra.mxu1 %v9136_v34  ;;  %5207 = vrot.lane.b32.xlu0 %v12071_v39, %s10038_s23 }
 0x405   : > { %v12690_v57 = vpop.xlane.xlu1 %3829  ;;  %5364 = vrot.lane.b32.xlu1 %v12201_v10, %s10038_s23  ;;  %9182 = vmatprep.subr.mxu1 %v4289_v2 }
 0x406   : > { %v12694_v9 = vpop.f32.mrf.mxu0  ;;  %9183 = vmatpush3.msra.mxu1 %v4289_v2 }
 0x407   : > { %9184 = vmatprep.subr.mxu1 %v9133_v44  ;;  %v3827_v22 = vpop.xlane.xlu0 %3826 }
 0x408   : > { %v12696_v46 = vpop.f32.mrf.mxu0  ;;  %9185 = vmatpush3.msra.mxu1 %v9133_v44  ;;  %5362 = vrot.lane.b32.xlu0 %v12194_v5, %s10038_s23 }
 0x409   : > { %v3803_v34 = vpop.xlane.xlu1 %3802  ;;  %5533 = vrot.lane.b32.xlu1 %v12182_v62, %s10038_s23  ;;  %9186 = vmatprep.subr.mxu1 %v4279_v4 }
 0x40a   : > { %v12702_v39 = vpop.f32.mrf.mxu0  ;;  %9187 = vmatpush3.msra.mxu1 %v4279_v4  ;;  %v3873_v21 = vmax.f32 %v12658_v15, %v3803_v34 }
 0x40b   : > { %9188 = vmatprep.subr.mxu1 %v9130_v7  ;;  %v12704_v10 = vpop.xlane.xlu0 %3811 }
 0x40c   : > { %v12706_v2 = vpop.f32.mrf.mxu0  ;;  %9189 = vmatpush3.msra.mxu1 %v9130_v7  ;;  %5531 = vrot.lane.b32.xlu0 %v12178_v50, %s10038_s23  ;;  %v3874_v15 = vmax.f32 %v3873_v21, %v3827_v22 }
 0x40d   : > { %v3836_v44 = vpop.xlane.xlu1 %3835  ;;  %5368 = vrot.lane.b32.xlu1 %v12226_v61, %s10038_s23  ;;  %9190 = vmatprep.subr.mxu1 %v4269_v33 }
 0x40e   : > { %v12712_v5 = vpop.f32.mrf.mxu0  ;;  %9191 = vmatpush3.msra.mxu1 %v4269_v33 }
 0x40f   : > { %v3833_v62 = vpop.xlane.xlu0 %3832 }
 0x410   : > { %v12714_v43 = vpop.f32.mrf.mxu0  ;;  %5366 = vrot.lane.b32.xlu0 %v12210_v47, %s10038_s23  ;;  %v3867_v47 = vmax.f32 %v12650_v56, %v3797_v16 }
 0x411   : > { %v3809_v4 = vpop.xlane.xlu1 %3808  ;;  %5537 = vrot.lane.b32.xlu1 %v12213_v14, %s10038_s23 }
 0x412   : > { %v12720_v7 = vpop.f32.mrf.mxu0  ;;  %v3868_v45 = vmax.f32 %v3867_v47, %v3821_v20  ;;  %v3876_v20 = vmax.f32 %v12646_v8, %v12686_v18  ;;  %v3879_v16 = vmax.f32 %v12666_v52, %v3809_v4 }
 0x413   : > { %9204 = vmatprep.subr.mxu1 %v12720_v7  ;;  %v12723_v50 = vpop.xlane.xlu0 %3817 }
 0x414   : > { %5535 = vrot.lane.b32.xlu0 %v12206_v32, %s10038_s23  ;;  %v3870_v32 = vmax.f32 %v12640_v24, %v12670_v29  ;;  %v3877_v52 = vmax.f32 %v3876_v20, %v12690_v57  ;;  %v3880_v4 = vmax.f32 %v3879_v16, %v3833_v62 }
 0x415   : > { %5372 = vrot.lane.b32.xlu1 %v12252_v58, %s10038_s23  ;;  %v12729_v61 = vpop.xlane.xlu1 %3841 }
 0x416   : > { %v3871_v56 = vmax.f32 %v3870_v32, %v12678_v31 }
 0x417   : > { %v3839_v33 = vpop.xlane.xlu0 %3838 }
 0x418   : > { %5370 = vrot.lane.b32.xlu0 %v12233_v38, %s10038_s23 }
 0x419   : > { %5541 = vrot.lane.b32.xlu1 %v12240_v17, %s10038_s23  ;;  %v3815_v14 = vpop.xlane.xlu1 %3814 }
 0x41b   : > { %v3845_v28 = vpop.xlane.xlu0 %3844 }
 0x41c   : > { %v12739_v58 = vmax.f32 %v3868_v45, %v3845_v28  ;;  %5539 = vrot.lane.b32.xlu0 %v12219_v37, %s10038_s23  ;;  %v14786_v45 = vld [vmem:[#allocation27_spill] sm:$0xff] }
 0x41d   : > { %5376 = vrot.lane.b32.xlu1 %v12271_v54, %s10038_s23  ;;  %v3848_v38 = vpop.xlane.xlu1 %3847  ;;  %v12757_v54 = vpop.f32.mrf.mxu0  ;;  %v14787_v28 = vld [vmem:[#allocation23_spill] sm:$0xff] }
 0x41e   : > { %v3891_v17 = vsub.f32 %v12279_v1, %v12739_v58  ;;  %v12750_v24 = vmax.f32 %v3871_v56, %v3848_v38 }
 0x41f   : > { %v3851_v29 = vpop.xlane.xlu0 %3850 }
 0x420   : > { %v3923_v34 = vmul.f32 1.442695, %v3891_v17  ;;  %v12753_v37 = vmax.f32 %v3874_v15, %v3851_v29  ;;  %5374 = vrot.lane.b32.xlu0 %v12257_v42, %s10038_s23  ;;  %v3892_v1 = vsub.f32 %v12277_v27, %v12750_v24  ;;  %v3882_v42 = vmax.f32 %v12654_v63, %v12704_v10  ;;  %v12770_v27 = vpop.f32.mrf.mxu0  ;;  %v14789_v17 = vld [vmem:[#allocation25_spill] sm:$0xff]  ;;  %v14790_v29 = vld [vmem:[#allocation19_spill] sm:$0xff] }
 0x421   : > { %5545 = vrot.lane.b32.xlu1 %v12263_v53, %s10038_s23  ;;  %v3854_v8 = vpop.xlane.xlu1 %3853 }
 0x422   : > { %9819 = vpow2.f32 %v3923_v34  ;;  %v3893_v31 = vsub.f32 %v12299_v36, %v12753_v37  ;;  %v3925_v18 = vmul.f32 1.442695, %v3892_v1  ;;  %v12772_v47 = vmax.f32 %v3877_v52, %v3854_v8  ;;  %v12783_v10 = vpop.f32.mrf.mxu0  ;;  %v14791_v1 = vld [vmem:[#allocation26_spill] sm:$0xff] }
 0x423   : > { %v3857_v22 = vpop.xlane.xlu0 %3856  ;;  %v3883_v63 = vmax.f32 %v3882_v42, %v3836_v44 }
 0x424   : > { %5543 = vrot.lane.b32.xlu0 %v12246_v19, %s10038_s23  ;;  %9821 = vpow2.f32 %v3925_v18  ;;  %v3927_v36 = vmul.f32 1.442695, %v3893_v31  ;;  %v12776_v57 = vmax.f32 %v3880_v4, %v3857_v22  ;;  %v3894_v62 = vsub.f32 %v12291_v11, %v12772_v47  ;;  %v12796_v44 = vpop.f32.mrf.mxu0  ;;  %v14792_v31 = vld [vmem:[#allocation35_spill] sm:$0xff]  ;;  %v14793_v22 = vld [vmem:[#allocation29_spill] sm:$0xff] }
 0x425   : > { %6070 = vrot.lane.b32.xlu1 %v12297_v26, %s10038_s23  ;;  %v3860_v53 = vpop.xlane.xlu1 %3859  ;;  %v3885_v19 = vmax.f32 %v12674_v13, %v3815_v14  ;;  %v3888_v13 = vmax.f32 %v12662_v12, %v12723_v50 }
 0x426   : > { %9823 = vpow2.f32 %v3927_v36  ;;  %v3929_v32 = vmul.f32 1.442695, %v3894_v62  ;;  %v3895_v56 = vsub.f32 %v14787_v28, %v12776_v57  ;;  %v12789_v38 = vmax.f32 %v3883_v63, %v3860_v53  ;;  %v12814_v8 = vpop.f32.mrf.mxu0  ;;  %v14794_v36 = vld [vmem:[#allocation31_spill] sm:$0xff]  ;;  %v14795_v63 = vld [vmem:[#allocation22_spill] sm:$0xff]  ;;  %v14797_v28 = vld [vmem:[#allocation60_spill] sm:$0xff] }
 0x427   : > { %v3863_v21 = vpop.xlane.xlu0 %3862  ;;  %v3886_v14 = vmax.f32 %v3885_v19, %v3839_v33  ;;  %v3889_v34 = vmax.f32 %v3888_v13, %v12729_v61  ;;  %v14798_v13 = vld [vmem:[#allocation36_spill] sm:$0xff] }
 0x428   : > { %6068 = vrot.lane.b32.xlu0 %v12294_v55, %s10038_s23  ;;  %v14788_v55 = vld [vmem:[#allocation20_spill] sm:$0xff]  ;;  %9825 = vpow2.f32 %v3929_v32  ;;  %v3931_v20 = vmul.f32 1.442695, %v3895_v56  ;;  %v3896_v12 = vsub.f32 %v14790_v29, %v12789_v38  ;;  %v12832_v62 = vpop.f32.mrf.mxu0  ;;  %v3899_v56 = vsub.f32 %v14797_v28, %v12739_v58 }
 0x429   : > { %6074 = vrot.lane.b32.xlu1 %v14786_v45, %s10038_s23  ;;  %v3866_v26 = vpop.xlane.xlu1 %3865  ;;  %v12805_v50 = vmax.f32 %v3886_v14, %v3863_v21 }
 0x42a   : > { %9827 = vpow2.f32 %v3931_v20  ;;  %v3933_v18 = vmul.f32 1.442695, %v3896_v12  ;;  %v12823_v4 = vmax.f32 %v3889_v34, %v3866_v26  ;;  %v14796_v26 = vld [vmem:[#allocation4_spill] sm:$0xff]  ;;  %v3939_v29 = vmul.f32 1.442695, %v3899_v56  ;;  %v14800_v12 = vld [vmem:[#allocation65_spill] sm:$0xff] }
 0x42b   : > { %v5049_v11 = vpop.permute.xlu0 %5048  ;;  %v3897_v61 = vsub.f32 %v14793_v22, %v12805_v50  ;;  %v14806_v56 = vld [vmem:[#allocation39_spill] sm:$0xff] }
 0x42c   : > { %6072 = vrot.lane.b32.xlu0 %v14788_v55, %s10038_s23  ;;  %9294 = vmatprep.subr.msk.mxu0 %vm3125_vm1, %v5049_v11  ;;  %9829 = vpow2.f32 %v3933_v18  ;;  %v3898_v45 = vsub.f32 %v14795_v63, %v12823_v4  ;;  %v14799_v55 = vld [vmem:[#allocation28_spill] sm:$0xff] }
 0x42d   : > { %6078 = vrot.lane.b32.xlu1 %v14789_v17, %s10038_s23  ;;  %v12800_v15 = vpop.permute.xlu1 %5217  ;;  %9295 = vmatpush3.xpose.msk.msra.mxu0 %vm3125_vm1, %v5049_v11  ;;  %v3935_v19 = vmul.f32 1.442695, %v3897_v61  ;;  %v12852_v11 = vpop.f32.mrf.mxu0  ;;  %v14803_v61 = vld [vmem:[#allocation37_spill] sm:$0xff]  ;;  %v14804_v63 = vld [vmem:[#allocation40_spill] sm:$0xff] }
 0x42e   : > { %v3937_v17 = vmul.f32 1.442695, %v3898_v45 }
 0x42f   : > { %v12807_v33 = vpop.eup %9819  ;;  %v5047_v16 = vpop.permute.xlu0 %5046  ;;  %9831 = vpow2.f32 %v3935_v19  ;;  %v3903_v19 = vsub.f32 %v12522_v40, %v12776_v57 }
 0x430   : > { %6076 = vrot.lane.b32.xlu0 %v14791_v1, %s10038_s23  ;;  %9192 = vmatprep.mubr.msk.f32.mxu1 %vm3770_vm2, %v12807_v33  ;;  %v12873_v1 = vpop.f32.mrf.mxu0  ;;  %9833 = vpow2.f32 %v3937_v17 }
 0x431   : > { %9296 = vmatprep.subr.msk.mxu0 %vm3125_vm1, %v5047_v16  ;;  %6082 = vrot.lane.b32.xlu1 %v14792_v31, %s10038_s23  ;;  %v12819_v52 = vpop.permute.xlu1 %5215  ;;  %v12826_v42 = vpop.eup %9821  ;;  %9835 = vpow2.f32 %v3939_v29 }
 0x432   : > { %9297 = vmatpush3.xpose.msk.msra.mxu0 %vm3125_vm1, %v5047_v16  ;;  %9193 = vmatmul.mubr.msk.f32.vlgmr.msra.gmra.mxu1 %vm3770_vm2, %v12826_v42  ;;  %v14801_v16 = vld [vmem:[#allocation38_spill] sm:$0xff]  ;;  %v12894_v45 = vpop.f32.mrf.mxu0 }
 0x433   : > { %v5045_v53 = vpop.permute.xlu0 %5044  ;;  %9205 = vmatpush3.msra.mxu1 %v12720_v7  ;;  %v12843_v32 = vpop.eup %9823 }
 0x434   : > { %6080 = vrot.lane.b32.xlu0 %v14794_v36, %s10038_s23  ;;  %9298 = vmatprep.subr.msk.mxu0 %vm3125_vm1, %v5045_v53  ;;  %v12913_v17 = vpop.f32.mrf.mxu0 }
 0x435   : > { %v12836_v21 = vpop.permute.xlu1 %5213  ;;  %9206 = vmatprep.subr.mxu1 %v12757_v54  ;;  %6086 = vrot.lane.b32.xlu1 %v14796_v26, %s10038_s23  ;;  %v12863_v20 = vpop.eup %9825 }
 0x436   : > { %9207 = vmatpush3.msra.mxu1 %v12757_v54  ;;  %9299 = vmatpush3.xpose.msk.msra.mxu0 %vm3125_vm1, %v5045_v53  ;;  %v3900_v54 = vsub.f32 %v14799_v55, %v12750_v24  ;;  %v3905_v55 = vsub.f32 %v12538_v60, %v12805_v50 }
 0x437   : > { %v5043_v7 = vpop.permute.xlu0 %5042  ;;  %9195 = vmatprep.mubr.msk.f32.mxu1 %vm3770_vm2, %v12843_v32  ;;  %9208 = vmatprep.subr.mxu1 %v12712_v5  ;;  %v12884_v53 = vpop.eup %9827 }
 0x438   : > { %9209 = vmatpush3.msra.mxu1 %v12712_v5  ;;  %6084 = vrot.lane.b32.xlu0 %v14798_v13, %s10038_s23  ;;  %v3901_v5 = vsub.f32 %v14800_v12, %v12753_v37  ;;  %v3941_v18 = vmul.f32 1.442695, %v3900_v54  ;;  %v3947_v13 = vmul.f32 1.442695, %v3903_v19  ;;  %v3906_v12 = vsub.f32 %v12526_v49, %v12823_v4  ;;  %v12934_v49 = vpop.f32.mrf.mxu0 }
 0x439   : > { %v12857_v14 = vpop.permute.xlu1 %5211  ;;  %9210 = vmatprep.subr.mxu1 %v12714_v43  ;;  %9300 = vmatprep.subr.msk.mxu0 %vm3125_vm1, %v5043_v7 }
 0x43a   : > { %9211 = vmatpush3.msra.mxu1 %v12714_v43  ;;  %6090 = vrot.lane.b32.xlu1 %v14801_v16, %s10038_s23  ;;  %v14802_v43 = vld [vmem:[#allocation62_spill] sm:$0xff]  ;;  %v3943_v36 = vmul.f32 1.442695, %v3901_v5  ;;  %9837 = vpow2.f32 %v3941_v18  ;;  %v14808_v5 = vld [vmem:[#allocation41_spill] sm:$0xff] }
 0x43b   : > { %v5041_v34 = vpop.permute.xlu0 %5040  ;;  %9196 = vmatmul.mubr.msk.f32.gmra.mxu1 %vm3770_vm2, %v12863_v20  ;;  %9212 = vmatprep.subr.mxu1 %v12702_v39  ;;  %v3902_v22 = vsub.f32 %v14802_v43, %v12772_v47 }
 0x43c   : > { %9301 = vmatpush3.xpose.msk.msra.mxu0 %vm3125_vm1, %v5043_v7  ;;  %9213 = vmatpush3.msra.mxu1 %v12702_v39  ;;  %v12903_v7 = vpop.eup %9829  ;;  %9839 = vpow2.f32 %v3943_v36  ;;  %v14812_v36 = vld [vmem:[#allocation59_spill] sm:$0xff] }
 0x43d   : > { %v12877_v31 = vpop.permute.xlu1 %5209  ;;  %9214 = vmatprep.subr.mxu1 %v12706_v2  ;;  %6088 = vrot.lane.b32.xlu0 %v14803_v61, %s10038_s23  ;;  %v3945_v40 = vmul.f32 1.442695, %v3902_v22  ;;  %v12924_v16 = vpop.eup %9831  ;;  %v14811_v22 = vld [vmem:[#allocation44_spill] sm:$0xff]  ;;  %v3908_v19 = vsub.f32 %v14812_v36, %v12750_v24 }
 0x43e   : > { %9215 = vmatpush3.msra.mxu1 %v12706_v2  ;;  %9302 = vmatprep.subr.msk.mxu0 %vm3125_vm1, %v5041_v34  ;;  %v14805_v2 = vld [vmem:[#allocation66_spill] sm:$0xff]  ;;  %14809 = vst [vmem:[#allocation2_spill] sm:$0xff] %v12924_v16 }
 0x43f   : > { %v5025_v39 = vpop.permute.xlu0 %5024  ;;  %9198 = vmatprep.mubr.msk.f32.mxu1 %vm3770_vm2, %v12884_v53  ;;  %6094 = vrot.lane.b32.xlu1 %v14804_v63, %s10038_s23  ;;  %v3904_v28 = vsub.f32 %v14805_v2, %v12789_v38  ;;  %9841 = vpow2.f32 %v3945_v40  ;;  %v14813_v63 = vld [vmem:[#allocation43_spill] sm:$0xff]  ;;  %v12944_v40 = vpop.eup %9833 }
 0x440   : > { %9216 = vmatprep.subr.mxu1 %v12694_v9  ;;  %9303 = vmatpush3.xpose.msk.msra.mxu0 %vm3125_vm1, %v5041_v34  ;;  %v14810_v34 = vld [vmem:[#allocation61_spill] sm:$0xff]  ;;  %9843 = vpow2.f32 %v3947_v13  ;;  %14814 = vst [vmem:[#allocation3_spill] sm:$0xff] %v12944_v40  ;;  %v12948_v13 = vpop.eup %9835 }
 0x441   : > { %v5393_v26 = vpop.permute.xlu1 %5392  ;;  %9217 = vmatpush3.msra.mxu1 %v12694_v9  ;;  %6092 = vrot.lane.b32.xlu0 %v14806_v56, %s10038_s23  ;;  %v14807_v9 = vld [vmem:[#allocation42_spill] sm:$0xff]  ;;  %v3949_v60 = vmul.f32 1.442695, %v3904_v28  ;;  %v3907_v18 = vsub.f32 %v14810_v34, %v12739_v58  ;;  %v14818_v34 = vld [vmem:[#allocation45_spill] sm:$0xff] }
 0x442   : > { %9218 = vmatprep.subr.mxu1 %v12696_v46  ;;  %9304 = vmatprep.mubr.msk.f32.mxu0 %vm3125_vm1, %v5025_v39  ;;  %v3953_v39 = vmul.f32 1.442695, %v3906_v12  ;;  %v14817_v12 = vld [vmem:[#allocation63_spill] sm:$0xff] }
 0x443   : > { %v5027_v54 = vpop.permute.xlu0 %5026  ;;  %9199 = vmatmul.mubr.msk.f32.gmra.mxu1 %vm3770_vm2, %v12903_v7  ;;  %6098 = vrot.lane.b32.xlu1 %v14807_v9, %s10038_s23  ;;  %9845 = vpow2.f32 %v3949_v60  ;;  %v3955_v2 = vmul.f32 1.442695, %v3907_v18  ;;  %v3957_v60 = vmul.f32 1.442695, %v3908_v19 }
 0x444   : > { %9219 = vmatpush3.msra.mxu1 %v12696_v46  ;;  %9344 = vmatprep.subr.msk.mxu0 %vm3125_vm1, %v5393_v26  ;;  %v3951_v46 = vmul.f32 1.442695, %v3905_v55  ;;  %v12953_v55 = vpop.f32.mrf.mxu0 }
 0x445   : > { %v12917_v29 = vpop.permute.xlu1 %5193  ;;  %9232 = vmatprep.subr.mxu1 %v12873_v1  ;;  %6096 = vrot.lane.b32.xlu0 %v14808_v5, %s10038_s23  ;;  %v3910_v5 = vsub.f32 %v14817_v12, %v12772_v47 }
 0x446   : > { %9305 = vmatmul.mubr.msk.f32.vlgmr.msra.gmra.mxu0 %vm3125_vm1, %v5027_v54  ;;  %9201 = vmatprep.mubr.msk.f32.mxu1 %vm3770_vm2, %v12924_v16  ;;  %9847 = vpow2.f32 %v3951_v46  ;;  %v14816_v54 = vld [vmem:[#allocation46_spill] sm:$0xff]  ;;  %v12975_v19 = vpop.f32.mrf.mxu0 }
 0x447   : > { %v12929_v43 = vpop.permute.xlu0 %5561  ;;  %9345 = vmatpush3.xpose.msk.msra.mxu0 %vm3125_vm1, %v5393_v26  ;;  %6102 = vrot.lane.b32.xlu1 %v14811_v22, %s10038_s23  ;;  %v14815_v26 = vld [vmem:[#allocation64_spill] sm:$0xff]  ;;  %9849 = vpow2.f32 %v3953_v39  ;;  %v12966_v18 = vpop.eup %9837 }
 0x448   : > { %v3909_v28 = vsub.f32 %v14815_v26, %v12753_v37  ;;  %9202 = vmatmul.mubr.msk.f32.gmra.mxu1 %vm3770_vm2, %v12944_v40  ;;  %9851 = vpow2.f32 %v3955_v2  ;;  %v14819_v22 = vld [vmem:[#allocation68_spill] sm:$0xff]  ;;  %v3961_v2 = vmul.f32 1.442695, %v3910_v5 }
 0x449   : > { %v12938_v61 = vpop.permute.xlu1 %5195  ;;  %6100 = vrot.lane.b32.xlu0 %v14813_v63, %s10038_s23  ;;  %9220 = vmatprep.mubr.msk.f32.mxu1 %vm3770_vm2, %v12948_v13  ;;  %v3911_v36 = vsub.f32 %v14819_v22, %v12776_v57  ;;  %v12970_v26 = vpop.eup %9839  ;;  %9853 = vpow2.f32 %v3957_v60  ;;  %v14823_v60 = vld [vmem:[#allocation47_spill] sm:$0xff] }
 0x44a   : > { %v3959_v46 = vmul.f32 1.442695, %v3909_v28  ;;  %v14820_v28 = vld [vmem:[#allocation67_spill] sm:$0xff] }
 0x44b   : > { %v5391_v56 = vpop.permute.xlu0 %5390  ;;  %6106 = vrot.lane.b32.xlu1 %v14816_v54, %s10038_s23  ;;  %v14821_v54 = vld [vmem:[#allocation48_spill] sm:$0xff] }
 0x44c   : > { %9346 = vmatprep.subr.msk.mxu0 %vm3125_vm1, %v5391_v56  ;;  %9221 = vmatmul.mubr.msk.f32.vlgmr.msra.gmra.mxu1 %vm3770_vm2, %v12966_v18  ;;  %v12987_v12 = vpop.eup %9841  ;;  %9855 = vpow2.f32 %v3959_v46 }
 0x44d   : > { %v12959_v9 = vpop.permute.xlu1 %5559  ;;  %6104 = vrot.lane.b32.xlu0 %v14818_v34, %s10038_s23  ;;  %9347 = vmatpush3.xpose.msk.msra.mxu0 %vm3125_vm1, %v5391_v56  ;;  %v3912_v56 = vsub.f32 %v14820_v28, %v12789_v38  ;;  %v3963_v34 = vmul.f32 1.442695, %v3911_v36  ;;  %v12994_v40 = vpop.eup %9843  ;;  %9857 = vpow2.f32 %v3961_v2  ;;  %v14824_v36 = vld [vmem:[#allocation50_spill] sm:$0xff] }
 0x44e   : > { %9233 = vmatpush3.msra.mxu1 %v12873_v1  ;;  %9223 = vmatprep.mubr.msk.f32.mxu1 %vm3770_vm2, %v12970_v26  ;;  %v14822_v1 = vld [vmem:[#allocation70_spill] sm:$0xff]  ;;  %v12999_v28 = vpop.f32.mrf.mxu0 }
 0x44f   : > { %v5389_v63 = vpop.permute.xlu0 %5388  ;;  %9234 = vmatprep.subr.mxu1 %v12894_v45  ;;  %6110 = vrot.lane.b32.xlu1 %v14821_v54, %s10038_s23  ;;  %v3913_v22 = vsub.f32 %v14822_v1, %v12805_v50  ;;  %9859 = vpow2.f32 %v3963_v34 }
 0x450   : > { %9348 = vmatprep.subr.msk.mxu0 %vm3125_vm1, %v5389_v63  ;;  %9235 = vmatpush3.msra.mxu1 %v12894_v45  ;;  %v3965_v45 = vmul.f32 1.442695, %v3912_v56  ;;  %v13009_v54 = vpop.eup %9845  ;;  %v3915_v56 = vsub.f32 %v12542_v6, %v12739_v58  ;;  %v4409_v34 = vpop.f32.mrf.mxu0 }
 0x451   : > { %v12980_v39 = vpop.permute.xlu1 %5557  ;;  %6108 = vrot.lane.b32.xlu0 %v14823_v60, %s10038_s23  ;;  %9236 = vmatprep.subr.mxu1 %v12832_v62  ;;  %v3967_v1 = vmul.f32 1.442695, %v3913_v22  ;;  %v14825_v60 = vld [vmem:[#allocation69_spill] sm:$0xff] }
 0x452   : > { %9224 = vmatmul.mubr.msk.f32.gmra.mxu1 %vm3770_vm2, %v12987_v12  ;;  %v3914_v16 = vsub.f32 %v14825_v60, %v12823_v4  ;;  %9349 = vmatpush3.xpose.msk.msra.mxu0 %vm3125_vm1, %v5389_v63  ;;  %9861 = vpow2.f32 %v3965_v45  ;;  %v14826_v63 = vld [vmem:[#allocation49_spill] sm:$0xff]  ;;  %v3916_v45 = vsub.f32 %v12546_v51, %v12750_v24  ;;  %v14827_v51 = vld [vmem:[#allocation52_spill] sm:$0xff]  ;;  %v3918_v60 = vsub.f32 %v12554_v25, %v12772_v47 }
 0x453   : > { %v5387_v5 = vpop.permute.xlu0 %5386  ;;  %9237 = vmatpush3.msra.mxu1 %v12832_v62  ;;  %9226 = vmatprep.mubr.msk.f32.mxu1 %vm3770_vm2, %v12994_v40  ;;  %v13017_v2 = vpop.eup %9847  ;;  %9863 = vpow2.f32 %v3967_v1 }
 0x454   : > { %9238 = vmatprep.subr.mxu1 %v12852_v11  ;;  %6114 = vrot.lane.b32.xlu1 %v14824_v36, %s10038_s23  ;;  %v13032_v6 = vpop.eup %9849  ;;  %v3969_v58 = vmul.f32 1.442695, %v3914_v16  ;;  %v3971_v36 = vmul.f32 1.442695, %v3915_v56  ;;  %v3917_v16 = vsub.f32 %v12550_v35, %v12753_v37  ;;  %v9175_v1 = vpop.f32.mrf.mxu0 }
 0x455   : > { %v13004_v46 = vpop.permute.xlu1 %5555  ;;  %9239 = vmatpush3.msra.mxu1 %v12852_v11  ;;  %6112 = vrot.lane.b32.xlu0 %v14826_v63, %s10038_s23  ;;  %v13038_v22 = vpop.eup %9851  ;;  %v3919_v63 = vsub.f32 %v12558_v30, %v12776_v57  ;;  %v3977_v57 = vmul.f32 1.442695, %v3918_v60 }
 0x456   : > { %9240 = vmatprep.subr.mxu1 %v12796_v44  ;;  %9227 = vmatmul.mubr.msk.f32.gmra.mxu1 %vm3770_vm2, %v13009_v54  ;;  %v13055_v24 = vpop.eup %9853  ;;  %9865 = vpow2.f32 %v3969_v58  ;;  %v3975_v56 = vmul.f32 1.442695, %v3917_v16  ;;  %v14828_v58 = vld [vmem:[#allocation51_spill] sm:$0xff]  ;;  %v3921_v16 = vsub.f32 %v12566_v59, %v12805_v50  ;;  %v3922_v50 = vsub.f32 %v12570_v23, %v12823_v4 }
 0x457   : > { %v13015_v62 = vpop.permute.xlu0 %5384  ;;  %9241 = vmatpush3.msra.mxu1 %v12796_v44  ;;  %9229 = vmatprep.mubr.msk.f32.mxu1 %vm3770_vm2, %v13017_v2  ;;  %9867 = vpow2.f32 %v3971_v36  ;;  %v3920_v36 = vsub.f32 %v12562_v48, %v12789_v38  ;;  %v14829_v48 = vld [vmem:[#allocation54_spill] sm:$0xff] }
 0x458   : > { %9242 = vmatprep.subr.mxu1 %v12814_v8  ;;  %9350 = vmatprep.subr.msk.mxu0 %vm3125_vm1, %v5387_v5  ;;  %v3985_v60 = vmul.f32 1.442695, %v3922_v50 }
 0x459   : > { %v13027_v11 = vpop.permute.xlu1 %5553  ;;  %9243 = vmatpush3.msra.mxu1 %v12814_v8  ;;  %6118 = vrot.lane.b32.xlu1 %v14827_v51, %s10038_s23  ;;  %v13061_v37 = vpop.eup %9855  ;;  %v3981_v59 = vmul.f32 1.442695, %v3920_v36 }
 0x45a   : > { %9244 = vmatprep.subr.mxu1 %v12770_v27  ;;  %9230 = vmatmul.mubr.msk.f32.gmra.mxu1 %vm3770_vm2, %v13032_v6  ;;  %v13075_v25 = vpop.eup %9857 }
 0x45b   : > { %v13036_v44 = vpop.permute.xlu0 %5028  ;;  %9245 = vmatpush3.msra.mxu1 %v12770_v27  ;;  %9248 = vmatprep.mubr.msk.f32.mxu1 %vm3770_vm2, %v13038_v22  ;;  %v3973_v27 = vmul.f32 1.442695, %v3916_v45  ;;  %v3979_v45 = vmul.f32 1.442695, %v3919_v63 }
 0x45c   : > { %9246 = vmatprep.subr.mxu1 %v12783_v10  ;;  %9351 = vmatpush3.xpose.msk.msra.mxu0 %vm3125_vm1, %v5387_v5  ;;  %v13081_v30 = vpop.eup %9859 }
 0x45d   : > { %v13050_v8 = vpop.permute.xlu1 %5030  ;;  %9247 = vmatpush3.msra.mxu1 %v12783_v10  ;;  %v4419_v10 = vpop.f32.mrf.mxu0  ;;  %6116 = vrot.lane.b32.xlu0 %v14828_v58, %s10038_s23  ;;  %9869 = vpow2.f32 %v3973_v27 }
 0x45e   : > { %9260 = vmatprep.subr.mxu1 %v9175_v1  ;;  %9249 = vmatmul.mubr.msk.f32.vlgmr.msra.gmra.mxu1 %vm3770_vm2, %v13055_v24  ;;  %9871 = vpow2.f32 %v3975_v56 }
 0x45f   : > { %v13059_v35 = vpop.permute.xlu0 %5382  ;;  %9261 = vmatpush3.msra.mxu1 %v9175_v1  ;;  %9251 = vmatprep.mubr.msk.f32.mxu1 %vm3770_vm2, %v13061_v37  ;;  %v13097_v38 = vpop.eup %9861  ;;  %9873 = vpow2.f32 %v3977_v57  ;;  %v14834_v57 = vld [vmem:[#allocation57_spill] sm:$0xff] }
 0x460   : > { %9262 = vmatprep.subr.mxu1 %v4419_v10  ;;  %9352 = vmatprep.subr.msk.mxu0 %vm3125_vm1, %v13015_v62  ;;  %v13101_v27 = vpop.eup %9863  ;;  %9875 = vpow2.f32 %v3979_v45 }
 0x461   : > { %v13071_v5 = vpop.permute.xlu1 %5197  ;;  %9263 = vmatpush3.msra.mxu1 %v4419_v10  ;;  %6122 = vrot.lane.b32.xlu1 %v14829_v48, %s10038_s23  ;;  %9877 = vpow2.f32 %v3981_v59 }
 0x462   : > { %9264 = vmatprep.subr.mxu1 %v12999_v28  ;;  %9252 = vmatmul.mubr.msk.f32.gmra.mxu1 %vm3770_vm2, %v13075_v25 }
 0x463   : > { %v13079_v47 = vpop.permute.xlu0 %5199  ;;  %9265 = vmatpush3.msra.mxu1 %v12999_v28  ;;  %9254 = vmatprep.mubr.msk.f32.mxu1 %vm3770_vm2, %v13081_v30  ;;  %v3983_v28 = vmul.f32 1.442695, %v3921_v16  ;;  %v13117_v4 = vpop.eup %9865 }
 0x464   : > { %9266 = vmatprep.subr.mxu1 %v4409_v34  ;;  %9353 = vmatpush3.xpose.msk.msra.mxu0 %vm3125_vm1, %v13015_v62  ;;  %v13122_v56 = vpop.eup %9867 }
 0x465   : > { %v13093_v1 = vpop.permute.xlu1 %5551  ;;  %9267 = vmatpush3.msra.mxu1 %v4409_v34  ;;  %v14830_v34 = vld [vmem:[#allocation53_spill] sm:$0xff]  ;;  %9307 = vmatprep.mubr.msk.f32.mxu0 %vm3125_vm1, %v13036_v44  ;;  %9879 = vpow2.f32 %v3983_v28  ;;  %v14832_v44 = vld [vmem:[#allocation55_spill] sm:$0xff] }
 0x466   : > { %9268 = vmatprep.subr.mxu1 %v12953_v55  ;;  %9255 = vmatmul.mubr.msk.f32.gmra.mxu1 %vm3770_vm2, %v13097_v38  ;;  %9881 = vpow2.f32 %v3985_v60 }
 0x467   : > { %v5033_v51 = vpop.permute.xlu0 %5032  ;;  %9269 = vmatpush3.msra.mxu1 %v12953_v55  ;;  %9257 = vmatprep.mubr.msk.f32.mxu1 %vm3770_vm2, %v13101_v27  ;;  %v14831_v55 = vld [vmem:[#allocation56_spill] sm:$0xff] }
 0x468   : > { %9270 = vmatprep.subr.mxu1 %v12975_v19  ;;  %6120 = vrot.lane.b32.xlu0 %v14830_v34, %s10038_s23 }
 0x469   : > { %v5035_v62 = vpop.permute.xlu1 %5034  ;;  %9271 = vmatpush3.msra.mxu1 %v12975_v19  ;;  %6126 = vrot.lane.b32.xlu1 %v14831_v55, %s10038_s23 }
 0x46a   : > { %9272 = vmatprep.subr.mxu1 %v12913_v17  ;;  %9258 = vmatmul.mubr.msk.f32.gmra.mxu1 %vm3770_vm2, %v13117_v4 }
 0x46b   : > { %v5381_v23 = vpop.permute.xlu0 %5380  ;;  %9308 = vmatmul.mubr.msk.f32.gmra.mxu0 %vm3125_vm1, %v13050_v8  ;;  %9273 = vmatpush3.msra.mxu1 %v12913_v17  ;;  %v13141_v8 = vpop.eup %9869  ;;  %v14833_v17 = vld [vmem:[#allocation58_spill] sm:$0xff] }
 0x46c   : > { %9276 = vmatprep.mubr.msk.f32.mxu1 %vm3770_vm2, %v13122_v56  ;;  %9274 = vmatprep.subr.mxu1 %v12934_v49  ;;  %v13149_v58 = vpop.eup %9871 }
 0x46d   : > { %v13128_v19 = vpop.permute.xlu1 %5201  ;;  %6124 = vrot.lane.b32.xlu0 %v14832_v44, %s10038_s23  ;;  %9275 = vmatpush3.msra.mxu1 %v12934_v49  ;;  %v13163_v36 = vpop.eup %9873 }
 0x46e   : > { %9354 = vmatprep.subr.msk.mxu0 %vm3125_vm1, %v13059_v35  ;;  %6130 = vrot.lane.b32.xlu1 %v14833_v17, %s10038_s23  ;;  %v13167_v45 = vpop.eup %9875 }
 0x46f   : > { %v13136_v63 = vpop.permute.xlu0 %5203  ;;  %9316 = vmatprep.subr.msk.mxu1 %vm3125_vm1, %v12630_v3  ;;  %9355 = vmatpush3.xpose.msk.msra.mxu0 %vm3125_vm1, %v13059_v35  ;;  %v13179_v16 = vpop.eup %9877 }
 0x470   : > { %9277 = vmatmul.mubr.msk.f32.vlgmr.msra.gmra.mxu1 %vm3770_vm2, %v13141_v8  ;;  %9310 = vmatprep.mubr.msk.f32.mxu0 %vm3125_vm1, %v5033_v51 }
 0x471   : > { %v13147_v10 = vpop.permute.xlu1 %5549  ;;  %9317 = vmatpush3.xpose.msk.msra.mxu1 %vm3125_vm1, %v12630_v3  ;;  %9279 = vmatprep.mubr.msk.f32.mxu1 %vm3770_vm2, %v13149_v58 }
 0x472   : > { %9318 = vmatprep.subr.msk.mxu1 %vm3125_vm1, %v12638_v41  ;;  %6128 = vrot.lane.b32.xlu0 %v14834_v57, %s10038_s23  ;;  %v13183_v51 = vpop.eup %9879 }
 0x473   : > { %v5037_v49 = vpop.permute.xlu0 %5036  ;;  %9356 = vmatprep.subr.msk.mxu0 %vm3125_vm1, %v5381_v23  ;;  %9311 = vmatmul.mubr.msk.f32.gmra.mxu0 %vm3125_vm1, %v5035_v62  ;;  %v13198_v50 = vpop.eup %9881 }
 0x474   : > { %9280 = vmatmul.mubr.msk.f32.gmra.mxu1 %vm3770_vm2, %v13163_v36  ;;  %9357 = vmatpush3.xpose.msk.msra.mxu0 %vm3125_vm1, %v5381_v23 }
 0x475   : > { %v5039_v35 = vpop.permute.xlu1 %5038  ;;  %9319 = vmatpush3.xpose.msk.msra.mxu1 %vm3125_vm1, %v12638_v41  ;;  %9282 = vmatprep.mubr.msk.f32.mxu1 %vm3770_vm2, %v13167_v45  ;;  %v463_v41 = vld [vmem:[%s14338_s6 + $0x8] sm:$0xff] }
 0x476   : > { %9320 = vmatprep.subr.msk.mxu1 %vm3125_vm1, %v12624_v0  ;;  %9313 = vmatprep.mubr.msk.f32.mxu0 %vm3125_vm1, %v5037_v49 }
 0x477   : > { %v5379_v3 = vpop.permute.xlu0 %5378  ;;  %9314 = vmatmul.mubr.msk.f32.gmra.mxu0 %vm3125_vm1, %v5039_v35 }
 0x478   : > { %9358 = vmatprep.subr.msk.mxu0 %vm3125_vm1, %v5379_v3  ;;  %9283 = vmatmul.mubr.msk.f32.gmra.mxu1 %vm3770_vm2, %v13179_v16 }
 0x479   : > { %v5206_v48 = vpop.permute.xlu1 %5205  ;;  %9321 = vmatpush3.xpose.msk.msra.mxu1 %vm3125_vm1, %v12624_v0  ;;  %9285 = vmatprep.mubr.msk.f32.mxu1 %vm3770_vm2, %v13183_v51 }
 0x47a   : > { %9322 = vmatprep.subr.msk.mxu1 %vm3125_vm1, %v12800_v15  ;;  %9359 = vmatpush3.xpose.msk.msra.mxu0 %vm3125_vm1, %v5379_v3 }
 0x47b   : > { %v5208_v59 = vpop.permute.xlu0 %5207  ;;  %9400 = vmatprep.subr.mxu0 %v463_v41 }
 0x47c   : > { %9286 = vmatmul.mubr.msk.f32.gmra.mxu1 %vm3770_vm2, %v13198_v50 }
 0x47d   : > { %v13200_v28 = vpop.permute.xlu1 %5547  ;;  %9323 = vmatpush3.xpose.msk.msra.mxu1 %vm3125_vm1, %v12800_v15  ;;  %9332 = vmatprep.mubr.msk.f32.mxu1 %vm3125_vm1, %v12917_v29 }
 0x47e   : > { %9324 = vmatprep.subr.msk.mxu1 %vm3125_vm1, %v12819_v52 }
 0x47f   : > { %v5363_v0 = vpop.permute.xlu0 %5362 }
 0x480   : > { %9360 = vmatprep.mubr.msk.f32.mxu0 %vm3125_vm1, %v5363_v0 }
 0x481   : > { %v5365_v62 = vpop.permute.xlu1 %5364  ;;  %9325 = vmatpush3.xpose.msk.msra.mxu1 %vm3125_vm1, %v12819_v52 }
 0x482   : > { %9361 = vmatmul.mubr.msk.f32.vlgmr.msra.gmra.mxu0 %vm3125_vm1, %v5365_v62  ;;  %9326 = vmatprep.subr.msk.mxu1 %vm3125_vm1, %v12836_v21 }
 0x483   : > { %v5532_v34 = vpop.permute.xlu0 %5531  ;;  %9401 = vmatpush3.msra.mxu0 %v463_v41 }
 0x485   : > { %v13216_v15 = vpop.permute.xlu1 %5533  ;;  %9327 = vmatpush3.xpose.msk.msra.mxu1 %vm3125_vm1, %v12836_v21 }
 0x486   : > { %9328 = vmatprep.subr.msk.mxu1 %vm3125_vm1, %v12857_v14 }
 0x487   : > { %v5367_v29 = vpop.permute.xlu0 %5366 }
 0x488   : > { %9363 = vmatprep.mubr.msk.f32.mxu0 %vm3125_vm1, %v5367_v29 }
 0x489   : > { %v5369_v23 = vpop.permute.xlu1 %5368  ;;  %9329 = vmatpush3.xpose.msk.msra.mxu1 %vm3125_vm1, %v12857_v14 }
 0x48a   : > { %9364 = vmatmul.mubr.msk.f32.gmra.mxu0 %vm3125_vm1, %v5369_v23  ;;  %9330 = vmatprep.subr.msk.mxu1 %vm3125_vm1, %v12877_v31 }
 0x48b   : > { %v5536_v52 = vpop.permute.xlu0 %5535 }
 0x48d   : > { %v13228_v60 = vpop.permute.xlu1 %5537  ;;  %9331 = vmatpush3.xpose.msk.msra.mxu1 %vm3125_vm1, %v12877_v31 }
 0x48e   : > { %9372 = vmatprep.subr.msk.mxu1 %vm3125_vm1, %v12929_v43 }
 0x48f   : > { %v5371_v21 = vpop.permute.xlu0 %5370 }
 0x490   : > { %9366 = vmatprep.mubr.msk.f32.mxu0 %vm3125_vm1, %v5371_v21  ;;  %9333 = vmatmul.mubr.msk.f32.vlgmr.msra.gmra.mxu1 %vm3125_vm1, %v12938_v61 }
 0x491   : > { %v5373_v55 = vpop.permute.xlu1 %5372  ;;  %9335 = vmatprep.mubr.msk.f32.mxu1 %vm3125_vm1, %v13071_v5  ;;  %9373 = vmatpush3.xpose.msk.msra.mxu1 %vm3125_vm1, %v12929_v43 }
 0x492   : > { %9367 = vmatmul.mubr.msk.f32.gmra.mxu0 %vm3125_vm1, %v5373_v55  ;;  %9374 = vmatprep.subr.msk.mxu1 %vm3125_vm1, %v12959_v9 }
 0x493   : > { %v5540_v14 = vpop.permute.xlu0 %5539 }
 0x494   : > { %9336 = vmatmul.mubr.msk.f32.gmra.mxu1 %vm3125_vm1, %v13079_v47 }
 0x495   : > { %v5542_v31 = vpop.permute.xlu1 %5541  ;;  %9338 = vmatprep.mubr.msk.f32.mxu1 %vm3125_vm1, %v13128_v19  ;;  %9375 = vmatpush3.xpose.msk.msra.mxu1 %vm3125_vm1, %v12959_v9 }
 0x496   : > { %9376 = vmatprep.subr.msk.mxu1 %vm3125_vm1, %v12980_v39 }
 0x497   : > { %v5375_v61 = vpop.permute.xlu0 %5374 }
 0x498   : > { %9369 = vmatprep.mubr.msk.f32.mxu0 %vm3125_vm1, %v5375_v61  ;;  %9339 = vmatmul.mubr.msk.f32.gmra.mxu1 %vm3125_vm1, %v13136_v63 }
 0x499   : > { %v5377_v43 = vpop.permute.xlu1 %5376  ;;  %9341 = vmatprep.mubr.msk.f32.mxu1 %vm3125_vm1, %v5206_v48  ;;  %9377 = vmatpush3.xpose.msk.msra.mxu1 %vm3125_vm1, %v12980_v39 }
 0x49a   : > { %9370 = vmatmul.mubr.msk.f32.gmra.mxu0 %vm3125_vm1, %v5377_v43  ;;  %9378 = vmatprep.subr.msk.mxu1 %vm3125_vm1, %v13004_v46 }
 0x49b   : > { %v5544_v5 = vpop.permute.xlu0 %5543 }
 0x49c   : > { %9342 = vmatmul.mubr.msk.f32.gmra.mxu1 %vm3125_vm1, %v5208_v59 }
 0x49d   : > { %v5546_v9 = vpop.permute.xlu1 %5545  ;;  %9379 = vmatpush3.xpose.msk.msra.mxu1 %vm3125_vm1, %v13004_v46  ;;  %9388 = vmatprep.mubr.msk.f32.mxu1 %vm3125_vm1, %v5532_v34 }
 0x49e   : > { %9380 = vmatprep.subr.msk.mxu1 %vm3125_vm1, %v13027_v11 }
 0x49f   : > { %v6069_v47 = vpop.permute.xlu0 %6068 }
 0x4a0   : > { %9402 = vmatprep.mubr.msk.f32.mxu0 %vm3125_vm1, %v6069_v47 }
 0x4a1   : > { %v6071_v19 = vpop.permute.xlu1 %6070  ;;  %9381 = vmatpush3.xpose.msk.msra.mxu1 %vm3125_vm1, %v13027_v11 }
 0x4a2   : > { %9403 = vmatmul.mubr.msk.f32.vlgmr.msra.gmra.mxu0 %vm3125_vm1, %v6071_v19  ;;  %9382 = vmatprep.subr.msk.mxu1 %vm3125_vm1, %v13093_v1 }
 0x4a3   : > { %v6073_v39 = vpop.permute.xlu0 %6072 }
 0x4a4   : > { %9405 = vmatprep.mubr.msk.f32.mxu0 %vm3125_vm1, %v6073_v39 }
 0x4a5   : > { %v6075_v46 = vpop.permute.xlu1 %6074  ;;  %9383 = vmatpush3.xpose.msk.msra.mxu1 %vm3125_vm1, %v13093_v1 }
 0x4a6   : > { %9406 = vmatmul.mubr.msk.f32.gmra.mxu0 %vm3125_vm1, %v6075_v46  ;;  %9384 = vmatprep.subr.msk.mxu1 %vm3125_vm1, %v13147_v10 }
 0x4a7   : > { %v6077_v44 = vpop.permute.xlu0 %6076 }
 0x4a8   : > { %9408 = vmatprep.mubr.msk.f32.mxu0 %vm3125_vm1, %v6077_v44 }
 0x4a9   : > { %v6079_v63 = vpop.permute.xlu1 %6078  ;;  %9385 = vmatpush3.xpose.msk.msra.mxu1 %vm3125_vm1, %v13147_v10 }
 0x4aa   : > { %9409 = vmatmul.mubr.msk.f32.gmra.mxu0 %vm3125_vm1, %v6079_v63  ;;  %9386 = vmatprep.subr.msk.mxu1 %vm3125_vm1, %v13200_v28 }
 0x4ab   : > { %v6081_v11 = vpop.permute.xlu0 %6080 }
 0x4ac   : > { %9411 = vmatprep.mubr.msk.f32.mxu0 %vm3125_vm1, %v6081_v11 }
 0x4ad   : > { %v6083_v17 = vpop.permute.xlu1 %6082  ;;  %9387 = vmatpush3.xpose.msk.msra.mxu1 %vm3125_vm1, %v13200_v28 }
 0x4ae   : > { %9412 = vmatmul.mubr.msk.f32.gmra.mxu0 %vm3125_vm1, %v6083_v17 }
 0x4af   : > { %v6085_v1 = vpop.permute.xlu0 %6084 }
 0x4b0   : > { %9414 = vmatprep.mubr.msk.f32.mxu0 %vm3125_vm1, %v6085_v1  ;;  %9389 = vmatmul.mubr.msk.f32.vlgmr.msra.gmra.mxu1 %vm3125_vm1, %v13216_v15 }
 0x4b1   : > { %v6087_v49 = vpop.permute.xlu1 %6086  ;;  %9391 = vmatprep.mubr.msk.f32.mxu1 %vm3125_vm1, %v5536_v52 }
 0x4b2   : > { %9415 = vmatmul.mubr.msk.f32.gmra.mxu0 %vm3125_vm1, %v6087_v49 }
 0x4b3   : > { %v6089_v10 = vpop.permute.xlu0 %6088 }
 0x4b4   : > { %9417 = vmatprep.mubr.msk.f32.mxu0 %vm3125_vm1, %v6089_v10  ;;  %9392 = vmatmul.mubr.msk.f32.gmra.mxu1 %vm3125_vm1, %v13228_v60 }
 0x4b5   : > { %v6091_v57 = vpop.permute.xlu1 %6090  ;;  %9394 = vmatprep.mubr.msk.f32.mxu1 %vm3125_vm1, %v5540_v14 }
 0x4b6   : > { %9418 = vmatmul.mubr.msk.f32.gmra.mxu0 %vm3125_vm1, %v6091_v57 }
 0x4b7   : > { %v6093_v35 = vpop.permute.xlu0 %6092 }
 0x4b8   : > { %9420 = vmatprep.mubr.msk.f32.mxu0 %vm3125_vm1, %v6093_v35  ;;  %9395 = vmatmul.mubr.msk.f32.gmra.mxu1 %vm3125_vm1, %v5542_v31 }
 0x4b9   : > { %v6095_v3 = vpop.permute.xlu1 %6094  ;;  %9397 = vmatprep.mubr.msk.f32.mxu1 %vm3125_vm1, %v5544_v5 }
 0x4ba   : > { %9421 = vmatmul.mubr.msk.f32.gmra.mxu0 %vm3125_vm1, %v6095_v3 }
 0x4bb   : > { %v6097_v48 = vpop.permute.xlu0 %6096 }
 0x4bc   : > { %9423 = vmatprep.mubr.msk.f32.mxu0 %vm3125_vm1, %v6097_v48  ;;  %9398 = vmatmul.mubr.msk.f32.gmra.mxu1 %vm3125_vm1, %v5546_v9 }
 0x4bd   : > { %v6099_v41 = vpop.permute.xlu1 %6098 }
 0x4be   : > { %9424 = vmatmul.mubr.msk.f32.gmra.mxu0 %vm3125_vm1, %v6099_v41 }
 0x4bf   : > { %v6101_v59 = vpop.permute.xlu0 %6100 }
 0x4c0   : > { %9426 = vmatprep.mubr.msk.f32.mxu0 %vm3125_vm1, %v6101_v59 }
 0x4c1   : > { %v6103_v28 = vpop.permute.xlu1 %6102 }
 0x4c2   : > { %9427 = vmatmul.mubr.msk.f32.gmra.mxu0 %vm3125_vm1, %v6103_v28 }
 0x4c3   : > { %v6105_v0 = vpop.permute.xlu0 %6104 }
 0x4c4   : > { %9429 = vmatprep.mubr.msk.f32.mxu0 %vm3125_vm1, %v6105_v0 }
 0x4c5   : > { %v6107_v62 = vpop.permute.xlu1 %6106 }
 0x4c6   : > { %9430 = vmatmul.mubr.msk.f32.gmra.mxu0 %vm3125_vm1, %v6107_v62 }
 0x4c7   : > { %v6109_v34 = vpop.permute.xlu0 %6108 }
 0x4c8   : > { %9432 = vmatprep.mubr.msk.f32.mxu0 %vm3125_vm1, %v6109_v34 }
 0x4c9   : > { %v6111_v15 = vpop.permute.xlu1 %6110 }
 0x4ca   : > { %9433 = vmatmul.mubr.msk.f32.gmra.mxu0 %vm3125_vm1, %v6111_v15 }
 0x4cb   : > { %v6113_v29 = vpop.permute.xlu0 %6112 }
 0x4cc   : > { %9435 = vmatprep.mubr.msk.f32.mxu0 %vm3125_vm1, %v6113_v29 }
 0x4cd   : > { %v6115_v23 = vpop.permute.xlu1 %6114 }
 0x4ce   : > { %9436 = vmatmul.mubr.msk.f32.gmra.mxu0 %vm3125_vm1, %v6115_v23 }
 0x4cf   : > { %v6117_v60 = vpop.permute.xlu0 %6116 }
 0x4d0   : > { %9438 = vmatprep.mubr.msk.f32.mxu0 %vm3125_vm1, %v6117_v60 }
 0x4d1   : > { %v6119_v52 = vpop.permute.xlu1 %6118 }
 0x4d2   : > { %9439 = vmatmul.mubr.msk.f32.gmra.mxu0 %vm3125_vm1, %v6119_v52 }
 0x4d5   : > { %v6123_v21 = vpop.permute.xlu1 %6122 }
 0x4da   : > { %v6121_v55 = vpop.permute.xlu0 %6120 }
 0x4db   : > { %9441 = vmatprep.mubr.msk.f32.mxu0 %vm3125_vm1, %v6121_v55  ;;  %v6127_v14 = vpop.permute.xlu1 %6126 }
 0x4dc   : > { %9442 = vmatmul.mubr.msk.f32.gmra.mxu0 %vm3125_vm1, %v6123_v21 }
 0x4df   : > { %v6125_v31 = vpop.permute.xlu0 %6124 }
 0x4e0   : > { %9444 = vmatprep.mubr.msk.f32.mxu0 %vm3125_vm1, %v6125_v31  ;;  %v6131_v61 = vpop.permute.xlu1 %6130 }
 0x4e1   : > { %9445 = vmatmul.mubr.msk.f32.gmra.mxu0 %vm3125_vm1, %v6127_v14 }
 0x4e4   : > { %v6129_v43 = vpop.permute.xlu0 %6128 }
 0x4e5   : > { %9447 = vmatprep.mubr.msk.f32.mxu0 %vm3125_vm1, %v6129_v43 }
 0x4e6   : > { %9448 = vmatmul.mubr.msk.f32.gmra.mxu0 %vm3125_vm1, %v6131_v61 }
 0x4f2   : > { %v9194_v5 = vpop.f32.mrf.mxu1 }
 0x4f3   : > { %v4951_v3 = vsel %vm672_vm0, %v9194_v5, 0.0 }
 0x4f4   : > { %v4518_v9 = vpop.f32.mrf.mxu1 }
 0x4f5   : > { %v4944_v28 = vsel %vm672_vm0, %v4518_v9, 0.0 }
 0x4fb   : > { %v9197_v47 = vpop.f32.mrf.mxu1 }
 0x4fc   : > { %v4965_v15 = vsel %vm672_vm0, %v9197_v47, 0.0 }
 0x4fd   : > { %v4528_v19 = vpop.f32.mrf.mxu1 }
 0x4fe   : > { %v4958_v60 = vsel %vm672_vm0, %v4528_v19, 0.0 }
 0x503   : > { %v9200_v39 = vpop.f32.mrf.mxu1 }
 0x504   : > { %v4979_v31 = vsel %vm672_vm0, %v9200_v39, 0.0 }
 0x505   : > { %v4538_v44 = vpop.f32.mrf.mxu1 }
 0x506   : > { %v9306_v46 = vpop.f32.mrf.mxu0  ;;  %v4972_v9 = vsel %vm672_vm0, %v4538_v44, 0.0 }
 0x507   : > { %v13322_v63 = vmul.f32 0.35355338, %v9306_v46 }
 0x508   : > { %v5154_v11 = vpop.f32.mrf.mxu0  ;;  %v9203_v49 = vpop.f32.mrf.mxu1 }
 0x509   : > { %v13324_v17 = vmul.f32 0.35355338, %v5154_v11  ;;  %v5735_v1 = vsel %vm3770_vm2, %v13322_v63, -inf }
 0x50a   : > { %5736 = vmax.xlane.f32.xlu0 %v5735_v1  ;;  %v4548_v10 = vpop.f32.mrf.mxu1  ;;  %v4993_v1 = vsel %vm672_vm0, %v9203_v49, 0.0 }
 0x50b   : > { %v5732_v57 = vsel %vm3770_vm2, %v13324_v17, -inf }
 0x50c   : > { %v9222_v35 = vpop.f32.mrf.mxu1 }
 0x50d   : > { %v4952_v48 = vsel %vm672_vm0, %v9222_v35, 0.0 }
 0x50e   : > { %5733 = vmax.xlane.f32.xlu0 %v5732_v57  ;;  %v4953_v41 = vadd.f32 %v4952_v48, %v4951_v3  ;;  %v4647_v59 = vpop.f32.mrf.mxu1  ;;  %v4986_v3 = vsel %vm672_vm0, %v4548_v10, 0.0 }
 0x50f   : > { %v4945_v0 = vsel %vm672_vm0, %v4647_v59, 0.0 }
 0x510   : > { %v4946_v62 = vadd.f32 %v4945_v0, %v4944_v28 }
 0x512   : > { %v9225_v34 = vpop.f32.mrf.mxu1 }
 0x513   : > { %v4966_v29 = vsel %vm672_vm0, %v9225_v34, 0.0 }
 0x514   : > { %v4967_v23 = vadd.f32 %v4966_v29, %v4965_v15  ;;  %v4657_v52 = vpop.f32.mrf.mxu1 }
 0x515   : > { %v4959_v21 = vsel %vm672_vm0, %v4657_v52, 0.0 }
 0x516   : > { %v4960_v55 = vadd.f32 %v4959_v21, %v4958_v60  ;;  %v9228_v14 = vpop.f32.mrf.mxu1 }
 0x517   : > { %v4980_v61 = vsel %vm672_vm0, %v9228_v14, 0.0 }
 0x518   : > { %v4981_v43 = vadd.f32 %v4980_v61, %v4979_v31  ;;  %v4667_v5 = vpop.f32.mrf.mxu1 }
 0x519   : > { %v4973_v47 = vsel %vm672_vm0, %v4667_v5, 0.0 }
 0x51a   : > { %v4974_v46 = vadd.f32 %v4973_v47, %v4972_v9  ;;  %v9231_v11 = vpop.f32.mrf.mxu1 }
 0x51b   : > { %v4994_v19 = vsel %vm672_vm0, %v9231_v11, 0.0 }
 0x51c   : > { %v4995_v57 = vadd.f32 %v4994_v19, %v4993_v1  ;;  %v4677_v35 = vpop.f32.mrf.mxu1 }
 0x51d   : > { %v4987_v39 = vsel %vm672_vm0, %v4677_v35, 0.0 }
 0x51e   : > { %v4988_v48 = vadd.f32 %v4987_v39, %v4986_v3  ;;  %v9250_v59 = vpop.f32.mrf.mxu1 }
 0x51f   : > { %v4954_v28 = vsel %vm672_vm0, %v9250_v59, 0.0 }
 0x520   : > { %v4955_v0 = vadd.f32 %v4954_v28, %v4953_v41  ;;  %v4776_v44 = vpop.f32.mrf.mxu1 }
 0x521   : > { %v4947_v34 = vsel %vm672_vm0, %v4776_v44, 0.0 }
 0x522   : > { %v4948_v15 = vadd.f32 %v4947_v34, %v4946_v62  ;;  %v9253_v29 = vpop.f32.mrf.mxu1 }
 0x523   : > { %v4968_v49 = vsel %vm672_vm0, %v9253_v29, 0.0 }
 0x524   : > { %v4969_v52 = vadd.f32 %v4968_v49, %v4967_v23  ;;  %v4786_v60 = vpop.f32.mrf.mxu1 }
 0x525   : > { %v4961_v21 = vsel %vm672_vm0, %v4786_v60, 0.0 }
 0x526   : > { %v4962_v14 = vadd.f32 %v4961_v21, %v4960_v55  ;;  %v9256_v10 = vpop.f32.mrf.mxu1 }
 0x527   : > { %v4982_v31 = vsel %vm672_vm0, %v9256_v10, 0.0 }
 0x528   : > { %v4983_v61 = vadd.f32 %v4982_v31, %v4981_v43  ;;  %v4796_v5 = vpop.f32.mrf.mxu1 }
 0x529   : > { %v4975_v9 = vsel %vm672_vm0, %v4796_v5, 0.0 }
 0x52a   : > { %v4976_v41 = vadd.f32 %v4975_v9, %v4974_v46  ;;  %v9259_v47 = vpop.f32.mrf.mxu1 }
 0x52b   : > { %v9309_v11 = vpop.f32.mrf.mxu0  ;;  %v4996_v62 = vsel %vm672_vm0, %v9259_v47, 0.0 }
 0x52c   : > { %v13353_v1 = vmul.f32 0.35355338, %v9309_v11  ;;  %v4997_v19 = vadd.f32 %v4996_v62, %v4995_v57  ;;  %v4806_v23 = vpop.f32.mrf.mxu1 }
 0x52d   : > { %v5164_v35 = vpop.f32.mrf.mxu0  ;;  %v4989_v3 = vsel %vm672_vm0, %v4806_v23, 0.0 }
 0x52e   : > { %v13356_v55 = vmul.f32 0.35355338, %v5164_v35  ;;  %v5741_v43 = vsel %vm3770_vm2, %v13353_v1, -inf  ;;  %v4990_v39 = vadd.f32 %v4989_v3, %v4988_v48 }
 0x52f   : > { %5742 = vmax.xlane.f32.xlu1 %v5741_v43 }
 0x530   : > { %v9278_v59 = vpop.f32.mrf.mxu1  ;;  %v5738_v46 = vsel %vm3770_vm2, %v13356_v55, -inf }
 0x531   : > { %v4956_v28 = vsel %vm672_vm0, %v9278_v59, 0.0  ;;  %5739 = vmax.xlane.f32.xlu0 %v5738_v46 }
 0x532   : > { %v13363_v44 = vadd.f32 %v4956_v28, %v4955_v0  ;;  %v4905_v57 = vpop.f32.mrf.mxu1 }
 0x533   : > { %v4949_v34 = vsel %vm672_vm0, %v4905_v57, 0.0  ;;  %v9312_v60 = vpop.f32.mrf.mxu0 }
 0x534   : > { %14835 = vst [vmem:[#allocation5_spill] sm:$0xff] %v13363_v44  ;;  %v13366_v29 = vadd.f32 %v4949_v34, %v4948_v15  ;;  %v9281_v49 = vpop.f32.mrf.mxu1  ;;  %v13369_v48 = vmul.f32 0.35355338, %v9312_v60 }
 0x535   : > { %v4970_v21 = vsel %vm672_vm0, %v9281_v49, 0.0  ;;  %v5174_v5 = vpop.f32.mrf.mxu0 }
 0x536   : > { %14836 = vst [vmem:[#allocation6_spill] sm:$0xff] %v13366_v29  ;;  %v13371_v10 = vadd.f32 %v4970_v21, %v4969_v52  ;;  %v4915_v31 = vpop.f32.mrf.mxu1  ;;  %v13374_v47 = vmul.f32 0.35355338, %v5174_v5  ;;  %v5747_v0 = vsel %vm3770_vm2, %v13369_v48, -inf }
 0x537   : > { %v4963_v9 = vsel %vm672_vm0, %v4915_v31, 0.0  ;;  %5748 = vmax.xlane.f32.xlu1 %v5747_v0  ;;  %v9315_v62 = vpop.f32.mrf.mxu0 }
 0x538   : > { %14837 = vst [vmem:[#allocation8_spill] sm:$0xff] %v13371_v10  ;;  %v13378_v11 = vadd.f32 %v4963_v9, %v4962_v14  ;;  %v9284_v15 = vpop.f32.mrf.mxu1  ;;  %v5744_v52 = vsel %vm3770_vm2, %v13374_v47, -inf  ;;  %v13383_v35 = vmul.f32 0.35355338, %v9315_v62 }
 0x539   : > { %v4984_v23 = vsel %vm672_vm0, %v9284_v15, 0.0  ;;  %5745 = vmax.xlane.f32.xlu0 %v5744_v52  ;;  %v5184_v59 = vpop.f32.mrf.mxu0 }
 0x53a   : > { %14838 = vst [vmem:[#allocation11_spill] sm:$0xff] %v13378_v11  ;;  %v13385_v3 = vadd.f32 %v4984_v23, %v4983_v61  ;;  %v4925_v43 = vpop.f32.mrf.mxu1  ;;  %v13388_v28 = vmul.f32 0.35355338, %v5184_v59  ;;  %v5753_v14 = vsel %vm3770_vm2, %v13383_v35, -inf }
 0x53b   : > { %v4977_v46 = vsel %vm672_vm0, %v4925_v43, 0.0  ;;  %5754 = vmax.xlane.f32.xlu1 %v5753_v14 }
 0x53c   : > { %14839 = vst [vmem:[#allocation7_spill] sm:$0xff] %v13385_v3  ;;  %v13392_v57 = vadd.f32 %v4977_v46, %v4976_v41  ;;  %v9287_v34 = vpop.f32.mrf.mxu1  ;;  %v5750_v61 = vsel %vm3770_vm2, %v13388_v28, -inf }
 0x53d   : > { %v4998_v49 = vsel %vm672_vm0, %v9287_v34, 0.0  ;;  %5751 = vmax.xlane.f32.xlu0 %v5750_v61 }
 0x53e   : > { %14840 = vst [vmem:[#allocation9_spill] sm:$0xff] %v13392_v57  ;;  %v13397_v60 = vadd.f32 %v4998_v49, %v4997_v19  ;;  %v4935_v21 = vpop.f32.mrf.mxu1 }
 0x53f   : > { %v4991_v31 = vsel %vm672_vm0, %v4935_v21, 0.0 }
 0x540   : > { %14841 = vst [vmem:[#allocation13_spill] sm:$0xff] %v13397_v60  ;;  %v13400_v5 = vadd.f32 %v4991_v31, %v4990_v39 }
 0x542   : > { %14842 = vst [vmem:[#allocation14_spill] sm:$0xff] %v13400_v5  ;;  %v9362_v9 = vpop.f32.mrf.mxu0 }
 0x543   : > { %v13402_v0 = vmul.f32 0.35355338, %v9362_v9 }
 0x544   : > { %v5492_v41 = vpop.f32.mrf.mxu0 }
 0x545   : > { %v13404_v15 = vmul.f32 0.35355338, %v5492_v41  ;;  %v5783_v62 = vsel %vm3770_vm2, %v13402_v0, -inf }
 0x546   : > { %5784 = vmax.xlane.f32.xlu1 %v5783_v62 }
 0x547   : > { %v5780_v19 = vsel %vm3770_vm2, %v13404_v15, -inf }
 0x548   : > { %5781 = vmax.xlane.f32.xlu0 %v5780_v19 }
 0x54a   : > { %v9365_v23 = vpop.f32.mrf.mxu0 }
 0x54b   : > { %v13410_v52 = vmul.f32 0.35355338, %v9365_v23 }
 0x54c   : > { %v5502_v43 = vpop.f32.mrf.mxu0 }
 0x54d   : > { %v13412_v39 = vmul.f32 0.35355338, %v5502_v43  ;;  %v5789_v59 = vsel %vm3770_vm2, %v13410_v52, -inf }
 0x54e   : > { %5790 = vmax.xlane.f32.xlu1 %v5789_v59 }
 0x54f   : > { %14843 = vst [vmem:[#allocation12_spill] sm:$0xff] %v13412_v39  ;;  %v5786_v46 = vsel %vm3770_vm2, %v13412_v39, -inf }
 0x550   : > { %5787 = vmax.xlane.f32.xlu0 %v5786_v46  ;;  %v9334_v14 = vpop.f32.mrf.mxu1 }
 0x552   : > { %v9368_v34 = vpop.f32.mrf.mxu0  ;;  %v5323_v61 = vpop.f32.mrf.mxu1 }
 0x553   : > { %v13418_v49 = vmul.f32 0.35355338, %v9368_v34  ;;  %v13428_v34 = vmul.f32 0.35355338, %v5323_v61 }
 0x554   : > { %v5512_v21 = vpop.f32.mrf.mxu0  ;;  %v9337_v41 = vpop.f32.mrf.mxu1 }
 0x555   : > { %14844 = vst [vmem:[#allocation10_spill] sm:$0xff] %v13418_v49  ;;  %v13420_v31 = vmul.f32 0.35355338, %v5512_v21  ;;  %v5795_v9 = vsel %vm3770_vm2, %v13418_v49, -inf  ;;  %v13444_v57 = vmul.f32 0.35355338, %v9337_v41 }
 0x556   : > { %5796 = vmax.xlane.f32.xlu1 %v5795_v9  ;;  %v5333_v19 = vpop.f32.mrf.mxu1  ;;  %v13434_v9 = vmul.f32 0.35355338, %v9334_v14 }
 0x557   : > { %14845 = vst [vmem:[#allocation21_spill] sm:$0xff] %v13420_v31  ;;  %v5792_v62 = vsel %vm3770_vm2, %v13420_v31, -inf  ;;  %v5765_v41 = vsel %vm3770_vm2, %v13444_v57, -inf }
 0x558   : > { %5793 = vmax.xlane.f32.xlu0 %v5792_v62  ;;  %v9340_v23 = vpop.f32.mrf.mxu1  ;;  %v13438_v62 = vmul.f32 0.35355338, %v5333_v19 }
 0x55a   : > { %v9371_v43 = vpop.f32.mrf.mxu0  ;;  %v5343_v5 = vpop.f32.mrf.mxu1 }
 0x55b   : > { %v13426_v59 = vmul.f32 0.35355338, %v9371_v43  ;;  %v5756_v43 = vsel %vm3770_vm2, %v13428_v34, -inf  ;;  %v13450_v10 = vmul.f32 0.35355338, %v5343_v5 }
 0x55c   : > { %v5522_v46 = vpop.f32.mrf.mxu0  ;;  %v9343_v61 = vpop.f32.mrf.mxu1 }
 0x55d   : > { %14846 = vst [vmem:[#allocation15_spill] sm:$0xff] %v13426_v59  ;;  %v13430_v60 = vmul.f32 0.35355338, %v5522_v46  ;;  %v5801_v21 = vsel %vm3770_vm2, %v13426_v59, -inf  ;;  %v13454_v59 = vmul.f32 0.35355338, %v9340_v23 }
 0x55e   : > { %5802 = vmax.xlane.f32.xlu1 %v5801_v21  ;;  %v5759_v21 = vsel %vm3770_vm2, %v13434_v9, -inf  ;;  %v5353_v19 = vpop.f32.mrf.mxu1 }
 0x55f   : > { %14847 = vst [vmem:[#allocation24_spill] sm:$0xff] %v13430_v60  ;;  %v5798_v3 = vsel %vm3770_vm2, %v13430_v60, -inf  ;;  %v13458_v44 = vmul.f32 0.35355338, %v5353_v19  ;;  %v13462_v60 = vmul.f32 0.35355338, %v9343_v61 }
 0x560   : > { %5799 = vmax.xlane.f32.xlu0 %v5798_v3  ;;  %v5762_v3 = vsel %vm3770_vm2, %v13438_v62, -inf }
 0x561   : > { %14848 = vst [vmem:[#allocation18_spill] sm:$0xff] %v13458_v44  ;;  %v5774_v49 = vsel %vm3770_vm2, %v13458_v44, -inf  ;;  %v5777_v19 = vsel %vm3770_vm2, %v13462_v60, -inf }
 0x562   : > { %5757 = vmax.xlane.f32.xlu1 %v5756_v43  ;;  %v13442_v46 = vpop.f32.mrf.mxu0 }
 0x564   : > { %5760 = vmax.xlane.f32.xlu0 %v5759_v21  ;;  %v13448_v14 = vpop.f32.mrf.mxu0  ;;  %v5768_v21 = vsel %vm3770_vm2, %v13450_v10, -inf }
 0x566   : > { %5763 = vmax.xlane.f32.xlu1 %v5762_v3  ;;  %v9407_v11 = vpop.f32.mrf.mxu0  ;;  %v5771_v3 = vsel %vm3770_vm2, %v13454_v59, -inf }
 0x568   : > { %5766 = vmax.xlane.f32.xlu0 %v5765_v41  ;;  %v6272_v43 = vpop.f32.mrf.mxu0 }
 0x56a   : > { %5769 = vmax.xlane.f32.xlu1 %v5768_v21  ;;  %v9410_v5 = vpop.f32.mrf.mxu0 }
 0x56c   : > { %5772 = vmax.xlane.f32.xlu0 %v5771_v3  ;;  %v6282_v23 = vpop.f32.mrf.mxu0 }
 0x56e   : > { %5775 = vmax.xlane.f32.xlu1 %v5774_v49  ;;  %v9413_v41 = vpop.f32.mrf.mxu0 }
 0x56f   : > { %9450 = vmatprep.subr.mxu1 %v9413_v41 }
 0x570   : > { %5778 = vmax.xlane.f32.xlu0 %v5777_v19  ;;  %v6292_v29 = vpop.f32.mrf.mxu0  ;;  %9451 = vmatpush3.msra.mxu1 %v9413_v41  ;;  %v9390_v61 = vpop.f32.mrf.mxu1 }
 0x571   : > { %9452 = vmatprep.subr.mxu1 %v6292_v29  ;;  %v13472_v31 = vmul.f32 0.35355338, %v9390_v61 }
 0x572   : > { %v13470_v21 = vpop.f32.mrf.mxu0  ;;  %9453 = vmatpush3.msra.mxu1 %v6292_v29  ;;  %v5661_v3 = vpop.f32.mrf.mxu1 }
 0x573   : > { %14849 = vst [vmem:[#allocation16_spill] sm:$0xff] %v13470_v21  ;;  %9454 = vmatprep.subr.mxu1 %v9410_v5  ;;  %v13476_v49 = vmul.f32 0.35355338, %v5661_v3  ;;  %v5807_v44 = vsel %vm3770_vm2, %v13472_v31, -inf }
 0x574   : > { %v13474_v39 = vpop.f32.mrf.mxu0  ;;  %9455 = vmatpush3.msra.mxu1 %v9410_v5  ;;  %v9393_v19 = vpop.f32.mrf.mxu1  ;;  %5808 = vmax.xlane.f32.xlu1 %v5807_v44 }
 0x575   : > { %14850 = vst [vmem:[#allocation17_spill] sm:$0xff] %v13474_v39  ;;  %9456 = vmatprep.subr.mxu1 %v6282_v23  ;;  %v13482_v21 = vmul.f32 0.35355338, %v9393_v19  ;;  %v5804_v29 = vsel %vm3770_vm2, %v13476_v49, -inf }
 0x576   : > { %v13480_v41 = vpop.f32.mrf.mxu0  ;;  %9457 = vmatpush3.msra.mxu1 %v6282_v23  ;;  %v5671_v61 = vpop.f32.mrf.mxu1  ;;  %5805 = vmax.xlane.f32.xlu0 %v5804_v29 }
 0x577   : > { %14851 = vst [vmem:[#allocation27_spill] sm:$0xff] %v13480_v41  ;;  %9458 = vmatprep.subr.mxu1 %v9407_v11  ;;  %v13488_v3 = vmul.f32 0.35355338, %v5671_v61  ;;  %v5813_v39 = vsel %vm3770_vm2, %v13482_v21, -inf }
 0x578   : > { %v13486_v5 = vpop.f32.mrf.mxu0  ;;  %9459 = vmatpush3.msra.mxu1 %v9407_v11  ;;  %v9396_v44 = vpop.f32.mrf.mxu1  ;;  %5814 = vmax.xlane.f32.xlu1 %v5813_v39 }
 0x579   : > { %14852 = vst [vmem:[#allocation23_spill] sm:$0xff] %v13486_v5  ;;  %9460 = vmatprep.subr.mxu1 %v6272_v43  ;;  %v13494_v19 = vmul.f32 0.35355338, %v9396_v44  ;;  %v5810_v41 = vsel %vm3770_vm2, %v13488_v3, -inf }
 0x57a   : > { %v13492_v23 = vpop.f32.mrf.mxu0  ;;  %9461 = vmatpush3.msra.mxu1 %v6272_v43  ;;  %v5681_v29 = vpop.f32.mrf.mxu1  ;;  %5811 = vmax.xlane.f32.xlu0 %v5810_v41 }
 0x57b   : > { %14853 = vst [vmem:[#allocation20_spill] sm:$0xff] %v13492_v23  ;;  %9462 = vmatprep.subr.mxu1 %v13442_v46  ;;  %v13502_v61 = vmul.f32 0.35355338, %v5681_v29  ;;  %v5819_v39 = vsel %vm3770_vm2, %v13494_v19, -inf }
 0x57c   : > { %v13499_v11 = vpop.f32.mrf.mxu0  ;;  %9463 = vmatpush3.msra.mxu1 %v13442_v46  ;;  %v9399_v43 = vpop.f32.mrf.mxu1  ;;  %5820 = vmax.xlane.f32.xlu1 %v5819_v39 }
 0x57d   : > { %14854 = vst [vmem:[#allocation25_spill] sm:$0xff] %v13499_v11  ;;  %9464 = vmatprep.subr.mxu1 %v13448_v14  ;;  %v13510_v5 = vmul.f32 0.35355338, %v9399_v43  ;;  %v5816_v41 = vsel %vm3770_vm2, %v13502_v61, -inf }
 0x57e   : > { %v13507_v44 = vpop.f32.mrf.mxu0  ;;  %9465 = vmatpush3.msra.mxu1 %v13448_v14  ;;  %v5691_v46 = vpop.f32.mrf.mxu1  ;;  %5817 = vmax.xlane.f32.xlu0 %v5816_v41 }
 0x57f   : > { %14855 = vst [vmem:[#allocation19_spill] sm:$0xff] %v13507_v44  ;;  %9478 = vmatprep.subr.mxu1 %v13507_v44  ;;  %v13517_v11 = vmul.f32 0.35355338, %v5691_v46  ;;  %v5825_v39 = vsel %vm3770_vm2, %v13510_v5, -inf  ;;  %v4011_v44 = vsel %vm3770_vm2, %v12948_v13, 0.0  ;;  %v3987_v46 = vsel %vm3770_vm2, %v12807_v33, 0.0 }
 0x580   : > { %v13515_v29 = vpop.f32.mrf.mxu0  ;;  %5826 = vmax.xlane.f32.xlu1 %v5825_v39  ;;  %v4014_v39 = vsel %vm3770_vm2, %v12966_v18, 0.0  ;;  %v4017_v18 = vsel %vm3770_vm2, %v12970_v26, 0.0 }
 0x581   : > { %14856 = vst [vmem:[#allocation26_spill] sm:$0xff] %v13515_v29  ;;  %14857 = vst [vmem:[#allocation35_spill] sm:$0xff] %v13517_v11  ;;  %v5822_v14 = vsel %vm3770_vm2, %v13517_v11, -inf }
 0x582   : > { %v13521_v23 = vpop.f32.mrf.mxu0  ;;  %5823 = vmax.xlane.f32.xlu0 %v5822_v14  ;;  %v3990_v14 = vsel %vm3770_vm2, %v12826_v42, 0.0  ;;  %v3993_v42 = vsel %vm3770_vm2, %v12843_v32, 0.0  ;;  %v4026_v32 = vsel %vm3770_vm2, %v13009_v54, 0.0  ;;  %v4032_v54 = vsel %vm3770_vm2, %v13032_v6, 0.0 }
 0x583   : > { %14858 = vst [vmem:[#allocation29_spill] sm:$0xff] %v13521_v23  ;;  %v4065_v6 = vsel %vm3770_vm2, %v13149_v58, 0.0  ;;  %v4050_v58 = vsel %vm3770_vm2, %v13097_v38, 0.0 }
 0x584   : > { %v13525_v43 = vpop.f32.mrf.mxu0  ;;  %4012 = vadd.xlane.f32.xlu1 %v4011_v44  ;;  %v4038_v44 = vsel %vm3770_vm2, %v13055_v24, 0.0  ;;  %v4020_v24 = vsel %vm3770_vm2, %v12987_v12, 0.0  ;;  %v4062_v12 = vsel %vm3770_vm2, %v13141_v8, 0.0 }
 0x585   : > { %14859 = vst [vmem:[#allocation31_spill] sm:$0xff] %v13525_v43 }
 0x586   : > { %v13529_v41 = vpop.f32.mrf.mxu0  ;;  %3988 = vadd.xlane.f32.xlu0 %v3987_v46  ;;  %v4035_v46 = vsel %vm3770_vm2, %v13038_v22, 0.0  ;;  %v4023_v22 = vsel %vm3770_vm2, %v12994_v40, 0.0 }
 0x587   : > { %14860 = vst [vmem:[#allocation22_spill] sm:$0xff] %v13529_v41 }
 0x588   : > { %v13533_v29 = vpop.f32.mrf.mxu0  ;;  %4015 = vadd.xlane.f32.xlu1 %v4014_v39 }
 0x589   : > { %14861 = vst [vmem:[#allocation4_spill] sm:$0xff] %v13533_v29 }
 0x58a   : > { %v13537_v23 = vpop.f32.mrf.mxu0  ;;  %3991 = vadd.xlane.f32.xlu0 %v3990_v14 }
 0x58b   : > { %14862 = vst [vmem:[#allocation60_spill] sm:$0xff] %v13537_v23 }
 0x58c   : > { %v13541_v13 = vpop.f32.mrf.mxu0  ;;  %4039 = vadd.xlane.f32.xlu1 %v4038_v44  ;;  %v4059_v44 = vsel %vm3770_vm2, %v13122_v56, 0.0  ;;  %v4029_v56 = vsel %vm3770_vm2, %v13017_v2, 0.0  ;;  %v3999_v2 = vsel %vm3770_vm2, %v12884_v53, 0.0  ;;  %v4068_v53 = vsel %vm3770_vm2, %v13163_v36, 0.0  ;;  %v14867_v36 = vld [vmem:[#allocation3_spill] sm:$0xff] }
 0x58d   : > { %14863 = vst [vmem:[#allocation36_spill] sm:$0xff] %v13541_v13 }
 0x58e   : > { %v13545_v33 = vpop.f32.mrf.mxu0  ;;  %4036 = vadd.xlane.f32.xlu0 %v4035_v46  ;;  %v3996_v46 = vsel %vm3770_vm2, %v12863_v20, 0.0 }
 0x58f   : > { %14864 = vst [vmem:[#allocation28_spill] sm:$0xff] %v13545_v33 }
 0x590   : > { %4018 = vadd.xlane.f32.xlu1 %v4017_v18  ;;  %v13551_v39 = vpop.f32.mrf.mxu0 }
 0x591   : > { %14865 = vst [vmem:[#allocation65_spill] sm:$0xff] %v13551_v39 }
 0x592   : > { %3994 = vadd.xlane.f32.xlu0 %v3993_v42  ;;  %v9440_v14 = vpop.f32.mrf.mxu0 }
 0x594   : > { %4021 = vadd.xlane.f32.xlu1 %v4020_v24  ;;  %v6382_v26 = vpop.f32.mrf.mxu0  ;;  %v4041_v24 = vsel %vm3770_vm2, %v13061_v37, 0.0  ;;  %v4002_v37 = vsel %vm3770_vm2, %v12903_v7, 0.0 }
 0x596   : > { %4060 = vadd.xlane.f32.xlu0 %v4059_v44  ;;  %v4044_v44 = vsel %vm3770_vm2, %v13075_v25, 0.0  ;;  %v4047_v25 = vsel %vm3770_vm2, %v13081_v30, 0.0 }
 0x598   : > { %4024 = vadd.xlane.f32.xlu1 %v4023_v22 }
 0x59a   : > { %3997 = vadd.xlane.f32.xlu0 %v3996_v46  ;;  %v14866_v46 = vld [vmem:[#allocation2_spill] sm:$0xff] }
 0x59b   : > { %v4005_v7 = vsel %vm3770_vm2, %v14866_v46, 0.0 }
 0x59c   : > { %v9443_v18 = vpop.f32.mrf.mxu0  ;;  %4027 = vadd.xlane.f32.xlu1 %v4026_v32  ;;  %v5737_v32 = vpop.xlane.xlu0 %5736 }
 0x59e   : > { %v6392_v42 = vpop.f32.mrf.mxu0  ;;  %4063 = vadd.xlane.f32.xlu0 %v4062_v12  ;;  %v4074_v12 = vsel %vm3770_vm2, %v13179_v16, 0.0  ;;  %v4077_v16 = vsel %vm3770_vm2, %v13183_v51, 0.0 }
 0x5a0   : > { %4030 = vadd.xlane.f32.xlu1 %v4029_v56  ;;  %v4053_v56 = vsel %vm3770_vm2, %v13101_v27, 0.0  ;;  %v4080_v27 = vsel %vm3770_vm2, %v13198_v50, 0.0 }
 0x5a1   : > { %v9446_v40 = vpop.f32.mrf.mxu0 }
 0x5a2   : > { %4042 = vadd.xlane.f32.xlu0 %v4041_v24  ;;  %v4056_v24 = vsel %vm3770_vm2, %v13117_v4, 0.0 }
 0x5a3   : > { %v6402_v20 = vpop.f32.mrf.mxu0 }
 0x5a4   : > { %4033 = vadd.xlane.f32.xlu1 %v4032_v54 }
 0x5a6   : > { %v9449_v8 = vpop.f32.mrf.mxu0  ;;  %4045 = vadd.xlane.f32.xlu0 %v4044_v44 }
 0x5a7   : > { %9534 = vmatprep.subr.mxu0 %v9449_v8 }
 0x5a8   : > { %v6412_v22 = vpop.f32.mrf.mxu0  ;;  %9535 = vmatpush3.msra.mxu0 %v9449_v8 }
 0x5a9   : > { %9536 = vmatprep.subr.mxu0 %v6412_v22 }
 0x5aa   : > { %9537 = vmatpush3.msra.mxu0 %v6412_v22  ;;  %4000 = vadd.xlane.f32.xlu0 %v3999_v2 }
 0x5ab   : > { %9538 = vmatprep.subr.mxu0 %v9446_v40 }
 0x5ac   : > { %9539 = vmatpush3.msra.mxu0 %v9446_v40 }
 0x5ad   : > { %9540 = vmatprep.subr.mxu0 %v6402_v20 }
 0x5ae   : > { %9541 = vmatpush3.msra.mxu0 %v6402_v20  ;;  %4066 = vadd.xlane.f32.xlu0 %v4065_v6 }
 0x5af   : > { %9542 = vmatprep.subr.mxu0 %v9443_v18 }
 0x5b0   : > { %9543 = vmatpush3.msra.mxu0 %v9443_v18  ;;  %v5734_v18 = vpop.xlane.xlu0 %5733 }
 0x5b1   : > { %9544 = vmatprep.subr.mxu0 %v6392_v42 }
 0x5b2   : > { %9545 = vmatpush3.msra.mxu0 %v6392_v42  ;;  %4003 = vadd.xlane.f32.xlu0 %v4002_v37 }
 0x5b3   : > { %9546 = vmatprep.subr.mxu0 %v9440_v14 }
 0x5b4   : > { %9547 = vmatpush3.msra.mxu0 %v9440_v14  ;;  %v4071_v14 = vsel %vm3770_vm2, %v13167_v45, 0.0 }
 0x5b5   : > { %9548 = vmatprep.subr.mxu0 %v6382_v26 }
 0x5b6   : > { %9549 = vmatpush3.msra.mxu0 %v6382_v26  ;;  %4069 = vadd.xlane.f32.xlu0 %v4068_v53  ;;  %v4008_v26 = vsel %vm3770_vm2, %v14867_v36, 0.0 }
 0x5b8   : > { %v5743_v30 = vpop.xlane.xlu1 %5742 }
 0x5ba   : > { %4048 = vadd.xlane.f32.xlu0 %v4047_v25  ;;  %v5740_v38 = vpop.xlane.xlu0 %5739 }
 0x5be   : > { %4051 = vadd.xlane.f32.xlu0 %v4050_v58 }
 0x5c0   : > { %v13595_v42 = vpop.xlane.xlu1 %5748 }
 0x5c2   : > { %4006 = vadd.xlane.f32.xlu0 %v4005_v7  ;;  %v13599_v40 = vpop.xlane.xlu0 %5745 }
 0x5c4   : > { %v13601_v45 = vpop.xlane.xlu1 %5754 }
 0x5c6   : > { %4072 = vadd.xlane.f32.xlu0 %v4071_v14  ;;  %v13605_v20 = vpop.xlane.xlu0 %5751 }
 0x5ca   : > { %4009 = vadd.xlane.f32.xlu0 %v4008_v26 }
 0x5ce   : > { %4075 = vadd.xlane.f32.xlu0 %v4074_v12 }
 0x5cf   : > { %v5785_v54 = vpop.xlane.xlu1 %5784 }
 0x5d1   : > { %v5782_v44 = vpop.xlane.xlu0 %5781 }
 0x5d2   : > { %4054 = vadd.xlane.f32.xlu0 %v4053_v56 }
 0x5d6   : > { %4057 = vadd.xlane.f32.xlu0 %v4056_v24 }
 0x5d7   : > { %v5791_v8 = vpop.xlane.xlu1 %5790 }
 0x5d9   : > { %v5788_v22 = vpop.xlane.xlu0 %5787 }
 0x5da   : > { %4078 = vadd.xlane.f32.xlu0 %v4077_v16 }
 0x5de   : > { %4081 = vadd.xlane.f32.xlu0 %v4080_v27 }
 0x5df   : > { %v5797_v2 = vpop.xlane.xlu1 %5796 }
 0x5e1   : > { %v5794_v6 = vpop.xlane.xlu0 %5793 }
 0x5e7   : > { %v13611_v37 = vpop.xlane.xlu1 %5802 }
 0x5e9   : > { %v13613_v4 = vpop.xlane.xlu0 %5799 }
 0x5eb   : > { %v5758_v53 = vpop.xlane.xlu1 %5757 }
 0x5ec   : > { %v5828_v50 = vmax.f32 %v5734_v18, %v5758_v53 }
 0x5ed   : > { %v5761_v25 = vpop.xlane.xlu0 %5760 }
 0x5ee   : > { %v5831_v36 = vmax.f32 %v5737_v32, %v5761_v25  ;;  %v5829_v27 = vmax.f32 %v5828_v50, %v5782_v44 }
 0x5ef   : > { %v5764_v58 = vpop.xlane.xlu1 %5763 }
 0x5f0   : > { %v5832_v12 = vmax.f32 %v5831_v36, %v5785_v54  ;;  %v5834_v13 = vmax.f32 %v5740_v38, %v5764_v58 }
 0x5f1   : > { %v5767_v46 = vpop.xlane.xlu0 %5766 }
 0x5f2   : > { %v5837_v56 = vmax.f32 %v5743_v30, %v5767_v46 }
 0x5f3   : > { %v5770_v7 = vpop.xlane.xlu1 %5769 }
 0x5f4   : > { %v5838_v11 = vmax.f32 %v5837_v56, %v5791_v8  ;;  %v5840_v8 = vmax.f32 %v13599_v40, %v5770_v7 }
 0x5f5   : > { %v5773_v51 = vpop.xlane.xlu0 %5772 }
 0x5f6   : > { %v5841_v40 = vmax.f32 %v5840_v8, %v5794_v6 }
 0x5f7   : > { %v13615_v14 = vpop.xlane.xlu1 %5775 }
 0x5f8   : > { %v5846_v7 = vmax.f32 %v13605_v20, %v13615_v14 }
 0x5f9   : > { %v13617_v26 = vpop.xlane.xlu0 %5778 }
 0x5fa   : > { %v5847_v56 = vmax.f32 %v5846_v7, %v13613_v4 }
 0x5fd   : > { %v5809_v24 = vpop.xlane.xlu1 %5808 }
 0x5fe   : > { %v5833_v16 = vmax.f32 %v5832_v12, %v5809_v24 }
 0x5ff   : > { %v5806_v43 = vpop.xlane.xlu0 %5805 }
 0x600   : > { %v5853_v29 = vsub.f32 %v13322_v63, %v5833_v16  ;;  %v5861_v41 = vsub.f32 %v13434_v9, %v5833_v16  ;;  %v5869_v23 = vsub.f32 %v13402_v0, %v5833_v16  ;;  %v5830_v39 = vmax.f32 %v5829_v27, %v5806_v43 }
 0x601   : > { %v5815_v33 = vpop.xlane.xlu1 %5814  ;;  %v5877_v53 = vsub.f32 %v13472_v31, %v5833_v16  ;;  %v5835_v0 = vmax.f32 %v5834_v13, %v5788_v22 }
 0x602   : > { %v5886_v32 = vmul.f32 1.442695, %v5853_v29  ;;  %v5902_v25 = vmul.f32 1.442695, %v5861_v41  ;;  %v5852_v18 = vsub.f32 %v13324_v17, %v5830_v39  ;;  %v5860_v30 = vsub.f32 %v13428_v34, %v5830_v39 }
 0x603   : > { %v13624_v54 = vmax.f32 %v5838_v11, %v5815_v33  ;;  %v5812_v44 = vpop.xlane.xlu0 %5811  ;;  %v5876_v63 = vsub.f32 %v13476_v49, %v5830_v39  ;;  %v5918_v9 = vmul.f32 1.442695, %v5869_v23  ;;  %v5843_v17 = vmax.f32 %v13595_v42, %v5773_v51 }
 0x604   : > { %9883 = vpow2.f32 %v5886_v32  ;;  %v5884_v38 = vmul.f32 1.442695, %v5852_v18  ;;  %v5900_v29 = vmul.f32 1.442695, %v5860_v30  ;;  %v13632_v11 = vmax.f32 %v5835_v0, %v5812_v44 }
 0x605   : > { %v5821_v43 = vpop.xlane.xlu1 %5820  ;;  %9885 = vpow2.f32 %v5902_v25  ;;  %v5932_v41 = vmul.f32 1.442695, %v5876_v63  ;;  %v5863_v34 = vsub.f32 %v13444_v57, %v13624_v54  ;;  %v5934_v33 = vmul.f32 1.442695, %v5877_v53 }
 0x606   : > { %9887 = vpow2.f32 %v5884_v38  ;;  %v5855_v49 = vsub.f32 %v13353_v1, %v13624_v54  ;;  %v5854_v23 = vsub.f32 %v13356_v55, %v13632_v11  ;;  %v5879_v42 = vsub.f32 %v13482_v21, %v13624_v54 }
 0x607   : > { %v5818_v31 = vpop.xlane.xlu0 %5817  ;;  %9889 = vpow2.f32 %v5918_v9  ;;  %v5906_v57 = vmul.f32 1.442695, %v5863_v34  ;;  %v5878_v22 = vsub.f32 %v13488_v3, %v13632_v11  ;;  %v5844_v58 = vmax.f32 %v5843_v17, %v5797_v2 }
 0x608   : > { %9891 = vpow2.f32 %v5900_v29  ;;  %v5862_v1 = vsub.f32 %v13438_v62, %v13632_v11  ;;  %v5888_v55 = vmul.f32 1.442695, %v5854_v23  ;;  %v5849_v51 = vmax.f32 %v13601_v45, %v13617_v26 }
 0x609   : > { %v5827_v13 = vpop.xlane.xlu1 %5826  ;;  %9893 = vpow2.f32 %v5932_v41  ;;  %v5890_v21 = vmul.f32 1.442695, %v5855_v49  ;;  %v13648_v6 = vmax.f32 %v5844_v58, %v5821_v43  ;;  %v13650_v36 = vmax.f32 %v5841_v40, %v5818_v31  ;;  %v14868_v49 = vld [vmem:[#allocation19_spill] sm:$0xff] }
 0x60a   : > { %9895 = vpow2.f32 %v5934_v33  ;;  %v5868_v3 = vsub.f32 %v13404_v15, %v5830_v39  ;;  %v5938_v2 = vmul.f32 1.442695, %v5879_v42  ;;  %v5936_v12 = vmul.f32 1.442695, %v5878_v22  ;;  %v14870_v40 = vld [vmem:[#allocation35_spill] sm:$0xff] }
 0x60b   : > { %v5824_v46 = vpop.xlane.xlu0 %5823  ;;  %9897 = vpow2.f32 %v5906_v57  ;;  %v5904_v14 = vmul.f32 1.442695, %v5862_v1  ;;  %v5856_v62 = vsub.f32 %v13374_v47, %v13650_v36  ;;  %v5857_v45 = vsub.f32 %v13369_v48, %v13648_v6 }
 0x60c   : > { %9899 = vpow2.f32 %v5888_v55  ;;  %v5850_v26 = vmax.f32 %v5849_v51, %v13611_v37  ;;  %v5916_v15 = vmul.f32 1.442695, %v5868_v3  ;;  %v5871_v39 = vsub.f32 %v13410_v52, %v13624_v54 }
 0x60d   : > { %v4013_v50 = vpop.xlane.xlu1 %4012  ;;  %9901 = vpow2.f32 %v5890_v21  ;;  %v5865_v27 = vsub.f32 %v13454_v59, %v13648_v6  ;;  %v5881_v48 = vsub.f32 %v13494_v19, %v13648_v6  ;;  %v5880_v47 = vsub.f32 %v13502_v61, %v13650_v36  ;;  %v14871_v21 = vld [vmem:[#allocation20_spill] sm:$0xff] }
 0x60e   : > { %9903 = vpow2.f32 %v5938_v2  ;;  %v13669_v37 = vmax.f32 %v5850_v26, %v5827_v13  ;;  %v5892_v25 = vmul.f32 1.442695, %v5856_v62  ;;  %v13671_v18 = vmax.f32 %v5847_v56, %v5824_v46  ;;  %v14873_v56 = vld [vmem:[#allocation18_spill] sm:$0xff] }
 0x60f   : > { %v3989_v20 = vpop.xlane.xlu0 %3988  ;;  %9905 = vpow2.f32 %v5936_v12  ;;  %v5894_v59 = vmul.f32 1.442695, %v5857_v45  ;;  %v5864_v54 = vsub.f32 %v13450_v10, %v13650_v36  ;;  %v5922_v19 = vmul.f32 1.442695, %v5871_v39  ;;  %v14874_v39 = vld [vmem:[#allocation27_spill] sm:$0xff] }
 0x610   : > { %9907 = vpow2.f32 %v5904_v14  ;;  %v4083_v52 = vadd.f32 %v4013_v50, %v3989_v20  ;;  %v5910_v63 = vmul.f32 1.442695, %v5865_v27  ;;  %v5942_v0 = vmul.f32 1.442695, %v5881_v48  ;;  %v14872_v20 = vld [vmem:[#allocation25_spill] sm:$0xff] }
 0x611   : > { %v4016_v24 = vpop.xlane.xlu1 %4015  ;;  %v9884_v16 = vpop.eup %9883  ;;  %9909 = vpow2.f32 %v5916_v15  ;;  %v5940_v43 = vmul.f32 1.442695, %v5880_v47  ;;  %v5859_v10 = vsub.f32 %v13383_v35, %v13669_v37  ;;  %v5867_v17 = vsub.f32 %v13462_v60, %v13669_v37 }
 0x612   : > { %v13663_v32 = vpop.eup %9885  ;;  %v5951_v9 = vsel %vm3770_vm2, %v9884_v16, 0.0  ;;  %9911 = vpow2.f32 %v5892_v25  ;;  %v5858_v41 = vsub.f32 %v13388_v28, %v13671_v18  ;;  %v5908_v33 = vmul.f32 1.442695, %v5864_v54  ;;  %v14869_v28 = vld [vmem:[#allocation26_spill] sm:$0xff] }
 0x613   : > { %v3992_v4 = vpop.xlane.xlu0 %3991  ;;  %v13673_v30 = vpop.eup %9887  ;;  %v5975_v61 = vsel %vm3770_vm2, %v13663_v32, 0.0  ;;  %5952 = vadd.xlane.f32.xlu0 %v5951_v9  ;;  %9913 = vpow2.f32 %v5894_v59  ;;  %v5883_v35 = vsub.f32 %v13510_v5, %v13669_v37  ;;  %v5898_v5 = vmul.f32 1.442695, %v5859_v10 }
 0x614   : > { %v13677_v53 = vpop.eup %9889  ;;  %9466 = vmatprep.mubr.msk.f32.mxu1 %vm3770_vm2, %v13673_v30  ;;  %5976 = vadd.xlane.f32.xlu1 %v5975_v61  ;;  %v4086_v34 = vadd.f32 %v4016_v24, %v3992_v4  ;;  %9915 = vpow2.f32 %v5910_v63  ;;  %v5882_v57 = vsub.f32 %v14870_v40, %v13671_v18  ;;  %v5896_v7 = vmul.f32 1.442695, %v5858_v41  ;;  %v14878_v41 = vld [vmem:[#allocation17_spill] sm:$0xff] }
 0x615   : > { %v4040_v44 = vpop.xlane.xlu1 %4039  ;;  %v13684_v38 = vpop.eup %9891  ;;  %9467 = vmatmul.mubr.msk.f32.vlgmr.msra.gmra.mxu1 %vm3770_vm2, %v9884_v16  ;;  %v5999_v13 = vsel %vm3770_vm2, %v13677_v53, 0.0  ;;  %9917 = vpow2.f32 %v5940_v43  ;;  %v5914_v51 = vmul.f32 1.442695, %v5867_v17  ;;  %v5946_v3 = vmul.f32 1.442695, %v5883_v35  ;;  %v14879_v35 = vld [vmem:[#allocation28_spill] sm:$0xff] }
 0x616   : > { %v13688_v29 = vpop.eup %9893  ;;  %9479 = vmatpush3.msra.mxu1 %v14868_v49  ;;  %v13700_v60 = vadd.f32 %v4086_v34, %v4040_v44  ;;  %v5972_v42 = vsel %vm3770_vm2, %v13684_v38, 0.0  ;;  %9919 = vpow2.f32 %v5942_v0  ;;  %v5944_v12 = vmul.f32 1.442695, %v5882_v57 }
 0x617   : > { %v4037_v8 = vpop.xlane.xlu0 %4036  ;;  %v9896_v31 = vpop.eup %9895  ;;  %9550 = vmatprep.mubr.msk.f32.mxu0 %vm3770_vm2, %v13688_v29  ;;  %9480 = vmatprep.subr.mxu1 %v14869_v28  ;;  %9921 = vpow2.f32 %v5922_v19  ;;  %v5866_v24 = vsub.f32 %v14873_v56, %v13671_v18  ;;  %v5948_v48 = vsel %vm3770_vm2, %v13673_v30, 0.0  ;;  %v14876_v30 = vld [vmem:[#allocation16_spill] sm:$0xff] }
 0x618   : > { %v4084_v23 = vadd.f32 %v4083_v52, %v4037_v8  ;;  %9551 = vmatmul.mubr.msk.f32.vlgmr.msra.gmra.mxu0 %vm3770_vm2, %v9896_v31  ;;  %6000 = vadd.xlane.f32.xlu1 %v5999_v13  ;;  %v13710_v46 = vpop.eup %9897  ;;  %9923 = vpow2.f32 %v5908_v33  ;;  %v6023_v14 = vsel %vm3770_vm2, %v9896_v31, 0.0  ;;  %v14875_v52 = vld [vmem:[#allocation23_spill] sm:$0xff]  ;;  %v14877_v8 = vld [vmem:[#allocation12_spill] sm:$0xff] }
 0x619   : > { %5973 = vadd.xlane.f32.xlu0 %v5972_v42  ;;  %v4019_v22 = vpop.xlane.xlu1 %4018  ;;  %9481 = vmatpush3.msra.mxu1 %v14869_v28  ;;  %v13715_v55 = vpop.eup %9899  ;;  %9925 = vpow2.f32 %v5898_v5  ;;  %v5981_v62 = vsel %vm3770_vm2, %v13710_v46, 0.0  ;;  %v5912_v25 = vmul.f32 1.442695, %v5866_v24  ;;  %v5870_v17 = vsub.f32 %v14877_v8, %v13632_v11  ;;  %v14883_v24 = vld [vmem:[#allocation65_spill] sm:$0xff] }
 0x61a   : > { %9482 = vmatprep.subr.mxu1 %v14871_v21  ;;  %v13718_v50 = vpop.eup %9901  ;;  %9469 = vmatprep.mubr.msk.f32.mxu1 %vm3770_vm2, %v13715_v55  ;;  %9927 = vpow2.f32 %v5896_v7  ;;  %v6020_v11 = vsel %vm3770_vm2, %v13688_v29, 0.0 }
 0x61b   : > { %v3995_v58 = vpop.xlane.xlu0 %3994  ;;  %9483 = vmatpush3.msra.mxu1 %v14871_v21  ;;  %v13723_v2 = vpop.eup %9903  ;;  %9929 = vpow2.f32 %v5914_v51  ;;  %v5920_v13 = vmul.f32 1.442695, %v5870_v17  ;;  %v5957_v29 = vsel %vm3770_vm2, %v13718_v50, 0.0  ;;  %v14890_v17 = vld [vmem:[#allocation4_spill] sm:$0xff] }
 0x61c   : > { %v13713_v1 = vadd.f32 %v4019_v22, %v3995_v58  ;;  %9470 = vmatmul.mubr.msk.f32.gmra.mxu1 %vm3770_vm2, %v13718_v50  ;;  %9484 = vmatprep.subr.mxu1 %v14872_v20  ;;  %v13731_v26 = vpop.eup %9905  ;;  %9931 = vpow2.f32 %v5946_v3  ;;  %v14881_v50 = vld [vmem:[#allocation6_spill] sm:$0xff] }
 0x61d   : > { %6024 = vadd.xlane.f32.xlu1 %v6023_v14  ;;  %5982 = vadd.xlane.f32.xlu0 %v5981_v62  ;;  %v13735_v15 = vpop.eup %9907  ;;  %9933 = vpow2.f32 %v5944_v12  ;;  %v4022_v27 = vpop.xlane.xlu1 %4021  ;;  %v14882_v62 = vld [vmem:[#allocation10_spill] sm:$0xff] }
 0x61e   : > { %9553 = vmatprep.mubr.msk.f32.mxu0 %vm3770_vm2, %v13731_v26  ;;  %9485 = vmatpush3.msra.mxu1 %v14872_v20  ;;  %v13746_v4 = vpop.eup %9909  ;;  %v5978_v59 = vsel %vm3770_vm2, %v13735_v15, 0.0 }
 0x61f   : > { %v4061_v45 = vpop.xlane.xlu0 %4060  ;;  %9554 = vmatmul.mubr.msk.f32.gmra.mxu0 %vm3770_vm2, %v13723_v2  ;;  %9486 = vmatprep.subr.mxu1 %v14874_v39  ;;  %v13751_v44 = vpop.eup %9911  ;;  %v5996_v61 = vsel %vm3770_vm2, %v13746_v4, 0.0 }
 0x620   : > { %v4085_v16 = vadd.f32 %v4084_v23, %v4061_v45  ;;  %9487 = vmatpush3.msra.mxu1 %v14874_v39  ;;  %v13754_v19 = vpop.eup %9913  ;;  %9472 = vmatprep.mubr.msk.f32.mxu1 %vm3770_vm2, %v13751_v44  ;;  %v5873_v45 = vsub.f32 %v14882_v62, %v13648_v6 }
 0x621   : > { %9488 = vmatprep.subr.mxu1 %v14875_v52  ;;  %5949 = vadd.xlane.f32.xlu1 %v5948_v48  ;;  %v13759_v63 = vpop.eup %9915 }
 0x622   : > { %9935 = vrcp.f32 %v4085_v16  ;;  %9489 = vmatpush3.msra.mxu1 %v14875_v52  ;;  %5979 = vadd.xlane.f32.xlu0 %v5978_v59  ;;  %v13765_v0 = vpop.eup %9917  ;;  %v5987_v31 = vsel %vm3770_vm2, %v13759_v63, 0.0  ;;  %v14887_v52 = vld [vmem:[#allocation15_spill] sm:$0xff] }
 0x623   : > { %v3998_v47 = vpop.xlane.xlu0 %3997  ;;  %9490 = vmatprep.subr.mxu1 %v14876_v30  ;;  %9473 = vmatmul.mubr.msk.f32.gmra.mxu1 %vm3770_vm2, %v13754_v19  ;;  %9937 = vpow2.f32 %v5912_v25  ;;  %v13769_v10 = vpop.eup %9919  ;;  %v5875_v59 = vsub.f32 %v14887_v52, %v13669_v37  ;;  %v14897_v52 = vld [vmem:[#allocation7_spill] sm:$0xff] }
 0x624   : > { %v4092_v54 = vadd.f32 %v4022_v27, %v3998_v47  ;;  %9491 = vmatpush3.msra.mxu1 %v14876_v30  ;;  %9556 = vmatprep.mubr.msk.f32.mxu0 %vm3770_vm2, %v13765_v0  ;;  %v13776_v34 = vpop.eup %9921  ;;  %v14885_v27 = vld [vmem:[#allocation60_spill] sm:$0xff]  ;;  %v14886_v47 = vld [vmem:[#allocation5_spill] sm:$0xff] }
 0x625   : > { %5997 = vadd.xlane.f32.xlu1 %v5996_v61  ;;  %9492 = vmatprep.subr.mxu1 %v14878_v41  ;;  %v9924_v33 = vpop.eup %9923 }
 0x626   : > { %9557 = vmatmul.mubr.msk.f32.gmra.mxu0 %vm3770_vm2, %v13769_v10  ;;  %9493 = vmatpush3.msra.mxu1 %v14878_v41  ;;  %v13786_v23 = vpop.eup %9925  ;;  %v5984_v5 = vsel %vm3770_vm2, %v9924_v33, 0.0  ;;  %v5954_v41 = vsel %vm3770_vm2, %v13715_v55, 0.0  ;;  %v14892_v55 = vld [vmem:[#allocation31_spill] sm:$0xff] }
 0x627   : > { %v4064_v9 = vpop.xlane.xlu0 %4063  ;;  %5988 = vadd.xlane.f32.xlu0 %v5987_v31  ;;  %9506 = vmatprep.subr.mxu1 %v14879_v35  ;;  %v13789_v28 = vpop.eup %9927 }
 0x628   : > { %v4088_v43 = vadd.f32 %v13700_v60, %v4064_v9  ;;  %v13791_v42 = vpop.eup %9929  ;;  %9475 = vmatprep.mubr.msk.f32.mxu1 %vm3770_vm2, %v13789_v28  ;;  %v14889_v9 = vld [vmem:[#allocation22_spill] sm:$0xff] }
 0x629   : > { %6021 = vadd.xlane.f32.xlu1 %v6020_v11  ;;  %v13796_v40 = vpop.eup %9931  ;;  %9476 = vmatmul.mubr.msk.f32.gmra.mxu1 %vm3770_vm2, %v13786_v23  ;;  %v5993_v21 = vsel %vm3770_vm2, %v13791_v42, 0.0 }
 0x62a   : > { %9939 = vrcp.f32 %v4088_v43  ;;  %v9934_v22 = vpop.eup %9933  ;;  %9494 = vmatprep.mubr.msk.f32.mxu1 %vm3770_vm2, %v13684_v38  ;;  %v4025_v38 = vpop.xlane.xlu1 %4024 }
 0x62b   : > { %v4043_v49 = vpop.xlane.xlu0 %4042  ;;  %5985 = vadd.xlane.f32.xlu0 %v5984_v5  ;;  %9941 = vpow2.f32 %v5920_v13  ;;  %9559 = vmatprep.mubr.msk.f32.mxu0 %vm3770_vm2, %v9934_v22  ;;  %v6038_v37 = vsel %vm3770_vm2, %v9934_v22, 0.0 }
 0x62c   : > { %v4090_v60 = vadd.f32 %v13713_v1, %v4043_v49  ;;  %v14880_v1 = vld [vmem:[#allocation21_spill] sm:$0xff]  ;;  %9560 = vmatmul.mubr.msk.f32.gmra.mxu0 %vm3770_vm2, %v13796_v40 }
 0x62d   : > { %5958 = vadd.xlane.f32.xlu1 %v5957_v29  ;;  %v5872_v51 = vsub.f32 %v14880_v1, %v13650_v36  ;;  %9495 = vmatmul.mubr.msk.f32.vlgmr.msra.gmra.mxu1 %vm3770_vm2, %v13663_v32  ;;  %v6005_v36 = vsel %vm3770_vm2, %v13776_v34, 0.0  ;;  %v14884_v32 = vld [vmem:[#allocation24_spill] sm:$0xff]  ;;  %v14893_v29 = vld [vmem:[#allocation11_spill] sm:$0xff] }
 0x62e   : > { %9507 = vmatpush3.msra.mxu1 %v14879_v35  ;;  %9497 = vmatprep.mubr.msk.f32.mxu1 %vm3770_vm2, %v13735_v15  ;;  %v5874_v16 = vsub.f32 %v14884_v32, %v13671_v18  ;;  %v5926_v18 = vmul.f32 1.442695, %v5873_v45  ;;  %v4028_v61 = vpop.xlane.xlu1 %4027 }
 0x62f   : > { %v4046_v57 = vpop.xlane.xlu0 %4045  ;;  %v9936_v7 = vpop.eup %9935  ;;  %5994 = vadd.xlane.f32.xlu0 %v5993_v21  ;;  %v5924_v56 = vmul.f32 1.442695, %v5872_v51  ;;  %9508 = vmatprep.subr.mxu1 %v14883_v24 }
 0x630   : > { %v13804_v58 = vadd.f32 %v4092_v54, %v4046_v57  ;;  %v13814_v3 = vmul.f32 %v9936_v7, %v14881_v50  ;;  %v9938_v14 = vpop.eup %9937  ;;  %9509 = vmatpush3.msra.mxu1 %v14883_v24  ;;  %v14888_v54 = vld [vmem:[#allocation36_spill] sm:$0xff]  ;;  %v5928_v30 = vmul.f32 1.442695, %v5874_v16  ;;  %v6032_v24 = vsel %vm3770_vm2, %v13765_v0, 0.0 }
 0x631   : > { %6006 = vadd.xlane.f32.xlu1 %v6005_v36  ;;  %9510 = vmatprep.subr.mxu1 %v14885_v27  ;;  %v5990_v6 = vsel %vm3770_vm2, %v9938_v14, 0.0  ;;  %9943 = vpow2.f32 %v5924_v56  ;;  %v14894_v50 = vld [vmem:[#allocation8_spill] sm:$0xff]  ;;  %v5960_v36 = vsel %vm3770_vm2, %v13751_v44, 0.0  ;;  %v5969_v44 = vsel %vm3770_vm2, %v13786_v23, 0.0 }
 0x632   : > { %9498 = vmatmul.mubr.msk.f32.gmra.mxu1 %vm3770_vm2, %v13710_v46  ;;  %v6029_v46 = vsel %vm3770_vm2, %v13723_v2, 0.0  ;;  %v5930_v2 = vmul.f32 1.442695, %v5875_v59  ;;  %v4031_v32 = vpop.xlane.xlu1 %4030  ;;  %v6041_v23 = vsel %vm3770_vm2, %v13796_v40, 0.0 }
 0x633   : > { %v4001_v12 = vpop.xlane.xlu0 %4000  ;;  %9511 = vmatpush3.msra.mxu1 %v14885_v27  ;;  %9500 = vmatprep.mubr.msk.f32.mxu1 %vm3770_vm2, %v9924_v33  ;;  %v14895_v27 = vld [vmem:[#allocation9_spill] sm:$0xff] }
 0x634   : > { %v4095_v20 = vadd.f32 %v4025_v38, %v4001_v12  ;;  %9512 = vmatprep.subr.mxu1 %v14888_v54  ;;  %5991 = vadd.xlane.f32.xlu0 %v5990_v6 }
 0x635   : > { %9513 = vmatpush3.msra.mxu1 %v14888_v54  ;;  %6030 = vadd.xlane.f32.xlu1 %v6029_v46  ;;  %v5966_v54 = vsel %vm3770_vm2, %v13789_v28, 0.0 }
 0x636   : > { %9514 = vmatprep.subr.mxu1 %v14889_v9  ;;  %9501 = vmatmul.mubr.msk.f32.gmra.mxu1 %vm3770_vm2, %v13759_v63  ;;  %v14891_v63 = vld [vmem:[#allocation29_spill] sm:$0xff] }
 0x637   : > { %v9940_v39 = vpop.eup %9939  ;;  %v4067_v15 = vpop.xlane.xlu0 %4066  ;;  %9515 = vmatpush3.msra.mxu1 %v14889_v9  ;;  %9503 = vmatprep.mubr.msk.f32.mxu1 %vm3770_vm2, %v9938_v14 }
 0x638   : > { %v4091_v48 = vadd.f32 %v4090_v60, %v4067_v15  ;;  %v13836_v25 = vmul.f32 %v9940_v39, %v14886_v47  ;;  %9516 = vmatprep.subr.mxu1 %v14890_v17  ;;  %6039 = vadd.xlane.f32.xlu0 %v6038_v37  ;;  %v9942_v31 = vpop.eup %9941 }
 0x639   : > { %9517 = vmatpush3.msra.mxu1 %v14890_v17  ;;  %5955 = vadd.xlane.f32.xlu1 %v5954_v41  ;;  %v6002_v11 = vsel %vm3770_vm2, %v9942_v31, 0.0 }
 0x63a   : > { %9945 = vrcp.f32 %v4091_v48  ;;  %9518 = vmatprep.subr.mxu1 %v14891_v63  ;;  %9504 = vmatmul.mubr.msk.f32.gmra.mxu1 %vm3770_vm2, %v13791_v42 }
 0x63b   : > { %v4004_v43 = vpop.xlane.xlu0 %4003  ;;  %9947 = vpow2.f32 %v5926_v18  ;;  %9519 = vmatpush3.msra.mxu1 %v14891_v63  ;;  %9522 = vmatprep.mubr.msk.f32.mxu1 %vm3770_vm2, %v13746_v4  ;;  %v6026_v4 = vsel %vm3770_vm2, %v13731_v26, 0.0 }
 0x63c   : > { %v4098_v8 = vadd.f32 %v4028_v61, %v4004_v43  ;;  %9949 = vpow2.f32 %v5928_v30  ;;  %9520 = vmatprep.subr.mxu1 %v14892_v55  ;;  %v14898_v61 = vld [vmem:[#allocation14_spill] sm:$0xff]  ;;  %v4034_v43 = vpop.xlane.xlu1 %4033 }
 0x63d   : > { %9951 = vpow2.f32 %v5930_v2  ;;  %9521 = vmatpush3.msra.mxu1 %v14892_v55  ;;  %6003 = vadd.xlane.f32.xlu1 %v6002_v11 }
 0x63e   : > { %9523 = vmatmul.mubr.msk.f32.vlgmr.msra.gmra.mxu1 %vm3770_vm2, %v13677_v53  ;;  %v9944_v13 = vpop.eup %9943  ;;  %v5963_v53 = vsel %vm3770_vm2, %v13754_v19, 0.0  ;;  %v6035_v19 = vsel %vm3770_vm2, %v13769_v10, 0.0 }
 0x63f   : > { %v4070_v33 = vpop.xlane.xlu0 %4069  ;;  %9525 = vmatprep.mubr.msk.f32.mxu1 %vm3770_vm2, %v9942_v31  ;;  %v6008_v45 = vsel %vm3770_vm2, %v9944_v13, 0.0 }
 0x640   : > { %v4094_v35 = vadd.f32 %v13804_v58, %v4070_v33 }
 0x641   : > { %6027 = vadd.xlane.f32.xlu1 %v6026_v4 }
 0x642   : > { %9953 = vrcp.f32 %v4094_v35  ;;  %9526 = vmatmul.mubr.msk.f32.gmra.mxu1 %vm3770_vm2, %v13776_v34 }
 0x643   : > { %v4049_v49 = vpop.xlane.xlu0 %4048  ;;  %9528 = vmatprep.mubr.msk.f32.mxu1 %vm3770_vm2, %v9944_v13 }
 0x644   : > { %v4096_v60 = vadd.f32 %v4095_v20, %v4049_v49 }
 0x645   : > { %5964 = vadd.xlane.f32.xlu1 %v5963_v53 }
 0x647   : > { %v9946_v42 = vpop.eup %9945  ;;  %v4052_v5 = vpop.xlane.xlu0 %4051 }
 0x648   : > { %v13873_v57 = vmul.f32 %v9946_v42, %v14893_v29  ;;  %v9948_v22 = vpop.eup %9947  ;;  %v4099_v20 = vadd.f32 %v4098_v8, %v4052_v5 }
 0x649   : > { %v9950_v58 = vpop.eup %9949  ;;  %9529 = vmatmul.mubr.msk.f32.gmra.mxu1 %vm3770_vm2, %v9948_v22  ;;  %v6011_v7 = vsel %vm3770_vm2, %v9948_v22, 0.0 }
 0x64a   : > { %9531 = vmatprep.mubr.msk.f32.mxu1 %vm3770_vm2, %v9950_v58  ;;  %v9952_v34 = vpop.eup %9951  ;;  %6012 = vadd.xlane.f32.xlu1 %v6011_v7  ;;  %v6014_v46 = vsel %vm3770_vm2, %v9950_v58, 0.0 }
 0x64b   : > { %v4007_v26 = vpop.xlane.xlu0 %4006  ;;  %v6017_v18 = vsel %vm3770_vm2, %v9952_v34, 0.0 }
 0x64c   : > { %v4101_v39 = vadd.f32 %v4031_v32, %v4007_v26 }
 0x64d   : > { %9532 = vmatmul.mubr.msk.f32.gmra.mxu1 %vm3770_vm2, %v9952_v34 }
 0x64e   : > { %6036 = vadd.xlane.f32.xlu1 %v6035_v19 }
 0x64f   : > { %v9954_v1 = vpop.eup %9953  ;;  %v4073_v51 = vpop.xlane.xlu0 %4072 }
 0x650   : > { %v4097_v21 = vadd.f32 %v4096_v60, %v4073_v51  ;;  %v13882_v38 = vmul.f32 %v9954_v1, %v14894_v50 }
 0x652   : > { %9955 = vrcp.f32 %v4097_v21  ;;  %5961 = vadd.xlane.f32.xlu1 %v5960_v36 }
 0x653   : > { %v13886_v12 = vpop.xlane.xlu0 %4009 }
 0x654   : > { %v4104_v36 = vadd.f32 %v4034_v43, %v13886_v12  ;;  %v14903_v12 = vld [vmem:[#allocation30_spill] sm:$0xff] }
 0x656   : > { %6009 = vadd.xlane.f32.xlu1 %v6008_v45 }
 0x657   : > { %v4076_v14 = vpop.xlane.xlu0 %4075 }
 0x658   : > { %v4100_v62 = vadd.f32 %v4099_v20, %v4076_v14 }
 0x65a   : > { %9957 = vrcp.f32 %v4100_v62  ;;  %6033 = vadd.xlane.f32.xlu1 %v6032_v24 }
 0x65b   : > { %v4055_v56 = vpop.xlane.xlu0 %4054 }
 0x65c   : > { %v4102_v6 = vadd.f32 %v4101_v39, %v4055_v56 }
 0x65e   : > { %5970 = vadd.xlane.f32.xlu1 %v5969_v44 }
 0x65f   : > { %v9956_v10 = vpop.eup %9955  ;;  %v4058_v16 = vpop.xlane.xlu0 %4057 }
 0x660   : > { %v13894_v15 = vmul.f32 %v9956_v10, %v14895_v27  ;;  %v4105_v20 = vadd.f32 %v4104_v36, %v4058_v16  ;;  %v3115_v16 = vsub.s32 6, %v14903_v12  ;;  %v8325_v27 = vld [vmem:[%s441_s16] sm:$0xff]  }
 0x662   : > { %14896 = vst [vmem:[#allocation38_spill] sm:$0xff] %v13894_v15  ;;  %6018 = vadd.xlane.f32.xlu1 %v6017_v18 }
 0x663   : > { %v4079_v48 = vpop.xlane.xlu0 %4078 }
 0x664   : > { %v4103_v47 = vadd.f32 %v4102_v6, %v4079_v48  ;;  %v8385_v6 = vld [vmem:[%s441_s16 + $0x8] sm:$0xff]  }
 0x666   : > { %9959 = vrcp.f32 %v4103_v47  ;;  %5967 = vadd.xlane.f32.xlu1 %v5966_v54  ;;  %v8386_v47 = vld [vmem:[%s441_s16 + $0x10] sm:$0xff]   ;;  %v8327_v54 = vunpack.c.h.bf16 %v8325_v27 }
 0x667   : > { %v9958_v0 = vpop.eup %9957  ;;  %v4082_v37 = vpop.xlane.xlu0 %4081 }
 0x668   : > { %v13900_v59 = vmul.f32 %v9958_v0, %v14897_v52  ;;  %v4106_v56 = vadd.f32 %v4105_v20, %v4082_v37  ;;  %v8331_v37 = vunpack.c.h.bf16 %v8385_v6 }
 0x66a   : > { %6015 = vadd.xlane.f32.xlu1 %v6014_v46  ;;  %9961 = vrcp.f32 %v4106_v56  ;;  %v13957_v46 = vld [vmem:[%s14342_s10] sm:$0xff] }
 0x66b   : > { %14904 = vst [vmem:[#allocation39_spill] sm:$0xff] %v13957_v46 }
 0x66e   : > { %6042 = vadd.xlane.f32.xlu1 %v6041_v23  ;;  %v3116_v23 = vrot.slane %v13957_v46, %v3115_v16 }
 0x670   : > { %v3118_v15 = vadd.f32 %v8327_v54, %v3116_v23 }
 0x673   : > { %v9960_v30 = vpop.eup %9959 }
 0x674   : > { %v13908_v9 = vmul.f32 %v9960_v30, %v14898_v61  ;;  %v8326_v30 = vunpack.c.l.bf16 %v8325_v27  ;;  %v8387_v61 = vld [vmem:[%s441_s16 + $0x18] sm:$0xff]   ;;  %s14305_s16 = scalar_lea.vmem %s14343_s11, %s8131_s13 }
 0x675   : > { %v8338_v36 = vunpack.c.l.bf16 %v8387_v61 }
 0x676   : > { %14899 = vst [vmem:[#allocation62_spill] sm:$0xff] %v13908_v9 }
 0x69c   : > { %v5953_v2 = vpop.xlane.xlu0 %5952 }
 0x69d   : > { %v5977_v8 = vpop.xlane.xlu1 %5976 }
 0x69e   : > { %v6047_v17 = vadd.f32 %v5977_v8, %v5953_v2  ;;  %v8330_v8 = vunpack.c.l.bf16 %v8385_v6 }
 0x6a1   : > { %v6001_v41 = vpop.xlane.xlu1 %6000 }
 0x6a2   : > { %v6048_v31 = vadd.f32 %v6047_v17, %v6001_v41  ;;  %v5974_v29 = vpop.xlane.xlu0 %5973 }
 0x6a6   : > { %v6025_v28 = vpop.xlane.xlu1 %6024  ;;  %v5983_v26 = vpop.xlane.xlu0 %5982 }
 0x6a7   : > { %v13910_v63 = vadd.f32 %v6048_v31, %v6025_v28  ;;  %v8335_v31 = vunpack.c.h.bf16 %v8386_v47  ;;  %v8334_v28 = vunpack.c.l.bf16 %v8386_v47 }
 0x6a9   : > { %9963 = vrcp.f32 %v13910_v63 }
 0x6aa   : > { %v5950_v33 = vpop.xlane.xlu1 %5949 }
 0x6ab   : > { %v5980_v21 = vpop.xlane.xlu0 %5979  ;;  %v6044_v18 = vadd.f32 %v5974_v29, %v5950_v33  ;;  %v8339_v29 = vunpack.c.h.bf16 %v8387_v61 }
 0x6ad   : > { %v13966_v6 = vadd.f32 %v8339_v29, %v3116_v23 }
 0x6ae   : > { %v5998_v35 = vpop.xlane.xlu1 %5997 }
 0x6af   : > { %v6045_v2 = vadd.f32 %v6044_v18, %v5998_v35 }
 0x6b0   : > { %v5989_v14 = vpop.xlane.xlu0 %5988 }
 0x6b2   : > { %v6022_v55 = vpop.xlane.xlu1 %6021 }
 0x6b3   : > { %v6046_v20 = vadd.f32 %v6045_v2, %v6022_v55 }
 0x6b4   : > { %v5986_v32 = vpop.xlane.xlu0 %5985 }
 0x6b5   : > { %9965 = vrcp.f32 %v6046_v20 }
 0x6b6   : > { %v5959_v11 = vpop.xlane.xlu1 %5958 }
 0x6b7   : > { %v6053_v17 = vadd.f32 %v5983_v26, %v5959_v11  ;;  %v3122_v26 = vadd.f32 %v8335_v31, %v3116_v23 }
 0x6b8   : > { %v5995_v43 = vpop.xlane.xlu0 %5994 }
 0x6ba   : > { %v6007_v40 = vpop.xlane.xlu1 %6006 }
 0x6bb   : > { %v6054_v56 = vadd.f32 %v6053_v17, %v6007_v40 }
 0x6be   : > { %v13912_v49 = vpop.xlane.xlu1 %6030 }
 0x6bf   : > { %v6055_v35 = vadd.f32 %v6054_v56, %v13912_v49  ;;  %v13972_v49 = vadd.f32 %v13836_v25, %v3118_v15  ;;  %v13987_v25 = vadd.f32 %v13900_v59, %v3122_v26 }
 0x6c1   : > { %9967 = vrcp.f32 %v6055_v35 }
 0x6c2   : > { %v5956_v60 = vpop.xlane.xlu1 %5955 }
 0x6c3   : > { %v6050_v33 = vadd.f32 %v5980_v21, %v5956_v60  ;;  %v13962_v60 = vadd.f32 %v8334_v28, %v3116_v23  ;;  %v5992_v21 = vpop.xlane.xlu0 %5991 }
 0x6c6   : > { %v6004_v4 = vpop.xlane.xlu1 %6003 }
 0x6c7   : > { %v6051_v16 = vadd.f32 %v6050_v33, %v6004_v4  ;;  %v13968_v4 = vadd.f32 %v8338_v36, %v3116_v23  ;;  %v6040_v61 = vpop.xlane.xlu0 %6039 }
 0x6ca   : > { %v13914_v13 = vpop.xlane.xlu1 %6027 }
 0x6cb   : > { %v6052_v55 = vadd.f32 %v6051_v16, %v13914_v13 }
 0x6cd   : > { %9969 = vrcp.f32 %v6052_v55 }
 0x6ce   : > { %v5965_v42 = vpop.xlane.xlu1 %5964 }
 0x6cf   : > { %v6059_v27 = vadd.f32 %v5989_v14, %v5965_v42  ;;  %v9962_v42 = vpop.eup %9961 }
 0x6d0   : > { %v9964_v16 = vpop.eup %9963 }
 0x6d3   : > { %v13916_v5 = vpop.xlane.xlu1 %6012 }
 0x6d4   : > { %v6060_v40 = vadd.f32 %v6059_v27, %v13916_v5 }
 0x6d5   : > { %v13918_v53 = vpop.f32.mrf.mxu1 }
 0x6d7   : > { %v13920_v22 = vpop.xlane.xlu1 %6036  ;;  %v13922_v58 = vpop.f32.mrf.mxu1 }
 0x6d8   : > { %v9552_v0 = vpop.f32.mrf.mxu0  ;;  %v6061_v13 = vadd.f32 %v6060_v40, %v13920_v22 }
 0x6da   : > { %v6898_v12 = vpop.f32.mrf.mxu0  ;;  %9971 = vrcp.f32 %v6061_v13 }
 0x6db   : > { %v13924_v7 = vpop.xlane.xlu1 %5961 }
 0x6dc   : > { %v13926_v34 = vpop.f32.mrf.mxu1  ;;  %v6056_v14 = vadd.f32 %v5986_v32, %v13924_v7 }
 0x6de   : > { %v13928_v1 = vpop.f32.mrf.mxu1 }
 0x6df   : > { %v13930_v51 = vpop.xlane.xlu1 %6009  ;;  %v9555_v63 = vpop.f32.mrf.mxu0 }
 0x6e0   : > { %v6057_v7 = vadd.f32 %v6056_v14, %v13930_v51 }
 0x6e1   : > { %v6908_v51 = vpop.f32.mrf.mxu0 }
 0x6e2   : > { %v6956_v28 = vsel %vm672_vm0, %v6908_v51, 0.0 }
 0x6e3   : > { %v13932_v50 = vpop.f32.mrf.mxu1  ;;  %v13934_v19 = vpop.xlane.xlu1 %6033 }
 0x6e5   : > { %v13937_v62 = vpop.f32.mrf.mxu1 }
 0x6e6   : > { %14900 = vst [vmem:[#allocation37_spill] sm:$0xff] %v13937_v62  ;;  %v3119_v62 = vadd.f32 %v8330_v8, %v3116_v23  ;;  %v6951_v8 = vsel %vm672_vm0, %v13928_v1, 0.0  ;;  %v9558_v2 = vpop.f32.mrf.mxu0 }
 0x6e7   : > { %v13939_v45 = vpop.xlane.xlu1 %5970 }
 0x6e8   : > { %v6065_v32 = vadd.f32 %v5995_v43, %v13939_v45  ;;  %v6058_v45 = vadd.f32 %v6057_v7, %v13934_v19 }
 0x6e9   : > { %v13942_v24 = vpop.f32.mrf.mxu1 }
 0x6ea   : > { %14901 = vst [vmem:[#allocation40_spill] sm:$0xff] %v13942_v24  ;;  %v3120_v24 = vadd.f32 %v8331_v37, %v3116_v23  ;;  %9973 = vrcp.f32 %v6058_v45 }
 0x6eb   : > { %v13944_v10 = vpop.xlane.xlu1 %6018  ;;  %v13949_v39 = vpop.f32.mrf.mxu1 }
 0x6ec   : > { %14902 = vst [vmem:[#allocation66_spill] sm:$0xff] %v13949_v39  ;;  %v3117_v39 = vadd.f32 %v8326_v30, %v3116_v23  ;;  %v13979_v5 = vadd.f32 %v13882_v38, %v3120_v24  ;;  %v13982_v23 = vadd.f32 %v13873_v57, %v3119_v62  ;;  %v6944_v57 = vsel %vm672_vm0, %v13918_v53, 0.0 }
 0x6ed   : > { %v9496_v44 = vpop.f32.mrf.mxu1  ;;  %v6949_v62 = vsel %vm672_vm0, %v9552_v0, 0.0  ;;  %v6066_v24 = vadd.f32 %v6065_v32, %v13944_v10  ;;  %v6958_v53 = vsel %vm672_vm0, %v13926_v34, 0.0  ;;  %v6963_v10 = vsel %vm672_vm0, %v9555_v63, 0.0  ;;  %v14906_v27 = vld [vmem:[#allocation37_spill] sm:$0xff] }
 0x6ee   : > { %v13975_v18 = vadd.f32 %v13814_v3, %v3117_v39  ;;  %v6945_v3 = vsel %vm672_vm0, %v9496_v44, 0.0  ;;  %v14905_v39 = vld [vmem:[#allocation13_spill] sm:$0xff]  ;;  %v6937_v44 = vsel %vm672_vm0, %v13922_v58, 0.0  ;;  %v6977_v63 = vsel %vm672_vm0, %v9558_v2, 0.0 }
 0x6ef   : > { %v5968_v48 = vpop.xlane.xlu1 %5967  ;;  %v13952_v52 = vpop.f32.mrf.mxu1  ;;  %v13991_v38 = vmul.f32 %v9962_v42, %v14905_v39  ;;  %v6946_v0 = vadd.f32 %v6945_v3, %v6944_v57 }
 0x6f0   : > { %v6062_v54 = vadd.f32 %v5992_v21, %v5968_v48  ;;  %v6942_v48 = vsel %vm672_vm0, %v6898_v12, 0.0  ;;  %v6918_v21 = vpop.f32.mrf.mxu0 }
 0x6f1   : > { %v14907_v57 = vld [vmem:[#allocation40_spill] sm:$0xff] }
 0x6f2   : > { %v9499_v41 = vpop.f32.mrf.mxu1 }
 0x6f3   : > { %v6016_v46 = vpop.xlane.xlu1 %6015  ;;  %v6959_v43 = vsel %vm672_vm0, %v9499_v41, 0.0  ;;  %v6972_v41 = vsel %vm672_vm0, %v13932_v50, 0.0 }
 0x6f4   : > { %v6650_v9 = vpop.f32.mrf.mxu1  ;;  %v6063_v15 = vadd.f32 %v6062_v54, %v6016_v46  ;;  %v6938_v46 = vsel %vm672_vm0, %v13952_v52, 0.0  ;;  %v6960_v33 = vadd.f32 %v6959_v43, %v6958_v53 }
 0x6f5   : > { %v6939_v52 = vadd.f32 %v6938_v46, %v6937_v44  ;;  %v6952_v17 = vsel %vm672_vm0, %v6650_v9, 0.0  ;;  %v6965_v9 = vsel %vm672_vm0, %v14906_v27, 0.0  ;;  %v14909_v27 = vld [vmem:[#allocation38_spill] sm:$0xff] }
 0x6f6   : > { %v9502_v11 = vpop.f32.mrf.mxu1  ;;  %v6064_v58 = vadd.f32 %v6063_v15, %v6040_v61  ;;  %v6953_v35 = vadd.f32 %v6952_v17, %v6951_v8  ;;  %v6970_v17 = vsel %vm672_vm0, %v6918_v21, 0.0 }
 0x6f7   : > { %v6043_v22 = vpop.xlane.xlu1 %6042  ;;  %v6973_v1 = vsel %vm672_vm0, %v9502_v11, 0.0  ;;  %v9966_v11 = vpop.eup %9965 }
 0x6f8   : > { %v6660_v47 = vpop.f32.mrf.mxu1  ;;  %v6067_v19 = vadd.f32 %v6066_v24, %v6043_v22  ;;  %v6974_v13 = vadd.f32 %v6973_v1, %v6972_v41 }
 0x6f9   : > { %v6966_v50 = vsel %vm672_vm0, %v6660_v47, 0.0  ;;  %v9968_v47 = vpop.eup %9967 }
 0x6fa   : > { %v9505_v30 = vpop.f32.mrf.mxu1  ;;  %9975 = vrcp.f32 %v6067_v19  ;;  %v6967_v51 = vadd.f32 %v6966_v50, %v6965_v9  ;;  %v9970_v44 = vpop.eup %9969  ;;  %v5020_v9 = vadd.f32 %v14909_v27, %v13962_v60  ;;  %v7147_v27 = vld [vmem:[%s14339_s7 + $0x10] sm:$0xff] }
 0x6fb   : > { %9977 = vrcp.f32 %v6064_v58  ;;  %v6987_v54 = vsel %vm672_vm0, %v9505_v30, 0.0  ;;  %v9561_v30 = vpop.f32.mrf.mxu0 }
 0x6fc   : > { %v6670_v59 = vpop.f32.mrf.mxu1 }
 0x6fd   : > { %v6980_v45 = vsel %vm672_vm0, %v6670_v59, 0.0  ;;  %v6928_v41 = vpop.f32.mrf.mxu0 }
 0x6fe   : > { %v9524_v37 = vpop.f32.mrf.mxu1 }
 0x6ff   : > { %v6947_v12 = vsel %vm672_vm0, %v9524_v37, 0.0 }
 0x700   : > { %v6948_v31 = vadd.f32 %v6947_v12, %v6946_v0  ;;  %v6769_v34 = vpop.f32.mrf.mxu1 }
 0x701   : > { %v6940_v29 = vsel %vm672_vm0, %v6769_v34, 0.0 }
 0x702   : > { %v6950_v36 = vadd.f32 %v6949_v62, %v6948_v31  ;;  %v6941_v20 = vadd.f32 %v6940_v29, %v6939_v52  ;;  %v9527_v56 = vpop.f32.mrf.mxu1  ;;  %v6986_v62 = vsel %vm672_vm0, %v14907_v57, 0.0 }
 0x703   : > { %v6961_v26 = vsel %vm672_vm0, %v9527_v56, 0.0  ;;  %v6988_v19 = vadd.f32 %v6987_v54, %v6986_v62  ;;  %v6991_v56 = vsel %vm672_vm0, %v9561_v30, 0.0 }
 0x704   : > { %v7002_v55 = vmul.f32 %v9964_v16, %v6950_v36  ;;  %v6943_v40 = vadd.f32 %v6942_v48, %v6941_v20  ;;  %v6962_v42 = vadd.f32 %v6961_v26, %v6960_v33  ;;  %v6779_v14 = vpop.f32.mrf.mxu1 }
 0x705   : > { %v6954_v7 = vsel %vm672_vm0, %v6779_v14, 0.0  ;;  %v5023_v14 = vadd.f32 %v13991_v38, %v13966_v6 }
 0x706   : > { %v7001_v32 = vmul.f32 %v9966_v11, %v6943_v40  ;;  %v6964_v3 = vadd.f32 %v6963_v10, %v6962_v42  ;;  %v6955_v15 = vadd.f32 %v6954_v7, %v6953_v35  ;;  %v14024_v39 = vadd.f32 %v7002_v55, %v13972_v49  ;;  %v14908_v49 = vld [vmem:[#allocation66_spill] sm:$0xff]  ;;  %v9972_v10 = vpop.eup %9971 }
 0x707   : > { %v6979_v43 = vsel %vm672_vm0, %v14908_v49, 0.0  ;;  %v9974_v20 = vpop.eup %9973  ;;  %v6984_v40 = vsel %vm672_vm0, %v6928_v41, 0.0 }
 0x708   : > { %v7004_v48 = vmul.f32 %v9968_v47, %v6964_v3  ;;  %v6957_v46 = vadd.f32 %v6956_v28, %v6955_v15  ;;  %v7020_v0 = vsel %vm672_vm0, %v14024_v39, 0.0  ;;  %v7009_v59 = vadd.f32 %v7001_v32, %v13975_v18  ;;  %v9976_v55 = vpop.eup %9975  ;;  %v14910_v32 = vld [vmem:[#allocation62_spill] sm:$0xff] }
 0x709   : > { %v9530_v22 = vpop.f32.mrf.mxu1  ;;  %7021 = vadd.xlane.f32.xlu1 %v7020_v0  ;;  %v6981_v31 = vadd.f32 %v6980_v45, %v6979_v43  ;;  %v9978_v11 = vpop.eup %9977  ;;  %v5022_v3 = vadd.f32 %v14910_v32, %v13968_v4 }
 0x70a   : > { %v6975_v24 = vsel %vm672_vm0, %v9530_v22, 0.0  ;;  %v7003_v8 = vmul.f32 %v9970_v44, %v6957_v46  ;;  %v7012_v52 = vadd.f32 %v7004_v48, %v13979_v5  ;;  %v7017_v28 = vsel %vm672_vm0, %v7009_v59, 0.0 }
 0x70b   : > { %v6976_v61 = vadd.f32 %v6975_v24, %v6974_v13  ;;  %v6789_v53 = vpop.f32.mrf.mxu1  ;;  %7018 = vadd.xlane.f32.xlu0 %v7017_v28 }
 0x70c   : > { %v6968_v37 = vsel %vm672_vm0, %v6789_v53, 0.0  ;;  %v7026_v36 = vsel %vm672_vm0, %v7012_v52, 0.0  ;;  %v7011_v16 = vadd.f32 %v7003_v8, %v13982_v23 }
 0x70d   : > { %v6978_v58 = vadd.f32 %v6977_v63, %v6976_v61  ;;  %v6969_v12 = vadd.f32 %v6968_v37, %v6967_v51  ;;  %v9533_v2 = vpop.f32.mrf.mxu1  ;;  %7027 = vadd.xlane.f32.xlu1 %v7026_v36 }
 0x70e   : > { %v6989_v34 = vsel %vm672_vm0, %v9533_v2, 0.0  ;;  %v7023_v42 = vsel %vm672_vm0, %v7011_v16, 0.0 }
 0x70f   : > { %v7006_v33 = vmul.f32 %v9972_v10, %v6978_v58  ;;  %v6971_v29 = vadd.f32 %v6970_v17, %v6969_v12  ;;  %v6990_v1 = vadd.f32 %v6989_v34, %v6988_v19  ;;  %v6799_v18 = vpop.f32.mrf.mxu1  ;;  %7024 = vadd.xlane.f32.xlu0 %v7023_v42 }
 0x710   : > { %v6982_v5 = vsel %vm672_vm0, %v6799_v18, 0.0 }
 0x711   : > { %v7005_v35 = vmul.f32 %v9974_v20, %v6971_v29  ;;  %v6992_v26 = vadd.f32 %v6991_v56, %v6990_v1  ;;  %v6983_v21 = vadd.f32 %v6982_v5, %v6981_v31  ;;  %v7014_v50 = vadd.f32 %v7006_v33, %v13987_v25 }
 0x713   : > { %v7008_v63 = vmul.f32 %v9976_v55, %v6992_v26  ;;  %v6985_v13 = vadd.f32 %v6984_v40, %v6983_v21  ;;  %v7032_v23 = vsel %vm672_vm0, %v7014_v50, 0.0  ;;  %v7013_v60 = vadd.f32 %v7005_v35, %v5020_v9  ;;  %v7146_v9 = vld [vmem:[%s14339_s7 + $0x8] sm:$0xff]  ;;  %v7145_v35 = vld [vmem:[%s14339_s7] sm:$0xff] }
 0x714   : > { %7033 = vadd.xlane.f32.xlu1 %v7032_v23 }
 0x715   : > { %v7007_v54 = vmul.f32 %v9978_v11, %v6985_v13  ;;  %v7029_v7 = vsel %vm672_vm0, %v7013_v60, 0.0  ;;  %v7016_v25 = vadd.f32 %v7008_v63, %v5023_v14 }
 0x716   : > { %7030 = vadd.xlane.f32.xlu0 %v7029_v7 }
 0x717   : > { %v7038_v15 = vsel %vm672_vm0, %v7016_v25, 0.0  ;;  %v7015_v22 = vadd.f32 %v7007_v54, %v5022_v3 }
 0x718   : > { %7039 = vadd.xlane.f32.xlu1 %v7038_v15 }
 0x719   : > { %v7035_v6 = vsel %vm672_vm0, %v7015_v22, 0.0 }
 0x71a   : > { %7036 = vadd.xlane.f32.xlu0 %v7035_v6 }
 0x792   : > { %v7022_v38 = vpop.xlane.xlu1 %7021 }
 0x793   : > { %v7042_v47 = vmul.f32 0.03125, %v7022_v38  ;;  %v14911_v38 = vld [vmem:[#allocation30_spill] sm:$0xff] }
 0x794   : > { %v7019_v62 = vpop.xlane.xlu0 %7018 }
 0x795   : > { %v14058_v57 = vsub.f32 %v14024_v39, %v7042_v47  ;;  %v7041_v51 = vmul.f32 0.03125, %v7019_v62  ;;  %v7123_v47 = vsub.s32 7, %v14911_v38 }
 0x796   : > { %v7028_v45 = vpop.xlane.xlu1 %7027 }
 0x797   : > { %v7044_v24 = vmul.f32 0.03125, %v7028_v45  ;;  %v7058_v4 = vmul.f32 %v14058_v57, %v14058_v57  ;;  %v14062_v44 = vsub.f32 %v7009_v59, %v7041_v51 }
 0x798   : > { %v7025_v48 = vpop.xlane.xlu0 %7024 }
 0x799   : > { %v14064_v30 = vsub.f32 %v7012_v52, %v7044_v24  ;;  %v7068_v46 = vsel %vm672_vm0, %v7058_v4, 0.0  ;;  %v7043_v61 = vmul.f32 0.03125, %v7025_v48  ;;  %v7057_v39 = vmul.f32 %v14062_v44, %v14062_v44  ;;  %v14912_v48 = vld [vmem:[#allocation39_spill] sm:$0xff] }
 0x79a   : > { %7069 = vadd.xlane.f32.xlu1 %v7068_v46  ;;  %v7124_v46 = vrot.slane %v14912_v48, %v7123_v47 }
 0x79b   : > { %v7060_v49 = vmul.f32 %v14064_v30, %v14064_v30  ;;  %v14071_v43 = vsub.f32 %v7011_v16, %v7043_v61  ;;  %v7065_v19 = vsel %vm672_vm0, %v7057_v39, 0.0  ;;  %v7148_v16 = vld [vmem:[%s14339_s7 + $0x18] sm:$0xff] }
 0x79c   : > { %7066 = vadd.xlane.f32.xlu0 %v7065_v19  ;;  %9562 = vmatprep.subr.mxu1 %v7148_v16  ;;  %v14913_v19 = vld [vmem:[#allocation32_spill] sm:$0xff] }
 0x79d   : > { %v7034_v53 = vpop.xlane.xlu1 %7033  ;;  %v7074_v10 = vsel %vm672_vm0, %v7060_v49, 0.0  ;;  %v7059_v12 = vmul.f32 %v14071_v43, %v14071_v43  ;;  %9563 = vmatpush3.msra.mxu1 %v7148_v16 }
 0x79e   : > { %v7046_v0 = vmul.f32 0.03125, %v7034_v53  ;;  %7075 = vadd.xlane.f32.xlu1 %v7074_v10  ;;  %9564 = vmatprep.subr.mxu1 %v7147_v27  ;;  %v14116_v53 = vld [vmem:[%s14342_s10 + $0x8] sm:$0xf] }
 0x79f   : > { %v7031_v59 = vpop.xlane.xlu0 %7030  ;;  %v7071_v31 = vsel %vm672_vm0, %v7059_v12, 0.0  ;;  %9565 = vmatpush3.msra.mxu1 %v7147_v27 }
 0x7a0   : > { %v14074_v37 = vsub.f32 %v7014_v50, %v7046_v0  ;;  %v7045_v8 = vmul.f32 0.03125, %v7031_v59  ;;  %7072 = vadd.xlane.f32.xlu0 %v7071_v31  ;;  %9566 = vmatprep.subr.mxu1 %v7146_v9  ;;  %v7136_v59 = vrot.slane %v14116_v53, %v14913_v19 }
 0x7a1   : > { %v7040_v58 = vpop.xlane.xlu1 %7039  ;;  %9567 = vmatpush3.msra.mxu1 %v7146_v9 }
 0x7a2   : > { %v7048_v2 = vmul.f32 0.03125, %v7040_v58  ;;  %v7062_v52 = vmul.f32 %v14074_v37, %v14074_v37  ;;  %v14081_v17 = vsub.f32 %v7013_v60, %v7045_v8  ;;  %9568 = vmatprep.subr.mxu1 %v7145_v35 }
 0x7a3   : > { %v7037_v28 = vpop.xlane.xlu0 %7036  ;;  %9569 = vmatpush3.msra.mxu1 %v7145_v35 }
 0x7a4   : > { %v14084_v34 = vsub.f32 %v7016_v25, %v7048_v2  ;;  %v7080_v41 = vsel %vm672_vm0, %v7062_v52, 0.0  ;;  %v7047_v33 = vmul.f32 0.03125, %v7037_v28  ;;  %v7061_v29 = vmul.f32 %v14081_v17, %v14081_v17 }
 0x7a5   : > { %7081 = vadd.xlane.f32.xlu1 %v7080_v41 }
 0x7a6   : > { %v7064_v1 = vmul.f32 %v14084_v34, %v14084_v34  ;;  %v14091_v18 = vsub.f32 %v7015_v22, %v7047_v33  ;;  %v7077_v36 = vsel %vm672_vm0, %v7061_v29, 0.0 }
 0x7a7   : > { %7078 = vadd.xlane.f32.xlu0 %v7077_v36 }
 0x7a8   : > { %v7086_v20 = vsel %vm672_vm0, %v7064_v1, 0.0  ;;  %v7063_v56 = vmul.f32 %v14091_v18, %v14091_v18 }
 0x7a9   : > { %7087 = vadd.xlane.f32.xlu1 %v7086_v20 }
 0x7aa   : > { %v7083_v5 = vsel %vm672_vm0, %v7063_v56, 0.0 }
 0x7ab   : > { %7084 = vadd.xlane.f32.xlu0 %v7083_v5 }
 0x823   : > { %v7070_v26 = vpop.xlane.xlu1 %7069 }
 0x824   : > { %v7090_v21 = vmul.f32 0.03125, %v7070_v26  ;;  %v7363_v26 = vld [vmem:[%s14341_s9 + $0x30] sm:$0xff] }
 0x825   : > { %v7067_v55 = vpop.xlane.xlu0 %7066 }
 0x826   : > { %v7098_v50 = vadd.f32 1e-05, %v7090_v21  ;;  %v7089_v40 = vmul.f32 0.03125, %v7067_v55  ;;  %v7362_v21 = vld [vmem:[%s14341_s9 + $0x28] sm:$0xff]  ;;  %v7360_v55 = vld [vmem:[%s14341_s9 + $0x18] sm:$0xff] }
 0x827   : > { %v7076_v42 = vpop.xlane.xlu1 %7075 }
 0x828   : > { %9979 = vrsqrt.f32 %v7098_v50  ;;  %v7092_v14 = vmul.f32 0.03125, %v7076_v42  ;;  %v7097_v11 = vadd.f32 1e-05, %v7089_v40  ;;  %v7361_v50 = vld [vmem:[%s14341_s9 + $0x20] sm:$0xff]  ;;  %v7359_v40 = vld [vmem:[%s14341_s9 + $0x10] sm:$0xff]  ;;  %v7358_v42 = vld [vmem:[%s14341_s9 + $0x8] sm:$0xff] }
 0x829   : > { %v7073_v13 = vpop.xlane.xlu0 %7072 }
 0x82a   : > { %v7100_v63 = vadd.f32 1e-05, %v7092_v14  ;;  %9981 = vrsqrt.f32 %v7097_v11  ;;  %v7091_v23 = vmul.f32 0.03125, %v7073_v13  ;;  %v7357_v14 = vld [vmem:[%s14341_s9] sm:$0xff] }
 0x82b   : > { %v8108_v11 = vld [vmem:[%s14340_s8] ss:$0 sm:$0xff] }
 0x82c   : > { %9983 = vrsqrt.f32 %v7100_v63  ;;  %v7099_v7 = vadd.f32 1e-05, %v7091_v23 }
 0x82e   : > { %v7082_v60 = vpop.xlane.xlu1 %7081  ;;  %9985 = vrsqrt.f32 %v7099_v7 }
 0x82f   : > { %v7094_v54 = vmul.f32 0.03125, %v7082_v60 }
 0x830   : > { %v7079_v32 = vpop.xlane.xlu0 %7078 }
 0x831   : > { %v7102_v25 = vadd.f32 1e-05, %v7094_v54  ;;  %v7093_v3 = vmul.f32 0.03125, %v7079_v32 }
 0x832   : > { %v7088_v15 = vpop.xlane.xlu1 %7087 }
 0x833   : > { %9987 = vrsqrt.f32 %v7102_v25  ;;  %v7096_v22 = vmul.f32 0.03125, %v7088_v15  ;;  %v7101_v6 = vadd.f32 1e-05, %v7093_v3 }
 0x834   : > { %v7085_v51 = vpop.xlane.xlu0 %7084 }
 0x835   : > { %v7104_v62 = vadd.f32 1e-05, %v7096_v22  ;;  %9989 = vrsqrt.f32 %v7101_v6  ;;  %v7095_v45 = vmul.f32 0.03125, %v7085_v51  ;;  %v9980_v24 = vpop.eup %9979 }
 0x836   : > { %v7114_v61 = vmul.f32 %v9980_v24, %v14058_v57 }
 0x837   : > { %9991 = vrsqrt.f32 %v7104_v62  ;;  %v7103_v4 = vadd.f32 1e-05, %v7095_v45  ;;  %v9982_v39 = vpop.eup %9981 }
 0x838   : > { %v7113_v49 = vmul.f32 %v9982_v39, %v14062_v44  ;;  %v7126_v10 = vmul.f32 %v7124_v46, %v7114_v61 }
 0x839   : > { %9993 = vrsqrt.f32 %v7103_v4  ;;  %v9984_v0 = vpop.eup %9983 }
 0x83a   : > { %v7116_v8 = vmul.f32 %v9984_v0, %v14064_v30  ;;  %v7125_v58 = vmul.f32 %v7124_v46, %v7113_v49  ;;  %v14125_v31 = vadd.f32 %v7136_v59, %v7126_v10 }
 0x83b   : > { %v9986_v12 = vpop.eup %9985 }
 0x83c   : > { %v14122_v57 = vadd.f32 %v7136_v59, %v7125_v58  ;;  %v7115_v52 = vmul.f32 %v9986_v12, %v14071_v43  ;;  %v7128_v41 = vmul.f32 %v7124_v46, %v7116_v8 }
 0x83e   : > { %9570 = vmatprep.mubr.msk.f32.mxu1 %vm672_vm0, %v14122_v57  ;;  %v7127_v44 = vmul.f32 %v7124_v46, %v7115_v52  ;;  %v14136_v36 = vadd.f32 %v7136_v59, %v7128_v41 }
 0x83f   : > { %9571 = vmatmul.mubr.msk.f32.vlgmr.msra.gmra.mxu1 %vm672_vm0, %v14125_v31 }
 0x840   : > { %v9988_v2 = vpop.eup %9987  ;;  %v14132_v29 = vadd.f32 %v7136_v59, %v7127_v44 }
 0x841   : > { %v7118_v28 = vmul.f32 %v9988_v2, %v14074_v37 }
 0x842   : > { %v9990_v33 = vpop.eup %9989  ;;  %9573 = vmatprep.mubr.msk.f32.mxu1 %vm672_vm0, %v14132_v29 }
 0x843   : > { %v7117_v1 = vmul.f32 %v9990_v33, %v14081_v17  ;;  %v7130_v20 = vmul.f32 %v7124_v46, %v7118_v28  ;;  %9574 = vmatmul.mubr.msk.f32.gmra.mxu1 %vm672_vm0, %v14136_v36 }
 0x844   : > { %v9992_v30 = vpop.eup %9991 }
 0x845   : > { %v7120_v43 = vmul.f32 %v9992_v30, %v14084_v34  ;;  %v7129_v37 = vmul.f32 %v7124_v46, %v7117_v1  ;;  %v14145_v27 = vadd.f32 %v7136_v59, %v7130_v20 }
 0x846   : > { %v9994_v56 = vpop.eup %9993 }
 0x847   : > { %v14142_v5 = vadd.f32 %v7136_v59, %v7129_v37  ;;  %v7119_v16 = vmul.f32 %v9994_v56, %v14091_v18  ;;  %v7132_v17 = vmul.f32 %v7124_v46, %v7120_v43  ;;  %v7364_v18 = vld [vmem:[%s14341_s9 + $0x38] sm:$0xff] }
 0x848   : > { %9582 = vmatprep.subr.mxu0 %v7364_v18 }
 0x849   : > { %9576 = vmatprep.mubr.msk.f32.mxu1 %vm672_vm0, %v14142_v5  ;;  %v7131_v34 = vmul.f32 %v7124_v46, %v7119_v16  ;;  %v14153_v35 = vadd.f32 %v7136_v59, %v7132_v17  ;;  %9583 = vmatpush3.msra.mxu0 %v7364_v18 }
 0x84a   : > { %9577 = vmatmul.mubr.msk.f32.gmra.mxu1 %vm672_vm0, %v14145_v27  ;;  %9584 = vmatprep.subr.mxu0 %v7363_v26 }
 0x84b   : > { %v14151_v9 = vadd.f32 %v7136_v59, %v7131_v34  ;;  %9585 = vmatpush3.msra.mxu0 %v7363_v26 }
 0x84c   : > { %9586 = vmatprep.subr.mxu0 %v7362_v21 }
 0x84d   : > { %9579 = vmatprep.mubr.msk.f32.mxu1 %vm672_vm0, %v14151_v9  ;;  %9587 = vmatpush3.msra.mxu0 %v7362_v21 }
 0x84e   : > { %9580 = vmatmul.mubr.msk.f32.gmra.mxu1 %vm672_vm0, %v14153_v35  ;;  %9588 = vmatprep.subr.mxu0 %v7361_v50 }
 0x84f   : > { %9589 = vmatpush3.msra.mxu0 %v7361_v50 }
 0x850   : > { %9590 = vmatprep.subr.mxu0 %v7360_v55 }
 0x851   : > { %9591 = vmatpush3.msra.mxu0 %v7360_v55 }
 0x852   : > { %9592 = vmatprep.subr.mxu0 %v7359_v40 }
 0x853   : > { %9593 = vmatpush3.msra.mxu0 %v7359_v40 }
 0x854   : > { %9594 = vmatprep.subr.mxu0 %v7358_v42 }
 0x855   : > { %9595 = vmatpush3.msra.mxu0 %v7358_v42 }
 0x856   : > { %9596 = vmatprep.subr.mxu0 %v7357_v14 }
 0x857   : > { %9597 = vmatpush3.msra.mxu0 %v7357_v14 }
 0x8ff   : > { %v9572_v63 = vpop.f32.mrf.mxu1 }
 0x900   : > { %v14186_v13 = vadd.f32 %v9572_v63, %v8108_v11 }
 0x901   : > { %v7246_v23 = vpop.f32.mrf.mxu1 }
 0x902   : > { %v7294_v60 = vmul.f32 0.044715, %v14186_v13  ;;  %v14189_v54 = vadd.f32 %v8108_v11, %v7246_v23 }
 0x903   : > { %v9575_v7 = vpop.f32.mrf.mxu1 }
 0x904   : > { %v7302_v25 = vmul.f32 %v7294_v60, %v14186_v13  ;;  %v7293_v32 = vmul.f32 0.044715, %v14189_v54  ;;  %v14193_v3 = vadd.f32 %v9575_v7, %v8108_v11 }
 0x905   : > { %v7256_v15 = vpop.f32.mrf.mxu1 }
 0x906   : > { %v7310_v22 = vmul.f32 %v7302_v25, %v14186_v13  ;;  %v7301_v6 = vmul.f32 %v7293_v32, %v14189_v54  ;;  %v7296_v47 = vmul.f32 0.044715, %v14193_v3  ;;  %v14198_v62 = vadd.f32 %v8108_v11, %v7256_v15 }
 0x907   : > { %v7285_v15 = vmul.f32 0.5, %v14189_v54 }
 0x908   : > { %v7318_v45 = vadd.f32 %v7310_v22, %v14186_v13  ;;  %v7309_v24 = vmul.f32 %v7301_v6, %v14189_v54  ;;  %v7304_v4 = vmul.f32 %v7296_v47, %v14193_v3  ;;  %v7295_v46 = vmul.f32 0.044715, %v14198_v62 }
 0x909   : > { %v7286_v6 = vmul.f32 0.5, %v14186_v13 }
 0x90a   : > { %v9578_v51 = vpop.f32.mrf.mxu1  ;;  %v7326_v39 = vmul.f32 0.7978846, %v7318_v45  ;;  %v7317_v0 = vadd.f32 %v7309_v24, %v14189_v54  ;;  %v7312_v49 = vmul.f32 %v7304_v4, %v14193_v3  ;;  %v7303_v19 = vmul.f32 %v7295_v46, %v14198_v62 }
 0x90b   : > { %v14203_v48 = vadd.f32 %v9578_v51, %v8108_v11  ;;  %v7287_v4 = vmul.f32 0.5, %v14198_v62 }
 0x90c   : > { %v7266_v61 = vpop.f32.mrf.mxu1  ;;  %9995 = vtanh.f32 %v7326_v39  ;;  %v7320_v58 = vadd.f32 %v7312_v49, %v14193_v3  ;;  %v7325_v2 = vmul.f32 0.7978846, %v7317_v0  ;;  %v7311_v52 = vmul.f32 %v7303_v19, %v14198_v62 }
 0x90d   : > { %v7298_v59 = vmul.f32 0.044715, %v14203_v48  ;;  %v7267_v10 = vadd.f32 %v8108_v11, %v7266_v61  ;;  %v7288_v39 = vmul.f32 0.5, %v14193_v3 }
 0x90e   : > { %v9581_v8 = vpop.f32.mrf.mxu1  ;;  %v7328_v33 = vmul.f32 0.7978846, %v7320_v58  ;;  %v7319_v43 = vadd.f32 %v7311_v52, %v14198_v62  ;;  %9997 = vtanh.f32 %v7325_v2  ;;  %v7290_v58 = vmul.f32 0.5, %v14203_v48 }
 0x90f   : > { %v14211_v12 = vadd.f32 %v9581_v8, %v8108_v11  ;;  %v7306_v28 = vmul.f32 %v7298_v59, %v14203_v48  ;;  %v7297_v41 = vmul.f32 0.044715, %v7267_v10  ;;  %v7289_v13 = vmul.f32 0.5, %v7267_v10 }
 0x910   : > { %v7276_v44 = vpop.f32.mrf.mxu1  ;;  %9999 = vtanh.f32 %v7328_v33  ;;  %v7327_v18 = vmul.f32 0.7978846, %v7319_v43 }
 0x911   : > { %v7300_v30 = vmul.f32 0.044715, %v14211_v12  ;;  %v7277_v1 = vadd.f32 %v8108_v11, %v7276_v44  ;;  %v7314_v20 = vmul.f32 %v7306_v28, %v14203_v48  ;;  %v7305_v37 = vmul.f32 %v7297_v41, %v7267_v10 }
 0x912   : > { %10001 = vtanh.f32 %v7327_v18  ;;  %v7292_v44 = vmul.f32 0.5, %v14211_v12 }
 0x913   : > { %v7308_v56 = vmul.f32 %v7300_v30, %v14211_v12  ;;  %v7299_v16 = vmul.f32 0.044715, %v7277_v1  ;;  %v7322_v17 = vadd.f32 %v7314_v20, %v14203_v48  ;;  %v7313_v34 = vmul.f32 %v7305_v37, %v7267_v10  ;;  %v14914_v48 = vld [vmem:[#allocation33_spill] sm:$0xff] }
 0x914   : > { %v7291_v28 = vmul.f32 0.5, %v7277_v1  ;;  %v7505_v30 = vrot.slane %v14116_v53, %v14914_v48 }
 0x915   : > { %v7316_v26 = vmul.f32 %v7308_v56, %v14211_v12  ;;  %v7307_v21 = vmul.f32 %v7299_v16, %v7277_v1  ;;  %v7330_v50 = vmul.f32 0.7978846, %v7322_v17  ;;  %v7321_v55 = vadd.f32 %v7313_v34, %v7267_v10 }
 0x917   : > { %v7324_v40 = vadd.f32 %v7316_v26, %v14211_v12  ;;  %v7315_v42 = vmul.f32 %v7307_v21, %v7277_v1  ;;  %10003 = vtanh.f32 %v7330_v50  ;;  %v7329_v14 = vmul.f32 0.7978846, %v7321_v55 }
 0x919   : > { %v7332_v11 = vmul.f32 0.7978846, %v7324_v40  ;;  %v7323_v63 = vadd.f32 %v7315_v42, %v7277_v1  ;;  %10005 = vtanh.f32 %v7329_v14  ;;  %v9996_v60 = vpop.eup %9995 }
 0x91a   : > { %v7342_v25 = vadd.f32 1.0, %v9996_v60 }
 0x91b   : > { %10007 = vtanh.f32 %v7332_v11  ;;  %v7331_v23 = vmul.f32 0.7978846, %v7323_v63  ;;  %v9998_v7 = vpop.eup %9997 }
 0x91c   : > { %v7341_v22 = vadd.f32 1.0, %v9998_v7  ;;  %v7350_v45 = vmul.f32 %v7342_v25, %v7286_v6 }
 0x91d   : > { %10009 = vtanh.f32 %v7331_v23  ;;  %v10000_v32 = vpop.eup %9999 }
 0x91e   : > { %v7349_v47 = vmul.f32 %v7341_v22, %v7285_v15  ;;  %v7344_v24 = vadd.f32 1.0, %v10000_v32 }
 0x91f   : > { %v10002_v51 = vpop.eup %10001 }
 0x920   : > { %9598 = vmatprep.mubr.msk.f32.mxu0 %vm3770_vm2, %v7349_v47  ;;  %v7343_v46 = vadd.f32 1.0, %v10002_v51  ;;  %v7352_v54 = vmul.f32 %v7344_v24, %v7288_v39 }
 0x921   : > { %9599 = vmatmul.mubr.msk.f32.vlgmr.msra.gmra.mxu0 %vm3770_vm2, %v7350_v45 }
 0x922   : > { %v7351_v0 = vmul.f32 %v7343_v46, %v7287_v4 }
 0x924   : > { %v10004_v61 = vpop.eup %10003  ;;  %9601 = vmatprep.mubr.msk.f32.mxu0 %vm3770_vm2, %v7351_v0 }
 0x925   : > { %v7346_v19 = vadd.f32 1.0, %v10004_v61  ;;  %9602 = vmatmul.mubr.msk.f32.gmra.mxu0 %vm3770_vm2, %v7352_v54 }
 0x926   : > { %v10006_v49 = vpop.eup %10005 }
 0x927   : > { %v7345_v8 = vadd.f32 1.0, %v10006_v49  ;;  %v7354_v52 = vmul.f32 %v7346_v19, %v7290_v58 }
 0x928   : > { %v10008_v59 = vpop.eup %10007 }
 0x929   : > { %v7353_v2 = vmul.f32 %v7345_v8, %v7289_v13  ;;  %v7348_v41 = vadd.f32 1.0, %v10008_v59 }
 0x92a   : > { %v10010_v62 = vpop.eup %10009 }
 0x92b   : > { %v7347_v3 = vadd.f32 1.0, %v10010_v62  ;;  %9604 = vmatprep.mubr.msk.f32.mxu0 %vm3770_vm2, %v7353_v2  ;;  %v7356_v10 = vmul.f32 %v7348_v41, %v7292_v44 }
 0x92c   : > { %9605 = vmatmul.mubr.msk.f32.gmra.mxu0 %vm3770_vm2, %v7354_v52 }
 0x92d   : > { %v7355_v33 = vmul.f32 %v7347_v3, %v7291_v28 }
 0x92f   : > { %9607 = vmatprep.mubr.msk.f32.mxu0 %vm3770_vm2, %v7355_v33 }
 0x930   : > { %9608 = vmatmul.mubr.msk.f32.gmra.mxu0 %vm3770_vm2, %v7356_v10 }
 0x9e1   : > { %v9600_v43 = vpop.f32.mrf.mxu0 }
 0x9e2   : > { %v7495_v1 = vadd.f32 %v9600_v43, %v14125_v31 }
 0x9e3   : > { %v7455_v20 = vpop.f32.mrf.mxu0 }
 0x9e4   : > { %v7507_v37 = vadd.f32 %v7505_v30, %v7495_v1  ;;  %v7494_v56 = vadd.f32 %v7455_v20, %v14122_v57 }
 0x9e5   : > { %v9603_v16 = vpop.f32.mrf.mxu0 }
 0x9e6   : > { %v7506_v12 = vadd.f32 %v7505_v30, %v7494_v56  ;;  %v7497_v17 = vadd.f32 %v9603_v16, %v14136_v36  ;;  %v7517_v34 = vsel %vm672_vm0, %v7507_v37, 0.0 }
 0x9e7   : > { %7518 = vadd.xlane.f32.xlu1 %v7517_v34  ;;  %v7465_v18 = vpop.f32.mrf.mxu0 }
 0x9e8   : > { %v7509_v26 = vadd.f32 %v7505_v30, %v7497_v17  ;;  %v7496_v21 = vadd.f32 %v7465_v18, %v14132_v29  ;;  %v7514_v50 = vsel %vm672_vm0, %v7506_v12, 0.0 }
 0x9e9   : > { %7515 = vadd.xlane.f32.xlu0 %v7514_v50 }
 0x9ea   : > { %v7508_v31 = vadd.f32 %v7505_v30, %v7496_v21  ;;  %v7523_v57 = vsel %vm672_vm0, %v7509_v26, 0.0 }
 0x9eb   : > { %7524 = vadd.xlane.f32.xlu1 %v7523_v57 }
 0x9ec   : > { %v9606_v55 = vpop.f32.mrf.mxu0  ;;  %v7520_v11 = vsel %vm672_vm0, %v7508_v31, 0.0 }
 0x9ed   : > { %v7499_v40 = vadd.f32 %v9606_v55, %v14145_v27  ;;  %7521 = vadd.xlane.f32.xlu0 %v7520_v11 }
 0x9ee   : > { %v7475_v42 = vpop.f32.mrf.mxu0 }
 0x9ef   : > { %v7511_v14 = vadd.f32 %v7505_v30, %v7499_v40  ;;  %v7498_v36 = vadd.f32 %v7475_v42, %v14142_v5 }
 0x9f0   : > { %v9609_v63 = vpop.f32.mrf.mxu0 }
 0x9f1   : > { %v7510_v23 = vadd.f32 %v7505_v30, %v7498_v36  ;;  %v7501_v29 = vadd.f32 %v9609_v63, %v14153_v35  ;;  %v7529_v60 = vsel %vm672_vm0, %v7511_v14, 0.0 }
 0x9f2   : > { %7530 = vadd.xlane.f32.xlu1 %v7529_v60  ;;  %v7485_v7 = vpop.f32.mrf.mxu0 }
 0x9f3   : > { %v7513_v25 = vadd.f32 %v7505_v30, %v7501_v29  ;;  %v7500_v27 = vadd.f32 %v7485_v7, %v14151_v9  ;;  %v7526_v32 = vsel %vm672_vm0, %v7510_v23, 0.0 }
 0x9f4   : > { %7527 = vadd.xlane.f32.xlu0 %v7526_v32 }
 0x9f5   : > { %v7512_v15 = vadd.f32 %v7505_v30, %v7500_v27  ;;  %v7535_v5 = vsel %vm672_vm0, %v7513_v25, 0.0 }
 0x9f6   : > { %7536 = vadd.xlane.f32.xlu1 %v7535_v5 }
 0x9f7   : > { %v7532_v22 = vsel %vm672_vm0, %v7512_v15, 0.0 }
 0x9f8   : > { %7533 = vadd.xlane.f32.xlu0 %v7532_v22 }
 0xa70   : > { %v7519_v6 = vpop.xlane.xlu1 %7518 }
 0xa71   : > { %v7539_v47 = vmul.f32 0.03125, %v7519_v6 }
 0xa72   : > { %v7516_v35 = vpop.xlane.xlu0 %7515 }
 0xa73   : > { %v14254_v51 = vsub.f32 %v7507_v37, %v7539_v47  ;;  %v7538_v45 = vmul.f32 0.03125, %v7516_v35  ;;  %v14915_v47 = vld [vmem:[#allocation34_spill] sm:$0xff] }
 0xa74   : > { %v7525_v24 = vpop.xlane.xlu1 %7524  ;;  %v7621_v35 = vrot.slane %v14116_v53, %v14915_v47 }
 0xa75   : > { %v14256_v4 = vsub.f32 %v7506_v12, %v7538_v45  ;;  %v7541_v9 = vmul.f32 0.03125, %v7525_v24  ;;  %v7555_v46 = vmul.f32 %v14254_v51, %v14254_v51 }
 0xa76   : > { %v7522_v61 = vpop.xlane.xlu0 %7521 }
 0xa77   : > { %v14260_v39 = vsub.f32 %v7509_v26, %v7541_v9  ;;  %v7540_v0 = vmul.f32 0.03125, %v7522_v61  ;;  %v7565_v49 = vsel %vm672_vm0, %v7555_v46, 0.0  ;;  %v7554_v54 = vmul.f32 %v14256_v4, %v14256_v4 }
 0xa78   : > { %7566 = vadd.xlane.f32.xlu1 %v7565_v49  ;;  %v14916_v9 = vsub.s32 3, %v14911_v38 }
 0xa79   : > { %v14265_v59 = vsub.f32 %v7508_v31, %v7540_v0  ;;  %v7562_v8 = vsel %vm672_vm0, %v7554_v54, 0.0  ;;  %v7557_v58 = vmul.f32 %v14260_v39, %v14260_v39 }
 0xa7a   : > { %7563 = vadd.xlane.f32.xlu0 %v7562_v8  ;;  %v7633_v46 = vrot.slane %v14116_v53, %v14916_v9 }
 0xa7b   : > { %v7531_v19 = vpop.xlane.xlu1 %7530  ;;  %v7571_v28 = vsel %vm672_vm0, %v7557_v58, 0.0  ;;  %v7556_v3 = vmul.f32 %v14265_v59, %v14265_v59 }
 0xa7c   : > { %v7543_v13 = vmul.f32 0.03125, %v7531_v19  ;;  %7572 = vadd.xlane.f32.xlu1 %v7571_v28 }
 0xa7d   : > { %v7528_v62 = vpop.xlane.xlu0 %7527  ;;  %v7568_v10 = vsel %vm672_vm0, %v7556_v3, 0.0 }
 0xa7e   : > { %v14270_v2 = vsub.f32 %v7511_v14, %v7543_v13  ;;  %v7542_v52 = vmul.f32 0.03125, %v7528_v62  ;;  %7569 = vadd.xlane.f32.xlu0 %v7568_v10 }
 0xa7f   : > { %v7537_v41 = vpop.xlane.xlu1 %7536 }
 0xa80   : > { %v14275_v44 = vsub.f32 %v7510_v23, %v7542_v52  ;;  %v7545_v33 = vmul.f32 0.03125, %v7537_v41  ;;  %v7559_v48 = vmul.f32 %v14270_v2, %v14270_v2 }
 0xa81   : > { %v7534_v30 = vpop.xlane.xlu0 %7533 }
 0xa82   : > { %v14280_v43 = vsub.f32 %v7513_v25, %v7545_v33  ;;  %v7544_v1 = vmul.f32 0.03125, %v7534_v30  ;;  %v7577_v20 = vsel %vm672_vm0, %v7559_v48, 0.0  ;;  %v7558_v37 = vmul.f32 %v14275_v44, %v14275_v44 }
 0xa83   : > { %7578 = vadd.xlane.f32.xlu1 %v7577_v20 }
 0xa84   : > { %v14285_v56 = vsub.f32 %v7512_v15, %v7544_v1  ;;  %v7574_v16 = vsel %vm672_vm0, %v7558_v37, 0.0  ;;  %v7561_v12 = vmul.f32 %v14280_v43, %v14280_v43 }
 0xa85   : > { %7575 = vadd.xlane.f32.xlu0 %v7574_v16 }
 0xa86   : > { %v7583_v17 = vsel %vm672_vm0, %v7561_v12, 0.0  ;;  %v7560_v34 = vmul.f32 %v14285_v56, %v14285_v56 }
 0xa87   : > { %7584 = vadd.xlane.f32.xlu1 %v7583_v17 }
 0xa88   : > { %v7580_v18 = vsel %vm672_vm0, %v7560_v34, 0.0 }
 0xa89   : > { %7581 = vadd.xlane.f32.xlu0 %v7580_v18 }
 0xb01   : > { %v7567_v26 = vpop.xlane.xlu1 %7566 }
 0xb02   : > { %v7587_v21 = vmul.f32 0.03125, %v7567_v26 }
 0xb03   : > { %v7564_v50 = vpop.xlane.xlu0 %7563 }
 0xb04   : > { %v7595_v55 = vadd.f32 1e-05, %v7587_v21  ;;  %v7586_v31 = vmul.f32 0.03125, %v7564_v50 }
 0xb05   : > { %v7573_v40 = vpop.xlane.xlu1 %7572 }
 0xb06   : > { %10011 = vrsqrt.f32 %v7595_v55  ;;  %v7594_v57 = vadd.f32 1e-05, %v7586_v31  ;;  %v7589_v42 = vmul.f32 0.03125, %v7573_v40 }
 0xb07   : > { %v7570_v14 = vpop.xlane.xlu0 %7569 }
 0xb08   : > { %10013 = vrsqrt.f32 %v7594_v57  ;;  %v7597_v36 = vadd.f32 1e-05, %v7589_v42  ;;  %v7588_v11 = vmul.f32 0.03125, %v7570_v14 }
 0xb0a   : > { %10015 = vrsqrt.f32 %v7597_v36  ;;  %v7596_v23 = vadd.f32 1e-05, %v7588_v11 }
 0xb0c   : > { %v7579_v63 = vpop.xlane.xlu1 %7578  ;;  %10017 = vrsqrt.f32 %v7596_v23 }
 0xb0d   : > { %v7591_v29 = vmul.f32 0.03125, %v7579_v63 }
 0xb0e   : > { %v7576_v60 = vpop.xlane.xlu0 %7575 }
 0xb0f   : > { %v7599_v7 = vadd.f32 1e-05, %v7591_v29  ;;  %v7590_v25 = vmul.f32 0.03125, %v7576_v60 }
 0xb10   : > { %v7585_v27 = vpop.xlane.xlu1 %7584 }
 0xb11   : > { %10019 = vrsqrt.f32 %v7599_v7  ;;  %v7598_v32 = vadd.f32 1e-05, %v7590_v25  ;;  %v7593_v15 = vmul.f32 0.03125, %v7585_v27 }
 0xb12   : > { %v7582_v5 = vpop.xlane.xlu0 %7581 }
 0xb13   : > { %10021 = vrsqrt.f32 %v7598_v32  ;;  %v7601_v22 = vadd.f32 1e-05, %v7593_v15  ;;  %v7592_v6 = vmul.f32 0.03125, %v7582_v5  ;;  %v10012_v24 = vpop.eup %10011 }
 0xb14   : > { %v7611_v61 = vmul.f32 %v10012_v24, %v14254_v51 }
 0xb15   : > { %10023 = vrsqrt.f32 %v7601_v22  ;;  %v7600_v45 = vadd.f32 1e-05, %v7592_v6  ;;  %v10014_v0 = vpop.eup %10013 }
 0xb16   : > { %v7623_v49 = vmul.f32 %v7621_v35, %v7611_v61  ;;  %v7610_v54 = vmul.f32 %v10014_v0, %v14256_v4 }
 0xb17   : > { %10025 = vrsqrt.f32 %v7600_v45  ;;  %v10016_v19 = vpop.eup %10015 }
 0xb18   : > { %v7635_v13 = vadd.f32 %v7633_v46, %v7623_v49  ;;  %v7622_v38 = vmul.f32 %v7621_v35, %v7610_v54  ;;  %v7613_v53 = vmul.f32 %v10016_v19, %v14260_v39 }
 0xb19   : > { %v10018_v8 = vpop.eup %10017 }
 0xb1a   : > { %7643 = vst.msk [vmem:[%s14305_s16 + $0x8] sm:$0xff] %vm672_vm0, %v7635_v13  ;;  %v7634_v51 = vadd.f32 %v7633_v46, %v7622_v38  ;;  %v7625_v58 = vmul.f32 %v7621_v35, %v7613_v53  ;;  %v7612_v4 = vmul.f32 %v10018_v8, %v14265_v59 }
 0xb1c   : > { %7642 = vst.msk [vmem:[%s14305_s16] sm:$0xff] %vm672_vm0, %v7634_v51  ;;  %v7637_v52 = vadd.f32 %v7633_v46, %v7625_v58  ;;  %v7624_v28 = vmul.f32 %v7621_v35, %v7612_v4 }
 0xb1e   : > { %v10020_v62 = vpop.eup %10019  ;;  %7645 = vst.msk [vmem:[%s14305_s16 + $0x18] sm:$0xff] %vm672_vm0, %v7637_v52  ;;  %v7636_v39 = vadd.f32 %v7633_v46, %v7624_v28 }
 0xb1f   : > { %v7615_v3 = vmul.f32 %v10020_v62, %v14270_v2 }
 0xb20   : > { %v10022_v41 = vpop.eup %10021  ;;  %7644 = vst.msk [vmem:[%s14305_s16 + $0x10] sm:$0xff] %vm672_vm0, %v7636_v39 }
 0xb21   : > { %v7627_v33 = vmul.f32 %v7621_v35, %v7615_v3  ;;  %v7614_v10 = vmul.f32 %v10022_v41, %v14275_v44 }
 0xb22   : > { %v10024_v48 = vpop.eup %10023 }
 0xb23   : > { %v7639_v59 = vadd.f32 %v7633_v46, %v7627_v33  ;;  %v7626_v30 = vmul.f32 %v7621_v35, %v7614_v10  ;;  %v7617_v1 = vmul.f32 %v10024_v48, %v14280_v43 }
 0xb24   : > { %v10026_v20 = vpop.eup %10025 }
 0xb25   : > { %7647 = vst.msk [vmem:[%s14305_s16 + $0x28] sm:$0xff] %vm672_vm0, %v7639_v59  ;;  %v7638_v2 = vadd.f32 %v7633_v46, %v7626_v30  ;;  %v7629_v37 = vmul.f32 %v7621_v35, %v7617_v1  ;;  %v7616_v16 = vmul.f32 %v10026_v20, %v14285_v56 }
 0xb27   : > { %7646 = vst.msk [vmem:[%s14305_s16 + $0x20] sm:$0xff] %vm672_vm0, %v7638_v2  ;;  %v7641_v12 = vadd.f32 %v7633_v46, %v7629_v37  ;;  %v7628_v17 = vmul.f32 %v7621_v35, %v7616_v16 }
 0xb29   : > { %7649 = vst.msk [vmem:[%s14305_s16 + $0x38] sm:$0xff] %vm672_vm0, %v7641_v12  ;;  %v7640_v44 = vadd.f32 %v7633_v46, %v7628_v17 }
 0xb2b   : > { %7648 = vst.msk [vmem:[%s14305_s16 + $0x30] sm:$0xff] %vm672_vm0, %v7640_v44 }
 0xb2c PF: > { %s21_s17 = sadd.s32 1, %s10036_s17  }
 0xb2d   : > { %p18_p4 = scmp.ge.s32.totalorder %s21_s17, 4  }
 0xb2f   :  { %20 = sbr.rel (!%p18_p4) target bundleno = 1 (0x1), region = 103 }

</bundles_post_ra>
